<compile_context>
chip_gen: v7x
topology: tpu7x:2x2x1
jax: 0.10.0
libtpu: 0.0.40
codegen_flags: <defaults>
</compile_context>

<pallas_src>
import functools

import jax
import jax.numpy as jnp
from jax.experimental import pallas as pl
from jax.experimental.pallas import tpu as pltpu


def _fused_kernel(x_ref, pool_ref, w1_ref, b1_ref, wfc1t_ref, bfc1_ref,
                  wfc2t_ref, bfc2_ref, w2_ref, b2_ref, o_ref, patch_ref,
                  *, H, W, Wp, dilations, d_max, B, Kpad, mxu_prec):
    """One grid step = B images, all dilation scales fused.

    x_ref     : (B, 3, L)      d_max-padded images, spatial flattened with the
                               padded width Wp (plus slack zeros for the taps)
    pool_ref  : (1, HWp)       valid-column mask / (H*W)   (SE average pool)
    w1_ref    : (32*S, Kpad)   block-diagonal im2col conv weight
    b1_ref    : (32*S, 1)
    wfc1t_ref : (4*S, 32*S)    block-diagonal SE squeeze FC (transposed)
    bfc1_ref  : (4*S, 1)
    wfc2t_ref : (32*S, 4*S)    block-diagonal SE excite FC (transposed)
    bfc2_ref  : (32*S, 1)
    w2_ref    : (16*S, 32*S)   block-diagonal 1x1 projection weight
    b2_ref    : (16*S, 1)
    o_ref     : (B, 16*S, HWp) channel-major output (wrapper strips pad columns)
    patch_ref : (Kpad, B*HWp)  f32 VMEM scratch holding the im2col matrix
    """
    HWp = H * Wp
    S = len(dilations)
    K = 27 * S
    cdt = w1_ref.dtype                      # MXU operand dtype (f32 or bf16)
    hi = jax.lax.Precision.HIGHEST

    # K-padding rows: matching weight columns are zero, just keep rows NaN-free.
    if Kpad > K:
        patch_ref[K:, :] = jnp.zeros((Kpad - K, B * HWp), jnp.float32)

    # ---- im2col into VMEM scratch: all scales, all B images ----------------
    # Every 3x3 tap of every dilation is a contiguous static lane slice of
    # length HWp of the flat padded image (stride Wp), so the patch matrix is
    # built from plain slices + scratch stores: no reshapes, no concatenates.
    for b in range(B):
        xb = x_ref[b]                                    # (3, L)
        r = 0
        for d in dilations:
            base = (d_max - d) * (Wp + 1)                # effective padding == d
            for kh in range(3):
                for kw in range(3):
                    c0 = base + (kh * d) * Wp + (kw * d)
                    patch_ref[r:r + 3, b * HWp:(b + 1) * HWp] = xb[:, c0:c0 + HWp]
                    r += 3

    patches = patch_ref[...].astype(cdt)                 # (Kpad, B*HWp)

    # ---- all scales' dilated 3x3 convs: ONE block-diagonal MXU matmul ------
    conv = jnp.dot(w1_ref[...], patches,
                   preferred_element_type=jnp.float32, precision=mxu_prec)
    conv = jnp.maximum(conv + b1_ref[...], 0.0)          # (32*S, B*HWp), f32

    pool_w = pool_ref[...]                               # (1, HWp)
    for b in range(B):
        conv_b = conv[:, b * HWp:(b + 1) * HWp]          # (32*S, HWp)

        # -- SqueezeExcitation: masked mean on VPU/XLU (MXU stays free) ------
        pooled = jnp.sum(conv_b * pool_w, axis=-1, keepdims=True)     # (32*S, 1)
        hidden = jnp.maximum(
            jnp.dot(wfc1t_ref[...], pooled,
                    preferred_element_type=jnp.float32, precision=hi)
            + bfc1_ref[...], 0.0)                                     # (4*S, 1)
        gate = jax.nn.sigmoid(
            jnp.dot(wfc2t_ref[...], hidden,
                    preferred_element_type=jnp.float32, precision=hi)
            + bfc2_ref[...])                                          # (32*S, 1)

        # -- gate + fused block-diagonal 1x1 projection, stored directly -----
        gated = (conv_b * gate).astype(cdt)                           # (32*S, HWp)
        proj = jnp.dot(w2_ref[...], gated,
                       preferred_element_type=jnp.float32, precision=mxu_prec)
        o_ref[b] = (proj + b2_ref[...]).astype(o_ref.dtype)           # (16*S, HWp)


def enhanced_laplacian(x_nchw, params_per_scale, dilations, *,
                       compute_dtype=jnp.float32, lanes_target=512):
    """x_nchw: (N, 3, H, W) -> (N, 16*len(dilations), H, W)."""
    N, Cin, H, W = x_nchw.shape
    assert Cin == 3
    S = len(dilations)
    d_max = max(dilations)
    Hp, Wp = H + 2 * d_max, W + 2 * d_max
    HWp = H * Wp
    K = 27 * S
    Kpad = -(-K // 8) * 8

    # Images per grid step: enough lanes per MXU matmul to hide push/pop cadence
    # at small spatial sizes, B=1 for large images (HWp alone is lane-dense).
    # NOTE: for very large images add a spatial (row-block) tiling axis so one
    # block stays inside v7x's 64 MiB VMEM, and keep >=2 parallel grid steps so
    # both v7x TensorCores are used.
    B = max(1, min(N, -(-lanes_target // HWp)))
    G = -(-N // B)
    N_pad = G * B

    # Pad ONCE to d_max (and pad batch to a multiple of B), flatten spatially
    # row-major; append slack zeros so every dilated tap slice of length H*Wp
    # stays in-bounds; round the lane dim up to 128.
    xp = jnp.pad(x_nchw.astype(jnp.float32),
                 ((0, N_pad - N), (0, 0), (d_max, d_max), (d_max, d_max)))
    L = -(-(Hp * Wp + 2 * d_max) // 128) * 128
    xf = jnp.pad(xp.reshape(N_pad, Cin, Hp * Wp),
                 ((0, 0), (0, 0), (0, L - Hp * Wp)))
    assert 2 * d_max * (Wp + 1) + HWp <= L     # every tap slice stays in-bounds

    # SE average-pool weights: 1/(H*W) on valid columns (w < W), 0 on pad cols.
    pool_w = (((jnp.arange(HWp) % Wp) < W).astype(jnp.float32)
              .reshape(1, HWp)) / float(H * W)

    # Block-diagonal, channel-major parameter packing: scale s's 32 conv rows
    # only see its own 27 patch rows / 4 SE-hidden rows / 16 output rows.
    w1_bd = jnp.zeros((32 * S, Kpad), jnp.float32)
    wfc1t_bd = jnp.zeros((4 * S, 32 * S), jnp.float32)
    wfc2t_bd = jnp.zeros((32 * S, 4 * S), jnp.float32)
    w2_bd = jnp.zeros((16 * S, 32 * S), jnp.float32)
    b1_l, bfc1_l, bfc2_l, b2_l = [], [], [], []
    for s, (w1, b1, wfc1, bfc1, wfc2, bfc2, w2, b2) in enumerate(params_per_scale):
        w1_bd = w1_bd.at[32 * s:32 * (s + 1), 27 * s:27 * (s + 1)].set(
            w1.reshape(27, 32).T)                       # HWIO -> (out, taps)
        wfc1t_bd = wfc1t_bd.at[4 * s:4 * (s + 1), 32 * s:32 * (s + 1)].set(wfc1.T)
        wfc2t_bd = wfc2t_bd.at[32 * s:32 * (s + 1), 4 * s:4 * (s + 1)].set(wfc2.T)
        w2_bd = w2_bd.at[16 * s:16 * (s + 1), 32 * s:32 * (s + 1)].set(w2.T)
        b1_l.append(b1.reshape(32, 1))
        bfc1_l.append(bfc1.reshape(4, 1))
        bfc2_l.append(bfc2.reshape(32, 1))
        b2_l.append(b2.reshape(16, 1))
    b1_c = jnp.concatenate(b1_l, axis=0)
    bfc1_c = jnp.concatenate(bfc1_l, axis=0)
    bfc2_c = jnp.concatenate(bfc2_l, axis=0)
    b2_c = jnp.concatenate(b2_l, axis=0)

    # bf16 MXU operands (f32 accumulate) when requested; the f32 path requests
    # HIGHEST precision explicitly so it really is full f32 on the MXU.
    cdt = jnp.dtype(compute_dtype)
    w1_bd = w1_bd.astype(cdt)
    w2_bd = w2_bd.astype(cdt)
    mxu_prec = (jax.lax.Precision.HIGHEST if cdt == jnp.dtype(jnp.float32)
                else jax.lax.Precision.DEFAULT)

    kernel = functools.partial(_fused_kernel, H=H, W=W, Wp=Wp,
                               dilations=tuple(dilations), d_max=d_max,
                               B=B, Kpad=Kpad, mxu_prec=mxu_prec)

    def const_spec(a):
        nd = a.ndim
        return pl.BlockSpec(a.shape, lambda g, _nd=nd: (0,) * _nd)

    out_flat = pl.pallas_call(
        kernel,
        out_shape=jax.ShapeDtypeStruct((N_pad, 16 * S, HWp), jnp.float32),
        grid=(G,),
        in_specs=[
            pl.BlockSpec((B, Cin, L), lambda g: (g, 0, 0)),
            const_spec(pool_w),
            const_spec(w1_bd), const_spec(b1_c),
            const_spec(wfc1t_bd), const_spec(bfc1_c),
            const_spec(wfc2t_bd), const_spec(bfc2_c),
            const_spec(w2_bd), const_spec(b2_c),
        ],
        out_specs=pl.BlockSpec((B, 16 * S, HWp), lambda g: (g, 0, 0)),
        scratch_shapes=[pltpu.VMEM((Kpad, B * HWp), jnp.float32)],
        compiler_params=pltpu.CompilerParams(
            dimension_semantics=("parallel",),
            vmem_limit_bytes=32 * 1024 * 1024),
    )(xf, pool_w, w1_bd, b1_c, wfc1t_bd, bfc1_c, wfc2t_bd, bfc2_c, w2_bd, b2_c)

    # Strip batch + column padding: (N_pad,48,H*Wp) -> (N,48,H,W); already NCHW.
    return out_flat[:N].reshape(N, 16 * S, H, Wp)[:, :, :, :W]


def reference(x_nchw, params_per_scale, dilations):
    """Pure-JAX reference (XLA conv, HIGHEST precision) for correctness."""
    hp = jax.lax.Precision.HIGHEST
    x = jnp.transpose(x_nchw, (0, 2, 3, 1))
    feats = []
    for d, (w1, b1, wfc1, bfc1, wfc2, bfc2, w2, b2) in zip(dilations, params_per_scale):
        f = jax.lax.conv_general_dilated(
            x, w1, window_strides=(1, 1), padding=[(d, d), (d, d)],
            rhs_dilation=(d, d), dimension_numbers=("NHWC", "HWIO", "NHWC"),
            precision=hp)
        f = jnp.maximum(f + b1, 0.0)
        pooled = jnp.mean(f, axis=(1, 2), keepdims=True)               # (N,1,1,32)
        h = jnp.maximum(jnp.einsum("nijc,cd->nijd", pooled, wfc1,
                                   precision=hp) + bfc1, 0.0)
        g = jax.nn.sigmoid(jnp.einsum("nijc,cd->nijd", h, wfc2,
                                      precision=hp) + bfc2)
        f = f * g
        f = jnp.einsum("nhwc,cd->nhwd", f, w2, precision=hp) + b2
        feats.append(f)
    out = jnp.concatenate(feats, axis=-1)
    return jnp.transpose(out, (0, 3, 1, 2))


def make_params(key, n_scales):
    params = []
    for i in range(n_scales):
        ks = jax.random.split(jax.random.fold_in(key, i), 8)
        w1 = jax.random.normal(ks[0], (3, 3, 3, 32), jnp.float32) * 0.1
        b1 = jax.random.normal(ks[1], (1, 1, 32), jnp.float32) * 0.1
        wfc1 = jax.random.normal(ks[2], (32, 4), jnp.float32) * 0.1
        bfc1 = jax.random.normal(ks[3], (1, 4), jnp.float32) * 0.1
        wfc2 = jax.random.normal(ks[4], (4, 32), jnp.float32) * 0.1
        bfc2 = jax.random.normal(ks[5], (1, 32), jnp.float32) * 0.1
        w2 = jax.random.normal(ks[6], (32, 16), jnp.float32) * 0.1
        b2 = jax.random.normal(ks[7], (1, 16), jnp.float32) * 0.1
        params.append((w1, b1, wfc1, bfc1, wfc2, bfc2, w2, b2))
    return params


if __name__ == "__main__":
    key = jax.random.PRNGKey(0)
    N, Cin, H, W = 2, 3, 16, 16
    dilations = [2 ** i for i in range(3)]          # scales=[1,2,4] -> 3 branches

    kx, kp = jax.random.split(key)
    x = jax.random.normal(kx, (N, Cin, H, W), jnp.float32)
    params_per_scale = make_params(kp, len(dilations))

    ref = reference(x, params_per_scale, dilations)

    # f32 path (explicit HIGHEST MXU precision): strict check.
    out = jax.block_until_ready(enhanced_laplacian(x, params_per_scale, dilations))
    assert out.shape == (N, 16 * len(dilations), H, W), out.shape
    assert jnp.allclose(out, ref, atol=2e-4, rtol=2e-3), \
        f"f32 max abs err {jnp.max(jnp.abs(out - ref))}"

    # bf16-operand / f32-accumulate path: looser tolerance.
    out_bf16 = jax.block_until_ready(
        enhanced_laplacian(x, params_per_scale, dilations,
                           compute_dtype=jnp.bfloat16))
    assert jnp.allclose(out_bf16, ref, atol=3e-2, rtol=5e-2), \
        f"bf16 max abs err {jnp.max(jnp.abs(out_bf16 - ref))}"

    print("KERNEL_OK")
</pallas_src>

<mosaic_0001>
module attributes {stable_mosaic.version = 11 : i64} {
  func.func @_fused_kernel(%arg0: i32, %arg1: memref<2x3x640xf32, #tpu.memory_space<vmem>>, %arg2: memref<1x384xf32, #tpu.memory_space<vmem>>, %arg3: memref<96x88xf32, #tpu.memory_space<vmem>>, %arg4: memref<96x1xf32, #tpu.memory_space<vmem>>, %arg5: memref<12x96xf32, #tpu.memory_space<vmem>>, %arg6: memref<12x1xf32, #tpu.memory_space<vmem>>, %arg7: memref<96x12xf32, #tpu.memory_space<vmem>>, %arg8: memref<96x1xf32, #tpu.memory_space<vmem>>, %arg9: memref<48x96xf32, #tpu.memory_space<vmem>>, %arg10: memref<48x1xf32, #tpu.memory_space<vmem>>, %arg11: memref<2x48x384xf32, #tpu.memory_space<vmem>>, %arg12: memref<88x768xf32, #tpu.memory_space<vmem>>) attributes {dimension_semantics = [#tpu.dimension_semantics<parallel>], iteration_bounds = array<i64: 1>, scalar_prefetch = 0 : i64, scratch_operands = 1 : i64, tpu.core_type = #tpu.core_type<tc>, window_params = [{transform_indices = @transform_0, window_bounds = array<i64: 2, 3, 640>}, {pipeline_mode = #tpu.pipeline_mode<synchronous>, transform_indices = @transform_1, window_bounds = array<i64: 1, 384>}, {pipeline_mode = #tpu.pipeline_mode<synchronous>, transform_indices = @transform_2, window_bounds = array<i64: 96, 88>}, {pipeline_mode = #tpu.pipeline_mode<synchronous>, transform_indices = @transform_3, window_bounds = array<i64: 96, 1>}, {pipeline_mode = #tpu.pipeline_mode<synchronous>, transform_indices = @transform_4, window_bounds = array<i64: 12, 96>}, {pipeline_mode = #tpu.pipeline_mode<synchronous>, transform_indices = @transform_5, window_bounds = array<i64: 12, 1>}, {pipeline_mode = #tpu.pipeline_mode<synchronous>, transform_indices = @transform_6, window_bounds = array<i64: 96, 12>}, {pipeline_mode = #tpu.pipeline_mode<synchronous>, transform_indices = @transform_7, window_bounds = array<i64: 96, 1>}, {pipeline_mode = #tpu.pipeline_mode<synchronous>, transform_indices = @transform_8, window_bounds = array<i64: 48, 96>}, {pipeline_mode = #tpu.pipeline_mode<synchronous>, transform_indices = @transform_9, window_bounds = array<i64: 48, 1>}, {transform_indices = @transform_10, window_bounds = array<i64: 2, 48, 384>}]} {
    %cst = arith.constant 0.000000e+00 : f32
    %0 = vector.broadcast %cst : f32 to vector<7x768xf32>
    %c81 = arith.constant 81 : index
    %c0 = arith.constant 0 : index
    %1 = vector.load %arg12[%c81, %c0] : memref<88x768xf32, #tpu.memory_space<vmem>>, vector<7x768xf32>
    tpu.vector_store %arg12[%c81, %c0], %0 {strides = array<i32>} : memref<88x768xf32, #tpu.memory_space<vmem>>, vector<7x768xf32>,
    %c0_0 = arith.constant 0 : index
    %c0_1 = arith.constant 0 : index
    %c0_2 = arith.constant 0 : index
    %2 = vector.load %arg1[%c0_0, %c0_1, %c0_2] : memref<2x3x640xf32, #tpu.memory_space<vmem>>, vector<1x3x640xf32>
    %3 = vector.shape_cast %2 : vector<1x3x640xf32> to vector<3x640xf32>
    %4 = vector.extract_strided_slice %3 {offsets = [0, 75], sizes = [3, 384], strides = [1, 1]} : vector<3x640xf32> to vector<3x384xf32>
    %c0_3 = arith.constant 0 : index
    %c0_4 = arith.constant 0 : index
    %5 = vector.load %arg12[%c0_3, %c0_4] : memref<88x768xf32, #tpu.memory_space<vmem>>, vector<3x384xf32>
    tpu.vector_store %arg12[%c0_3, %c0_4], %4 {strides = array<i32>} : memref<88x768xf32, #tpu.memory_space<vmem>>, vector<3x384xf32>,
    %6 = vector.extract_strided_slice %3 {offsets = [0, 76], sizes = [3, 384], strides = [1, 1]} : vector<3x640xf32> to vector<3x384xf32>
    %c3 = arith.constant 3 : index
    %c0_5 = arith.constant 0 : index
    %7 = vector.load %arg12[%c3, %c0_5] : memref<88x768xf32, #tpu.memory_space<vmem>>, vector<3x384xf32>
    tpu.vector_store %arg12[%c3, %c0_5], %6 {strides = array<i32>} : memref<88x768xf32, #tpu.memory_space<vmem>>, vector<3x384xf32>,
    %8 = vector.extract_strided_slice %3 {offsets = [0, 77], sizes = [3, 384], strides = [1, 1]} : vector<3x640xf32> to vector<3x384xf32>
    %c6 = arith.constant 6 : index
    %c0_6 = arith.constant 0 : index
    %9 = vector.load %arg12[%c6, %c0_6] : memref<88x768xf32, #tpu.memory_space<vmem>>, vector<3x384xf32>
    tpu.vector_store %arg12[%c6, %c0_6], %8 {strides = array<i32>} : memref<88x768xf32, #tpu.memory_space<vmem>>, vector<3x384xf32>,
    %10 = vector.extract_strided_slice %3 {offsets = [0, 99], sizes = [3, 384], strides = [1, 1]} : vector<3x640xf32> to vector<3x384xf32>
    %c9 = arith.constant 9 : index
    %c0_7 = arith.constant 0 : index
    %11 = vector.load %arg12[%c9, %c0_7] : memref<88x768xf32, #tpu.memory_space<vmem>>, vector<3x384xf32>
    tpu.vector_store %arg12[%c9, %c0_7], %10 {strides = array<i32>} : memref<88x768xf32, #tpu.memory_space<vmem>>, vector<3x384xf32>,
    %12 = vector.extract_strided_slice %3 {offsets = [0, 100], sizes = [3, 384], strides = [1, 1]} : vector<3x640xf32> to vector<3x384xf32>
    %c12 = arith.constant 12 : index
    %c0_8 = arith.constant 0 : index
    %13 = vector.load %arg12[%c12, %c0_8] : memref<88x768xf32, #tpu.memory_space<vmem>>, vector<3x384xf32>
    tpu.vector_store %arg12[%c12, %c0_8], %12 {strides = array<i32>} : memref<88x768xf32, #tpu.memory_space<vmem>>, vector<3x384xf32>,
    %14 = vector.extract_strided_slice %3 {offsets = [0, 101], sizes = [3, 384], strides = [1, 1]} : vector<3x640xf32> to vector<3x384xf32>
    %c15 = arith.constant 15 : index
    %c0_9 = arith.constant 0 : index
    %15 = vector.load %arg12[%c15, %c0_9] : memref<88x768xf32, #tpu.memory_space<vmem>>, vector<3x384xf32>
    tpu.vector_store %arg12[%c15, %c0_9], %14 {strides = array<i32>} : memref<88x768xf32, #tpu.memory_space<vmem>>, vector<3x384xf32>,
    %16 = vector.extract_strided_slice %3 {offsets = [0, 123], sizes = [3, 384], strides = [1, 1]} : vector<3x640xf32> to vector<3x384xf32>
    %c18 = arith.constant 18 : index
    %c0_10 = arith.constant 0 : index
    %17 = vector.load %arg12[%c18, %c0_10] : memref<88x768xf32, #tpu.memory_space<vmem>>, vector<3x384xf32>
    tpu.vector_store %arg12[%c18, %c0_10], %16 {strides = array<i32>} : memref<88x768xf32, #tpu.memory_space<vmem>>, vector<3x384xf32>,
    %18 = vector.extract_strided_slice %3 {offsets = [0, 124], sizes = [3, 384], strides = [1, 1]} : vector<3x640xf32> to vector<3x384xf32>
    %c21 = arith.constant 21 : index
    %c0_11 = arith.constant 0 : index
    %19 = vector.load %arg12[%c21, %c0_11] : memref<88x768xf32, #tpu.memory_space<vmem>>, vector<3x384xf32>
    tpu.vector_store %arg12[%c21, %c0_11], %18 {strides = array<i32>} : memref<88x768xf32, #tpu.memory_space<vmem>>, vector<3x384xf32>,
    %20 = vector.extract_strided_slice %3 {offsets = [0, 125], sizes = [3, 384], strides = [1, 1]} : vector<3x640xf32> to vector<3x384xf32>
    %c24 = arith.constant 24 : index
    %c0_12 = arith.constant 0 : index
    %21 = vector.load %arg12[%c24, %c0_12] : memref<88x768xf32, #tpu.memory_space<vmem>>, vector<3x384xf32>
    tpu.vector_store %arg12[%c24, %c0_12], %20 {strides = array<i32>} : memref<88x768xf32, #tpu.memory_space<vmem>>, vector<3x384xf32>,
    %22 = vector.extract_strided_slice %3 {offsets = [0, 50], sizes = [3, 384], strides = [1, 1]} : vector<3x640xf32> to vector<3x384xf32>
    %c27 = arith.constant 27 : index
    %c0_13 = arith.constant 0 : index
    %23 = vector.load %arg12[%c27, %c0_13] : memref<88x768xf32, #tpu.memory_space<vmem>>, vector<3x384xf32>
    tpu.vector_store %arg12[%c27, %c0_13], %22 {strides = array<i32>} : memref<88x768xf32, #tpu.memory_space<vmem>>, vector<3x384xf32>,
    %24 = vector.extract_strided_slice %3 {offsets = [0, 52], sizes = [3, 384], strides = [1, 1]} : vector<3x640xf32> to vector<3x384xf32>
    %c30 = arith.constant 30 : index
    %c0_14 = arith.constant 0 : index
    %25 = vector.load %arg12[%c30, %c0_14] : memref<88x768xf32, #tpu.memory_space<vmem>>, vector<3x384xf32>
    tpu.vector_store %arg12[%c30, %c0_14], %24 {strides = array<i32>} : memref<88x768xf32, #tpu.memory_space<vmem>>, vector<3x384xf32>,
    %26 = vector.extract_strided_slice %3 {offsets = [0, 54], sizes = [3, 384], strides = [1, 1]} : vector<3x640xf32> to vector<3x384xf32>
    %c33 = arith.constant 33 : index
    %c0_15 = arith.constant 0 : index
    %27 = vector.load %arg12[%c33, %c0_15] : memref<88x768xf32, #tpu.memory_space<vmem>>, vector<3x384xf32>
    tpu.vector_store %arg12[%c33, %c0_15], %26 {strides = array<i32>} : memref<88x768xf32, #tpu.memory_space<vmem>>, vector<3x384xf32>,
    %28 = vector.extract_strided_slice %3 {offsets = [0, 98], sizes = [3, 384], strides = [1, 1]} : vector<3x640xf32> to vector<3x384xf32>
    %c36 = arith.constant 36 : index
    %c0_16 = arith.constant 0 : index
    %29 = vector.load %arg12[%c36, %c0_16] : memref<88x768xf32, #tpu.memory_space<vmem>>, vector<3x384xf32>
    tpu.vector_store %arg12[%c36, %c0_16], %28 {strides = array<i32>} : memref<88x768xf32, #tpu.memory_space<vmem>>, vector<3x384xf32>,
    %30 = vector.extract_strided_slice %3 {offsets = [0, 100], sizes = [3, 384], strides = [1, 1]} : vector<3x640xf32> to vector<3x384xf32>
    %c39 = arith.constant 39 : index
    %c0_17 = arith.constant 0 : index
    %31 = vector.load %arg12[%c39, %c0_17] : memref<88x768xf32, #tpu.memory_space<vmem>>, vector<3x384xf32>
    tpu.vector_store %arg12[%c39, %c0_17], %30 {strides = array<i32>} : memref<88x768xf32, #tpu.memory_space<vmem>>, vector<3x384xf32>,
    %32 = vector.extract_strided_slice %3 {offsets = [0, 102], sizes = [3, 384], strides = [1, 1]} : vector<3x640xf32> to vector<3x384xf32>
    %c42 = arith.constant 42 : index
    %c0_18 = arith.constant 0 : index
    %33 = vector.load %arg12[%c42, %c0_18] : memref<88x768xf32, #tpu.memory_space<vmem>>, vector<3x384xf32>
    tpu.vector_store %arg12[%c42, %c0_18], %32 {strides = array<i32>} : memref<88x768xf32, #tpu.memory_space<vmem>>, vector<3x384xf32>,
    %34 = vector.extract_strided_slice %3 {offsets = [0, 146], sizes = [3, 384], strides = [1, 1]} : vector<3x640xf32> to vector<3x384xf32>
    %c45 = arith.constant 45 : index
    %c0_19 = arith.constant 0 : index
    %35 = vector.load %arg12[%c45, %c0_19] : memref<88x768xf32, #tpu.memory_space<vmem>>, vector<3x384xf32>
    tpu.vector_store %arg12[%c45, %c0_19], %34 {strides = array<i32>} : memref<88x768xf32, #tpu.memory_space<vmem>>, vector<3x384xf32>,
    %36 = vector.extract_strided_slice %3 {offsets = [0, 148], sizes = [3, 384], strides = [1, 1]} : vector<3x640xf32> to vector<3x384xf32>
    %c48 = arith.constant 48 : index
    %c0_20 = arith.constant 0 : index
    %37 = vector.load %arg12[%c48, %c0_20] : memref<88x768xf32, #tpu.memory_space<vmem>>, vector<3x384xf32>
    tpu.vector_store %arg12[%c48, %c0_20], %36 {strides = array<i32>} : memref<88x768xf32, #tpu.memory_space<vmem>>, vector<3x384xf32>,
    %38 = vector.extract_strided_slice %3 {offsets = [0, 150], sizes = [3, 384], strides = [1, 1]} : vector<3x640xf32> to vector<3x384xf32>
    %c51 = arith.constant 51 : index
    %c0_21 = arith.constant 0 : index
    %39 = vector.load %arg12[%c51, %c0_21] : memref<88x768xf32, #tpu.memory_space<vmem>>, vector<3x384xf32>
    tpu.vector_store %arg12[%c51, %c0_21], %38 {strides = array<i32>} : memref<88x768xf32, #tpu.memory_space<vmem>>, vector<3x384xf32>,
    %40 = vector.extract_strided_slice %3 {offsets = [0, 0], sizes = [3, 384], strides = [1, 1]} : vector<3x640xf32> to vector<3x384xf32>
    %c54 = arith.constant 54 : index
    %c0_22 = arith.constant 0 : index
    %41 = vector.load %arg12[%c54, %c0_22] : memref<88x768xf32, #tpu.memory_space<vmem>>, vector<3x384xf32>
    tpu.vector_store %arg12[%c54, %c0_22], %40 {strides = array<i32>} : memref<88x768xf32, #tpu.memory_space<vmem>>, vector<3x384xf32>,
    %42 = vector.extract_strided_slice %3 {offsets = [0, 4], sizes = [3, 384], strides = [1, 1]} : vector<3x640xf32> to vector<3x384xf32>
    %c57 = arith.constant 57 : index
    %c0_23 = arith.constant 0 : index
    %43 = vector.load %arg12[%c57, %c0_23] : memref<88x768xf32, #tpu.memory_space<vmem>>, vector<3x384xf32>
    tpu.vector_store %arg12[%c57, %c0_23], %42 {strides = array<i32>} : memref<88x768xf32, #tpu.memory_space<vmem>>, vector<3x384xf32>,
    %44 = vector.extract_strided_slice %3 {offsets = [0, 8], sizes = [3, 384], strides = [1, 1]} : vector<3x640xf32> to vector<3x384xf32>
    %c60 = arith.constant 60 : index
    %c0_24 = arith.constant 0 : index
    %45 = vector.load %arg12[%c60, %c0_24] : memref<88x768xf32, #tpu.memory_space<vmem>>, vector<3x384xf32>
    tpu.vector_store %arg12[%c60, %c0_24], %44 {strides = array<i32>} : memref<88x768xf32, #tpu.memory_space<vmem>>, vector<3x384xf32>,
    %46 = vector.extract_strided_slice %3 {offsets = [0, 96], sizes = [3, 384], strides = [1, 1]} : vector<3x640xf32> to vector<3x384xf32>
    %c63 = arith.constant 63 : index
    %c0_25 = arith.constant 0 : index
    %47 = vector.load %arg12[%c63, %c0_25] : memref<88x768xf32, #tpu.memory_space<vmem>>, vector<3x384xf32>
    tpu.vector_store %arg12[%c63, %c0_25], %46 {strides = array<i32>} : memref<88x768xf32, #tpu.memory_space<vmem>>, vector<3x384xf32>,
    %48 = vector.extract_strided_slice %3 {offsets = [0, 100], sizes = [3, 384], strides = [1, 1]} : vector<3x640xf32> to vector<3x384xf32>
    %c66 = arith.constant 66 : index
    %c0_26 = arith.constant 0 : index
    %49 = vector.load %arg12[%c66, %c0_26] : memref<88x768xf32, #tpu.memory_space<vmem>>, vector<3x384xf32>
    tpu.vector_store %arg12[%c66, %c0_26], %48 {strides = array<i32>} : memref<88x768xf32, #tpu.memory_space<vmem>>, vector<3x384xf32>,
    %50 = vector.extract_strided_slice %3 {offsets = [0, 104], sizes = [3, 384], strides = [1, 1]} : vector<3x640xf32> to vector<3x384xf32>
    %c69 = arith.constant 69 : index
    %c0_27 = arith.constant 0 : index
    %51 = vector.load %arg12[%c69, %c0_27] : memref<88x768xf32, #tpu.memory_space<vmem>>, vector<3x384xf32>
    tpu.vector_store %arg12[%c69, %c0_27], %50 {strides = array<i32>} : memref<88x768xf32, #tpu.memory_space<vmem>>, vector<3x384xf32>,
    %52 = vector.extract_strided_slice %3 {offsets = [0, 192], sizes = [3, 384], strides = [1, 1]} : vector<3x640xf32> to vector<3x384xf32>
    %c72 = arith.constant 72 : index
    %c0_28 = arith.constant 0 : index
    %53 = vector.load %arg12[%c72, %c0_28] : memref<88x768xf32, #tpu.memory_space<vmem>>, vector<3x384xf32>
    tpu.vector_store %arg12[%c72, %c0_28], %52 {strides = array<i32>} : memref<88x768xf32, #tpu.memory_space<vmem>>, vector<3x384xf32>,
    %54 = vector.extract_strided_slice %3 {offsets = [0, 196], sizes = [3, 384], strides = [1, 1]} : vector<3x640xf32> to vector<3x384xf32>
    %c75 = arith.constant 75 : index
    %c0_29 = arith.constant 0 : index
    %55 = vector.load %arg12[%c75, %c0_29] : memref<88x768xf32, #tpu.memory_space<vmem>>, vector<3x384xf32>
    tpu.vector_store %arg12[%c75, %c0_29], %54 {strides = array<i32>} : memref<88x768xf32, #tpu.memory_space<vmem>>, vector<3x384xf32>,
    %56 = vector.extract_strided_slice %3 {offsets = [0, 200], sizes = [3, 384], strides = [1, 1]} : vector<3x640xf32> to vector<3x384xf32>
    %c78 = arith.constant 78 : index
    %c0_30 = arith.constant 0 : index
    %57 = vector.load %arg12[%c78, %c0_30] : memref<88x768xf32, #tpu.memory_space<vmem>>, vector<3x384xf32>
    tpu.vector_store %arg12[%c78, %c0_30], %56 {strides = array<i32>} : memref<88x768xf32, #tpu.memory_space<vmem>>, vector<3x384xf32>,
    %c1 = arith.constant 1 : index
    %c0_31 = arith.constant 0 : index
    %c0_32 = arith.constant 0 : index
    %58 = vector.load %arg1[%c1, %c0_31, %c0_32] : memref<2x3x640xf32, #tpu.memory_space<vmem>>, vector<1x3x640xf32>
    %59 = vector.shape_cast %58 : vector<1x3x640xf32> to vector<3x640xf32>
    %60 = vector.extract_strided_slice %59 {offsets = [0, 75], sizes = [3, 384], strides = [1, 1]} : vector<3x640xf32> to vector<3x384xf32>
    %c0_33 = arith.constant 0 : index
    %c384 = arith.constant 384 : index
    %61 = vector.load %arg12[%c0_33, %c384] : memref<88x768xf32, #tpu.memory_space<vmem>>, vector<3x384xf32>
    tpu.vector_store %arg12[%c0_33, %c384], %60 {strides = array<i32>} : memref<88x768xf32, #tpu.memory_space<vmem>>, vector<3x384xf32>,
    %62 = vector.extract_strided_slice %59 {offsets = [0, 76], sizes = [3, 384], strides = [1, 1]} : vector<3x640xf32> to vector<3x384xf32>
    %c3_34 = arith.constant 3 : index
    %c384_35 = arith.constant 384 : index
    %63 = vector.load %arg12[%c3_34, %c384_35] : memref<88x768xf32, #tpu.memory_space<vmem>>, vector<3x384xf32>
    tpu.vector_store %arg12[%c3_34, %c384_35], %62 {strides = array<i32>} : memref<88x768xf32, #tpu.memory_space<vmem>>, vector<3x384xf32>,
    %64 = vector.extract_strided_slice %59 {offsets = [0, 77], sizes = [3, 384], strides = [1, 1]} : vector<3x640xf32> to vector<3x384xf32>
    %c6_36 = arith.constant 6 : index
    %c384_37 = arith.constant 384 : index
    %65 = vector.load %arg12[%c6_36, %c384_37] : memref<88x768xf32, #tpu.memory_space<vmem>>, vector<3x384xf32>
    tpu.vector_store %arg12[%c6_36, %c384_37], %64 {strides = array<i32>} : memref<88x768xf32, #tpu.memory_space<vmem>>, vector<3x384xf32>,
    %66 = vector.extract_strided_slice %59 {offsets = [0, 99], sizes = [3, 384], strides = [1, 1]} : vector<3x640xf32> to vector<3x384xf32>
    %c9_38 = arith.constant 9 : index
    %c384_39 = arith.constant 384 : index
    %67 = vector.load %arg12[%c9_38, %c384_39] : memref<88x768xf32, #tpu.memory_space<vmem>>, vector<3x384xf32>
    tpu.vector_store %arg12[%c9_38, %c384_39], %66 {strides = array<i32>} : memref<88x768xf32, #tpu.memory_space<vmem>>, vector<3x384xf32>,
    %68 = vector.extract_strided_slice %59 {offsets = [0, 100], sizes = [3, 384], strides = [1, 1]} : vector<3x640xf32> to vector<3x384xf32>
    %c12_40 = arith.constant 12 : index
    %c384_41 = arith.constant 384 : index
    %69 = vector.load %arg12[%c12_40, %c384_41] : memref<88x768xf32, #tpu.memory_space<vmem>>, vector<3x384xf32>
    tpu.vector_store %arg12[%c12_40, %c384_41], %68 {strides = array<i32>} : memref<88x768xf32, #tpu.memory_space<vmem>>, vector<3x384xf32>,
    %70 = vector.extract_strided_slice %59 {offsets = [0, 101], sizes = [3, 384], strides = [1, 1]} : vector<3x640xf32> to vector<3x384xf32>
    %c15_42 = arith.constant 15 : index
    %c384_43 = arith.constant 384 : index
    %71 = vector.load %arg12[%c15_42, %c384_43] : memref<88x768xf32, #tpu.memory_space<vmem>>, vector<3x384xf32>
    tpu.vector_store %arg12[%c15_42, %c384_43], %70 {strides = array<i32>} : memref<88x768xf32, #tpu.memory_space<vmem>>, vector<3x384xf32>,
    %72 = vector.extract_strided_slice %59 {offsets = [0, 123], sizes = [3, 384], strides = [1, 1]} : vector<3x640xf32> to vector<3x384xf32>
    %c18_44 = arith.constant 18 : index
    %c384_45 = arith.constant 384 : index
    %73 = vector.load %arg12[%c18_44, %c384_45] : memref<88x768xf32, #tpu.memory_space<vmem>>, vector<3x384xf32>
    tpu.vector_store %arg12[%c18_44, %c384_45], %72 {strides = array<i32>} : memref<88x768xf32, #tpu.memory_space<vmem>>, vector<3x384xf32>,
    %74 = vector.extract_strided_slice %59 {offsets = [0, 124], sizes = [3, 384], strides = [1, 1]} : vector<3x640xf32> to vector<3x384xf32>
    %c21_46 = arith.constant 21 : index
    %c384_47 = arith.constant 384 : index
    %75 = vector.load %arg12[%c21_46, %c384_47] : memref<88x768xf32, #tpu.memory_space<vmem>>, vector<3x384xf32>
    tpu.vector_store %arg12[%c21_46, %c384_47], %74 {strides = array<i32>} : memref<88x768xf32, #tpu.memory_space<vmem>>, vector<3x384xf32>,
    %76 = vector.extract_strided_slice %59 {offsets = [0, 125], sizes = [3, 384], strides = [1, 1]} : vector<3x640xf32> to vector<3x384xf32>
    %c24_48 = arith.constant 24 : index
    %c384_49 = arith.constant 384 : index
    %77 = vector.load %arg12[%c24_48, %c384_49] : memref<88x768xf32, #tpu.memory_space<vmem>>, vector<3x384xf32>
    tpu.vector_store %arg12[%c24_48, %c384_49], %76 {strides = array<i32>} : memref<88x768xf32, #tpu.memory_space<vmem>>, vector<3x384xf32>,
    %78 = vector.extract_strided_slice %59 {offsets = [0, 50], sizes = [3, 384], strides = [1, 1]} : vector<3x640xf32> to vector<3x384xf32>
    %c27_50 = arith.constant 27 : index
    %c384_51 = arith.constant 384 : index
    %79 = vector.load %arg12[%c27_50, %c384_51] : memref<88x768xf32, #tpu.memory_space<vmem>>, vector<3x384xf32>
    tpu.vector_store %arg12[%c27_50, %c384_51], %78 {strides = array<i32>} : memref<88x768xf32, #tpu.memory_space<vmem>>, vector<3x384xf32>,
    %80 = vector.extract_strided_slice %59 {offsets = [0, 52], sizes = [3, 384], strides = [1, 1]} : vector<3x640xf32> to vector<3x384xf32>
    %c30_52 = arith.constant 30 : index
    %c384_53 = arith.constant 384 : index
    %81 = vector.load %arg12[%c30_52, %c384_53] : memref<88x768xf32, #tpu.memory_space<vmem>>, vector<3x384xf32>
    tpu.vector_store %arg12[%c30_52, %c384_53], %80 {strides = array<i32>} : memref<88x768xf32, #tpu.memory_space<vmem>>, vector<3x384xf32>,
    %82 = vector.extract_strided_slice %59 {offsets = [0, 54], sizes = [3, 384], strides = [1, 1]} : vector<3x640xf32> to vector<3x384xf32>
    %c33_54 = arith.constant 33 : index
    %c384_55 = arith.constant 384 : index
    %83 = vector.load %arg12[%c33_54, %c384_55] : memref<88x768xf32, #tpu.memory_space<vmem>>, vector<3x384xf32>
    tpu.vector_store %arg12[%c33_54, %c384_55], %82 {strides = array<i32>} : memref<88x768xf32, #tpu.memory_space<vmem>>, vector<3x384xf32>,
    %84 = vector.extract_strided_slice %59 {offsets = [0, 98], sizes = [3, 384], strides = [1, 1]} : vector<3x640xf32> to vector<3x384xf32>
    %c36_56 = arith.constant 36 : index
    %c384_57 = arith.constant 384 : index
    %85 = vector.load %arg12[%c36_56, %c384_57] : memref<88x768xf32, #tpu.memory_space<vmem>>, vector<3x384xf32>
    tpu.vector_store %arg12[%c36_56, %c384_57], %84 {strides = array<i32>} : memref<88x768xf32, #tpu.memory_space<vmem>>, vector<3x384xf32>,
    %86 = vector.extract_strided_slice %59 {offsets = [0, 100], sizes = [3, 384], strides = [1, 1]} : vector<3x640xf32> to vector<3x384xf32>
    %c39_58 = arith.constant 39 : index
    %c384_59 = arith.constant 384 : index
    %87 = vector.load %arg12[%c39_58, %c384_59] : memref<88x768xf32, #tpu.memory_space<vmem>>, vector<3x384xf32>
    tpu.vector_store %arg12[%c39_58, %c384_59], %86 {strides = array<i32>} : memref<88x768xf32, #tpu.memory_space<vmem>>, vector<3x384xf32>,
    %88 = vector.extract_strided_slice %59 {offsets = [0, 102], sizes = [3, 384], strides = [1, 1]} : vector<3x640xf32> to vector<3x384xf32>
    %c42_60 = arith.constant 42 : index
    %c384_61 = arith.constant 384 : index
    %89 = vector.load %arg12[%c42_60, %c384_61] : memref<88x768xf32, #tpu.memory_space<vmem>>, vector<3x384xf32>
    tpu.vector_store %arg12[%c42_60, %c384_61], %88 {strides = array<i32>} : memref<88x768xf32, #tpu.memory_space<vmem>>, vector<3x384xf32>,
    %90 = vector.extract_strided_slice %59 {offsets = [0, 146], sizes = [3, 384], strides = [1, 1]} : vector<3x640xf32> to vector<3x384xf32>
    %c45_62 = arith.constant 45 : index
    %c384_63 = arith.constant 384 : index
    %91 = vector.load %arg12[%c45_62, %c384_63] : memref<88x768xf32, #tpu.memory_space<vmem>>, vector<3x384xf32>
    tpu.vector_store %arg12[%c45_62, %c384_63], %90 {strides = array<i32>} : memref<88x768xf32, #tpu.memory_space<vmem>>, vector<3x384xf32>,
    %92 = vector.extract_strided_slice %59 {offsets = [0, 148], sizes = [3, 384], strides = [1, 1]} : vector<3x640xf32> to vector<3x384xf32>
    %c48_64 = arith.constant 48 : index
    %c384_65 = arith.constant 384 : index
    %93 = vector.load %arg12[%c48_64, %c384_65] : memref<88x768xf32, #tpu.memory_space<vmem>>, vector<3x384xf32>
    tpu.vector_store %arg12[%c48_64, %c384_65], %92 {strides = array<i32>} : memref<88x768xf32, #tpu.memory_space<vmem>>, vector<3x384xf32>,
    %94 = vector.extract_strided_slice %59 {offsets = [0, 150], sizes = [3, 384], strides = [1, 1]} : vector<3x640xf32> to vector<3x384xf32>
    %c51_66 = arith.constant 51 : index
    %c384_67 = arith.constant 384 : index
    %95 = vector.load %arg12[%c51_66, %c384_67] : memref<88x768xf32, #tpu.memory_space<vmem>>, vector<3x384xf32>
    tpu.vector_store %arg12[%c51_66, %c384_67], %94 {strides = array<i32>} : memref<88x768xf32, #tpu.memory_space<vmem>>, vector<3x384xf32>,
    %96 = vector.extract_strided_slice %59 {offsets = [0, 0], sizes = [3, 384], strides = [1, 1]} : vector<3x640xf32> to vector<3x384xf32>
    %c54_68 = arith.constant 54 : index
    %c384_69 = arith.constant 384 : index
    %97 = vector.load %arg12[%c54_68, %c384_69] : memref<88x768xf32, #tpu.memory_space<vmem>>, vector<3x384xf32>
    tpu.vector_store %arg12[%c54_68, %c384_69], %96 {strides = array<i32>} : memref<88x768xf32, #tpu.memory_space<vmem>>, vector<3x384xf32>,
    %98 = vector.extract_strided_slice %59 {offsets = [0, 4], sizes = [3, 384], strides = [1, 1]} : vector<3x640xf32> to vector<3x384xf32>
    %c57_70 = arith.constant 57 : index
    %c384_71 = arith.constant 384 : index
    %99 = vector.load %arg12[%c57_70, %c384_71] : memref<88x768xf32, #tpu.memory_space<vmem>>, vector<3x384xf32>
    tpu.vector_store %arg12[%c57_70, %c384_71], %98 {strides = array<i32>} : memref<88x768xf32, #tpu.memory_space<vmem>>, vector<3x384xf32>,
    %100 = vector.extract_strided_slice %59 {offsets = [0, 8], sizes = [3, 384], strides = [1, 1]} : vector<3x640xf32> to vector<3x384xf32>
    %c60_72 = arith.constant 60 : index
    %c384_73 = arith.constant 384 : index
    %101 = vector.load %arg12[%c60_72, %c384_73] : memref<88x768xf32, #tpu.memory_space<vmem>>, vector<3x384xf32>
    tpu.vector_store %arg12[%c60_72, %c384_73], %100 {strides = array<i32>} : memref<88x768xf32, #tpu.memory_space<vmem>>, vector<3x384xf32>,
    %102 = vector.extract_strided_slice %59 {offsets = [0, 96], sizes = [3, 384], strides = [1, 1]} : vector<3x640xf32> to vector<3x384xf32>
    %c63_74 = arith.constant 63 : index
    %c384_75 = arith.constant 384 : index
    %103 = vector.load %arg12[%c63_74, %c384_75] : memref<88x768xf32, #tpu.memory_space<vmem>>, vector<3x384xf32>
    tpu.vector_store %arg12[%c63_74, %c384_75], %102 {strides = array<i32>} : memref<88x768xf32, #tpu.memory_space<vmem>>, vector<3x384xf32>,
    %104 = vector.extract_strided_slice %59 {offsets = [0, 100], sizes = [3, 384], strides = [1, 1]} : vector<3x640xf32> to vector<3x384xf32>
    %c66_76 = arith.constant 66 : index
    %c384_77 = arith.constant 384 : index
    %105 = vector.load %arg12[%c66_76, %c384_77] : memref<88x768xf32, #tpu.memory_space<vmem>>, vector<3x384xf32>
    tpu.vector_store %arg12[%c66_76, %c384_77], %104 {strides = array<i32>} : memref<88x768xf32, #tpu.memory_space<vmem>>, vector<3x384xf32>,
    %106 = vector.extract_strided_slice %59 {offsets = [0, 104], sizes = [3, 384], strides = [1, 1]} : vector<3x640xf32> to vector<3x384xf32>
    %c69_78 = arith.constant 69 : index
    %c384_79 = arith.constant 384 : index
    %107 = vector.load %arg12[%c69_78, %c384_79] : memref<88x768xf32, #tpu.memory_space<vmem>>, vector<3x384xf32>
    tpu.vector_store %arg12[%c69_78, %c384_79], %106 {strides = array<i32>} : memref<88x768xf32, #tpu.memory_space<vmem>>, vector<3x384xf32>,
    %108 = vector.extract_strided_slice %59 {offsets = [0, 192], sizes = [3, 384], strides = [1, 1]} : vector<3x640xf32> to vector<3x384xf32>
    %c72_80 = arith.constant 72 : index
    %c384_81 = arith.constant 384 : index
    %109 = vector.load %arg12[%c72_80, %c384_81] : memref<88x768xf32, #tpu.memory_space<vmem>>, vector<3x384xf32>
    tpu.vector_store %arg12[%c72_80, %c384_81], %108 {strides = array<i32>} : memref<88x768xf32, #tpu.memory_space<vmem>>, vector<3x384xf32>,
    %110 = vector.extract_strided_slice %59 {offsets = [0, 196], sizes = [3, 384], strides = [1, 1]} : vector<3x640xf32> to vector<3x384xf32>
    %c75_82 = arith.constant 75 : index
    %c384_83 = arith.constant 384 : index
    %111 = vector.load %arg12[%c75_82, %c384_83] : memref<88x768xf32, #tpu.memory_space<vmem>>, vector<3x384xf32>
    tpu.vector_store %arg12[%c75_82, %c384_83], %110 {strides = array<i32>} : memref<88x768xf32, #tpu.memory_space<vmem>>, vector<3x384xf32>,
    %112 = vector.extract_strided_slice %59 {offsets = [0, 200], sizes = [3, 384], strides = [1, 1]} : vector<3x640xf32> to vector<3x384xf32>
    %c78_84 = arith.constant 78 : index
    %c384_85 = arith.constant 384 : index
    %113 = vector.load %arg12[%c78_84, %c384_85] : memref<88x768xf32, #tpu.memory_space<vmem>>, vector<3x384xf32>
    tpu.vector_store %arg12[%c78_84, %c384_85], %112 {strides = array<i32>} : memref<88x768xf32, #tpu.memory_space<vmem>>, vector<3x384xf32>,
    %c0_86 = arith.constant 0 : index
    %c0_87 = arith.constant 0 : index
    %114 = vector.load %arg12[%c0_86, %c0_87] : memref<88x768xf32, #tpu.memory_space<vmem>>, vector<88x768xf32>
    %c0_88 = arith.constant 0 : index
    %c0_89 = arith.constant 0 : index
    %115 = vector.load %arg3[%c0_88, %c0_89] : memref<96x88xf32, #tpu.memory_space<vmem>>, vector<96x88xf32>
    %cst_90 = arith.constant dense<0.000000e+00> : vector<96x768xf32>
    %116 = tpu.matmul %115, %114, %cst_90 {dimension_numbers = #tpu.dot_dimension_numbers<[1], [0], [0], [1], [0, 0, 1, 1], [], []>, precision = #tpu.contract_precision<fp32>} : vector<96x88xf32>, vector<88x768xf32>, vector<96x768xf32> -> vector<96x768xf32>
    %c0_91 = arith.constant 0 : index
    %c0_92 = arith.constant 0 : index
    %117 = vector.load %arg4[%c0_91, %c0_92] : memref<96x1xf32, #tpu.memory_space<vmem>>, vector<96x1xf32>
    %118 = vector.broadcast %117 : vector<96x1xf32> to vector<96x768xf32>
    %119 = arith.addf %116, %118 : vector<96x768xf32>
    %cst_93 = arith.constant 0.000000e+00 : f32
    %120 = vector.broadcast %cst_93 : f32 to vector<96x768xf32>
    %121 = arith.maximumf %119, %120 : vector<96x768xf32>
    %c0_94 = arith.constant 0 : index
    %c0_95 = arith.constant 0 : index
    %122 = vector.load %arg2[%c0_94, %c0_95] : memref<1x384xf32, #tpu.memory_space<vmem>>, vector<1x384xf32>
    %123 = vector.extract_strided_slice %121 {offsets = [0, 0], sizes = [96, 384], strides = [1, 1]} : vector<96x768xf32> to vector<96x384xf32>
    %124 = vector.broadcast %122 : vector<1x384xf32> to vector<96x384xf32>
    %125 = arith.mulf %123, %124 : vector<96x384xf32>
    %cst_96 = arith.constant dense<0.000000e+00> : vector<96xf32>
    %126 = vector.multi_reduction <add>, %125, %cst_96 [1] : vector<96x384xf32> to vector<96xf32>
    %127 = vector.shape_cast %126 : vector<96xf32> to vector<96x1xf32>
    %c0_97 = arith.constant 0 : index
    %c0_98 = arith.constant 0 : index
    %128 = vector.load %arg5[%c0_97, %c0_98] : memref<12x96xf32, #tpu.memory_space<vmem>>, vector<12x96xf32>
    %cst_99 = arith.constant dense<0.000000e+00> : vector<12x1xf32>
    %129 = tpu.matmul %128, %127, %cst_99 {dimension_numbers = #tpu.dot_dimension_numbers<[1], [0], [0], [1], [0, 0, 1, 1], [], []>, precision = #tpu.contract_precision<fp32>} : vector<12x96xf32>, vector<96x1xf32>, vector<12x1xf32> -> vector<12x1xf32>
    %c0_100 = arith.constant 0 : index
    %c0_101 = arith.constant 0 : index
    %130 = vector.load %arg6[%c0_100, %c0_101] : memref<12x1xf32, #tpu.memory_space<vmem>>, vector<12x1xf32>
    %131 = arith.addf %129, %130 : vector<12x1xf32>
    %cst_102 = arith.constant 0.000000e+00 : f32
    %132 = vector.broadcast %cst_102 : f32 to vector<12x1xf32>
    %133 = arith.maximumf %131, %132 : vector<12x1xf32>
    %c0_103 = arith.constant 0 : index
    %c0_104 = arith.constant 0 : index
    %134 = vector.load %arg7[%c0_103, %c0_104] : memref<96x12xf32, #tpu.memory_space<vmem>>, vector<96x12xf32>
    %cst_105 = arith.constant dense<0.000000e+00> : vector<96x1xf32>
    %135 = tpu.matmul %134, %133, %cst_105 {dimension_numbers = #tpu.dot_dimension_numbers<[1], [0], [0], [1], [0, 0, 1, 1], [], []>, precision = #tpu.contract_precision<fp32>} : vector<96x12xf32>, vector<12x1xf32>, vector<96x1xf32> -> vector<96x1xf32>
    %c0_106 = arith.constant 0 : index
    %c0_107 = arith.constant 0 : index
    %136 = vector.load %arg8[%c0_106, %c0_107] : memref<96x1xf32, #tpu.memory_space<vmem>>, vector<96x1xf32>
    %137 = arith.addf %135, %136 : vector<96x1xf32>
    %138 = arith.negf %137 : vector<96x1xf32>
    %139 = math.exp %138 : vector<96x1xf32>
    %cst_108 = arith.constant 1.000000e+00 : f32
    %140 = vector.broadcast %cst_108 : f32 to vector<96x1xf32>
    %141 = arith.addf %140, %139 : vector<96x1xf32>
    %142 = arith.divf %140, %141 : vector<96x1xf32>
    %143 = vector.broadcast %142 : vector<96x1xf32> to vector<96x384xf32>
    %144 = arith.mulf %123, %143 : vector<96x384xf32>
    %c0_109 = arith.constant 0 : index
    %c0_110 = arith.constant 0 : index
    %145 = vector.load %arg9[%c0_109, %c0_110] : memref<48x96xf32, #tpu.memory_space<vmem>>, vector<48x96xf32>
    %cst_111 = arith.constant dense<0.000000e+00> : vector<48x384xf32>
    %146 = tpu.matmul %145, %144, %cst_111 {dimension_numbers = #tpu.dot_dimension_numbers<[1], [0], [0], [1], [0, 0, 1, 1], [], []>, precision = #tpu.contract_precision<fp32>} : vector<48x96xf32>, vector<96x384xf32>, vector<48x384xf32> -> vector<48x384xf32>
    %c0_112 = arith.constant 0 : index
    %c0_113 = arith.constant 0 : index
    %147 = vector.load %arg10[%c0_112, %c0_113] : memref<48x1xf32, #tpu.memory_space<vmem>>, vector<48x1xf32>
    %148 = vector.broadcast %147 : vector<48x1xf32> to vector<48x384xf32>
    %149 = arith.addf %146, %148 : vector<48x384xf32>
    %c0_114 = arith.constant 0 : index
    %c0_115 = arith.constant 0 : index
    %c0_116 = arith.constant 0 : index
    %150 = vector.load %arg11[%c0_114, %c0_115, %c0_116] : memref<2x48x384xf32, #tpu.memory_space<vmem>>, vector<1x48x384xf32>
    %151 = vector.shape_cast %150 : vector<1x48x384xf32> to vector<48x384xf32>
    %152 = vector.shape_cast %149 : vector<48x384xf32> to vector<1x48x384xf32>
    tpu.vector_store %arg11[%c0_114, %c0_115, %c0_116], %152 {strides = array<i32>} : memref<2x48x384xf32, #tpu.memory_space<vmem>>, vector<1x48x384xf32>,
    %153 = vector.extract_strided_slice %121 {offsets = [0, 384], sizes = [96, 384], strides = [1, 1]} : vector<96x768xf32> to vector<96x384xf32>
    %154 = vector.broadcast %122 : vector<1x384xf32> to vector<96x384xf32>
    %155 = arith.mulf %153, %154 : vector<96x384xf32>
    %cst_117 = arith.constant dense<0.000000e+00> : vector<96xf32>
    %156 = vector.multi_reduction <add>, %155, %cst_117 [1] : vector<96x384xf32> to vector<96xf32>
    %157 = vector.shape_cast %156 : vector<96xf32> to vector<96x1xf32>
    %c0_118 = arith.constant 0 : index
    %c0_119 = arith.constant 0 : index
    %158 = vector.load %arg5[%c0_118, %c0_119] : memref<12x96xf32, #tpu.memory_space<vmem>>, vector<12x96xf32>
    %cst_120 = arith.constant dense<0.000000e+00> : vector<12x1xf32>
    %159 = tpu.matmul %158, %157, %cst_120 {dimension_numbers = #tpu.dot_dimension_numbers<[1], [0], [0], [1], [0, 0, 1, 1], [], []>, precision = #tpu.contract_precision<fp32>} : vector<12x96xf32>, vector<96x1xf32>, vector<12x1xf32> -> vector<12x1xf32>
    %c0_121 = arith.constant 0 : index
    %c0_122 = arith.constant 0 : index
    %160 = vector.load %arg6[%c0_121, %c0_122] : memref<12x1xf32, #tpu.memory_space<vmem>>, vector<12x1xf32>
    %161 = arith.addf %159, %160 : vector<12x1xf32>
    %cst_123 = arith.constant 0.000000e+00 : f32
    %162 = vector.broadcast %cst_123 : f32 to vector<12x1xf32>
    %163 = arith.maximumf %161, %162 : vector<12x1xf32>
    %c0_124 = arith.constant 0 : index
    %c0_125 = arith.constant 0 : index
    %164 = vector.load %arg7[%c0_124, %c0_125] : memref<96x12xf32, #tpu.memory_space<vmem>>, vector<96x12xf32>
    %cst_126 = arith.constant dense<0.000000e+00> : vector<96x1xf32>
    %165 = tpu.matmul %164, %163, %cst_126 {dimension_numbers = #tpu.dot_dimension_numbers<[1], [0], [0], [1], [0, 0, 1, 1], [], []>, precision = #tpu.contract_precision<fp32>} : vector<96x12xf32>, vector<12x1xf32>, vector<96x1xf32> -> vector<96x1xf32>
    %c0_127 = arith.constant 0 : index
    %c0_128 = arith.constant 0 : index
    %166 = vector.load %arg8[%c0_127, %c0_128] : memref<96x1xf32, #tpu.memory_space<vmem>>, vector<96x1xf32>
    %167 = arith.addf %165, %166 : vector<96x1xf32>
    %168 = arith.negf %167 : vector<96x1xf32>
    %169 = math.exp %168 : vector<96x1xf32>
    %cst_129 = arith.constant 1.000000e+00 : f32
    %170 = vector.broadcast %cst_129 : f32 to vector<96x1xf32>
    %171 = arith.addf %170, %169 : vector<96x1xf32>
    %172 = arith.divf %170, %171 : vector<96x1xf32>
    %173 = vector.broadcast %172 : vector<96x1xf32> to vector<96x384xf32>
    %174 = arith.mulf %153, %173 : vector<96x384xf32>
    %c0_130 = arith.constant 0 : index
    %c0_131 = arith.constant 0 : index
    %175 = vector.load %arg9[%c0_130, %c0_131] : memref<48x96xf32, #tpu.memory_space<vmem>>, vector<48x96xf32>
    %cst_132 = arith.constant dense<0.000000e+00> : vector<48x384xf32>
    %176 = tpu.matmul %175, %174, %cst_132 {dimension_numbers = #tpu.dot_dimension_numbers<[1], [0], [0], [1], [0, 0, 1, 1], [], []>, precision = #tpu.contract_precision<fp32>} : vector<48x96xf32>, vector<96x384xf32>, vector<48x384xf32> -> vector<48x384xf32>
    %c0_133 = arith.constant 0 : index
    %c0_134 = arith.constant 0 : index
    %177 = vector.load %arg10[%c0_133, %c0_134] : memref<48x1xf32, #tpu.memory_space<vmem>>, vector<48x1xf32>
    %178 = vector.broadcast %177 : vector<48x1xf32> to vector<48x384xf32>
    %179 = arith.addf %176, %178 : vector<48x384xf32>
    %c1_135 = arith.constant 1 : index
    %c0_136 = arith.constant 0 : index
    %c0_137 = arith.constant 0 : index
    %180 = vector.load %arg11[%c1_135, %c0_136, %c0_137] : memref<2x48x384xf32, #tpu.memory_space<vmem>>, vector<1x48x384xf32>
    %181 = vector.shape_cast %180 : vector<1x48x384xf32> to vector<48x384xf32>
    %182 = vector.shape_cast %179 : vector<48x384xf32> to vector<1x48x384xf32>
    tpu.vector_store %arg11[%c1_135, %c0_136, %c0_137], %182 {strides = array<i32>} : memref<2x48x384xf32, #tpu.memory_space<vmem>>, vector<1x48x384xf32>,
    return
  }
  func.func @transform_0(%arg0: i32) -> (i32, i32, i32) {
    %c0_i32 = arith.constant 0 : i32
    %c0_i32_0 = arith.constant 0 : i32
    %c0_i32_1 = arith.constant 0 : i32
    return %arg0, %c0_i32, %c0_i32_0 : i32, i32, i32
  }
  func.func @transform_1(%arg0: i32) -> (i32, i32) {
    %c0_i32 = arith.constant 0 : i32
    %c0_i32_0 = arith.constant 0 : i32
    %c0_i32_1 = arith.constant 0 : i32
    return %c0_i32, %c0_i32_0 : i32, i32
  }
  func.func @transform_2(%arg0: i32) -> (i32, i32) {
    %c0_i32 = arith.constant 0 : i32
    %c0_i32_0 = arith.constant 0 : i32
    %c0_i32_1 = arith.constant 0 : i32
    return %c0_i32, %c0_i32_0 : i32, i32
  }
  func.func @transform_3(%arg0: i32) -> (i32, i32) {
    %c0_i32 = arith.constant 0 : i32
    %c0_i32_0 = arith.constant 0 : i32
    %c0_i32_1 = arith.constant 0 : i32
    return %c0_i32, %c0_i32_0 : i32, i32
  }
  func.func @transform_4(%arg0: i32) -> (i32, i32) {
    %c0_i32 = arith.constant 0 : i32
    %c0_i32_0 = arith.constant 0 : i32
    %c0_i32_1 = arith.constant 0 : i32
    return %c0_i32, %c0_i32_0 : i32, i32
  }
  func.func @transform_5(%arg0: i32) -> (i32, i32) {
    %c0_i32 = arith.constant 0 : i32
    %c0_i32_0 = arith.constant 0 : i32
    %c0_i32_1 = arith.constant 0 : i32
    return %c0_i32, %c0_i32_0 : i32, i32
  }
  func.func @transform_6(%arg0: i32) -> (i32, i32) {
    %c0_i32 = arith.constant 0 : i32
    %c0_i32_0 = arith.constant 0 : i32
    %c0_i32_1 = arith.constant 0 : i32
    return %c0_i32, %c0_i32_0 : i32, i32
  }
  func.func @transform_7(%arg0: i32) -> (i32, i32) {
    %c0_i32 = arith.constant 0 : i32
    %c0_i32_0 = arith.constant 0 : i32
    %c0_i32_1 = arith.constant 0 : i32
    return %c0_i32, %c0_i32_0 : i32, i32
  }
  func.func @transform_8(%arg0: i32) -> (i32, i32) {
    %c0_i32 = arith.constant 0 : i32
    %c0_i32_0 = arith.constant 0 : i32
    %c0_i32_1 = arith.constant 0 : i32
    return %c0_i32, %c0_i32_0 : i32, i32
  }
  func.func @transform_9(%arg0: i32) -> (i32, i32) {
    %c0_i32 = arith.constant 0 : i32
    %c0_i32_0 = arith.constant 0 : i32
    %c0_i32_1 = arith.constant 0 : i32
    return %c0_i32, %c0_i32_0 : i32, i32
  }
  func.func @transform_10(%arg0: i32) -> (i32, i32, i32) {
    %c0_i32 = arith.constant 0 : i32
    %c0_i32_0 = arith.constant 0 : i32
    %c0_i32_1 = arith.constant 0 : i32
    return %arg0, %c0_i32, %c0_i32_0 : i32, i32, i32
  }
}

</mosaic_0001>

<bundles_post_ra>
// kernel: tpu_custom_call.1
= control target key start
LH: loop header
LB: loop body
LE: loop exit
PB: predicated region body
PF: predicated region fallthrough
CT: control target
= control target key end

     0   :  { %s16516_s17 = smov 52   ;;  %s16517_s18 = smov 53   ;;  %s22465_s0 = inlined_call_operand.vmem [shape: f32[2,3,640], index: 0, kind: input, shape index: {}]   ;;  %s22466_s1 = inlined_call_operand.vmem [shape: f32[1,384], index: 1, kind: input, shape index: {}]   ;;  %s22467_s2 = inlined_call_operand.vmem [shape: f32[96,88], index: 2, kind: input, shape index: {}]   ;;  %s22468_s3 = inlined_call_operand.vmem [shape: f32[96,1], index: 3, kind: input, shape index: {}]   ;;  %s22469_s4 = inlined_call_operand.vmem [shape: f32[12,96], index: 4, kind: input, shape index: {}]   ;;  %s22470_s5 = inlined_call_operand.vmem [shape: f32[12,1], index: 5, kind: input, shape index: {}]   ;;  %s22471_s6 = inlined_call_operand.vmem [shape: f32[96,12], index: 6, kind: input, shape index: {}]   ;;  %s22472_s7 = inlined_call_operand.vmem [shape: f32[96,1], index: 7, kind: input, shape index: {}]   ;;  %s22473_s8 = inlined_call_operand.vmem [shape: f32[48,96], index: 8, kind: input, shape index: {}]   ;;  %s22474_s9 = inlined_call_operand.vmem [shape: f32[48,1], index: 9, kind: input, shape index: {}]   ;;  %s22475_s10 = inlined_call_operand.hbm [shape: f32[2,48,384], index: 10, kind: output, shape index: {}]  }
   0x1   :  { %v16602_v0 = vld [vmem:[%s22465_s0 + $0x8] sm:$0x77]  ;;  %v16607_v1 = vld [vmem:[%s22465_s0] sm:$0x77]  ;;  %v16636_v8 = vld [vmem:[%s22465_s0 + $0x14] sm:$0x77] }
   0x2   :  { %v16610_v2 = vrot.slane %v16602_v0, 5  ;;  %v16614_v3 = vcombine.high %v16607_v1, %v16607_v1  ;;  %v16617_v4 = vrot.slane %v16602_v0, 2  ;;  %v16620_v5 = vrot.slane %v16607_v1, 2 }
   0x3   :  { %v16641_v9 = vcombine.high %v16636_v8, %v16636_v8 }
   0x4   :  { %75 = vrot.lane.b32.xlu1 %v16610_v2, %s16516_s17  ;;  %51 = vrot.lane.b32.xlu0 %v16614_v3, %s16517_s18  ;;  %v16627_v6 = vrot.slane %v16614_v3, 5  ;;  %v16630_v7 = vrot.slane %v16614_v3, 2  ;;  %418 = vst [vmem:[#allocation2 + $0x160] ss:$-44 sps:$4 sm:$0xc1] %v16617_v4  }
   0x5   :  { %416 = vst [vmem:[#allocation2 + $0x150] ss:$-44 sps:$4 sm:$0xc1] %v16620_v5  }
   0x6   :  { %15 = vsyncpa [#allocation4], 0  ;;  %417 = vst [vmem:[#allocation2 + $0x158] ss:$-44 sps:$4 sm:$0xc1] %v16630_v7   ;;  %v16645_v10 = vrot.slane %v16636_v8, 2  ;;  %v16672_v14 = vcombine.low %v16602_v0, %v16602_v0  ;;  %v16703_v19 = vcombine.low %v16607_v1, %v16607_v1  ;;  %v16741_v25 = vcombine.low %v16636_v8, %v16636_v8 }
   0x7   :  { %v16648_v11 = vrot.slane %v16641_v9, 2  ;;  %s16518_s21 = smov 51   ;;  %v16661_v12 = vrot.slane %v16614_v3, 7  ;;  %v16664_v13 = vrot.slane %v16602_v0, 7  ;;  %s16519_s22 = smov 29   ;;  %v16679_v15 = vrot.slane %v16614_v3, 1 }
   0x8   :  { %53 = vrot.lane.b32.xlu0 %v16602_v0, %s16517_s18  ;;  %73 = vrot.lane.b32.xlu1 %v16627_v6, %s16516_s17  ;;  %930 = vst [vmem:[#allocation2 + $0x168] ss:$-44 sps:$4 sm:$0xc1] %v16645_v10   ;;  %s16520_s23 = smov 28   ;;  %v16682_v16 = vrot.slane %v16602_v0, 1  ;;  %s16521_s24 = smov 27   ;;  %v16755_v28 = vcombine.high %v16602_v0, %v16602_v0 }
   0x9   :  { %931 = vst [vmem:[#allocation2 + $0x170] ss:$-44 sps:$4 sm:$0xc1] %v16648_v11   ;;  %v67_v17 = vrot.slane %v16607_v1, 5  ;;  %v16695_v18 = vrot.slane %v16607_v1, 7  ;;  %v16706_v20 = vrot.slane %v16607_v1, 1 }
   0xa   :  { %v597_v21 = vrot.slane %v16636_v8, 5  ;;  %v16718_v22 = vrot.slane %v16641_v9, 5  ;;  %v16730_v23 = vrot.slane %v16636_v8, 7  ;;  %v16733_v24 = vrot.slane %v16641_v9, 7  ;;  %s16522_s25 = smov 5   ;;  %s16523_s26 = smov 4  }
   0xb   :  { %v16748_v26 = vrot.slane %v16636_v8, 1  ;;  %v16751_v27 = vrot.slane %v16641_v9, 1  ;;  %v16762_v29 = vrot.slane %v16755_v28, 5  ;;  %v16769_v30 = vrot.slane %v16755_v28, 2  ;;  %s16524_s27 = smov 3   ;;  %s16525_s28 = smov 78  }
   0xc   :  { %95 = vrot.lane.b32.xlu0 %v16630_v7, %s16518_s21  ;;  %97 = vrot.lane.b32.xlu1 %v16617_v4, %s16518_s21  ;;  %v16772_v31 = vrot.slane %v16755_v28, 7  ;;  %v16779_v32 = vrot.slane %v16755_v28, 1  ;;  %v16786_v33 = vrot.slane %v16614_v3, 6  ;;  %v16789_v34 = vrot.slane %v16602_v0, 6  ;;  %s16526_s29 = smov 76   ;;  %s16527_s30 = smov 74  }
   0xd   :  { %v16796_v35 = vrot.slane %v16614_v3, 3  ;;  %v16799_v36 = vrot.slane %v16602_v0, 3  ;;  %v16818_v37 = vrot.slane %v16607_v1, 6  ;;  %v22477_v38 = vrot.slane %v16607_v1, 3  ;;  %s16528_s11 = smov 30   ;;  %s16529_s12 = smov 26  }
   0xe   :  { %v16832_v39 = vrot.slane %v16636_v8, 6  ;;  %v16839_v40 = vrot.slane %v16641_v9, 6  ;;  %v22476_v41 = vrot.slane %v16636_v8, 3  ;;  %v16848_v42 = vrot.slane %v16641_v9, 3  ;;  %s16530_s13 = smov 110   ;;  %s16531_s20 = smov 108  }
   0xf   :  { %vm57_vm0 = vcmask 433152   ;;  %vm79_vm1 = vcmask 424960   ;;  %v16866_v45 = vrot.slane %v16755_v28, 6  ;;  %vm101_vm2 = vcmask 416768   ;;  %s22513_s14 = smov 106   ;;  %s22511_s15 = smov 124  }
  0x10   :  { %120 = vrot.lane.b32.xlu0 %v16661_v12, %s16519_s22  ;;  %122 = vrot.lane.b32.xlu1 %v16664_v13, %s16519_s22  ;;  %v16879_v50 = vrot.slane %v16755_v28, 3  ;;  %vm126_vm3 = vcmask 236544   ;;  %vm146_vm4 = vcmask 228352   ;;  %vm168_vm5 = vcmask 220160   ;;  %s22509_s16 = smov 120   ;;  %s22507_s19 = smov 32  }
  0x11   :  { %vm193_vm6 = vcmask 39936   ;;  %vm215_vm7 = vcmask 31744   ;;  %vm233_vm8 = vcmask 23552   ;;  %vm251_vm9 = vcmask 637952  }
  0x12   :  { %vm269_vm10 = vcmask 621568   ;;  %vm22523_vm11 = vcmask 605184   ;;  %vm22522_vm12 = vcmask 244736   ;;  %vm22519_vm13 = vcmask 211968  }
  0x13   :  { %vm22518_vm14 = vcmask 900096   ;;  %vm22560_vm15 = vcmask 883712  }
  0x14   :  { %140 = vrot.lane.b32.xlu0 %v16607_v1, %s16520_s23  ;;  %142 = vrot.lane.b32.xlu1 %v16672_v14, %s16520_s23 }
  0x18   :  { %162 = vrot.lane.b32.xlu0 %v16679_v15, %s16521_s24  ;;  %164 = vrot.lane.b32.xlu1 %v16682_v16, %s16521_s24 }
  0x1c   :  { %49 = vrot.lane.b32.xlu0 %v16607_v1, %s16517_s18  ;;  %71 = vrot.lane.b32.xlu1 %v67_v17, %s16516_s17 }
  0x20   :  { %93 = vrot.lane.b32.xlu0 %v16620_v5, %s16518_s21  ;;  %118 = vrot.lane.b32.xlu1 %v16695_v18, %s16519_s22 }
  0x24   :  { %138 = vrot.lane.b32.xlu0 %v16703_v19, %s16520_s23  ;;  %160 = vrot.lane.b32.xlu1 %v16706_v20, %s16521_s24 }
  0x28   :  { %580 = vrot.lane.b32.xlu0 %v16636_v8, %s16517_s18  ;;  %582 = vrot.lane.b32.xlu1 %v16641_v9, %s16517_s18 }
  0x2c   :  { %601 = vrot.lane.b32.xlu0 %v597_v21, %s16516_s17  ;;  %603 = vrot.lane.b32.xlu1 %v16718_v22, %s16516_s17 }
  0x30   :  { %622 = vrot.lane.b32.xlu0 %v16645_v10, %s16518_s21  ;;  %624 = vrot.lane.b32.xlu1 %v16648_v11, %s16518_s21 }
  0x34   :  { %646 = vrot.lane.b32.xlu0 %v16730_v23, %s16519_s22  ;;  %648 = vrot.lane.b32.xlu1 %v16733_v24, %s16519_s22 }
  0x38   :  { %665 = vrot.lane.b32.xlu0 %v16741_v25, %s16520_s23  ;;  %667 = vrot.lane.b32.xlu1 %v16636_v8, %s16520_s23 }
  0x3c   :  { %686 = vrot.lane.b32.xlu0 %v16748_v26, %s16521_s24  ;;  %688 = vrot.lane.b32.xlu1 %v16751_v27, %s16521_s24 }
  0x40   :  { %55 = vrot.lane.b32.xlu0 %v16755_v28, %s16517_s18  ;;  %77 = vrot.lane.b32.xlu1 %v16762_v29, %s16516_s17 }
  0x44   :  { %99 = vrot.lane.b32.xlu0 %v16769_v30, %s16518_s21  ;;  %124 = vrot.lane.b32.xlu1 %v16772_v31, %s16519_s22 }
  0x48   :  { %144 = vrot.lane.b32.xlu0 %v16602_v0, %s16520_s23  ;;  %166 = vrot.lane.b32.xlu1 %v16779_v32, %s16521_s24 }
  0x4c   :  { %187 = vrot.lane.b32.xlu0 %v16786_v33, %s16522_s25  ;;  %189 = vrot.lane.b32.xlu1 %v16789_v34, %s16522_s25 }
  0x50   :  { %209 = vrot.lane.b32.xlu0 %v16796_v35, %s16523_s26  ;;  %211 = vrot.lane.b32.xlu1 %v16799_v36, %s16523_s26 }
  0x54   :  { %227 = vrot.lane.b32.xlu0 %v16614_v3, %s16524_s27  ;;  %229 = vrot.lane.b32.xlu1 %v16602_v0, %s16524_s27 }
  0x58   :  { %245 = vrot.lane.b32.xlu0 %v16627_v6, %s16525_s28  ;;  %247 = vrot.lane.b32.xlu1 %v16610_v2, %s16525_s28 }
  0x5c   :  { %263 = vrot.lane.b32.xlu0 %v16630_v7, %s16526_s29  ;;  %265 = vrot.lane.b32.xlu1 %v16617_v4, %s16526_s29 }
  0x60   :  { %185 = vrot.lane.b32.xlu0 %v16818_v37, %s16522_s25  ;;  %207 = vrot.lane.b32.xlu1 %v22477_v38, %s16523_s26 }
  0x64   :  { %225 = vrot.lane.b32.xlu0 %v16607_v1, %s16524_s27  ;;  %243 = vrot.lane.b32.xlu1 %v67_v17, %s16525_s28 }
  0x68   :  { %261 = vrot.lane.b32.xlu0 %v16620_v5, %s16526_s29  ;;  %710 = vrot.lane.b32.xlu1 %v16832_v39, %s16522_s25 }
  0x6c   :  { %712 = vrot.lane.b32.xlu0 %v16839_v40, %s16522_s25  ;;  %731 = vrot.lane.b32.xlu1 %v22476_v41, %s16523_s26 }
  0x70   :  { %733 = vrot.lane.b32.xlu0 %v16848_v42, %s16523_s26  ;;  %748 = vrot.lane.b32.xlu1 %v16636_v8, %s16524_s27 }
  0x74   :  { %750 = vrot.lane.b32.xlu0 %v16641_v9, %s16524_s27  ;;  %765 = vrot.lane.b32.xlu1 %v597_v21, %s16525_s28 }
  0x76   :  { %v16859_v43 = vpop.permute.xlu1 %75  ;;  %v52_v44 = vpop.permute.xlu0 %51 }
  0x78   :  { %767 = vrot.lane.b32.xlu0 %v16718_v22, %s16525_s28  ;;  %782 = vrot.lane.b32.xlu1 %v16645_v10, %s16526_s29 }
  0x7a   :  { %v16868_v46 = vpop.permute.xlu0 %53  ;;  %v74_v47 = vpop.permute.xlu1 %73 }
  0x7b   :  { %v59_v48 = vsel %vm57_vm0, %v52_v44, %v16868_v46  ;;  %v81_v49 = vsel %vm79_vm1, %v74_v47, %v16859_v43 }
  0x7c   :  { %65 = vst [vmem:[#allocation2 + $0x8] sm:$0x7] %v59_v48  ;;  %87 = vst [vmem:[#allocation2 + $0x8] sm:$0x38] %v81_v49  ;;  %784 = vrot.lane.b32.xlu0 %v16648_v11, %s16526_s29  ;;  %191 = vrot.lane.b32.xlu1 %v16866_v45, %s16522_s25 }
  0x7e   :  { %v96_v51 = vpop.permute.xlu0 %95  ;;  %v16881_v52 = vpop.permute.xlu1 %97 }
  0x7f   :  { %v103_v53 = vsel %vm101_vm2, %v96_v51, %v16881_v52 }
  0x80   :  { %109 = vst [vmem:[#allocation2 + $0x38] ss:$-44 sps:$4 sm:$0xc1] %v103_v53   ;;  %213 = vrot.lane.b32.xlu0 %v16879_v50, %s16523_s26  ;;  %231 = vrot.lane.b32.xlu1 %v16755_v28, %s16524_s27 }
  0x82   :  { %v121_v54 = vpop.permute.xlu0 %120  ;;  %v16889_v55 = vpop.permute.xlu1 %122 }
  0x83   :  { %v128_v56 = vsel %vm126_vm3, %v121_v54, %v16889_v55 }
  0x84   :  { %134 = vst [vmem:[#allocation2 + $0x38] sm:$0xe] %v128_v56  ;;  %249 = vrot.lane.b32.xlu0 %v16762_v29, %s16525_s28  ;;  %267 = vrot.lane.b32.xlu1 %v16769_v30, %s16526_s29 }
  0x86   :  { %v141_v57 = vpop.permute.xlu0 %140  ;;  %v16897_v58 = vpop.permute.xlu1 %142 }
  0x87   :  { %v148_v59 = vsel %vm146_vm4, %v141_v57, %v16897_v58  ;;  %v1080_v60 = vld [vmem:[#allocation2 + $0x8] sm:$0xff] }
  0x88   :  { %154 = vst [vmem:[#allocation2 + $0x38] sm:$0x70] %v148_v59  ;;  %284 = vrot.lane.b32.xlu0 %v16661_v12, %s16527_s30  ;;  %286 = vrot.lane.b32.xlu1 %v16664_v13, %s16527_s30  ;;  %v1266_v61 = vand.u32 4294901760, %v1080_v60 }
  0x8a   :  { %v163_v62 = vpop.permute.xlu0 %162  ;;  %v16905_v63 = vpop.permute.xlu1 %164  ;;  %v16907_v5 = vsub.f32 %v1080_v60, %v1266_v61 }
  0x8b   :  { %v170_v10 = vsel %vm168_vm5, %v163_v62, %v16905_v63 }
  0x8c   :  { %23111 = vst [vmem:[#allocation6_spill] sm:$0xff] %v16907_v5  ;;  %176 = vst [vmem:[#allocation2 + $0x68] ss:$-44 sps:$4 sm:$0x83] %v170_v10   ;;  %302 = vrot.lane.b32.xlu0 %v16607_v1, %s16528_s11  ;;  %304 = vrot.lane.b32.xlu1 %v16672_v14, %s16528_s11 }
  0x8e   :  { %v50_v17 = vpop.permute.xlu0 %49  ;;  %v72_v21 = vpop.permute.xlu1 %71 }
  0x8f   :  { %v58_v48 = vsel %vm57_vm0, %v50_v17, %v52_v44  ;;  %v80_v49 = vsel %vm79_vm1, %v72_v21, %v74_v47  ;;  %v1487_v47 = vand.u32 4294901760, %v16907_v5 }
  0x90   :  { %64 = vst [vmem:[#allocation2] sm:$0x7] %v58_v48  ;;  %86 = vst [vmem:[#allocation2] sm:$0x38] %v80_v49  ;;  %320 = vrot.lane.b32.xlu0 %v16679_v15, %s16520_s23  ;;  %322 = vrot.lane.b32.xlu1 %v16682_v16, %s16520_s23 }
  0x92   :  { %v94_v53 = vpop.permute.xlu0 %93  ;;  %v119_v56 = vpop.permute.xlu1 %118 }
  0x93   :  { %v102_v59 = vsel %vm101_vm2, %v94_v53, %v96_v51  ;;  %v127_v60 = vsel %vm126_vm3, %v119_v56, %v121_v54  ;;  %v1086_v10 = vld [vmem:[#allocation2 + $0x38] sm:$0xff]  ;;  %v1488_v53 = vsub.f32 %v16907_v5, %v1487_v47 }
  0x94   :  { %108 = vst [vmem:[#allocation2 + $0x30] ss:$-44 sps:$4 sm:$0xc1] %v102_v59   ;;  %133 = vst [vmem:[#allocation2 + $0x30] sm:$0xe] %v127_v60  ;;  %340 = vrot.lane.b32.xlu0 %v16786_v33, %s16529_s12  ;;  %342 = vrot.lane.b32.xlu1 %v16789_v34, %s16529_s12  ;;  %v1270_v44 = vand.u32 4294901760, %v1086_v10 }
  0x96   :  { %v139_v17 = vpop.permute.xlu0 %138  ;;  %v161_v21 = vpop.permute.xlu1 %160  ;;  %v16928_v48 = vpack.c.bf16 %v1270_v44, %v1266_v61  ;;  %v16930_v51 = vsub.f32 %v1086_v10, %v1270_v44 }
  0x97   :  { %v147_v54 = vsel %vm146_vm4, %v139_v17, %v141_v57  ;;  %v169_v49 = vsel %vm168_vm5, %v161_v21, %v163_v62  ;;  %v1489_v21 = vand.u32 4294901760, %v1488_v53 }
  0x98   :  { %23112 = vst [vmem:[#allocation7_spill] sm:$0xff] %v16928_v48  ;;  %23113 = vst [vmem:[#allocation8_spill] sm:$0xff] %v16930_v51  ;;  %360 = vrot.lane.b32.xlu0 %v16799_v36, %s16530_s13  ;;  %362 = vrot.lane.b32.xlu1 %v16879_v50, %s16530_s13  ;;  %v1499_v61 = vand.u32 4294901760, %v16930_v51 }
  0x99   :  { %153 = vst [vmem:[#allocation2 + $0x30] sm:$0x70] %v147_v54  ;;  %175 = vst [vmem:[#allocation2 + $0x60] ss:$-44 sps:$4 sm:$0x83] %v169_v49   ;;  %14269 = vmatprep.subr.bf16.mxu0 %v16928_v48 }
  0x9a   :  { %v581_v57 = vpop.permute.xlu0 %580  ;;  %v16943_v62 = vpop.permute.xlu1 %582  ;;  %v1500_v59 = vsub.f32 %v16930_v51, %v1499_v61  ;;  %v16946_v60 = vpack.c.bf16 %v1499_v61, %v1487_v47 }
  0x9b   :  { %23114 = vst [vmem:[#allocation9_spill] sm:$0xff] %v16943_v62  ;;  %v588_v10 = vsel %vm57_vm0, %v581_v57, %v16943_v62  ;;  %v1079_v44 = vld [vmem:[#allocation2] sm:$0xff] }
  0x9c   :  { %23115 = vst [vmem:[#allocation10_spill] sm:$0xff] %v16946_v60  ;;  %594 = vst [vmem:[#allocation2 + $0x18] sm:$0x7] %v588_v10  ;;  %282 = vrot.lane.b32.xlu0 %v16695_v18, %s16527_s30  ;;  %300 = vrot.lane.b32.xlu1 %v16703_v19, %s16528_s11  ;;  %v1268_v17 = vand.u32 4294901760, %v1079_v44  ;;  %v1501_v54 = vand.u32 4294901760, %v1500_v59 }
  0x9e   :  { %v602_v49 = vpop.permute.xlu0 %601  ;;  %v16954_v56 = vpop.permute.xlu1 %603  ;;  %v16956_v41 = vsub.f32 %v1079_v44, %v1268_v17  ;;  %v16958_v47 = vpack.c.bf16 %v1501_v54, %v1489_v21 }
  0x9f   :  { %23116 = vst [vmem:[#allocation11_spill] sm:$0xff] %v16954_v56  ;;  %v609_v61 = vsel %vm79_vm1, %v602_v49, %v16954_v56 }
  0xa0   :  { %23117 = vst [vmem:[#allocation12_spill] sm:$0xff] %v16956_v41  ;;  %v1085_v57 = vld [vmem:[#allocation2 + $0x30] sm:$0xff]  ;;  %615 = vst [vmem:[#allocation2 + $0x18] sm:$0x38] %v609_v61  ;;  %318 = vrot.lane.b32.xlu0 %v16706_v20, %s16520_s23  ;;  %338 = vrot.lane.b32.xlu1 %v16818_v37, %s16529_s12  ;;  %v1493_v59 = vand.u32 4294901760, %v16956_v41 }
  0xa1   :  { %v1272_v53 = vand.u32 4294901760, %v1085_v57 }
  0xa2   :  { %v623_v10 = vpop.permute.xlu0 %622  ;;  %v16967_v38 = vpop.permute.xlu1 %624  ;;  %v1494_v49 = vsub.f32 %v16956_v41, %v1493_v59 }
  0xa3   :  { %23118 = vst [vmem:[#allocation13_spill] sm:$0xff] %v16967_v38  ;;  %v16969_v44 = vpack.c.bf16 %v1272_v53, %v1268_v17  ;;  %v16971_v21 = vsub.f32 %v1085_v57, %v1272_v53  ;;  %v630_v54 = vsel %vm101_vm2, %v623_v10, %v16967_v38 }
  0xa4   :  { %636 = vst [vmem:[#allocation2 + $0x48] ss:$-44 sps:$4 sm:$0xc1] %v630_v54   ;;  %358 = vrot.lane.b32.xlu0 %v16796_v35, %s16530_s13  ;;  %802 = vrot.lane.b32.xlu1 %v16730_v23, %s16527_s30  ;;  %v1495_v17 = vand.u32 4294901760, %v1494_v49 }
  0xa5   :  { %23119 = vst [vmem:[#allocation14_spill] sm:$0xff] %v16969_v44  ;;  %23120 = vst [vmem:[#allocation15_spill] sm:$0xff] %v16971_v21  ;;  %v1505_v61 = vand.u32 4294901760, %v16971_v21  ;;  %14271 = vmatpush1.bf16.msra.mxu0 %v16969_v44 }
  0xa6   :  { %v647_v57 = vpop.permute.xlu0 %646  ;;  %v16984_v53 = vpop.permute.xlu1 %648 }
  0xa7   :  { %23121 = vst [vmem:[#allocation16_spill] sm:$0xff] %v16984_v53  ;;  %v1506_v10 = vsub.f32 %v16971_v21, %v1505_v61  ;;  %v16987_v54 = vpack.c.bf16 %v1505_v61, %v1493_v59  ;;  %v654_v38 = vsel %vm126_vm3, %v647_v57, %v16984_v53 }
  0xa8   :  { %660 = vst [vmem:[#allocation2 + $0x48] sm:$0xe] %v654_v38  ;;  %804 = vrot.lane.b32.xlu0 %v16733_v24, %s16527_s30  ;;  %819 = vrot.lane.b32.xlu1 %v16741_v25, %s16528_s11 }
  0xa9   :  { %23122 = vst [vmem:[#allocation17_spill] sm:$0xff] %v16987_v54  ;;  %v1507_v56 = vand.u32 4294901760, %v1506_v10 }
  0xaa   :  { %v666_v62 = vpop.permute.xlu0 %665  ;;  %v16995_v60 = vpop.permute.xlu1 %667 }
  0xab   :  { %23123 = vst [vmem:[#allocation18_spill] sm:$0xff] %v16995_v60  ;;  %v16997_v44 = vpack.c.bf16 %v1507_v56, %v1495_v17  ;;  %v673_v59 = vsel %vm146_vm4, %v666_v62, %v16995_v60  ;;  %v1082_v61 = vld [vmem:[#allocation2 + $0x18] sm:$0xff] }
  0xac   :  { %679 = vst [vmem:[#allocation2 + $0x48] sm:$0x70] %v673_v59  ;;  %821 = vrot.lane.b32.xlu0 %v16636_v8, %s16528_s11  ;;  %836 = vrot.lane.b32.xlu1 %v16748_v26, %s16520_s23  ;;  %v2530_v38 = vand.u32 4294901760, %v1082_v61  ;;  %v17010_v56 = vld [vmem:[%s22465_s0 + $0x1c] sm:$0x77] }
  0xad   :  { %v17017_v10 = vrot.slane %v17010_v56, 2 }
  0xae   :  { %v687_v57 = vpop.permute.xlu0 %686  ;;  %v17005_v49 = vpop.permute.xlu1 %688  ;;  %v17012_v17 = vsub.f32 %v1082_v61, %v2530_v38 }
  0xaf   :  { %23124 = vst [vmem:[#allocation19_spill] sm:$0xff] %v17005_v49  ;;  %v694_v62 = vsel %vm168_vm5, %v687_v57, %v17005_v49  ;;  %23126 = vst [vmem:[#allocation21_spill] sm:$0xff] %v17017_v10 }
  0xb0   :  { %23125 = vst [vmem:[#allocation20_spill] sm:$0xff] %v17012_v17  ;;  %700 = vst [vmem:[#allocation2 + $0x78] ss:$-44 sps:$4 sm:$0x83] %v694_v62   ;;  %838 = vrot.lane.b32.xlu0 %v16751_v27, %s16520_s23  ;;  %856 = vrot.lane.b32.xlu1 %v16832_v39, %s16529_s12  ;;  %v17033_v62 = vrot.slane %v17010_v56, 3 }
  0xb1   :  { %932 = vst [vmem:[#allocation2 + $0x178] ss:$-44 sps:$4 sm:$0xc1] %v17017_v10  }
  0xb2   :  { %v56_v59 = vpop.permute.xlu0 %55  ;;  %v78_v60 = vpop.permute.xlu1 %77  ;;  %23127 = vst [vmem:[#allocation22_spill] sm:$0xff] %v17033_v62 }
  0xb3   :  { %v60_v61 = vsel %vm57_vm0, %v16868_v46, %v56_v59  ;;  %v82_v57 = vsel %vm79_vm1, %v16859_v43, %v78_v60  ;;  %v2751_v59 = vand.u32 4294901760, %v17012_v17 }
  0xb4   :  { %66 = vst [vmem:[#allocation2 + $0x10] sm:$0x7] %v60_v61  ;;  %88 = vst [vmem:[#allocation2 + $0x10] sm:$0x38] %v82_v57  ;;  %858 = vrot.lane.b32.xlu0 %v16839_v40, %s16529_s12  ;;  %875 = vrot.lane.b32.xlu1 %v16848_v42, %s16530_s13  ;;  %v17047_v61 = vld [vmem:[%s22465_s0 + $0x10] sm:$0x7] }
  0xb6   :  { %v100_v49 = vpop.permute.xlu0 %99  ;;  %v125_v53 = vpop.permute.xlu1 %124 }
  0xb7   :  { %v104_v54 = vsel %vm101_vm2, %v16881_v52, %v100_v49  ;;  %v129_v46 = vsel %vm126_vm3, %v16889_v55, %v125_v53  ;;  %v1088_v43 = vld [vmem:[#allocation2 + $0x48] sm:$0xff] }
  0xb8   :  { %110 = vst [vmem:[#allocation2 + $0x40] ss:$-44 sps:$4 sm:$0xc1] %v104_v54   ;;  %135 = vst [vmem:[#allocation2 + $0x40] sm:$0xe] %v129_v46  ;;  %877 = vrot.lane.b32.xlu0 %v17033_v62, %s16530_s13  ;;  %288 = vrot.lane.b32.xlu1 %v16772_v31, %s16527_s30  ;;  %v2534_v60 = vand.u32 4294901760, %v1088_v43  ;;  %v2752_v46 = vsub.f32 %v17012_v17, %v2751_v59 }
  0xba   :  { %v145_v52 = vpop.permute.xlu0 %144  ;;  %v167_v49 = vpop.permute.xlu1 %166  ;;  %v17049_v55 = vpack.c.bf16 %v2534_v60, %v2530_v38  ;;  %v17051_v53 = vsub.f32 %v1088_v43, %v2534_v60  ;;  %v357_v38 = vrot.slane %v17047_v61, 3  ;;  %v2753_v62 = vand.u32 4294901760, %v2752_v46 }
  0xbb   :  { %v149_v54 = vsel %vm146_vm4, %v16897_v58, %v145_v52  ;;  %v171_v57 = vsel %vm168_vm5, %v16905_v63, %v167_v49 }
  0xbc   :  { %23128 = vst [vmem:[#allocation23_spill] sm:$0xff] %v17049_v55  ;;  %23129 = vst [vmem:[#allocation24_spill] sm:$0xff] %v17051_v53  ;;  %306 = vrot.lane.b32.xlu0 %v16602_v0, %s16528_s11  ;;  %324 = vrot.lane.b32.xlu1 %v16779_v32, %s16520_s23  ;;  %v2763_v43 = vand.u32 4294901760, %v17051_v53 }
  0xbd   :  { %155 = vst [vmem:[#allocation2 + $0x40] sm:$0x70] %v149_v54  ;;  %177 = vst [vmem:[#allocation2 + $0x70] ss:$-44 sps:$4 sm:$0x83] %v171_v57   ;;  %14389 = vmatprep.subr.bf16.mxu1 %v17049_v55 }
  0xbe   :  { %v17067_v63 = vpop.permute.xlu0 %187  ;;  %v17069_v60 = vpop.permute.xlu1 %189  ;;  %v2764_v52 = vsub.f32 %v17051_v53, %v2763_v43  ;;  %v17072_v49 = vpack.c.bf16 %v2763_v43, %v2751_v59 }
  0xbf   :  { %v195_v54 = vsel %vm193_vm6, %v17067_v63, %v17069_v60  ;;  %v1081_v57 = vld [vmem:[#allocation2 + $0x10] sm:$0xff] }
  0xc0   :  { %23130 = vst [vmem:[#allocation25_spill] sm:$0xff] %v17072_v49  ;;  %201 = vst [vmem:[#allocation2 + $0x68] sm:$0x1c] %v195_v54  ;;  %344 = vrot.lane.b32.xlu0 %v16866_v45, %s16529_s12  ;;  %364 = vrot.lane.b32.xlu1 %v357_v38, %s16530_s13  ;;  %v2532_v58 = vand.u32 4294901760, %v1081_v57  ;;  %v2765_v55 = vand.u32 4294901760, %v2764_v52 }
  0xc2   :  { %v210_v48 = vpop.permute.xlu0 %209  ;;  %v17080_v17 = vpop.permute.xlu1 %211  ;;  %v17082_v59 = vsub.f32 %v1081_v57, %v2532_v58  ;;  %v17084_v43 = vpack.c.bf16 %v2765_v55, %v2753_v62 }
  0xc3   :  { %v217_v49 = vsel %vm215_vm7, %v210_v48, %v17080_v17 }
  0xc4   :  { %23131 = vst [vmem:[#allocation26_spill] sm:$0xff] %v17082_v59  ;;  %23132 = vst [vmem:[#allocation27_spill] sm:$0xff] %v17084_v43  ;;  %v1087_v54 = vld [vmem:[#allocation2 + $0x40] sm:$0xff]  ;;  %378 = vrot.lane.b32.xlu0 %v16602_v0, %s16531_s20  ;;  %380 = vrot.lane.b32.xlu1 %v16755_v28, %s16531_s20  ;;  %v2757_v46 = vand.u32 4294901760, %v17082_v59 }
  0xc5   :  { %223 = vst [vmem:[#allocation2 + $0x68] sm:$0xe0] %v217_v49  ;;  %v2536_v38 = vand.u32 4294901760, %v1087_v54 }
  0xc6   :  { %v228_v52 = vpop.permute.xlu0 %227  ;;  %v17093_v57 = vpop.permute.xlu1 %229  ;;  %v2758_v53 = vsub.f32 %v17082_v59, %v2757_v46 }
  0xc7   :  { %v17095_v62 = vpack.c.bf16 %v2536_v38, %v2532_v58  ;;  %v17097_v55 = vsub.f32 %v1087_v54, %v2536_v38  ;;  %v235_v49 = vsel %vm233_vm8, %v228_v52, %v17093_v57 }
  0xc8   :  { %241 = vst [vmem:[#allocation2 + $0x98] sm:$0x7] %v235_v49  ;;  %397 = vrot.lane.b32.xlu0 %v16610_v2, %s22513_s14  ;;  %399 = vrot.lane.b32.xlu1 %v16762_v29, %s22513_s14 }
  0xc9   :  { %23133 = vst [vmem:[#allocation28_spill] sm:$0xff] %v17095_v62  ;;  %23134 = vst [vmem:[#allocation29_spill] sm:$0xff] %v17097_v55  ;;  %v2769_v41 = vand.u32 4294901760, %v17097_v55  ;;  %14391 = vmatpush1.bf16.msra.mxu1 %v17095_v62  ;;  %v2759_v62 = vand.u32 4294901760, %v2758_v53 }
  0xca   :  { %v246_v54 = vpop.permute.xlu0 %245  ;;  %v17110_v38 = vpop.permute.xlu1 %247 }
  0xcb   :  { %v2770_v49 = vsub.f32 %v17097_v55, %v2769_v41  ;;  %v17113_v21 = vpack.c.bf16 %v2769_v41, %v2757_v46  ;;  %v253_v43 = vsel %vm251_vm9, %v246_v54, %v17110_v38 }
  0xcc   :  { %v1092_v5 = vld [vmem:[#allocation2 + $0x68] sm:$0xff]  ;;  %259 = vst [vmem:[#allocation2 + $0x98] sm:$0x38] %v253_v43  ;;  %424 = vrot.lane.b32.xlu0 %v16661_v12, %s22511_s15  ;;  %426 = vrot.lane.b32.xlu1 %v16664_v13, %s22511_s15 }
  0xcd   :  { %23135 = vst [vmem:[#allocation30_spill] sm:$0xff] %v17113_v21  ;;  %v1274_v58 = vand.u32 4294901760, %v1092_v5  ;;  %v2771_v59 = vand.u32 4294901760, %v2770_v49 }
  0xce   :  { %v264_v51 = vpop.permute.xlu0 %263  ;;  %v17121_v55 = vpop.permute.xlu1 %265 }
  0xcf   :  { %v17123_v41 = vsub.f32 %v1092_v5, %v1274_v58  ;;  %v17125_v46 = vpack.c.bf16 %v2771_v59, %v2759_v62  ;;  %v271_v43 = vsel %vm269_vm10, %v264_v51, %v17121_v55 }
  0xd0   :  { %277 = vst [vmem:[#allocation2 + $0xc8] ss:$-44 sps:$4 sm:$0xc1] %v271_v43   ;;  %442 = vrot.lane.b32.xlu0 %v16607_v1, %s22509_s16  ;;  %444 = vrot.lane.b32.xlu1 %v16672_v14, %s22509_s16 }
  0xd2   :  { %v186_v12 = vpop.permute.xlu0 %185  ;;  %v208_v13 = vpop.permute.xlu1 %207 }
  0xd3   :  { %v194_v53 = vsel %vm193_vm6, %v186_v12, %v17067_v63  ;;  %v216_v5 = vsel %vm215_vm7, %v208_v13, %v210_v48 }
  0xd4   :  { %200 = vst [vmem:[#allocation2 + $0x60] sm:$0x1c] %v194_v53  ;;  %222 = vst [vmem:[#allocation2 + $0x60] sm:$0xe0] %v216_v5  ;;  %460 = vrot.lane.b32.xlu0 %v16679_v15, %s22507_s19  ;;  %462 = vrot.lane.b32.xlu1 %v16682_v16, %s22507_s19  ;;  %v1511_v15 = vand.u32 4294901760, %v17123_v41 }
  0xd6   :  { %v226_v59 = vpop.permute.xlu0 %225  ;;  %v244_v62 = vpop.permute.xlu1 %243  ;;  %v1512_v5 = vsub.f32 %v17123_v41, %v1511_v15 }
  0xd7   :  { %v234_v14 = vsel %vm233_vm8, %v226_v59, %v228_v52  ;;  %v252_v49 = vsel %vm251_vm9, %v244_v62, %v246_v54  ;;  %v1098_v43 = vld [vmem:[#allocation2 + $0x98] sm:$0xff] }
  0xd8   :  { %240 = vst [vmem:[#allocation2 + $0x90] sm:$0x7] %v234_v14  ;;  %258 = vst [vmem:[#allocation2 + $0x90] sm:$0x38] %v252_v49  ;;  %376 = vrot.lane.b32.xlu0 %v16614_v3, %s16531_s20  ;;  %395 = vrot.lane.b32.xlu1 %v16627_v6, %s22513_s14  ;;  %v1278_v48 = vand.u32 4294901760, %v1098_v43 }
  0xda   :  { %v262_v63 = vpop.permute.xlu0 %261  ;;  %v711_v16 = vpop.permute.xlu1 %710  ;;  %v17147_v12 = vpack.c.bf16 %v1278_v48, %v1274_v58  ;;  %v17149_v13 = vsub.f32 %v1098_v43, %v1278_v48  ;;  %v1513_v43 = vand.u32 4294901760, %v1512_v5 }
  0xdb   :  { %v270_v52 = vsel %vm269_vm10, %v262_v63, %v264_v51  ;;  %v1091_v54 = vld [vmem:[#allocation2 + $0x60] sm:$0xff] }
  0xdc   :  { %23136 = vst [vmem:[#allocation31_spill] sm:$0xff] %v17147_v12  ;;  %276 = vst [vmem:[#allocation2 + $0xc0] ss:$-44 sps:$4 sm:$0xc1] %v270_v52   ;;  %422 = vrot.lane.b32.xlu0 %v16695_v18, %s22511_s15  ;;  %440 = vrot.lane.b32.xlu1 %v16703_v19, %s22509_s16  ;;  %v1276_v53 = vand.u32 4294901760, %v1091_v54  ;;  %v1523_v59 = vand.u32 4294901760, %v17149_v13 }
  0xdd   :  { %14273 = vmatprep.subr.bf16.mxu0 %v17147_v12 }
  0xde   :  { %v17161_v62 = vpop.permute.xlu0 %712  ;;  %v732_v51 = vpop.permute.xlu1 %731  ;;  %v17163_v14 = vsub.f32 %v1091_v54, %v1276_v53  ;;  %v1524_v18 = vsub.f32 %v17149_v13, %v1523_v59  ;;  %v17166_v49 = vpack.c.bf16 %v1523_v59, %v1511_v15 }
  0xdf   :  { %23137 = vst [vmem:[#allocation32_spill] sm:$0xff] %v17161_v62  ;;  %v718_v19 = vsel %vm193_vm6, %v711_v16, %v17161_v62 }
  0xe0   :  { %23138 = vst [vmem:[#allocation33_spill] sm:$0xff] %v17166_v49  ;;  %724 = vst [vmem:[#allocation2 + $0x78] sm:$0x1c] %v718_v19  ;;  %458 = vrot.lane.b32.xlu0 %v16706_v20, %s22507_s19  ;;  %892 = vrot.lane.b32.xlu1 %v16641_v9, %s16531_s20  ;;  %v1525_v48 = vand.u32 4294901760, %v1524_v18  ;;  %v17185_v20 = vrot.slane %v17010_v56, 5  ;;  %v1517_v5 = vand.u32 4294901760, %v17163_v14 }
  0xe2   :  { %v17174_v63 = vpop.permute.xlu0 %733  ;;  %v749_v52 = vpop.permute.xlu1 %748  ;;  %v17176_v54 = vpack.c.bf16 %v1525_v48, %v1513_v43  ;;  %23140 = vst [vmem:[#allocation35_spill] sm:$0xff] %v17185_v20 }
  0xe3   :  { %23139 = vst [vmem:[#allocation34_spill] sm:$0xff] %v17174_v63  ;;  %v739_v15 = vsel %vm215_vm7, %v732_v51, %v17174_v63  ;;  %v1097_v59 = vld [vmem:[#allocation2 + $0x90] sm:$0xff] }
  0xe4   :  { %745 = vst [vmem:[#allocation2 + $0x78] sm:$0xe0] %v739_v15  ;;  %894 = vrot.lane.b32.xlu0 %v17010_v56, %s16531_s20  ;;  %910 = vrot.lane.b32.xlu1 %v16718_v22, %s22513_s14  ;;  %v1280_v16 = vand.u32 4294901760, %v1097_v59  ;;  %v1518_v15 = vsub.f32 %v17163_v14, %v1517_v5 }
  0xe6   :  { %v17188_v18 = vpop.permute.xlu0 %750  ;;  %v766_v19 = vpop.permute.xlu1 %765  ;;  %v17190_v43 = vpack.c.bf16 %v1280_v16, %v1276_v53  ;;  %v17192_v51 = vsub.f32 %v1097_v59, %v1280_v16  ;;  %v1519_v63 = vand.u32 4294901760, %v1518_v15 }
  0xe7   :  { %23141 = vst [vmem:[#allocation36_spill] sm:$0xff] %v17188_v18  ;;  %v756_v48 = vsel %vm233_vm8, %v749_v52, %v17188_v18 }
  0xe8   :  { %23142 = vst [vmem:[#allocation37_spill] sm:$0xff] %v17190_v43  ;;  %762 = vst [vmem:[#allocation2 + $0xa8] sm:$0x7] %v756_v48  ;;  %912 = vrot.lane.b32.xlu0 %v17185_v20, %s22513_s14  ;;  %936 = vrot.lane.b32.xlu1 %v16730_v23, %s22511_s15  ;;  %v1529_v58 = vand.u32 4294901760, %v17192_v51 }
  0xe9   :  { %14275 = vmatpush1.bf16.msra.mxu0 %v17190_v43 }
  0xea   :  { %v17205_v59 = vpop.permute.xlu0 %767  ;;  %v783_v16 = vpop.permute.xlu1 %782  ;;  %v1530_v52 = vsub.f32 %v17192_v51, %v1529_v58  ;;  %v17208_v48 = vpack.c.bf16 %v1529_v58, %v1517_v5 }
  0xeb   :  { %23143 = vst [vmem:[#allocation38_spill] sm:$0xff] %v17205_v59  ;;  %v773_v18 = vsel %vm251_vm9, %v766_v19, %v17205_v59  ;;  %v1094_v23 = vld [vmem:[#allocation2 + $0x78] sm:$0xff] }
  0xec   :  { %23144 = vst [vmem:[#allocation39_spill] sm:$0xff] %v17208_v48  ;;  %779 = vst [vmem:[#allocation2 + $0xa8] sm:$0x38] %v773_v18  ;;  %938 = vrot.lane.b32.xlu0 %v16733_v24, %s22511_s15  ;;  %953 = vrot.lane.b32.xlu1 %v16741_v25, %s22509_s16  ;;  %v2538_v53 = vand.u32 4294901760, %v1094_v23  ;;  %v1531_v62 = vand.u32 4294901760, %v1530_v52 }
  0xee   :  { %v17216_v21 = vpop.permute.xlu0 %784  ;;  %v192_v49 = vpop.permute.xlu1 %191  ;;  %v17218_v43 = vsub.f32 %v1094_v23, %v2538_v53  ;;  %v17220_v58 = vpack.c.bf16 %v1531_v62, %v1519_v63 }
  0xef   :  { %23145 = vst [vmem:[#allocation40_spill] sm:$0xff] %v17216_v21  ;;  %v790_v5 = vsel %vm269_vm10, %v783_v16, %v17216_v21  ;;  %v196_v18 = vsel %vm193_vm6, %v17069_v60, %v192_v49  ;;  %v22517_v60 = vrot.slane %v17047_v61, 5 }
  0xf0   :  { %23146 = vst [vmem:[#allocation41_spill] sm:$0xff] %v17218_v43  ;;  %796 = vst [vmem:[#allocation2 + $0xd8] ss:$-44 sps:$4 sm:$0xc1] %v790_v5   ;;  %955 = vrot.lane.b32.xlu0 %v16636_v8, %s22509_s16  ;;  %970 = vrot.lane.b32.xlu1 %v16748_v26, %s22507_s19 }
  0xf1   :  { %202 = vst [vmem:[#allocation2 + $0x70] sm:$0x1c] %v196_v18 }
  0xf2   :  { %v214_v24 = vpop.permute.xlu0 %213  ;;  %v232_v25 = vpop.permute.xlu1 %231 }
  0xf3   :  { %v218_v62 = vsel %vm215_vm7, %v17080_v17, %v214_v24  ;;  %v236_v63 = vsel %vm233_vm8, %v17093_v57, %v232_v25  ;;  %v2775_v57 = vand.u32 4294901760, %v17218_v43 }
  0xf4   :  { %224 = vst [vmem:[#allocation2 + $0x70] sm:$0xe0] %v218_v62  ;;  %242 = vst [vmem:[#allocation2 + $0xa0] sm:$0x7] %v236_v63  ;;  %972 = vrot.lane.b32.xlu0 %v16751_v27, %s22507_s19  ;;  %382 = vrot.lane.b32.xlu1 %v17047_v61, %s16531_s20 }
  0xf5   :  { %v2776_v18 = vsub.f32 %v17218_v43, %v2775_v57 }
  0xf6   :  { %v250_v49 = vpop.permute.xlu0 %249  ;;  %v268_v26 = vpop.permute.xlu1 %267 }
  0xf7   :  { %v254_v19 = vsel %vm251_vm9, %v17110_v38, %v250_v49  ;;  %v272_v17 = vsel %vm269_vm10, %v17121_v55, %v268_v26  ;;  %v1100_v15 = vld [vmem:[#allocation2 + $0xa8] sm:$0xff] }
  0xf8   :  { %260 = vst [vmem:[#allocation2 + $0xa0] sm:$0x38] %v254_v19  ;;  %278 = vst [vmem:[#allocation2 + $0xd0] ss:$-44 sps:$4 sm:$0xc1] %v272_v17   ;;  %401 = vrot.lane.b32.xlu0 %v22517_v60, %s22513_s14  ;;  %428 = vrot.lane.b32.xlu1 %v16772_v31, %s22511_s15  ;;  %v2542_v27 = vand.u32 4294901760, %v1100_v15 }
  0xf9   :  { %v2777_v17 = vand.u32 4294901760, %v2776_v18  ;;  %s22565_s14 = smov 64   ;;  %s22558_s15 = smov 60  }
  0xfa   :  { %v17249_v16 = vpop.permute.xlu0 %284  ;;  %v17251_v38 = vpop.permute.xlu1 %286  ;;  %v17253_v52 = vpack.c.bf16 %v2542_v27, %v2538_v53  ;;  %v17255_v55 = vsub.f32 %v1100_v15, %v2542_v27 }
  0xfb   :  { %v292_v23 = vsel %vm22523_vm11, %v17249_v16, %v17251_v38  ;;  %v1093_v5 = vld [vmem:[#allocation2 + $0x70] sm:$0xff] }
  0xfc   :  { %23147 = vst [vmem:[#allocation42_spill] sm:$0xff] %v17253_v52  ;;  %23148 = vst [vmem:[#allocation43_spill] sm:$0xff] %v17255_v55  ;;  %446 = vrot.lane.b32.xlu0 %v16602_v0, %s22509_s16  ;;  %464 = vrot.lane.b32.xlu1 %v16779_v32, %s22507_s19  ;;  %v2540_v31 = vand.u32 4294901760, %v1093_v5  ;;  %v2787_v53 = vand.u32 4294901760, %v17255_v55  ;;  %s22576_s19 = smov 24   ;;  %s22556_s16 = smov 56  }
  0xfd   :  { %298 = vst [vmem:[#allocation2 + $0xc8] sm:$0xe] %v292_v23  ;;  %14393 = vmatprep.subr.bf16.mxu1 %v17253_v52 }
  0xfe   :  { %v17269_v25 = vpop.permute.xlu0 %302  ;;  %v17271_v62 = vpop.permute.xlu1 %304  ;;  %v17273_v63 = vsub.f32 %v1093_v5, %v2540_v31  ;;  %v2788_v0 = vsub.f32 %v17255_v55, %v2787_v53  ;;  %v17276_v49 = vpack.c.bf16 %v2787_v53, %v2775_v57 }
  0xff   :  { %v310_v32 = vsel %vm22522_vm12, %v17269_v25, %v17271_v62  ;;  %v1099_v26 = vld [vmem:[#allocation2 + $0xa0] sm:$0xff] }
 0x100   :  { %23149 = vst [vmem:[#allocation44_spill] sm:$0xff] %v17273_v63  ;;  %23150 = vst [vmem:[#allocation45_spill] sm:$0xff] %v17276_v49  ;;  %481 = vrot.lane.b32.xlu0 %v16786_v33, %s16520_s23  ;;  %483 = vrot.lane.b32.xlu1 %v16789_v34, %s16520_s23  ;;  %v2544_v19 = vand.u32 4294901760, %v1099_v26  ;;  %v2789_v15 = vand.u32 4294901760, %v2788_v0  ;;  %v2781_v27 = vand.u32 4294901760, %v17273_v63  ;;  %v22515_v0 = vmov 0.0  }
 0x101   :  { %316 = vst [vmem:[#allocation2 + $0xc8] sm:$0x70] %v310_v32  ;;  %37 = vst [vmem:[#allocation2 + $0x1e8] sm:$0xfe] %v22515_v0  ;;  %1352 = vmatprep.mubr.f32.mxu0 %v22515_v0  ;;  %2616 = vmatprep.mubr.f32.mxu1 %v22515_v0 }
 0x102   :  { %v321_v23 = vpop.permute.xlu0 %320  ;;  %v17286_v57 = vpop.permute.xlu1 %322  ;;  %v17288_v5 = vpack.c.bf16 %v2544_v19, %v2540_v31  ;;  %v17290_v53 = vsub.f32 %v1099_v26, %v2544_v19  ;;  %v17292_v24 = vpack.c.bf16 %v2789_v15, %v2777_v17  ;;  %v2782_v34 = vsub.f32 %v17273_v63, %v2781_v27  ;;  %36 = vst [vmem:[#allocation2 + $0x1e0] sm:$0xfe] %v22515_v0  ;;  %v16490_v17 = vld [vmem:[%s22465_s0 + $0x8] sm:$0x77] }
 0x103   :  { %v327_v33 = vsel %vm146_vm4, %v321_v23, %v17286_v57  ;;  %38 = vst [vmem:[#allocation2 + $0x1f0] sm:$0xfe] %v22515_v0  ;;  %39 = vst [vmem:[#allocation2 + $0x1f8] sm:$0xfe] %v22515_v0 }
 0x104   :  { %23151 = vst [vmem:[#allocation46_spill] sm:$0xff] %v17288_v5  ;;  %23152 = vst [vmem:[#allocation47_spill] sm:$0xff] %v17290_v53  ;;  %498 = vrot.lane.b32.xlu0 %v16796_v35, %s22576_s19  ;;  %500 = vrot.lane.b32.xlu1 %v16799_v36, %s22576_s19  ;;  %v2793_v31 = vand.u32 4294901760, %v17290_v53  ;;  %v2783_v15 = vand.u32 4294901760, %v2782_v34 }
 0x105   :  { %333 = vst [vmem:[#allocation2 + $0xf8] ss:$-44 sps:$4 sm:$0x83] %v327_v33   ;;  %14395 = vmatpush1.bf16.msra.mxu1 %v17288_v5  ;;  %40 = vst [vmem:[#allocation2 + $0x200] sm:$0xfe] %v22515_v0 }
 0x106   :  { %41 = vst [vmem:[#allocation2 + $0x208] sm:$0xfe] %v22515_v0  ;;  %v341_v35 = vpop.permute.xlu0 %340  ;;  %v17312_v36 = vpop.permute.xlu1 %342  ;;  %v2794_v32 = vsub.f32 %v17290_v53, %v2793_v31  ;;  %v17316_v26 = vpack.c.bf16 %v2793_v31, %v2781_v27 }
 0x107   :  { %v348_v19 = vsel %vm22519_vm13, %v341_v35, %v17312_v36 }
 0x108   :  { %23153 = vst [vmem:[#allocation48_spill] sm:$0xff] %v17316_v26  ;;  %354 = vst [vmem:[#allocation2 + $0xf8] sm:$0x1c] %v348_v19  ;;  %516 = vrot.lane.b32.xlu0 %v16490_v17, %s22565_s14  ;;  %518 = vrot.lane.b32.xlu1 %v16755_v28, %s22565_s14  ;;  %v2795_v33 = vand.u32 4294901760, %v2794_v32 }
 0x10a   :  { %v361_v18 = vpop.permute.xlu0 %360  ;;  %v17326_v27 = vpop.permute.xlu1 %362  ;;  %v17328_v31 = vpack.c.bf16 %v2795_v33, %v2783_v15 }
 0x10b   :  { %v368_v19 = vsel %vm22518_vm14, %v361_v18, %v17326_v27 }
 0x10c   :  { %v1104_v0 = vld [vmem:[#allocation2 + $0xc8] sm:$0xff]  ;;  %374 = vst [vmem:[#allocation2 + $0xf8] sm:$0xe0] %v368_v19  ;;  %534 = vrot.lane.b32.xlu0 %v16610_v2, %s22558_s15  ;;  %536 = vrot.lane.b32.xlu1 %v16762_v29, %s22558_s15 }
 0x10d   :  { %v1282_v28 = vand.u32 4294901760, %v1104_v0 }
 0x10e   :  { %v283_v34 = vpop.permute.xlu0 %282  ;;  %v301_v32 = vpop.permute.xlu1 %300 }
 0x10f   :  { %v17336_v17 = vsub.f32 %v1104_v0, %v1282_v28  ;;  %v291_v15 = vsel %vm22523_vm11, %v283_v34, %v17249_v16  ;;  %v309_v33 = vsel %vm22522_vm12, %v301_v32, %v17269_v25  ;;  %v23154_v16 = vrot.slane %v16607_v1, 3 }
 0x110   :  { %297 = vst [vmem:[#allocation2 + $0xc0] sm:$0xe] %v291_v15  ;;  %315 = vst [vmem:[#allocation2 + $0xc0] sm:$0x70] %v309_v33  ;;  %553 = vrot.lane.b32.xlu0 %v16617_v4, %s22556_s16  ;;  %555 = vrot.lane.b32.xlu1 %v16769_v30, %s22556_s16 }
 0x111   :  { %v1535_v25 = vand.u32 4294901760, %v17336_v17 }
 0x112   :  { %v319_v2 = vpop.permute.xlu0 %318  ;;  %v339_v29 = vpop.permute.xlu1 %338 }
 0x113   :  { %v326_v0 = vsel %vm146_vm4, %v319_v2, %v321_v23  ;;  %v347_v19 = vsel %vm22519_vm13, %v339_v29, %v341_v35  ;;  %v1110_v60 = vld [vmem:[#allocation2 + $0xf8] sm:$0xff]  ;;  %v1536_v1 = vsub.f32 %v17336_v17, %v1535_v25 }
 0x114   :  { %332 = vst [vmem:[#allocation2 + $0xf0] ss:$-44 sps:$4 sm:$0x83] %v326_v0   ;;  %353 = vst [vmem:[#allocation2 + $0xf0] sm:$0x1c] %v347_v19  ;;  %479 = vrot.lane.b32.xlu0 %v16818_v37, %s16520_s23  ;;  %496 = vrot.lane.b32.xlu1 %v23154_v16, %s22576_s19  ;;  %v1286_v4 = vand.u32 4294901760, %v1110_v60 }
 0x115   :  { %v1537_v29 = vand.u32 4294901760, %v1536_v1 }
 0x116   :  { %v359_v30 = vpop.permute.xlu0 %358  ;;  %v803_v34 = vpop.permute.xlu1 %802  ;;  %v17354_v32 = vpack.c.bf16 %v1286_v4, %v1282_v28  ;;  %v17356_v23 = vsub.f32 %v1110_v60, %v1286_v4 }
 0x117   :  { %v367_v35 = vsel %vm22518_vm14, %v359_v30, %v361_v18 }
 0x118   :  { %23155 = vst [vmem:[#allocation49_spill] sm:$0xff] %v17354_v32  ;;  %373 = vst [vmem:[#allocation2 + $0xf0] sm:$0xe0] %v367_v35  ;;  %514 = vrot.lane.b32.xlu0 %v16614_v3, %s22565_s14  ;;  %532 = vrot.lane.b32.xlu1 %v16627_v6, %s22558_s15  ;;  %v1547_v37 = vand.u32 4294901760, %v17356_v23 }
 0x119   :  { %14277 = vmatprep.subr.bf16.mxu0 %v17354_v32  ;;  %v1146_v32 = vld [vmem:[%s22467_s2 + $0x8] sm:$0xff] }
 0x11a   :  { %v17368_v60 = vpop.permute.xlu0 %804  ;;  %v820_v28 = vpop.permute.xlu1 %819  ;;  %v1548_v18 = vsub.f32 %v17356_v23, %v1547_v37  ;;  %v17371_v33 = vpack.c.bf16 %v1547_v37, %v1535_v25 }
 0x11b   :  { %23156 = vst [vmem:[#allocation50_spill] sm:$0xff] %v17368_v60  ;;  %v810_v3 = vsel %vm22523_vm11, %v803_v34, %v17368_v60  ;;  %v1103_v6 = vld [vmem:[#allocation2 + $0xc0] sm:$0xff] }
 0x11c   :  { %23157 = vst [vmem:[#allocation51_spill] sm:$0xff] %v17371_v33  ;;  %816 = vst [vmem:[#allocation2 + $0xd8] sm:$0xe] %v810_v3  ;;  %551 = vrot.lane.b32.xlu0 %v16630_v7, %s22556_s16  ;;  %990 = vrot.lane.b32.xlu1 %v16832_v39, %s16520_s23  ;;  %v1284_v2 = vand.u32 4294901760, %v1103_v6  ;;  %v1549_v0 = vand.u32 4294901760, %v1548_v18  ;;  %v23159_v7 = vrot.slane %v16636_v8, 3 }
 0x11e   :  { %v17379_v19 = vpop.permute.xlu0 %821  ;;  %v837_v16 = vpop.permute.xlu1 %836  ;;  %v17381_v4 = vsub.f32 %v1103_v6, %v1284_v2  ;;  %v17383_v25 = vpack.c.bf16 %v1549_v0, %v1537_v29 }
 0x11f   :  { %23158 = vst [vmem:[#allocation52_spill] sm:$0xff] %v17379_v19  ;;  %v827_v30 = vsel %vm22522_vm12, %v820_v28, %v17379_v19  ;;  %v1109_v34 = vld [vmem:[#allocation2 + $0xf0] sm:$0xff] }
 0x120   :  { %833 = vst [vmem:[#allocation2 + $0xd8] sm:$0x70] %v827_v30  ;;  %992 = vrot.lane.b32.xlu0 %v16839_v40, %s16520_s23  ;;  %1007 = vrot.lane.b32.xlu1 %v23159_v7, %s22576_s19  ;;  %v1288_v39 = vand.u32 4294901760, %v1109_v34  ;;  %v1541_v35 = vand.u32 4294901760, %v17381_v4 }
 0x122   :  { %v17393_v1 = vpop.permute.xlu0 %838  ;;  %v857_v37 = vpop.permute.xlu1 %856  ;;  %v17395_v18 = vpack.c.bf16 %v1288_v39, %v1284_v2  ;;  %v17397_v3 = vsub.f32 %v1109_v34, %v1288_v39  ;;  %v1542_v8 = vsub.f32 %v17381_v4, %v1541_v35 }
 0x123   :  { %23160 = vst [vmem:[#allocation53_spill] sm:$0xff] %v17393_v1  ;;  %v844_v28 = vsel %vm146_vm4, %v837_v16, %v17393_v1 }
 0x124   :  { %23161 = vst [vmem:[#allocation54_spill] sm:$0xff] %v17395_v18  ;;  %850 = vst [vmem:[#allocation2 + $0x108] ss:$-44 sps:$4 sm:$0x83] %v844_v28   ;;  %1009 = vrot.lane.b32.xlu0 %v16848_v42, %s22576_s19  ;;  %1024 = vrot.lane.b32.xlu1 %v16641_v9, %s22565_s14  ;;  %v1553_v40 = vand.u32 4294901760, %v17397_v3  ;;  %v1543_v9 = vand.u32 4294901760, %v1542_v8 }
 0x125   :  { %14279 = vmatpush1.bf16.msra.mxu0 %v17395_v18 }
 0x126   :  { %v17410_v2 = vpop.permute.xlu0 %858  ;;  %v876_v29 = vpop.permute.xlu1 %875  ;;  %v1554_v0 = vsub.f32 %v17397_v3, %v1553_v40  ;;  %v17413_v16 = vpack.c.bf16 %v1553_v40, %v1541_v35 }
 0x127   :  { %23162 = vst [vmem:[#allocation55_spill] sm:$0xff] %v17410_v2  ;;  %v864_v42 = vsel %vm22519_vm13, %v857_v37, %v17410_v2 }
 0x128   :  { %23163 = vst [vmem:[#allocation56_spill] sm:$0xff] %v17413_v16  ;;  %870 = vst [vmem:[#allocation2 + $0x108] sm:$0x1c] %v864_v42  ;;  %1026 = vrot.lane.b32.xlu0 %v17010_v56, %s22565_s14  ;;  %1041 = vrot.lane.b32.xlu1 %v16718_v22, %s22558_s15  ;;  %v1555_v30 = vand.u32 4294901760, %v1554_v0 }
 0x12a   :  { %v17421_v34 = vpop.permute.xlu0 %877  ;;  %v289_v7 = vpop.permute.xlu1 %288  ;;  %v17423_v39 = vpack.c.bf16 %v1555_v30, %v1543_v9 }
 0x12b   :  { %23164 = vst [vmem:[#allocation57_spill] sm:$0xff] %v17421_v34  ;;  %v883_v35 = vsel %vm22518_vm14, %v876_v29, %v17421_v34  ;;  %v293_v37 = vsel %vm22523_vm11, %v17251_v38, %v289_v7  ;;  %v1106_v28 = vld [vmem:[#allocation2 + $0xd8] sm:$0xff]  ;;  %vm22537_vm11 = vcmask 261120  }
 0x12c   :  { %889 = vst [vmem:[#allocation2 + $0x108] sm:$0xe0] %v883_v35  ;;  %299 = vst [vmem:[#allocation2 + $0xd0] sm:$0xe] %v293_v37  ;;  %1043 = vrot.lane.b32.xlu0 %v17185_v20, %s22558_s15  ;;  %1059 = vrot.lane.b32.xlu1 %v16648_v11, %s22556_s16  ;;  %v2546_v22 = vand.u32 4294901760, %v1106_v28 }
 0x12e   :  { %v307_v56 = vpop.permute.xlu0 %306  ;;  %v325_v8 = vpop.permute.xlu1 %324  ;;  %v17433_v40 = vsub.f32 %v1106_v28, %v2546_v22  ;;  %v23168_v28 = vrot.slane %v17047_v61, 5 }
 0x12f   :  { %v311_v29 = vsel %vm22522_vm12, %v17271_v62, %v307_v56  ;;  %v328_v38 = vsel %vm146_vm4, %v17286_v57, %v325_v8  ;;  %vm22536_vm12 = vcmask 982016  }
 0x130   :  { %23165 = vst [vmem:[#allocation58_spill] sm:$0xff] %v17433_v40  ;;  %317 = vst [vmem:[#allocation2 + $0xd0] sm:$0x70] %v311_v29  ;;  %1061 = vrot.lane.b32.xlu0 %v17017_v10, %s22556_s16  ;;  %485 = vrot.lane.b32.xlu1 %v16866_v45, %s16520_s23  ;;  %v550_v45 = vrot.slane %v17047_v61, 2  ;;  %v2799_v30 = vand.u32 4294901760, %v17433_v40 }
 0x131   :  { %334 = vst [vmem:[#allocation2 + $0x100] ss:$-44 sps:$4 sm:$0x83] %v328_v38  }
 0x132   :  { %v345_v11 = vpop.permute.xlu0 %344  ;;  %v365_v0 = vpop.permute.xlu1 %364 }
 0x133   :  { %v349_v42 = vsel %vm22519_vm13, %v17312_v36, %v345_v11  ;;  %v369_v9 = vsel %vm22518_vm14, %v17326_v27, %v365_v0  ;;  %v1112_v62 = vld [vmem:[#allocation2 + $0x108] sm:$0xff]  ;;  %vm22545_vm14 = vcmask 867328   ;;  %vm22544_vm13 = vcmask 1014784  }
 0x134   :  { %355 = vst [vmem:[#allocation2 + $0x100] sm:$0x1c] %v349_v42  ;;  %375 = vst [vmem:[#allocation2 + $0x100] sm:$0xe0] %v369_v9  ;;  %502 = vrot.lane.b32.xlu0 %v16879_v50, %s22576_s19  ;;  %520 = vrot.lane.b32.xlu1 %v17047_v61, %s22565_s14  ;;  %v2550_v57 = vand.u32 4294901760, %v1112_v62 }
 0x136   :  { %v379_v7 = vpop.permute.xlu0 %378  ;;  %v17453_v36 = vpop.permute.xlu1 %380  ;;  %v17455_v35 = vpack.c.bf16 %v2550_v57, %v2546_v22  ;;  %v17457_v27 = vsub.f32 %v1112_v62, %v2550_v57  ;;  %v2800_v22 = vsub.f32 %v17433_v40, %v2799_v30 }
 0x137   :  { %v386_v37 = vsel %vm22560_vm15, %v379_v7, %v17453_v36 }
 0x138   :  { %23166 = vst [vmem:[#allocation59_spill] sm:$0xff] %v17455_v35  ;;  %23167 = vst [vmem:[#allocation60_spill] sm:$0xff] %v17457_v27  ;;  %v1105_v50 = vld [vmem:[#allocation2 + $0xd0] sm:$0xff]  ;;  %538 = vrot.lane.b32.xlu0 %v23168_v28, %s22558_s15  ;;  %557 = vrot.lane.b32.xlu1 %v550_v45, %s22556_s16  ;;  %v2811_v8 = vand.u32 4294901760, %v17457_v27  ;;  %v2801_v57 = vand.u32 4294901760, %v2800_v22 }
 0x139   :  { %392 = vst [vmem:[#allocation2 + $0x128] sm:$0x7] %v386_v37  ;;  %v2548_v56 = vand.u32 4294901760, %v1105_v50  ;;  %14397 = vmatprep.subr.bf16.mxu1 %v17455_v35 }
 0x13a   :  { %v398_v38 = vpop.permute.xlu0 %397  ;;  %v17470_v11 = vpop.permute.xlu1 %399  ;;  %v2812_v9 = vsub.f32 %v17457_v27, %v2811_v8  ;;  %v17477_v62 = vpack.c.bf16 %v2811_v8, %v2799_v30 }
 0x13b   :  { %v17472_v0 = vsub.f32 %v1105_v50, %v2548_v56  ;;  %v405_v61 = vsel %vm22545_vm14, %v398_v38, %v17470_v11  ;;  %v1111_v42 = vld [vmem:[#allocation2 + $0x100] sm:$0xff] }
 0x13c   :  { %23170 = vst [vmem:[#allocation62_spill] sm:$0xff] %v17477_v62  ;;  %411 = vst [vmem:[#allocation2 + $0x128] sm:$0x38] %v405_v61  ;;  %v2552_v45 = vand.u32 4294901760, %v1111_v42  ;;  %v2813_v37 = vand.u32 4294901760, %v2812_v9 }
 0x13d   :  { %23169 = vst [vmem:[#allocation61_spill] sm:$0xff] %v17472_v0  ;;  %v2805_v28 = vand.u32 4294901760, %v17472_v0 }
 0x13e   :  { %v425_v29 = vpop.permute.xlu0 %424  ;;  %v17480_v6 = vpop.permute.xlu1 %426  ;;  %v17482_v50 = vpack.c.bf16 %v2552_v45, %v2548_v56  ;;  %v17484_v15 = vsub.f32 %v1111_v42, %v2552_v45  ;;  %v17488_v2 = vpack.c.bf16 %v2813_v37, %v2801_v57 }
 0x13f   :  { %v432_v34 = vsel %vm22544_vm13, %v425_v29, %v17480_v6  ;;  %v2806_v30 = vsub.f32 %v17472_v0, %v2805_v28 }
 0x140   :  { %23171 = vst [vmem:[#allocation63_spill] sm:$0xff] %v17482_v50  ;;  %23172 = vst [vmem:[#allocation64_spill] sm:$0xff] %v17484_v15  ;;  %14399 = vmatpush1.bf16.msra.mxu1 %v17482_v50  ;;  %v2817_v22 = vand.u32 4294901760, %v17484_v15 }
 0x141   :  { %438 = vst [vmem:[#allocation2 + $0x158] sm:$0xe] %v432_v34  ;;  %v2807_v37 = vand.u32 4294901760, %v2806_v30 }
 0x142   :  { %v443_v56 = vpop.permute.xlu0 %442  ;;  %v17495_v61 = vpop.permute.xlu1 %444  ;;  %v2818_v42 = vsub.f32 %v17484_v15, %v2817_v22  ;;  %v17498_v9 = vpack.c.bf16 %v2817_v22, %v2805_v28 }
 0x143   :  { %v450_v34 = vsel %vm22536_vm12, %v443_v56, %v17495_v61  ;;  %v1116_v45 = vld [vmem:[#allocation2 + $0x128] sm:$0xff] }
 0x144   :  { %23173 = vst [vmem:[#allocation65_spill] sm:$0xff] %v17498_v9  ;;  %456 = vst [vmem:[#allocation2 + $0x158] sm:$0x70] %v450_v34  ;;  %v1290_v57 = vand.u32 4294901760, %v1116_v45  ;;  %v2819_v1 = vand.u32 4294901760, %v2818_v42 }
 0x146   :  { %v461_v19 = vpop.permute.xlu0 %460  ;;  %v17502_v60 = vpop.permute.xlu1 %462  ;;  %v17504_v8 = vsub.f32 %v1116_v45, %v1290_v57  ;;  %v17506_v21 = vpack.c.bf16 %v2819_v1, %v2807_v37 }
 0x147   :  { %v468_v28 = vsel %vm22537_vm11, %v461_v19, %v17502_v60 }
 0x148   :  { %474 = vst [vmem:[#allocation2 + $0x188] ss:$-44 sps:$4 sm:$0x83] %v468_v28   ;;  %v1559_v28 = vand.u32 4294901760, %v17504_v8 }
 0x14a   :  { %v377_v22 = vpop.permute.xlu0 %376  ;;  %v396_v59 = vpop.permute.xlu1 %395 }
 0x14b   :  { %v385_v10 = vsel %vm22560_vm15, %v377_v22, %v379_v7  ;;  %v404_v34 = vsel %vm22545_vm14, %v396_v59, %v398_v38  ;;  %v1560_v38 = vsub.f32 %v17504_v8, %v1559_v28 }
 0x14c   :  { %391 = vst [vmem:[#allocation2 + $0x120] sm:$0x7] %v385_v10  ;;  %410 = vst [vmem:[#allocation2 + $0x120] sm:$0x38] %v404_v34 }
 0x14e   :  { %v423_v30 = vpop.permute.xlu0 %422  ;;  %v441_v42 = vpop.permute.xlu1 %440 }
 0x14f   :  { %v431_v20 = vsel %vm22544_vm13, %v423_v30, %v425_v29  ;;  %v449_v45 = vsel %vm22536_vm12, %v441_v42, %v443_v56  ;;  %v1122_v1 = vld [vmem:[#allocation2 + $0x158] sm:$0xff]  ;;  %v1561_v42 = vand.u32 4294901760, %v1560_v38 }
 0x150   :  { %437 = vst [vmem:[#allocation2 + $0x150] sm:$0xe] %v431_v20  ;;  %455 = vst [vmem:[#allocation2 + $0x150] sm:$0x70] %v449_v45  ;;  %v1294_v37 = vand.u32 4294901760, %v1122_v1 }
 0x152   :  { %v459_v9 = vpop.permute.xlu0 %458  ;;  %v893_v62 = vpop.permute.xlu1 %892  ;;  %v17515_v26 = vpack.c.bf16 %v1294_v37, %v1290_v57  ;;  %v17517_v7 = vsub.f32 %v1122_v1, %v1294_v37 }
 0x153   :  { %v467_v10 = vsel %vm22537_vm11, %v459_v9, %v461_v19  ;;  %v1115_v59 = vld [vmem:[#allocation2 + $0x120] sm:$0xff] }
 0x154   :  { %23174 = vst [vmem:[#allocation66_spill] sm:$0xff] %v17515_v26  ;;  %473 = vst [vmem:[#allocation2 + $0x180] ss:$-44 sps:$4 sm:$0x83] %v467_v10   ;;  %14281 = vmatprep.subr.bf16.mxu0 %v17515_v26  ;;  %v1292_v29 = vand.u32 4294901760, %v1115_v59  ;;  %v1571_v20 = vand.u32 4294901760, %v17517_v7 }
 0x156   :  { %v17525_v22 = vpop.permute.xlu0 %894  ;;  %v911_v57 = vpop.permute.xlu1 %910  ;;  %v17527_v34 = vsub.f32 %v1115_v59, %v1292_v29  ;;  %v1572_v30 = vsub.f32 %v17517_v7, %v1571_v20  ;;  %v17530_v19 = vpack.c.bf16 %v1571_v20, %v1559_v28 }
 0x157   :  { %23175 = vst [vmem:[#allocation67_spill] sm:$0xff] %v17525_v22  ;;  %v900_v9 = vsel %vm22560_vm15, %v893_v62, %v17525_v22 }
 0x158   :  { %23176 = vst [vmem:[#allocation68_spill] sm:$0xff] %v17530_v19  ;;  %906 = vst [vmem:[#allocation2 + $0x138] sm:$0x7] %v900_v9  ;;  %v1573_v45 = vand.u32 4294901760, %v1572_v30  ;;  %v1565_v28 = vand.u32 4294901760, %v17527_v34 }
 0x15a   :  { %v17534_v1 = vpop.permute.xlu0 %912  ;;  %v937_v37 = vpop.permute.xlu1 %936  ;;  %v17536_v10 = vpack.c.bf16 %v1573_v45, %v1561_v42 }
 0x15b   :  { %23177 = vst [vmem:[#allocation69_spill] sm:$0xff] %v17534_v1  ;;  %v918_v56 = vsel %vm22545_vm14, %v911_v57, %v17534_v1  ;;  %v1121_v59 = vld [vmem:[#allocation2 + $0x150] sm:$0xff]  ;;  %v1566_v57 = vsub.f32 %v17527_v34, %v1565_v28 }
 0x15c   :  { %924 = vst [vmem:[#allocation2 + $0x138] sm:$0x38] %v918_v56  ;;  %v1296_v49 = vand.u32 4294901760, %v1121_v59 }
 0x15e   :  { %v17541_v20 = vpop.permute.xlu0 %938  ;;  %v954_v19 = vpop.permute.xlu1 %953  ;;  %v17543_v62 = vpack.c.bf16 %v1296_v49, %v1292_v29  ;;  %v17545_v38 = vsub.f32 %v1121_v59, %v1296_v49 }
 0x15f   :  { %23178 = vst [vmem:[#allocation70_spill] sm:$0xff] %v17541_v20  ;;  %v944_v30 = vsel %vm22544_vm13, %v937_v37, %v17541_v20  ;;  %v1567_v20 = vand.u32 4294901760, %v1566_v57 }
 0x160   :  { %23179 = vst [vmem:[#allocation71_spill] sm:$0xff] %v17543_v62  ;;  %950 = vst [vmem:[#allocation2 + $0x168] sm:$0xe] %v944_v30  ;;  %14283 = vmatpush1.bf16.msra.mxu0 %v17543_v62  ;;  %v1577_v56 = vand.u32 4294901760, %v17545_v38 }
 0x162   :  { %v17554_v42 = vpop.permute.xlu0 %955  ;;  %v971_v45 = vpop.permute.xlu1 %970  ;;  %v1578_v29 = vsub.f32 %v17545_v38, %v1577_v56  ;;  %v17557_v49 = vpack.c.bf16 %v1577_v56, %v1565_v28 }
 0x163   :  { %23180 = vst [vmem:[#allocation72_spill] sm:$0xff] %v17554_v42  ;;  %v961_v37 = vsel %vm22536_vm12, %v954_v19, %v17554_v42  ;;  %v1118_v59 = vld [vmem:[#allocation2 + $0x138] sm:$0xff] }
 0x164   :  { %23181 = vst [vmem:[#allocation73_spill] sm:$0xff] %v17557_v49  ;;  %967 = vst [vmem:[#allocation2 + $0x168] sm:$0x70] %v961_v37  ;;  %v2554_v30 = vand.u32 4294901760, %v1118_v59  ;;  %v1579_v1 = vand.u32 4294901760, %v1578_v29 }
 0x166   :  { %v17561_v22 = vpop.permute.xlu0 %972  ;;  %v383_v16 = vpop.permute.xlu1 %382  ;;  %v17563_v33 = vsub.f32 %v1118_v59, %v2554_v30  ;;  %v17565_v9 = vpack.c.bf16 %v1579_v1, %v1567_v20 }
 0x167   :  { %23182 = vst [vmem:[#allocation74_spill] sm:$0xff] %v17561_v22  ;;  %v978_v48 = vsel %vm22537_vm11, %v971_v45, %v17561_v22  ;;  %v387_v28 = vsel %vm22560_vm15, %v17453_v36, %v383_v16  ;;  %vm1229_vm15 = vcmask 719872  }
 0x168   :  { %23183 = vst [vmem:[#allocation75_spill] sm:$0xff] %v17563_v33  ;;  %984 = vst [vmem:[#allocation2 + $0x198] ss:$-44 sps:$4 sm:$0x83] %v978_v48   ;;  %v2823_v37 = vand.u32 4294901760, %v17563_v33 }
 0x169   :  { %393 = vst [vmem:[#allocation2 + $0x130] sm:$0x7] %v387_v28 }
 0x16a   :  { %v402_v19 = vpop.permute.xlu0 %401  ;;  %v429_v56 = vpop.permute.xlu1 %428 }
 0x16b   :  { %v406_v57 = vsel %vm22545_vm14, %v17470_v11, %v402_v19  ;;  %v433_v29 = vsel %vm22544_vm13, %v17480_v6, %v429_v56  ;;  %v2824_v56 = vsub.f32 %v17563_v33, %v2823_v37  ;;  %vm540_vm13 = vcmask 490496  }
 0x16c   :  { %412 = vst [vmem:[#allocation2 + $0x130] sm:$0x38] %v406_v57  ;;  %439 = vst [vmem:[#allocation2 + $0x160] sm:$0xe] %v433_v29  ;;  %vm559_vm14 = vcmask 457728  }
 0x16d   :  { %v2825_v22 = vand.u32 4294901760, %v2824_v56 }
 0x16e   :  { %v447_v1 = vpop.permute.xlu0 %446  ;;  %v465_v20 = vpop.permute.xlu1 %464 }
 0x16f   :  { %v451_v45 = vsel %vm22536_vm12, %v17495_v61, %v447_v1  ;;  %v469_v16 = vsel %vm22537_vm11, %v17502_v60, %v465_v20  ;;  %v1124_v48 = vld [vmem:[#allocation2 + $0x168] sm:$0xff]  ;;  %vm504_vm12 = vcmask 195584   ;;  %vm522_vm11 = vcmask 523264  }
 0x170   :  { %457 = vst [vmem:[#allocation2 + $0x160] sm:$0x70] %v451_v45  ;;  %475 = vst [vmem:[#allocation2 + $0x190] ss:$-44 sps:$4 sm:$0x83] %v469_v16   ;;  %v2558_v36 = vand.u32 4294901760, %v1124_v48 }
 0x172   :  { %v482_v11 = vpop.permute.xlu0 %481  ;;  %v17580_v59 = vpop.permute.xlu1 %483  ;;  %v17582_v6 = vpack.c.bf16 %v2558_v36, %v2554_v30  ;;  %v17584_v28 = vsub.f32 %v1124_v48, %v2558_v36 }
 0x173   :  { %v488_v19 = vsel %vm146_vm4, %v482_v11, %v17580_v59  ;;  %v1117_v61 = vld [vmem:[#allocation2 + $0x130] sm:$0xff] }
 0x174   :  { %23184 = vst [vmem:[#allocation76_spill] sm:$0xff] %v17582_v6  ;;  %23185 = vst [vmem:[#allocation77_spill] sm:$0xff] %v17584_v28  ;;  %14401 = vmatprep.subr.bf16.mxu1 %v17582_v6  ;;  %v2556_v60 = vand.u32 4294901760, %v1117_v61  ;;  %v2835_v57 = vand.u32 4294901760, %v17584_v28 }
 0x175   :  { %494 = vst [vmem:[#allocation2 + $0x188] sm:$0x1c] %v488_v19 }
 0x176   :  { %v499_v30 = vpop.permute.xlu0 %498  ;;  %v17593_v1 = vpop.permute.xlu1 %500  ;;  %v17595_v20 = vsub.f32 %v1117_v61, %v2556_v60  ;;  %v2836_v45 = vsub.f32 %v17584_v28, %v2835_v57  ;;  %v17598_v16 = vpack.c.bf16 %v2835_v57, %v2823_v37 }
 0x177   :  { %v506_v48 = vsel %vm504_vm12, %v499_v30, %v17593_v1  ;;  %v1123_v36 = vld [vmem:[#allocation2 + $0x160] sm:$0xff] }
 0x178   :  { %23186 = vst [vmem:[#allocation78_spill] sm:$0xff] %v17595_v20  ;;  %23187 = vst [vmem:[#allocation79_spill] sm:$0xff] %v17598_v16  ;;  %v2560_v19 = vand.u32 4294901760, %v1123_v36  ;;  %v2837_v42 = vand.u32 4294901760, %v2836_v45  ;;  %v2829_v29 = vand.u32 4294901760, %v17595_v20 }
 0x179   :  { %512 = vst [vmem:[#allocation2 + $0x188] sm:$0xe0] %v506_v48 }
 0x17a   :  { %v517_v49 = vpop.permute.xlu0 %516  ;;  %v17603_v6 = vpop.permute.xlu1 %518  ;;  %v17605_v61 = vpack.c.bf16 %v2560_v19, %v2556_v60  ;;  %v17607_v50 = vsub.f32 %v1123_v36, %v2560_v19  ;;  %v17609_v37 = vpack.c.bf16 %v2837_v42, %v2825_v22  ;;  %v2830_v56 = vsub.f32 %v17595_v20, %v2829_v29 }
 0x17b   :  { %v524_v57 = vsel %vm522_vm11, %v517_v49, %v17603_v6 }
 0x17c   :  { %23188 = vst [vmem:[#allocation80_spill] sm:$0xff] %v17605_v61  ;;  %23189 = vst [vmem:[#allocation81_spill] sm:$0xff] %v17607_v50  ;;  %14403 = vmatpush1.bf16.msra.mxu1 %v17605_v61  ;;  %v2841_v45 = vand.u32 4294901760, %v17607_v50  ;;  %v2831_v19 = vand.u32 4294901760, %v2830_v56 }
 0x17d   :  { %530 = vst [vmem:[#allocation2 + $0x1b8] sm:$0x7] %v524_v57 }
 0x17e   :  { %v535_v60 = vpop.permute.xlu0 %534  ;;  %v17618_v16 = vpop.permute.xlu1 %536  ;;  %v2842_v22 = vsub.f32 %v17607_v50, %v2841_v45  ;;  %v17621_v42 = vpack.c.bf16 %v2841_v45, %v2829_v29  ;;  %v1145_v45 = vld [vmem:[%s22467_s2] sm:$0xff] }
 0x17f   :  { %v542_v36 = vsel %vm540_vm13, %v535_v60, %v17618_v16 }
 0x180   :  { %23190 = vst [vmem:[#allocation82_spill] sm:$0xff] %v17621_v42  ;;  %548 = vst [vmem:[#allocation2 + $0x1b8] sm:$0x38] %v542_v36  ;;  %v2843_v57 = vand.u32 4294901760, %v2842_v22  ;;  %v1128_v52 = vld [vmem:[#allocation2 + $0x188] sm:$0xff] }
 0x181   :  { %v1298_v36 = vand.u32 4294901760, %v1128_v52 }
 0x182   :  { %v554_v61 = vpop.permute.xlu0 %553  ;;  %v17625_v35 = vpop.permute.xlu1 %555  ;;  %v17627_v5 = vpack.c.bf16 %v2843_v57, %v2831_v19  ;;  %v1231_v19 = vsel %vm1229_vm15, %v1145_v45, 0 }
 0x183   :  { %v561_v48 = vsel %vm559_vm14, %v554_v61, %v17625_v35 }
 0x184   :  { %567 = vst [vmem:[#allocation2 + $0x1e8] ss:$-44 sps:$4 sm:$0xc1] %v561_v48  }
 0x186   :  { %v480_v62 = vpop.permute.xlu0 %479  ;;  %v497_v29 = vpop.permute.xlu1 %496 }
 0x187   :  { %v487_v56 = vsel %vm146_vm4, %v480_v62, %v482_v11  ;;  %v505_v22 = vsel %vm504_vm12, %v497_v29, %v499_v30  ;;  %v17642_v11 = vsub.f32 %v1128_v52, %v1298_v36  ;;  %v17644_v30 = vand.u32 4294901760, %v1231_v19 }
 0x188   :  { %493 = vst [vmem:[#allocation2 + $0x180] sm:$0x1c] %v487_v56  ;;  %511 = vst [vmem:[#allocation2 + $0x180] sm:$0xe0] %v505_v22 }
 0x189   :  { %v17657_v52 = vsub.f32 %v1231_v19, %v17644_v30 }
 0x18a   :  { %v515_v57 = vpop.permute.xlu0 %514  ;;  %v533_v42 = vpop.permute.xlu1 %532 }
 0x18b   :  { %v523_v48 = vsel %vm522_vm11, %v515_v57, %v517_v49  ;;  %v541_v26 = vsel %vm540_vm13, %v533_v42, %v535_v60  ;;  %v1134_v18 = vld [vmem:[#allocation2 + $0x1b8] sm:$0xff]  ;;  %v1234_v49 = vsel %vm1229_vm15, %v1146_v32, 0  ;;  %v1147_v42 = vld [vmem:[%s22467_s2 + $0x10] sm:$0xff]  ;;  %23192 = vst [vmem:[#allocation84_spill] sm:$0xff] %v17657_v52 }
 0x18c   :  { %529 = vst [vmem:[#allocation2 + $0x1b0] sm:$0x7] %v523_v48  ;;  %547 = vst [vmem:[#allocation2 + $0x1b0] sm:$0x38] %v541_v26  ;;  %v1302_v62 = vand.u32 4294901760, %v1134_v18  ;;  %v22574_v26 = vand.u32 4294901760, %v17642_v11 }
 0x18d   :  { %v17661_v57 = vand.u32 4294901760, %v1234_v49  ;;  %v1237_v48 = vsel %vm1229_vm15, %v1147_v42, 0 }
 0x18e   :  { %v552_v29 = vpop.permute.xlu0 %551  ;;  %v991_v45 = vpop.permute.xlu1 %990  ;;  %v17646_v56 = vpack.c.bf16 %v1302_v62, %v1298_v36  ;;  %v17648_v22 = vsub.f32 %v1134_v18, %v1302_v62  ;;  %v17683_v12 = vand.u32 4294901760, %v1237_v48 }
 0x18f   :  { %v560_v60 = vsel %vm559_vm14, %v552_v29, %v554_v61  ;;  %v1127_v18 = vld [vmem:[#allocation2 + $0x180] sm:$0xff]  ;;  %v1148_v29 = vld [vmem:[%s22467_s2 + $0x18] sm:$0xff]  ;;  %v17681_v42 = vsub.f32 %v1234_v49, %v17661_v57  ;;  %v1140_v49 = vld [vmem:[#allocation2 + $0x1e8] sm:$0xff] }
 0x190   :  { %23191 = vst [vmem:[#allocation83_spill] sm:$0xff] %v17646_v56  ;;  %566 = vst [vmem:[#allocation2 + $0x1e0] ss:$-44 sps:$4 sm:$0xc1] %v560_v60   ;;  %14285 = vmatprep.subr.bf16.mxu0 %v17646_v56  ;;  %v22575_v36 = vand.u32 4294901760, %v17648_v22  ;;  %v1300_v60 = vand.u32 4294901760, %v1127_v18  ;;  %v17704_v0 = vsub.f32 %v1237_v48, %v17683_v12 }
 0x191   :  { %v17678_v56 = vand.u32 4294901760, %v17657_v52  ;;  %23196 = vst [vmem:[#allocation88_spill] sm:$0xff] %v17681_v42  ;;  %23197 = vst [vmem:[#allocation89_spill] sm:$0xff] %v17683_v12  ;;  %v17701_v28 = vand.u32 4294901760, %v17681_v42  ;;  %v17717_v40 = vand.u32 4294901760, %v1140_v49 }
 0x192   :  { %v17663_v32 = vpop.permute.xlu0 %992  ;;  %v1008_v61 = vpop.permute.xlu1 %1007  ;;  %v17670_v62 = vpack.c.bf16 %v22575_v36, %v22574_v26  ;;  %v1240_v36 = vsel %vm1229_vm15, %v1148_v29, 0  ;;  %v17693_v50 = vsub.f32 %v1127_v18, %v1300_v60  ;;  %v1150_v29 = vld [vmem:[%s22467_s2 + $0x28] sm:$0xff]  ;;  %23200 = vst [vmem:[#allocation92_spill] sm:$0xff] %v17704_v0 }
 0x193   :  { %23193 = vst [vmem:[#allocation85_spill] sm:$0xff] %v17663_v32  ;;  %v998_v19 = vsel %vm146_vm4, %v991_v45, %v17663_v32  ;;  %23195 = vst [vmem:[#allocation87_spill] sm:$0xff] %v17678_v56  ;;  %v1149_v45 = vld [vmem:[%s22467_s2 + $0x20] sm:$0xff]  ;;  %v1356_v33 = vsub.f32 %v17657_v52, %v17678_v56  ;;  %v1246_v48 = vsel %vm1229_vm15, %v1150_v29, 0 }
 0x194   :  { %23194 = vst [vmem:[#allocation86_spill] sm:$0xff] %v17670_v62  ;;  %1004 = vst [vmem:[#allocation2 + $0x198] sm:$0x1c] %v998_v19  ;;  %v17743_v53 = vand.u32 4294901760, %v1246_v48  ;;  %v23212_v43 = vand.u32 4294901760, %v17693_v50 }
 0x195   :  { %23199 = vst [vmem:[#allocation91_spill] sm:$0xff] %v17701_v28  ;;  %23204 = vst [vmem:[#allocation96_spill] sm:$0xff] %v17717_v40 }
 0x196   :  { %v17685_v20 = vpop.permute.xlu0 %1009  ;;  %v1025_v26 = vpop.permute.xlu1 %1024  ;;  %23211 = vst [vmem:[#allocation103_spill] sm:$0xff] %v17743_v53 }
 0x197   :  { %23198 = vst [vmem:[#allocation90_spill] sm:$0xff] %v17685_v20  ;;  %v1015_v19 = vsel %vm504_vm12, %v1008_v61, %v17685_v20  ;;  %v1133_v32 = vld [vmem:[#allocation2 + $0x1b0] sm:$0xff]  ;;  %v17706_v61 = vand.u32 4294901760, %v1240_v36  ;;  %v1139_v27 = vld [vmem:[#allocation2 + $0x1e0] sm:$0xff] }
 0x198   :  { %1021 = vst [vmem:[#allocation2 + $0x198] sm:$0xe0] %v1015_v19  ;;  %v1304_v62 = vand.u32 4294901760, %v1133_v32  ;;  %v1243_v19 = vsel %vm1229_vm15, %v1149_v45, 0 }
 0x199   :  { %23201 = vst [vmem:[#allocation93_spill] sm:$0xff] %v17706_v61  ;;  %v17721_v63 = vand.u32 4294901760, %v1243_v19  ;;  %v17737_v29 = vsub.f32 %v1240_v36, %v17706_v61 }
 0x19a   :  { %v17709_v18 = vpop.permute.xlu0 %1026  ;;  %v1042_v20 = vpop.permute.xlu1 %1041  ;;  %v17711_v15 = vpack.c.bf16 %v1304_v62, %v1300_v60  ;;  %v17713_v56 = vsub.f32 %v1133_v32, %v1304_v62  ;;  %v1151_v32 = vld [vmem:[%s22467_s2 + $0x30] sm:$0xff]  ;;  %v1367_v62 = vsub.f32 %v17681_v42, %v17701_v28 }
 0x19b   :  { %23202 = vst [vmem:[#allocation94_spill] sm:$0xff] %v17709_v18  ;;  %v1032_v52 = vsel %vm522_vm11, %v1025_v26, %v17709_v18  ;;  %23205 = vst [vmem:[#allocation97_spill] sm:$0xff] %v17721_v63  ;;  %v17729_v26 = vand.u32 4294901760, %v1356_v33  ;;  %v1249_v42 = vsel %vm1229_vm15, %v1151_v32, 0  ;;  %v17754_v36 = vsub.f32 %v1243_v19, %v17721_v63 }
 0x19c   :  { %23203 = vst [vmem:[#allocation95_spill] sm:$0xff] %v17711_v15  ;;  %1038 = vst [vmem:[#allocation2 + $0x1c8] sm:$0x7] %v1032_v52  ;;  %14287 = vmatpush1.bf16.msra.mxu0 %v17711_v15  ;;  %v1601_v60 = vand.u32 4294901760, %v17713_v56  ;;  %v17734_v52 = vand.u32 4294901760, %v17704_v0  ;;  %v17741_v15 = vand.u32 4294901760, %v1139_v27 }
 0x19d   :  { %1307 = vmatprep.subr.mxu0 %v17717_v40  ;;  %23206 = vst [vmem:[#allocation98_spill] sm:$0xff] %v17729_v26  ;;  %23208 = vst [vmem:[#allocation100_spill] sm:$0xff] %v17737_v29  ;;  %v17758_v55 = vand.u32 4294901760, %v1367_v62  ;;  %v23218_v32 = vmov 0.0   ;;  %v17775_v62 = vand.u32 4294901760, %v1249_v42 }
 0x19e   :  { %23207 = vst [vmem:[#allocation99_spill] sm:$0xff] %v17734_v52  ;;  %v17739_v45 = vpop.permute.xlu0 %1043  ;;  %v1060_v18 = vpop.permute.xlu1 %1059  ;;  %23210 = vst [vmem:[#allocation102_spill] sm:$0xff] %v17741_v15  ;;  %v17747_v33 = vpack.c.bf16 %v1601_v60, %v23212_v43  ;;  %v1378_v43 = vsub.f32 %v17704_v0, %v17734_v52  ;;  %v17783_v0 = vand.u32 4294901760, %v17754_v36 }
 0x19f   :  { %23209 = vst [vmem:[#allocation101_spill] sm:$0xff] %v17739_v45  ;;  %v1049_v28 = vsel %vm540_vm13, %v1042_v20, %v17739_v45  ;;  %23214 = vst [vmem:[#allocation105_spill] sm:$0xff] %v17754_v36 }
 0x1a0   :  { %23213 = vst [vmem:[#allocation104_spill] sm:$0xff] %v17747_v33  ;;  %1055 = vst [vmem:[#allocation2 + $0x1c8] sm:$0x38] %v1049_v28  ;;  %1309 = vmatpush1.msra.mxu0 %v17741_v15  ;;  %v17763_v33 = vand.u32 4294901760, %v17737_v29  ;;  %v1152_v28 = vld [vmem:[%s22467_s2 + $0x38] sm:$0xff] }
 0x1a1   :  { %1358 = vmatmul.mubr.f32.vlgmr.msra.gmra.mrb[0].mxu0 %v17729_v26  ;;  %14289 = vmatprep.subr.bf16.mxu0 %v16958_v47  ;;  %23215 = vst [vmem:[#allocation106_spill] sm:$0xff] %v17758_v55  ;;  %v17773_v47 = vsub.f32 %v1246_v48, %v17743_v53  ;;  %23220 = vst [vmem:[#allocation110_spill] sm:$0xff] %v17775_v62  ;;  %v17787_v48 = vand.u32 4294901760, %v1378_v43 }
 0x1a2   :  { %23216 = vst [vmem:[#allocation107_spill] sm:$0xff] %v17763_v33  ;;  %v17768_v20 = vpop.permute.xlu0 %1061  ;;  %v486_v19 = vpop.permute.xlu1 %485  ;;  %14291 = vmatpush1.bf16.msra.mxu0 %v16997_v44  ;;  %1363 = vmatprep.mubr.f32.mxu0 %v23218_v32  ;;  %23221 = vst [vmem:[#allocation111_spill] sm:$0xff] %v17783_v0  ;;  %v1252_v44 = vsel %vm1229_vm15, %v1152_v28, 0  ;;  %v1389_v53 = vsub.f32 %v17737_v29, %v17763_v33  ;;  %v1130_v28 = vld [vmem:[#allocation2 + $0x198] sm:$0xff] }
 0x1a3   :  { %23217 = vst [vmem:[#allocation108_spill] sm:$0xff] %v17768_v20  ;;  %23219 = vst [vmem:[#allocation109_spill] sm:$0xff] %v17773_v47  ;;  %v1067_v45 = vsel %vm559_vm14, %v1060_v18, %v17768_v20  ;;  %v489_v52 = vsel %vm146_vm4, %v17580_v59, %v486_v19  ;;  %14293 = vmatprep.subr.bf16.mxu0 %v17176_v54  ;;  %v23223_v18 = vand.u32 4294901760, %v17648_v22  ;;  %v17800_v43 = vand.u32 4294901760, %v17773_v47 }
 0x1a4   :  { %1073 = vst [vmem:[#allocation2 + $0x1f8] ss:$-44 sps:$4 sm:$0xc1] %v1067_v45   ;;  %495 = vst [vmem:[#allocation2 + $0x190] sm:$0x1c] %v489_v52  ;;  %v17795_v54 = vsub.f32 %v1140_v49, %v17717_v40  ;;  %v17803_v19 = vsub.f32 %v1249_v42, %v17775_v62  ;;  %v17813_v33 = vand.u32 4294901760, %v1252_v44  ;;  %v17819_v42 = vsub.f32 %v1139_v27, %v17741_v15 }
 0x1a5   :  { %1369 = vmatmul.mubr.f32.gmra.mrb[2].mxu0 %v17758_v55  ;;  %23222 = vst [vmem:[#allocation112_spill] sm:$0xff] %v17787_v48  ;;  %v1596_v59 = vsub.f32 %v17648_v22, %v23223_v18  ;;  %23224 = vst [vmem:[#allocation113_spill] sm:$0xff] %v17800_v43  ;;  %v23226_v18 = vand.u32 4294901760, %v17642_v11  ;;  %v1153_v40 = vld [vmem:[%s22467_s2 + $0x40] sm:$0xff]  ;;  %v23228_v27 = vand.u32 4294901760, %v17693_v50 }
 0x1a6   :  { %v503_v45 = vpop.permute.xlu0 %502  ;;  %v521_v52 = vpop.permute.xlu1 %520  ;;  %14295 = vmatpush1.bf16.msra.mxu0 %v17220_v58  ;;  %1374 = vmatprep.mubr.f32.mxu0 %v23218_v32  ;;  %23225 = vst [vmem:[#allocation114_spill] sm:$0xff] %v17803_v19  ;;  %23227 = vst [vmem:[#allocation115_spill] sm:$0xff] %v17813_v33 }
 0x1a7   :  { %v507_v20 = vsel %vm504_vm12, %v17593_v1, %v503_v45  ;;  %v525_v49 = vsel %vm522_vm11, %v17603_v6, %v521_v52  ;;  %14297 = vmatprep.subr.bf16.mxu0 %v17383_v25  ;;  %v1584_v58 = vsub.f32 %v17642_v11, %v23226_v18  ;;  %v1400_v6 = vsub.f32 %v17754_v36, %v17783_v0 }
 0x1a8   :  { %513 = vst [vmem:[#allocation2 + $0x190] sm:$0xe0] %v507_v20  ;;  %531 = vst [vmem:[#allocation2 + $0x1c0] sm:$0x7] %v525_v49  ;;  %v1602_v25 = vsub.f32 %v17713_v56, %v1601_v60  ;;  %v17825_v1 = vand.u32 4294901760, %v1389_v53  ;;  %v1597_v45 = vand.u32 4294901760, %v1596_v59  ;;  %v1590_v20 = vsub.f32 %v17693_v50, %v23228_v27 }
 0x1a9   :  { %1380 = vmatmul.mubr.f32.gmra.mrb[4].mxu0 %v17787_v48  ;;  %v2562_v52 = vand.u32 4294901760, %v1130_v28  ;;  %v1411_v60 = vsub.f32 %v17773_v47, %v17800_v43  ;;  %v17836_v53 = vand.u32 4294901760, %v17803_v19  ;;  %v1255_v59 = vsel %vm1229_vm15, %v1153_v40, 0  ;;  %v1154_v43 = vld [vmem:[%s22467_s2 + $0x48] sm:$0xff] }
 0x1aa   :  { %v539_v29 = vpop.permute.xlu0 %538  ;;  %v558_v62 = vpop.permute.xlu1 %557  ;;  %14299 = vmatpush1.bf16.msra.mxu0 %v17423_v39  ;;  %1385 = vmatprep.mubr.f32.mxu0 %v23218_v32  ;;  %v1585_v18 = vand.u32 4294901760, %v1584_v58  ;;  %v17845_v27 = vsub.f32 %v1252_v44, %v17813_v33  ;;  %v17850_v15 = vand.u32 4294901760, %v1400_v6  ;;  %v17859_v58 = vand.u32 4294901760, %v1255_v59 }
 0x1ab   :  { %23229 = vst [vmem:[#allocation116_spill] sm:$0xff] %v17836_v53  ;;  %v543_v49 = vsel %vm540_vm13, %v17618_v16, %v539_v29  ;;  %v562_v39 = vsel %vm559_vm14, %v17625_v35, %v558_v62  ;;  %14301 = vmatprep.subr.bf16.mxu0 %v17536_v10  ;;  %v1136_v0 = vld [vmem:[#allocation2 + $0x1c8] sm:$0xff]  ;;  %v1603_v16 = vand.u32 4294901760, %v1602_v25  ;;  %v22626_v29 = vand.u32 4294901760, %v17819_v42  ;;  %v1142_v47 = vld [vmem:[#allocation2 + $0x1f8] sm:$0xff] }
 0x1ac   :  { %23230 = vst [vmem:[#allocation117_spill] sm:$0xff] %v17845_v27  ;;  %549 = vst [vmem:[#allocation2 + $0x1c0] sm:$0x38] %v543_v49  ;;  %v2566_v40 = vand.u32 4294901760, %v1136_v0  ;;  %v14304_v35 = vpack.c.bf16 %v1597_v45, %v1585_v18  ;;  %v17854_v10 = vsub.f32 %v1130_v28, %v2562_v52  ;;  %v23231_v62 = vand.u32 4294901760, %v17795_v54 }
 0x1ad   :  { %568 = vst [vmem:[#allocation2 + $0x1f0] ss:$-44 sps:$4 sm:$0xc1] %v562_v39   ;;  %1391 = vmatmul.mubr.f32.gmra.mrb[6].mxu0 %v17825_v1  ;;  %23232 = vst [vmem:[#allocation118_spill] sm:$0xff] %v17859_v58  ;;  %v1591_v49 = vand.u32 4294901760, %v1590_v20  ;;  %v1258_v39 = vsel %vm1229_vm15, %v1154_v43, 0  ;;  %v1422_v18 = vsub.f32 %v17803_v19, %v17836_v53  ;;  %v1614_v43 = vsub.f32 %v17819_v42, %v22626_v29 }
 0x1ae   :  { %v1608_v44 = vsub.f32 %v17795_v54, %v23231_v62  ;;  %14303 = vmatpush1.bf16.msra.mxu0 %v17565_v9  ;;  %1396 = vmatprep.mubr.f32.mxu0 %v23218_v32  ;;  %v17863_v6 = vpack.c.bf16 %v2566_v40, %v2562_v52  ;;  %v17865_v25 = vsub.f32 %v1136_v0, %v2566_v40  ;;  %v17868_v28 = vand.u32 4294901760, %v1411_v60  ;;  %v1155_v9 = vld [vmem:[%s22467_s2 + $0x50] sm:$0xff]  ;;  %v1156_v29 = vld [vmem:[%s22467_s2 + $0x58] sm:$0xff] }
 0x1af   :  { %14305 = vmatprep.subr.bf16.mxu0 %v14304_v35  ;;  %v1129_v45 = vld [vmem:[#allocation2 + $0x190] sm:$0xff]  ;;  %v17873_v62 = vand.u32 4294901760, %v17845_v27  ;;  %v14306_v0 = vpack.c.bf16 %v1603_v16, %v1591_v49  ;;  %v17885_v40 = vsub.f32 %v1255_v59, %v17859_v58  ;;  %v17887_v35 = vand.u32 4294901760, %v1258_v39 }
 0x1b0   :  { %23233 = vst [vmem:[#allocation119_spill] sm:$0xff] %v17863_v6  ;;  %14405 = vmatprep.subr.bf16.mxu1 %v17863_v6  ;;  %v2564_v52 = vand.u32 4294901760, %v1129_v45  ;;  %v22635_v20 = vand.u32 4294901760, %v17865_v25  ;;  %v1609_v60 = vand.u32 4294901760, %v1608_v44  ;;  %v2847_v53 = vand.u32 4294901760, %v17854_v10 }
 0x1b1   :  { %23234 = vst [vmem:[#allocation120_spill] sm:$0xff] %v17873_v62  ;;  %1402 = vmatmul.mubr.f32.gmra.mrb[8].mxu0 %v17850_v15  ;;  %23235 = vst [vmem:[#allocation121_spill] sm:$0xff] %v17885_v40  ;;  %v1261_v16 = vsel %vm1229_vm15, %v1155_v9, 0  ;;  %v1615_v59 = vand.u32 4294901760, %v1614_v43  ;;  %v17904_v9 = vand.u32 4294901760, %v1422_v18  ;;  %v17910_v36 = vsub.f32 %v1258_v39, %v17887_v35  ;;  %v23243_v18 = vld [vmem:[#allocation6_spill] sm:$0xff] }
 0x1b2   :  { %23236 = vst [vmem:[#allocation122_spill] sm:$0xff] %v17887_v35  ;;  %14307 = vmatpush1.bf16.msra.mxu0 %v14306_v0  ;;  %1407 = vmatprep.mubr.f32.mxu0 %v23218_v32  ;;  %v17897_v44 = vpack.c.bf16 %v22635_v20, %v2847_v53  ;;  %v17899_v19 = vsub.f32 %v1129_v45, %v2564_v52  ;;  %v17912_v20 = vand.u32 4294901760, %v1261_v16  ;;  %v17923_v58 = vand.u32 4294901760, %v1142_v47 }
 0x1b3   :  { %1610 = vmatprep.subr.mxu0 %v1609_v60  ;;  %v1433_v0 = vsub.f32 %v17845_v27, %v17873_v62  ;;  %v17907_v60 = vand.u32 4294901760, %v17885_v40  ;;  %23239 = vst [vmem:[#allocation125_spill] sm:$0xff] %v17910_v36  ;;  %v23242_v62 = vld [vmem:[#allocation8_spill] sm:$0xff] }
 0x1b4   :  { %v1135_v49 = vld [vmem:[#allocation2 + $0x1c0] sm:$0xff]  ;;  %23237 = vst [vmem:[#allocation123_spill] sm:$0xff] %v17897_v44  ;;  %23240 = vst [vmem:[#allocation126_spill] sm:$0xff] %v17912_v20  ;;  %v1264_v44 = vsel %vm1229_vm15, %v1156_v29, 0  ;;  %v23244_v27 = vpack.c.bf16 %v23242_v62, %v23243_v18  ;;  %v1141_v33 = vld [vmem:[#allocation2 + $0x1f0] sm:$0xff]  ;;  %vm5235_vm15 = vcmask 785408  }
 0x1b5   :  { %v2568_v6 = vand.u32 4294901760, %v1135_v49  ;;  %1413 = vmatmul.mubr.f32.gmra.mrb[10].mxu0 %v17868_v28  ;;  %23238 = vst [vmem:[#allocation124_spill] sm:$0xff] %v17907_v60  ;;  %v17926_v39 = vand.u32 4294901760, %v1433_v0  ;;  %v1444_v29 = vsub.f32 %v17885_v40, %v17907_v60  ;;  %v17940_v62 = vand.u32 4294901760, %v1264_v44  ;;  %v23251_v40 = vld [vmem:[#allocation27_spill] sm:$0xff] }
 0x1b6   :  { %1616 = vmatpush1.msra.mxu0 %v1615_v59  ;;  %1418 = vmatprep.mubr.f32.mxu0 %v23218_v32  ;;  %v2853_v59 = vand.u32 4294901760, %v17899_v19 }
 0x1b7   :  { %v17915_v45 = vpack.c.bf16 %v2568_v6, %v2564_v52  ;;  %v17917_v43 = vsub.f32 %v1135_v49, %v2568_v6  ;;  %14309 = vmatprep.subr.bf16.mxu0 %v23244_v27  ;;  %v17935_v27 = vand.u32 4294901760, %v17910_v36  ;;  %v17938_v6 = vsub.f32 %v1261_v16, %v17912_v20  ;;  %23247 = vst [vmem:[#allocation128_spill] sm:$0xff] %v17940_v62 }
 0x1b8   :  { %v17943_v49 = vand.u32 4294901760, %v1141_v33  ;;  %v17950_v18 = vand.u32 4294901760, %v1444_v29 }
 0x1b9   :  { %23241 = vst [vmem:[#allocation127_spill] sm:$0xff] %v17915_v45  ;;  %14407 = vmatpush1.bf16.msra.mxu1 %v17915_v45  ;;  %v2865_v52 = vand.u32 4294901760, %v17917_v43  ;;  %1424 = vmatmul.mubr.f32.gmra.mrb[12].mxu0 %v17904_v9  ;;  %23245 = vst [vmem:[#allocation8_spill] sm:$0xff] %v17935_v27  ;;  %v1455_v16 = vsub.f32 %v17910_v36, %v17935_v27  ;;  %v17955_v60 = vand.u32 4294901760, %v17938_v6 }
 0x1ba   :  { %2571 = vmatprep.subr.mxu1 %v17923_v58  ;;  %23246 = vst [vmem:[#allocation6_spill] sm:$0xff] %v17938_v6  ;;  %1429 = vmatprep.mubr.f32.mxu0 %v23218_v32  ;;  %v17958_v45 = vsub.f32 %v1264_v44, %v17940_v62 }
 0x1bb   :  { %v17945_v0 = vpack.c.bf16 %v2865_v52, %v2853_v59  ;;  %23249 = vst [vmem:[#allocation130_spill] sm:$0xff] %v17955_v60  ;;  %v17967_v29 = vand.u32 4294901760, %v1455_v16  ;;  %v1466_v44 = vsub.f32 %v17938_v6, %v17955_v60  ;;  %v2848_v16 = vsub.f32 %v17854_v10, %v2847_v53 }
 0x1bc   :  { %23250 = vst [vmem:[#allocation131_spill] sm:$0xff] %v17958_v45 }
 0x1bd   :  { %23248 = vst [vmem:[#allocation129_spill] sm:$0xff] %v17945_v0  ;;  %2573 = vmatpush1.msra.mxu1 %v17943_v49  ;;  %1435 = vmatmul.mubr.f32.gmra.mrb[14].mxu0 %v17926_v39  ;;  %v17990_v0 = vand.u32 4294901760, %v1466_v44  ;;  %v2849_v53 = vand.u32 4294901760, %v2848_v16 }
 0x1be   :  { %2622 = vmatmul.mubr.f32.vlgmr.msra.gmra.mrb[0].mxu1 %v17729_v26  ;;  %14409 = vmatprep.subr.bf16.mxu1 %v23251_v40  ;;  %v17972_v26 = vand.u32 4294901760, %v17958_v45  ;;  %v17980_v40 = vsub.f32 %v1142_v47, %v17923_v58  ;;  %v2866_v47 = vsub.f32 %v17917_v43, %v2865_v52 }
 0x1bf   :  { %1440 = vmatprep.mubr.f32.mxu0 %v23218_v32  ;;  %14411 = vmatpush1.bf16.msra.mxu1 %v17125_v46  ;;  %v23253_v46 = vand.u32 4294901760, %v17865_v25 }
 0x1c0   :  { %2627 = vmatprep.mubr.f32.mxu1 %v23218_v32  ;;  %14413 = vmatprep.subr.bf16.mxu1 %v17292_v24  ;;  %23252 = vst [vmem:[#allocation27_spill] sm:$0xff] %v17972_v26  ;;  %v2867_v52 = vand.u32 4294901760, %v2866_v47 }
 0x1c1   :  { %1446 = vmatmul.mubr.f32.gmra.mrb[16].mxu0 %v17950_v18  ;;  %v2860_v24 = vsub.f32 %v17865_v25, %v23253_v46  ;;  %v1477_v46 = vsub.f32 %v17958_v45, %v17972_v26 }
 0x1c2   :  { %2633 = vmatmul.mubr.f32.gmra.mrb[2].mxu1 %v17758_v55  ;;  %1451 = vmatprep.mubr.f32.mxu0 %v23218_v32  ;;  %v17986_v55 = vsub.f32 %v1141_v33, %v17943_v49  ;;  %v2854_v33 = vsub.f32 %v17899_v19, %v2853_v59 }
 0x1c3   :  { %2638 = vmatprep.mubr.f32.mxu1 %v23218_v32  ;;  %14415 = vmatpush1.bf16.msra.mxu1 %v17328_v31  ;;  %v2861_v31 = vand.u32 4294901760, %v2860_v24  ;;  %v18003_v44 = vand.u32 4294901760, %v1477_v46  ;;  %v23256_v46 = vld [vmem:[#allocation12_spill] sm:$0xff] }
 0x1c4   :  { %14417 = vmatprep.subr.bf16.mxu1 %v17488_v2  ;;  %v22656_v2 = vand.u32 4294901760, %v17980_v40 }
 0x1c5   :  { %1457 = vmatmul.mubr.f32.gmra.mrb[18].mxu0 %v17967_v29  ;;  %23254 = vst [vmem:[#allocation132_spill] sm:$0xff] %v18003_v44  ;;  %v14424_v26 = vpack.c.bf16 %v2861_v31, %v2849_v53  ;;  %v23258_v31 = vpack.c.bf16 %v17149_v13, %v17123_v41  ;;  %v23260_v53 = vld [vmem:[#allocation20_spill] sm:$0xff]  ;;  %v23263_v41 = vpack.c.bf16 %v17356_v23, %v17336_v17 }
 0x1c6   :  { %2644 = vmatmul.mubr.f32.gmra.mrb[4].mxu1 %v17787_v48  ;;  %1462 = vmatprep.mubr.f32.mxu0 %v23218_v32  ;;  %v22655_v48 = vand.u32 4294901760, %v17986_v55  ;;  %v23264_v13 = vpack.c.bf16 %v17397_v3, %v17381_v4  ;;  %v23266_v17 = vpack.c.bf16 %v17545_v38, %v17527_v34  ;;  %v14326_v23 = vpack.c.bf16 %v17713_v56, %v17693_v50  ;;  %v23267_v4 = vld [vmem:[#allocation103_spill] sm:$0xff]  ;;  %v23269_v50 = vld [vmem:[#allocation110_spill] sm:$0xff]  ;;  %v23275_v56 = vld [vmem:[#allocation41_spill] sm:$0xff] }
 0x1c7   :  { %2649 = vmatprep.mubr.f32.mxu1 %v23218_v32  ;;  %14419 = vmatpush1.bf16.msra.mxu1 %v17506_v21  ;;  %v2872_v21 = vsub.f32 %v17980_v40, %v22656_v2  ;;  %v23268_v3 = vld [vmem:[#allocation7_spill] sm:$0xff]  ;;  %v23272_v34 = vld [vmem:[#allocation26_spill] sm:$0xff] }
 0x1c8   :  { %14421 = vmatprep.subr.bf16.mxu1 %v17609_v37  ;;  %v2855_v37 = vand.u32 4294901760, %v2854_v33  ;;  %v2878_v24 = vsub.f32 %v17986_v55, %v22655_v48  ;;  %v23259_v33 = vld [vmem:[#allocation24_spill] sm:$0xff]  ;;  %v23322_v48 = vld [vmem:[#allocation119_spill] sm:$0xff] }
 0x1c9   :  { %1468 = vmatmul.mubr.f32.gmra.mrb[20].mxu0 %v17990_v0  ;;  %v2873_v16 = vand.u32 4294901760, %v2872_v21  ;;  %v23262_v21 = vpack.c.bf16 %v17192_v51, %v17163_v14  ;;  %v23265_v14 = vpack.c.bf16 %v17517_v7, %v17504_v8  ;;  %v14324_v51 = vpack.c.bf16 %v17648_v22, %v17642_v11  ;;  %v23270_v8 = vld [vmem:[#allocation115_spill] sm:$0xff]  ;;  %v23271_v7 = vld [vmem:[#allocation29_spill] sm:$0xff] }
 0x1ca   :  { %2655 = vmatmul.mubr.f32.gmra.mrb[6].mxu1 %v17825_v1  ;;  %1473 = vmatprep.mubr.f32.mxu0 %v23218_v32  ;;  %v14426_v59 = vpack.c.bf16 %v2867_v52, %v2855_v37  ;;  %v23261_v52 = vpack.c.bf16 %v23259_v33, %v23260_v53  ;;  %v23273_v38 = vpack.c.bf16 %v23271_v7, %v23272_v34  ;;  %v23274_v11 = vld [vmem:[#allocation43_spill] sm:$0xff]  ;;  %v23277_v37 = vld [vmem:[#allocation118_spill] sm:$0xff]  ;;  %v23287_v53 = vld [vmem:[#allocation77_spill] sm:$0xff] }
 0x1cb   :  { %2660 = vmatprep.mubr.f32.mxu1 %v23218_v32  ;;  %14423 = vmatpush1.bf16.msra.mxu1 %v17627_v5  ;;  %v2879_v5 = vand.u32 4294901760, %v2878_v24  ;;  %v23276_v22 = vpack.c.bf16 %v23274_v11, %v23275_v56  ;;  %v23279_v24 = vld [vmem:[#allocation44_spill] sm:$0xff]  ;;  %v23298_v7 = vld [vmem:[#allocation37_spill] sm:$0xff]  ;;  %v23301_v11 = vld [vmem:[#allocation54_spill] sm:$0xff] }
 0x1cc   :  { %14425 = vmatprep.subr.bf16.mxu1 %v14424_v26  ;;  %v23255_v26 = vld [vmem:[#allocation15_spill] sm:$0xff]  ;;  %v23299_v34 = vld [vmem:[#allocation49_spill] sm:$0xff]  ;;  %v23302_v56 = vld [vmem:[#allocation66_spill] sm:$0xff] }
 0x1cd   :  { %1479 = vmatmul.mubr.f32.gmra.mrb[22].mxu0 %v18003_v44  ;;  %v23257_v47 = vpack.c.bf16 %v23255_v26, %v23256_v46  ;;  %v23282_v26 = vld [vmem:[#allocation58_spill] sm:$0xff]  ;;  %v23323_v2 = vld [vmem:[#allocation127_spill] sm:$0xff] }
 0x1ce   :  { %2666 = vmatmul.mubr.f32.gmra.mrb[8].mxu1 %v17850_v15  ;;  %1659 = vmatprep.mubr.f32.mxu0 %v23218_v32 }
 0x1cf   :  { %2671 = vmatprep.mubr.f32.mxu1 %v23218_v32  ;;  %14427 = vmatpush1.bf16.msra.mxu1 %v14426_v59  ;;  %v23278_v59 = vld [vmem:[#allocation47_spill] sm:$0xff] }
 0x1d0   :  { %2874 = vmatprep.subr.mxu1 %v2873_v16  ;;  %v23280_v16 = vpack.c.bf16 %v23278_v59, %v23279_v24  ;;  %v23304_v59 = vld [vmem:[#allocation71_spill] sm:$0xff] }
 0x1d1   :  { %1661 = vmatmul.mubr.f32.vlgmr.msra.gmra.mrb[0].mxu0 %v17644_v30  ;;  %v23305_v24 = vld [vmem:[#allocation83_spill] sm:$0xff] }
 0x1d2   :  { %2677 = vmatmul.mubr.f32.gmra.mrb[10].mxu1 %v17868_v28  ;;  %14311 = vmatpush1.bf16.msra.mxu0 %v23257_v47  ;;  %v23284_v47 = vld [vmem:[#allocation64_spill] sm:$0xff] }
 0x1d3   :  { %1666 = vmatprep.mubr.f32.mxu0 %v23218_v32  ;;  %14313 = vmatprep.subr.bf16.mxu0 %v23258_v31  ;;  %v23285_v31 = vld [vmem:[#allocation61_spill] sm:$0xff] }
 0x1d4   :  { %2880 = vmatpush1.msra.mxu1 %v2879_v5  ;;  %2682 = vmatprep.mubr.f32.mxu1 %v23218_v32  ;;  %v23281_v5 = vld [vmem:[#allocation60_spill] sm:$0xff]  ;;  %v23286_v33 = vpack.c.bf16 %v23284_v47, %v23285_v31  ;;  %v23310_v47 = vld [vmem:[#allocation102_spill] sm:$0xff] }
 0x1d5   :  { %14429 = vmatprep.subr.bf16.mxu1 %v23261_v52  ;;  %1668 = vmatmul.mubr.f32.gmra.mrb[2].mxu0 %v17661_v57  ;;  %v23283_v46 = vpack.c.bf16 %v23281_v5, %v23282_v26  ;;  %v23288_v52 = vld [vmem:[#allocation75_spill] sm:$0xff]  ;;  %v23308_v26 = vld [vmem:[#allocation96_spill] sm:$0xff]  ;;  %v23311_v31 = vld [vmem:[#allocation10_spill] sm:$0xff] }
 0x1d6   :  { %2688 = vmatmul.mubr.f32.gmra.mrb[12].mxu1 %v17904_v9  ;;  %14315 = vmatpush1.bf16.msra.mxu0 %v23262_v21  ;;  %v23289_v21 = vpack.c.bf16 %v23287_v53, %v23288_v52  ;;  %v23307_v5 = vld [vmem:[#allocation95_spill] sm:$0xff]  ;;  %v23313_v53 = vld [vmem:[#allocation117_spill] sm:$0xff]  ;;  %v23314_v52 = vld [vmem:[#allocation28_spill] sm:$0xff] }
 0x1d7   :  { %1673 = vmatprep.mubr.f32.mxu0 %v23218_v32  ;;  %14317 = vmatprep.subr.bf16.mxu0 %v23263_v41  ;;  %v14444_v41 = vpack.c.bf16 %v17865_v25, %v17854_v10  ;;  %v23293_v10 = vld [vmem:[#allocation84_spill] sm:$0xff]  ;;  %v23294_v25 = vld [vmem:[#allocation14_spill] sm:$0xff] }
 0x1d8   :  { %2693 = vmatprep.mubr.f32.mxu1 %v23218_v32 }
 0x1d9   :  { %1675 = vmatmul.mubr.f32.gmra.mrb[4].mxu0 %v17683_v12 }
 0x1da   :  { %2699 = vmatmul.mubr.f32.gmra.mrb[14].mxu1 %v17926_v39  ;;  %14319 = vmatpush1.bf16.msra.mxu0 %v23264_v13  ;;  %v23290_v13 = vld [vmem:[#allocation81_spill] sm:$0xff] }
 0x1db   :  { %1680 = vmatprep.mubr.f32.mxu0 %v23218_v32  ;;  %14321 = vmatprep.subr.bf16.mxu0 %v23265_v14  ;;  %v23291_v14 = vld [vmem:[#allocation78_spill] sm:$0xff] }
 0x1dc   :  { %2704 = vmatprep.mubr.f32.mxu1 %v23218_v32 }
 0x1dd   :  { %1682 = vmatmul.mubr.f32.gmra.mrb[6].mxu0 %v17706_v61 }
 0x1de   :  { %2710 = vmatmul.mubr.f32.gmra.mrb[16].mxu1 %v17950_v18  ;;  %14323 = vmatpush1.bf16.msra.mxu0 %v23266_v17  ;;  %v14446_v17 = vpack.c.bf16 %v17917_v43, %v17899_v19  ;;  %v23295_v19 = vld [vmem:[#allocation31_spill] sm:$0xff] }
 0x1df   :  { %1687 = vmatprep.mubr.f32.mxu0 %v23218_v32  ;;  %14325 = vmatprep.subr.bf16.mxu0 %v14324_v51  ;;  %v23292_v51 = vpack.c.bf16 %v23290_v13, %v23291_v14  ;;  %v23296_v43 = vld [vmem:[#allocation23_spill] sm:$0xff]  ;;  %v23317_v13 = vld [vmem:[#allocation46_spill] sm:$0xff] }
 0x1e0   :  { %2715 = vmatprep.mubr.f32.mxu1 %v23218_v32  ;;  %v23318_v14 = vld [vmem:[#allocation59_spill] sm:$0xff] }
 0x1e1   :  { %1689 = vmatmul.mubr.f32.gmra.mrb[8].mxu0 %v17721_v63 }
 0x1e2   :  { %2721 = vmatmul.mubr.f32.gmra.mrb[18].mxu1 %v17967_v29  ;;  %14327 = vmatpush1.bf16.msra.mxu0 %v14326_v23  ;;  %v23297_v23 = vld [vmem:[#allocation88_spill] sm:$0xff] }
 0x1e3   :  { %1694 = vmatprep.mubr.f32.mxu0 %v23218_v32  ;;  %1806 = vmatprep.subr.mxu0 %v17795_v54 }
 0x1e4   :  { %2726 = vmatprep.mubr.f32.mxu1 %v23218_v32 }
 0x1e5   :  { %1696 = vmatmul.mubr.f32.gmra.mrb[10].mxu0 %v23267_v4 }
 0x1e6   :  { %2732 = vmatmul.mubr.f32.gmra.mrb[20].mxu1 %v17990_v0  ;;  %1809 = vmatpush1.msra.mxu0 %v17819_v42 }
 0x1e7   :  { %1701 = vmatprep.mubr.f32.mxu0 %v23218_v32  ;;  %14329 = vmatprep.subr.bf16.mxu0 %v23268_v3 }
 0x1e8   :  { %2737 = vmatprep.mubr.f32.mxu1 %v23218_v32 }
 0x1e9   :  { %1703 = vmatmul.mubr.f32.gmra.mrb[12].mxu0 %v23269_v50 }
 0x1ea   :  { %2743 = vmatmul.mubr.f32.gmra.mrb[22].mxu1 %v18003_v44  ;;  %1708 = vmatprep.mubr.f32.mxu0 %v23218_v32  ;;  %v23329_v44 = vld [vmem:[#allocation39_spill] sm:$0xff] }
 0x1eb   :  { %2923 = vmatprep.mubr.f32.mxu1 %v23218_v32 }
 0x1ed   :  { %1710 = vmatmul.mubr.f32.gmra.mrb[14].mxu0 %v23270_v8 }
 0x1ee   :  { %2925 = vmatmul.mubr.f32.vlgmr.msra.gmra.mrb[0].mxu1 %v17644_v30  ;;  %1715 = vmatprep.mubr.f32.mxu0 %v23218_v32 }
 0x1ef   :  { %14431 = vmatpush1.bf16.msra.mxu1 %v23273_v38  ;;  %2930 = vmatprep.mubr.f32.mxu1 %v23218_v32  ;;  %v23300_v38 = vld [vmem:[#allocation92_spill] sm:$0xff] }
 0x1f0   :  { %14433 = vmatprep.subr.bf16.mxu1 %v23276_v22  ;;  %v23303_v22 = vld [vmem:[#allocation100_spill] sm:$0xff] }
 0x1f1   :  { %1717 = vmatmul.mubr.f32.gmra.mrb[16].mxu0 %v23277_v37 }
 0x1f2   :  { %2932 = vmatmul.mubr.f32.gmra.mrb[2].mxu1 %v17661_v57  ;;  %1722 = vmatprep.mubr.f32.mxu0 %v23218_v32 }
 0x1f3   :  { %14435 = vmatpush1.bf16.msra.mxu1 %v23280_v16  ;;  %2937 = vmatprep.mubr.f32.mxu1 %v23218_v32  ;;  %v23306_v16 = vld [vmem:[#allocation105_spill] sm:$0xff] }
 0x1f4   :  { %14437 = vmatprep.subr.bf16.mxu1 %v23283_v46  ;;  %v23309_v46 = vld [vmem:[#allocation109_spill] sm:$0xff] }
 0x1f5   :  { %1724 = vmatmul.mubr.f32.gmra.mrb[18].mxu0 %v17887_v35 }
 0x1f6   :  { %2939 = vmatmul.mubr.f32.gmra.mrb[4].mxu1 %v17683_v12  ;;  %1729 = vmatprep.mubr.f32.mxu0 %v23218_v32 }
 0x1f7   :  { %14439 = vmatpush1.bf16.msra.mxu1 %v23286_v33  ;;  %2944 = vmatprep.mubr.f32.mxu1 %v23218_v32  ;;  %v23312_v33 = vld [vmem:[#allocation114_spill] sm:$0xff] }
 0x1f8   :  { %14441 = vmatprep.subr.bf16.mxu1 %v23289_v21  ;;  %v23315_v21 = vld [vmem:[#allocation42_spill] sm:$0xff] }
 0x1f9   :  { %1731 = vmatmul.mubr.f32.gmra.mrb[20].mxu0 %v17912_v20 }
 0x1fa   :  { %2946 = vmatmul.mubr.f32.gmra.mrb[6].mxu1 %v17706_v61  ;;  %1736 = vmatprep.mubr.f32.mxu0 %v23218_v32 }
 0x1fb   :  { %14443 = vmatpush1.bf16.msra.mxu1 %v23292_v51  ;;  %2951 = vmatprep.mubr.f32.mxu1 %v23218_v32  ;;  %v23319_v51 = vld [vmem:[#allocation63_spill] sm:$0xff] }
 0x1fc   :  { %14445 = vmatprep.subr.bf16.mxu1 %v14444_v41  ;;  %v23316_v41 = vld [vmem:[#allocation121_spill] sm:$0xff] }
 0x1fd   :  { %1738 = vmatmul.mubr.f32.gmra.mrb[22].mxu0 %v17940_v62 }
 0x1fe   :  { %2953 = vmatmul.mubr.f32.gmra.mrb[8].mxu1 %v17721_v63  ;;  %1852 = vmatprep.mubr.f32.mxu0 %v23218_v32 }
 0x1ff   :  { %14447 = vmatpush1.bf16.msra.mxu1 %v14446_v17  ;;  %2958 = vmatprep.mubr.f32.mxu1 %v23218_v32  ;;  %v23320_v17 = vld [vmem:[#allocation76_spill] sm:$0xff] }
 0x200   :  { %3070 = vmatprep.subr.mxu1 %v17980_v40 }
 0x201   :  { %1855 = vmatmul.mubr.f32.vlgmr.msra.gmra.mrb[0].mxu0 %v23293_v10 }
 0x202   :  { %2960 = vmatmul.mubr.f32.gmra.mrb[10].mxu1 %v23267_v4  ;;  %14331 = vmatpush1.bf16.msra.mxu0 %v23294_v25 }
 0x203   :  { %3073 = vmatpush1.msra.mxu1 %v17986_v55  ;;  %14333 = vmatprep.subr.bf16.mxu0 %v23295_v19 }
 0x204   :  { %14449 = vmatprep.subr.bf16.mxu1 %v23296_v43  ;;  %1860 = vmatprep.mubr.f32.mxu0 %v23218_v32 }
 0x205   :  { %2965 = vmatprep.mubr.f32.mxu1 %v23218_v32  ;;  %1863 = vmatmul.mubr.f32.gmra.mrb[2].mxu0 %v23297_v23 }
 0x206   :  { %2967 = vmatmul.mubr.f32.gmra.mrb[12].mxu1 %v23269_v50  ;;  %14335 = vmatpush1.bf16.msra.mxu0 %v23298_v7 }
 0x207   :  { %1868 = vmatprep.mubr.f32.mxu0 %v23218_v32  ;;  %14337 = vmatprep.subr.bf16.mxu0 %v23299_v34 }
 0x208   :  { %2972 = vmatprep.mubr.f32.mxu1 %v23218_v32 }
 0x209   :  { %1871 = vmatmul.mubr.f32.gmra.mrb[4].mxu0 %v23300_v38 }
 0x20a   :  { %2974 = vmatmul.mubr.f32.gmra.mrb[14].mxu1 %v23270_v8  ;;  %14339 = vmatpush1.bf16.msra.mxu0 %v23301_v11 }
 0x20b   :  { %1876 = vmatprep.mubr.f32.mxu0 %v23218_v32  ;;  %14341 = vmatprep.subr.bf16.mxu0 %v23302_v56 }
 0x20c   :  { %2979 = vmatprep.mubr.f32.mxu1 %v23218_v32 }
 0x20d   :  { %1879 = vmatmul.mubr.f32.gmra.mrb[6].mxu0 %v23303_v22 }
 0x20e   :  { %2981 = vmatmul.mubr.f32.gmra.mrb[16].mxu1 %v23277_v37  ;;  %14343 = vmatpush1.bf16.msra.mxu0 %v23304_v59 }
 0x20f   :  { %1884 = vmatprep.mubr.f32.mxu0 %v23218_v32  ;;  %14345 = vmatprep.subr.bf16.mxu0 %v23305_v24 }
 0x210   :  { %2986 = vmatprep.mubr.f32.mxu1 %v23218_v32 }
 0x211   :  { %1887 = vmatmul.mubr.f32.gmra.mrb[8].mxu0 %v23306_v16 }
 0x212   :  { %2988 = vmatmul.mubr.f32.gmra.mrb[18].mxu1 %v17887_v35  ;;  %14347 = vmatpush1.bf16.msra.mxu0 %v23307_v5 }
 0x213   :  { %1892 = vmatprep.mubr.f32.mxu0 %v23218_v32  ;;  %1990 = vmatprep.subr.mxu0 %v23308_v26 }
 0x214   :  { %2993 = vmatprep.mubr.f32.mxu1 %v23218_v32 }
 0x215   :  { %1895 = vmatmul.mubr.f32.gmra.mrb[10].mxu0 %v23309_v46 }
 0x216   :  { %2995 = vmatmul.mubr.f32.gmra.mrb[20].mxu1 %v17912_v20  ;;  %1992 = vmatpush1.msra.mxu0 %v23310_v47 }
 0x217   :  { %1900 = vmatprep.mubr.f32.mxu0 %v23218_v32  ;;  %14349 = vmatprep.subr.bf16.mxu0 %v23311_v31  ;;  %v23321_v31 = vld [vmem:[#allocation80_spill] sm:$0xff] }
 0x218   :  { %3000 = vmatprep.mubr.f32.mxu1 %v23218_v32 }
 0x219   :  { %1903 = vmatmul.mubr.f32.gmra.mrb[12].mxu0 %v23312_v33 }
 0x21a   :  { %3002 = vmatmul.mubr.f32.gmra.mrb[22].mxu1 %v17940_v62  ;;  %1908 = vmatprep.mubr.f32.mxu0 %v23218_v32 }
 0x21b   :  { %3116 = vmatprep.mubr.f32.mxu1 %v23218_v32 }
 0x21d   :  { %1911 = vmatmul.mubr.f32.gmra.mrb[14].mxu0 %v23313_v53 }
 0x21e   :  { %3119 = vmatmul.mubr.f32.vlgmr.msra.gmra.mrb[0].mxu1 %v23293_v10  ;;  %1916 = vmatprep.mubr.f32.mxu0 %v23218_v32  ;;  %v23327_v10 = vld [vmem:[#allocation25_spill] sm:$0xff] }
 0x21f   :  { %14451 = vmatpush1.bf16.msra.mxu1 %v23314_v52  ;;  %3124 = vmatprep.mubr.f32.mxu1 %v23218_v32 }
 0x220   :  { %14453 = vmatprep.subr.bf16.mxu1 %v23315_v21 }
 0x221   :  { %1919 = vmatmul.mubr.f32.gmra.mrb[16].mxu0 %v23316_v41 }
 0x222   :  { %3127 = vmatmul.mubr.f32.gmra.mrb[2].mxu1 %v23297_v23  ;;  %1924 = vmatprep.mubr.f32.mxu0 %v23218_v32  ;;  %v23326_v23 = vld [vmem:[#allocation33_spill] sm:$0xff] }
 0x223   :  { %14455 = vmatpush1.bf16.msra.mxu1 %v23317_v13  ;;  %3132 = vmatprep.mubr.f32.mxu1 %v23218_v32 }
 0x224   :  { %14457 = vmatprep.subr.bf16.mxu1 %v23318_v14 }
 0x225   :  { %1927 = vmatmul.mubr.f32.gmra.mrb[18].mxu0 %v17910_v36 }
 0x226   :  { %3135 = vmatmul.mubr.f32.gmra.mrb[4].mxu1 %v23300_v38  ;;  %1932 = vmatprep.mubr.f32.mxu0 %v23218_v32  ;;  %v23325_v38 = vld [vmem:[#allocation17_spill] sm:$0xff] }
 0x227   :  { %14459 = vmatpush1.bf16.msra.mxu1 %v23319_v51  ;;  %3140 = vmatprep.mubr.f32.mxu1 %v23218_v32 }
 0x228   :  { %14461 = vmatprep.subr.bf16.mxu1 %v23320_v17 }
 0x229   :  { %1935 = vmatmul.mubr.f32.gmra.mrb[20].mxu0 %v17938_v6 }
 0x22a   :  { %3143 = vmatmul.mubr.f32.gmra.mrb[6].mxu1 %v23303_v22  ;;  %1940 = vmatprep.mubr.f32.mxu0 %v23218_v32  ;;  %v23324_v22 = vld [vmem:[#allocation87_spill] sm:$0xff] }
 0x22b   :  { %14463 = vmatpush1.bf16.msra.mxu1 %v23321_v31  ;;  %3148 = vmatprep.mubr.f32.mxu1 %v23218_v32 }
 0x22c   :  { %14465 = vmatprep.subr.bf16.mxu1 %v23322_v48 }
 0x22d   :  { %1943 = vmatmul.mubr.f32.gmra.mrb[22].mxu0 %v17958_v45 }
 0x22e   :  { %3151 = vmatmul.mubr.f32.gmra.mrb[8].mxu1 %v23306_v16  ;;  %2035 = vmatprep.mubr.f32.mxu0 %v23218_v32  ;;  %v23328_v16 = vld [vmem:[#allocation91_spill] sm:$0xff] }
 0x22f   :  { %14467 = vmatpush1.bf16.msra.mxu1 %v23323_v2  ;;  %3156 = vmatprep.mubr.f32.mxu1 %v23218_v32 }
 0x230   :  { %3254 = vmatprep.subr.mxu1 %v17923_v58 }
 0x231   :  { %2039 = vmatmul.mubr.f32.vlgmr.msra.gmra.mrb[0].mxu0 %v23324_v22 }
 0x232   :  { %3159 = vmatmul.mubr.f32.gmra.mrb[10].mxu1 %v23309_v46  ;;  %14351 = vmatpush1.bf16.msra.mxu0 %v23325_v38  ;;  %v23330_v46 = vld [vmem:[#allocation51_spill] sm:$0xff] }
 0x233   :  { %3256 = vmatpush1.msra.mxu1 %v17943_v49  ;;  %14353 = vmatprep.subr.bf16.mxu0 %v23326_v23  ;;  %v23331_v38 = vld [vmem:[#allocation99_spill] sm:$0xff]  ;;  %v23333_v23 = vld [vmem:[#allocation68_spill] sm:$0xff] }
 0x234   :  { %14469 = vmatprep.subr.bf16.mxu1 %v23327_v10  ;;  %2044 = vmatprep.mubr.f32.mxu0 %v23218_v32  ;;  %v23332_v10 = vld [vmem:[#allocation56_spill] sm:$0xff] }
 0x235   :  { %3164 = vmatprep.mubr.f32.mxu1 %v23218_v32  ;;  %2048 = vmatmul.mubr.f32.gmra.mrb[2].mxu0 %v23328_v16 }
 0x236   :  { %3167 = vmatmul.mubr.f32.gmra.mrb[12].mxu1 %v23312_v33  ;;  %14355 = vmatpush1.bf16.msra.mxu0 %v23329_v44  ;;  %v23334_v33 = vld [vmem:[#allocation107_spill] sm:$0xff]  ;;  %v23335_v44 = vld [vmem:[#allocation73_spill] sm:$0xff] }
 0x237   :  { %2053 = vmatprep.mubr.f32.mxu0 %v23218_v32  ;;  %14357 = vmatprep.subr.bf16.mxu0 %v23330_v46  ;;  %v23336_v46 = vld [vmem:[#allocation86_spill] sm:$0xff] }
 0x238   :  { %3172 = vmatprep.mubr.f32.mxu1 %v23218_v32 }
 0x239   :  { %2057 = vmatmul.mubr.f32.gmra.mrb[4].mxu0 %v23331_v38 }
 0x23a   :  { %3175 = vmatmul.mubr.f32.gmra.mrb[14].mxu1 %v23313_v53  ;;  %14359 = vmatpush1.bf16.msra.mxu0 %v23332_v10  ;;  %v23337_v53 = vld [vmem:[#allocation111_spill] sm:$0xff]  ;;  %v23338_v10 = vld [vmem:[#allocation104_spill] sm:$0xff] }
 0x23b   :  { %2062 = vmatprep.mubr.f32.mxu0 %v23218_v32  ;;  %14361 = vmatprep.subr.bf16.mxu0 %v23333_v23  ;;  %v23339_v23 = vand.u32 4294901760, %v17795_v54  ;;  %v23343_v54 = vld [vmem:[#allocation120_spill] sm:$0xff] }
 0x23c   :  { %3180 = vmatprep.mubr.f32.mxu1 %v23218_v32 }
 0x23d   :  { %2066 = vmatmul.mubr.f32.gmra.mrb[6].mxu0 %v23334_v33 }
 0x23e   :  { %3183 = vmatmul.mubr.f32.gmra.mrb[16].mxu1 %v23316_v41  ;;  %14363 = vmatpush1.bf16.msra.mxu0 %v23335_v44  ;;  %v23340_v44 = vld [vmem:[#allocation113_spill] sm:$0xff] }
 0x23f   :  { %2071 = vmatprep.mubr.f32.mxu0 %v23218_v32  ;;  %14365 = vmatprep.subr.bf16.mxu0 %v23336_v46  ;;  %v23341_v46 = vand.u32 4294901760, %v17819_v42  ;;  %v23344_v42 = vld [vmem:[#allocation30_spill] sm:$0xff]  ;;  %v23452_v41 = vld [vmem:[#allocation9_spill] sm:$0xff] }
 0x240   :  { %3188 = vmatprep.mubr.f32.mxu1 %v23218_v32 }
 0x241   :  { %2075 = vmatmul.mubr.f32.gmra.mrb[8].mxu0 %v23337_v53 }
 0x242   :  { %3191 = vmatmul.mubr.f32.gmra.mrb[18].mxu1 %v17910_v36  ;;  %14367 = vmatpush1.bf16.msra.mxu0 %v23338_v10  ;;  %v23342_v10 = vld [vmem:[#allocation116_spill] sm:$0xff] }
 0x243   :  { %2080 = vmatprep.mubr.f32.mxu0 %v23218_v32  ;;  %2227 = vmatprep.subr.mxu0 %v23339_v23  ;;  %v23345_v23 = vld [vmem:[#allocation45_spill] sm:$0xff] }
 0x244   :  { %3196 = vmatprep.mubr.f32.mxu1 %v23218_v32 }
 0x245   :  { %2084 = vmatmul.mubr.f32.gmra.mrb[10].mxu0 %v23340_v44 }
 0x246   :  { %3199 = vmatmul.mubr.f32.gmra.mrb[20].mxu1 %v17938_v6  ;;  %2231 = vmatpush1.msra.mxu0 %v23341_v46  ;;  %v23347_v46 = vld [vmem:[#allocation48_spill] sm:$0xff] }
 0x247   :  { %2089 = vmatprep.mubr.f32.mxu0 %v23218_v32  ;;  %14369 = vmatprep.subr.bf16.mxu0 %v23268_v3  ;;  %v23346_v3 = vld [vmem:[#allocation124_spill] sm:$0xff] }
 0x248   :  { %3204 = vmatprep.mubr.f32.mxu1 %v23218_v32 }
 0x249   :  { %2093 = vmatmul.mubr.f32.gmra.mrb[12].mxu0 %v23342_v10 }
 0x24a   :  { %3207 = vmatmul.mubr.f32.gmra.mrb[22].mxu1 %v17958_v45  ;;  %2098 = vmatprep.mubr.f32.mxu0 %v23218_v32  ;;  %v23348_v45 = vld [vmem:[#allocation62_spill] sm:$0xff] }
 0x24b   :  { %3299 = vmatprep.mubr.f32.mxu1 %v23218_v32 }
 0x24d   :  { %2102 = vmatmul.mubr.f32.gmra.mrb[14].mxu0 %v23343_v54 }
 0x24e   :  { %3303 = vmatmul.mubr.f32.vlgmr.msra.gmra.mrb[0].mxu1 %v23324_v22  ;;  %2107 = vmatprep.mubr.f32.mxu0 %v23218_v32 }
 0x24f   :  { %14471 = vmatpush1.bf16.msra.mxu1 %v23344_v42  ;;  %3308 = vmatprep.mubr.f32.mxu1 %v23218_v32  ;;  %v23349_v42 = vld [vmem:[#allocation65_spill] sm:$0xff] }
 0x250   :  { %14473 = vmatprep.subr.bf16.mxu1 %v23345_v23  ;;  %v23350_v23 = vld [vmem:[#allocation79_spill] sm:$0xff] }
 0x251   :  { %2111 = vmatmul.mubr.f32.gmra.mrb[16].mxu0 %v23346_v3 }
 0x252   :  { %3312 = vmatmul.mubr.f32.gmra.mrb[2].mxu1 %v23328_v16  ;;  %2116 = vmatprep.mubr.f32.mxu0 %v23218_v32 }
 0x253   :  { %14475 = vmatpush1.bf16.msra.mxu1 %v23347_v46  ;;  %3317 = vmatprep.mubr.f32.mxu1 %v23218_v32  ;;  %v23351_v46 = vld [vmem:[#allocation82_spill] sm:$0xff] }
 0x254   :  { %14477 = vmatprep.subr.bf16.mxu1 %v23348_v45  ;;  %v23352_v45 = vld [vmem:[#allocation123_spill] sm:$0xff] }
 0x255   :  { %2120 = vmatmul.mubr.f32.gmra.mrb[18].mxu0 %v17935_v27 }
 0x256   :  { %3321 = vmatmul.mubr.f32.gmra.mrb[4].mxu1 %v23331_v38  ;;  %2125 = vmatprep.mubr.f32.mxu0 %v23218_v32  ;;  %v16541_v38 = vmov 0  }
 0x257   :  { %14479 = vmatpush1.bf16.msra.mxu1 %v23349_v42  ;;  %3326 = vmatprep.mubr.f32.mxu1 %v23218_v32  ;;  %v23353_v42 = vld [vmem:[#allocation27_spill] sm:$0xff] }
 0x258   :  { %14481 = vmatprep.subr.bf16.mxu1 %v23350_v23  ;;  %16384 = vset.pattern.permute.xlu0 %v16541_v38  ;;  %v1157_v23 = vld [vmem:[%s22468_s3] sm:$0xff] }
 0x259   :  { %2129 = vmatmul.mubr.f32.gmra.mrb[20].mxu0 %v17955_v60  ;;  %16385 = vset.pattern.permute.xlu1 %v16541_v38  ;;  %v23356_v38 = vand.u32 4294901760, %v17986_v55  ;;  %v1160_v55 = vld [vmem:[%s22468_s3 + $0x18] sm:$0xff] }
 0x25a   :  { %3330 = vmatmul.mubr.f32.gmra.mrb[6].mxu1 %v23334_v33  ;;  %2134 = vmatprep.mubr.f32.mxu0 %v23218_v32  ;;  %v23354_v33 = vld [vmem:[#allocation129_spill] sm:$0xff] }
 0x25b   :  { %14483 = vmatpush1.bf16.msra.mxu1 %v23351_v46  ;;  %3335 = vmatprep.mubr.f32.mxu1 %v23218_v32  ;;  %v1158_v46 = vld [vmem:[%s22468_s3 + $0x8] sm:$0xff] }
 0x25c   :  { %14485 = vmatprep.subr.bf16.mxu1 %v23352_v45  ;;  %v23355_v45 = vand.u32 4294901760, %v17980_v40  ;;  %1171 = vperm.xlu0 %16384, %v1157_v23   ;;  %v1159_v40 = vld [vmem:[%s22468_s3 + $0x10] sm:$0xff] }
 0x25d   :  { %2138 = vmatmul.mubr.f32.gmra.mrb[22].mxu0 %v23353_v42  ;;  %1176 = vperm.xlu1 %16385, %v1158_v46  }
 0x25e   :  { %3339 = vmatmul.mubr.f32.gmra.mrb[8].mxu1 %v23337_v53  ;;  %2274 = vmatprep.mubr.f32.mxu0 %v23218_v32 }
 0x25f   :  { %14487 = vmatpush1.bf16.msra.mxu1 %v23354_v33  ;;  %3344 = vmatprep.mubr.f32.mxu1 %v23218_v32 }
 0x260   :  { %3491 = vmatprep.subr.mxu1 %v23355_v45  ;;  %1186 = vperm.xlu0 %16384, %v1160_v55   ;;  %v5130_v45 = vld [vmem:[%s22466_s1] sm:$0x7] }
 0x261   :  { %2276 = vmatmul.mubr.f32.vlgmr.msra.gmra.mrb[0].mxu0 %v17644_v30  ;;  %1181 = vperm.xlu1 %16385, %v1159_v40  }
 0x262   :  { %3348 = vmatmul.mubr.f32.gmra.mrb[10].mxu1 %v23340_v44  ;;  %14371 = vmatpush1.bf16.msra.mxu0 %v23294_v25  ;;  %v1161_v25 = vld [vmem:[%s22468_s3 + $0x20] sm:$0xff] }
 0x263   :  { %3495 = vmatpush1.msra.mxu1 %v23356_v38  ;;  %14373 = vmatprep.subr.bf16.mxu0 %v23295_v19  ;;  %v1162_v19 = vld [vmem:[%s22468_s3 + $0x28] sm:$0xff] }
 0x264   :  { %14489 = vmatprep.subr.bf16.mxu1 %v23296_v43  ;;  %2281 = vmatprep.mubr.f32.mxu0 %v23218_v32  ;;  %v1163_v43 = vld [vmem:[%s22468_s3 + $0x30] sm:$0xff] }
 0x265   :  { %3353 = vmatprep.mubr.f32.mxu1 %v23218_v32  ;;  %2283 = vmatmul.mubr.f32.gmra.mrb[2].mxu0 %v17661_v57 }
 0x266   :  { %3357 = vmatmul.mubr.f32.gmra.mrb[12].mxu1 %v23342_v10  ;;  %14375 = vmatpush1.bf16.msra.mxu0 %v23298_v7  ;;  %v1164_v7 = vld [vmem:[%s22468_s3 + $0x38] sm:$0xff] }
 0x267   :  { %2288 = vmatprep.mubr.f32.mxu0 %v23218_v32  ;;  %14377 = vmatprep.subr.bf16.mxu0 %v23299_v34  ;;  %v1166_v34 = vld [vmem:[%s22468_s3 + $0x48] sm:$0xff] }
 0x268   :  { %3362 = vmatprep.mubr.f32.mxu1 %v23218_v32  ;;  %1191 = vperm.xlu1 %16385, %v1161_v25  }
 0x269   :  { %2290 = vmatmul.mubr.f32.gmra.mrb[4].mxu0 %v17683_v12  ;;  %1196 = vperm.xlu0 %16384, %v1162_v19  }
 0x26a   :  { %3366 = vmatmul.mubr.f32.gmra.mrb[14].mxu1 %v23343_v54  ;;  %14379 = vmatpush1.bf16.msra.mxu0 %v23301_v11  ;;  %v1165_v11 = vld [vmem:[%s22468_s3 + $0x40] sm:$0xff] }
 0x26b   :  { %2295 = vmatprep.mubr.f32.mxu0 %v23218_v32  ;;  %14381 = vmatprep.subr.bf16.mxu0 %v23302_v56  ;;  %v1168_v56 = vld [vmem:[%s22468_s3 + $0x58] sm:$0xff] }
 0x26c   :  { %3371 = vmatprep.mubr.f32.mxu1 %v23218_v32  ;;  %1201 = vperm.xlu1 %16385, %v1163_v43  }
 0x26d   :  { %2297 = vmatmul.mubr.f32.gmra.mrb[6].mxu0 %v17706_v61  ;;  %1206 = vperm.xlu0 %16384, %v1164_v7  }
 0x26e   :  { %3375 = vmatmul.mubr.f32.gmra.mrb[16].mxu1 %v23346_v3  ;;  %14383 = vmatpush1.bf16.msra.mxu0 %v23304_v59  ;;  %v1167_v59 = vld [vmem:[%s22468_s3 + $0x50] sm:$0xff] }
 0x26f   :  { %2302 = vmatprep.mubr.f32.mxu0 %v23218_v32  ;;  %14385 = vmatprep.subr.bf16.mxu0 %v23305_v24 }
 0x270   :  { %3380 = vmatprep.mubr.f32.mxu1 %v23218_v32  ;;  %1211 = vperm.xlu1 %16385, %v1165_v11  }
 0x271   :  { %2304 = vmatmul.mubr.f32.gmra.mrb[8].mxu0 %v17721_v63  ;;  %1216 = vperm.xlu0 %16384, %v1166_v34  }
 0x272   :  { %3384 = vmatmul.mubr.f32.gmra.mrb[18].mxu1 %v17935_v27  ;;  %14387 = vmatpush1.bf16.msra.mxu0 %v23307_v5 }
 0x273   :  { %2309 = vmatprep.mubr.f32.mxu0 %v23218_v32  ;;  %2400 = vmatprep.subr.mxu0 %v23308_v26  ;;  %v5132_v26 = vlaneseq }
 0x274   :  { %3389 = vmatprep.mubr.f32.mxu1 %v23218_v32  ;;  %1221 = vperm.xlu1 %16385, %v1167_v59  }
 0x275   :  { %2311 = vmatmul.mubr.f32.gmra.mrb[10].mxu0 %v23267_v4  ;;  %1226 = vperm.xlu0 %16384, %v1168_v56  }
 0x276   :  { %3393 = vmatmul.mubr.f32.gmra.mrb[20].mxu1 %v17955_v60  ;;  %2402 = vmatpush1.msra.mxu0 %v23310_v47 }
 0x277   :  { %2316 = vmatprep.mubr.f32.mxu0 %v23218_v32  ;;  %3398 = vmatprep.mubr.f32.mxu1 %v23218_v32 }
 0x279   :  { %2318 = vmatmul.mubr.f32.gmra.mrb[12].mxu0 %v23269_v50 }
 0x27a   :  { %3402 = vmatmul.mubr.f32.gmra.mrb[22].mxu1 %v23353_v42  ;;  %2323 = vmatprep.mubr.f32.mxu0 %v23218_v32 }
 0x27b   :  { %3538 = vmatprep.mubr.f32.mxu1 %v23218_v32 }
 0x27d   :  { %2325 = vmatmul.mubr.f32.gmra.mrb[14].mxu0 %v23270_v8 }
 0x27e   :  { %3540 = vmatmul.mubr.f32.vlgmr.msra.gmra.mrb[0].mxu1 %v17644_v30  ;;  %2330 = vmatprep.mubr.f32.mxu0 %v23218_v32 }
 0x27f   :  { %14491 = vmatpush1.bf16.msra.mxu1 %v23314_v52  ;;  %3545 = vmatprep.mubr.f32.mxu1 %v23218_v32  ;;  %v5133_v52 = vshrl.u32 %v5132_v26, 7 }
 0x280   :  { %14493 = vmatprep.subr.bf16.mxu1 %v23315_v21 }
 0x281   :  { %2332 = vmatmul.mubr.f32.gmra.mrb[16].mxu0 %v23277_v37  ;;  %v5138_v23 = vsub.s32 1, %v5133_v52 }
 0x282   :  { %3547 = vmatmul.mubr.f32.gmra.mrb[2].mxu1 %v17661_v57  ;;  %2337 = vmatprep.mubr.f32.mxu0 %v23218_v32 }
 0x283   :  { %14495 = vmatpush1.bf16.msra.mxu1 %v23317_v13  ;;  %3552 = vmatprep.mubr.f32.mxu1 %v23218_v32  ;;  %v18462_v43 = vrot.slane %v5130_v45, %v5138_v23 }
 0x284   :  { %14497 = vmatprep.subr.bf16.mxu1 %v23318_v14 }
 0x285   :  { %2339 = vmatmul.mubr.f32.gmra.mrb[18].mxu0 %v17887_v35  ;;  %23362 = vst [vmem:[#allocation29_spill] sm:$0xff] %v18462_v43 }
 0x286   :  { %3554 = vmatmul.mubr.f32.gmra.mrb[4].mxu1 %v17683_v12  ;;  %2344 = vmatprep.mubr.f32.mxu0 %v23218_v32 }
 0x287   :  { %14499 = vmatpush1.bf16.msra.mxu1 %v23319_v51  ;;  %3559 = vmatprep.mubr.f32.mxu1 %v23218_v32 }
 0x288   :  { %14501 = vmatprep.subr.bf16.mxu1 %v23320_v17  ;;  %v5134_v17 = vsub.s32 0, %v5133_v52 }
 0x289   :  { %2346 = vmatmul.mubr.f32.gmra.mrb[20].mxu0 %v17912_v20 }
 0x28a   :  { %3561 = vmatmul.mubr.f32.gmra.mrb[6].mxu1 %v17706_v61  ;;  %2351 = vmatprep.mubr.f32.mxu0 %v23218_v32  ;;  %v18459_v25 = vrot.slane %v5130_v45, %v5134_v17 }
 0x28b   :  { %14503 = vmatpush1.bf16.msra.mxu1 %v23321_v31  ;;  %3566 = vmatprep.mubr.f32.mxu1 %v23218_v32 }
 0x28c   :  { %14505 = vmatprep.subr.bf16.mxu1 %v23322_v48  ;;  %23361 = vst [vmem:[#allocation7_spill] sm:$0xff] %v18459_v25 }
 0x28d   :  { %2353 = vmatmul.mubr.f32.gmra.mrb[22].mxu0 %v17940_v62 }
 0x28e   :  { %3568 = vmatmul.mubr.f32.gmra.mrb[8].mxu1 %v17721_v63  ;;  %2445 = vmatprep.mubr.f32.mxu0 %v23218_v32 }
 0x28f   :  { %14507 = vmatpush1.bf16.msra.mxu1 %v23323_v2  ;;  %3573 = vmatprep.mubr.f32.mxu1 %v23218_v32 }
 0x290   :  { %3664 = vmatprep.subr.mxu1 %v17923_v58 }
 0x291   :  { %2447 = vmatmul.mubr.f32.vlgmr.msra.gmra.mrb[0].mxu0 %v17644_v30 }
 0x292   :  { %3575 = vmatmul.mubr.f32.gmra.mrb[10].mxu1 %v23267_v4  ;;  %2452 = vmatprep.mubr.f32.mxu0 %v23218_v32 }
 0x293   :  { %3666 = vmatpush1.msra.mxu1 %v17943_v49  ;;  %3580 = vmatprep.mubr.f32.mxu1 %v23218_v32 }
 0x295   :  { %2454 = vmatmul.mubr.f32.gmra.mrb[2].mxu0 %v17661_v57 }
 0x296   :  { %3582 = vmatmul.mubr.f32.gmra.mrb[12].mxu1 %v23269_v50  ;;  %2459 = vmatprep.mubr.f32.mxu0 %v23218_v32 }
 0x297   :  { %3587 = vmatprep.mubr.f32.mxu1 %v23218_v32 }
 0x299   :  { %2461 = vmatmul.mubr.f32.gmra.mrb[4].mxu0 %v17683_v12 }
 0x29a   :  { %3589 = vmatmul.mubr.f32.gmra.mrb[14].mxu1 %v23270_v8  ;;  %2466 = vmatprep.mubr.f32.mxu0 %v23218_v32 }
 0x29b   :  { %3594 = vmatprep.mubr.f32.mxu1 %v23218_v32 }
 0x29d   :  { %2468 = vmatmul.mubr.f32.gmra.mrb[6].mxu0 %v17706_v61 }
 0x29e   :  { %3596 = vmatmul.mubr.f32.gmra.mrb[16].mxu1 %v23277_v37  ;;  %2473 = vmatprep.mubr.f32.mxu0 %v23218_v32 }
 0x29f   :  { %3601 = vmatprep.mubr.f32.mxu1 %v23218_v32 }
 0x2a1   :  { %2475 = vmatmul.mubr.f32.gmra.mrb[8].mxu0 %v17721_v63 }
 0x2a2   :  { %3603 = vmatmul.mubr.f32.gmra.mrb[18].mxu1 %v17887_v35  ;;  %2480 = vmatprep.mubr.f32.mxu0 %v23218_v32 }
 0x2a3   :  { %3608 = vmatprep.mubr.f32.mxu1 %v23218_v32 }
 0x2a5   :  { %2482 = vmatmul.mubr.f32.gmra.mrb[10].mxu0 %v23267_v4 }
 0x2a6   :  { %3610 = vmatmul.mubr.f32.gmra.mrb[20].mxu1 %v17912_v20  ;;  %2487 = vmatprep.mubr.f32.mxu0 %v23218_v32 }
 0x2a7   :  { %3615 = vmatprep.mubr.f32.mxu1 %v23218_v32 }
 0x2a9   :  { %2489 = vmatmul.mubr.f32.gmra.mrb[12].mxu0 %v23269_v50 }
 0x2aa   :  { %3617 = vmatmul.mubr.f32.gmra.mrb[22].mxu1 %v17940_v62  ;;  %2494 = vmatprep.mubr.f32.mxu0 %v23218_v32 }
 0x2ab   :  { %3709 = vmatprep.mubr.f32.mxu1 %v23218_v32 }
 0x2ad   :  { %2496 = vmatmul.mubr.f32.gmra.mrb[14].mxu0 %v23270_v8 }
 0x2ae   :  { %3711 = vmatmul.mubr.f32.vlgmr.msra.gmra.mrb[0].mxu1 %v17644_v30  ;;  %2501 = vmatprep.mubr.f32.mxu0 %v23218_v32 }
 0x2af   :  { %3716 = vmatprep.mubr.f32.mxu1 %v23218_v32 }
 0x2b1   :  { %2503 = vmatmul.mubr.f32.gmra.mrb[16].mxu0 %v23277_v37 }
 0x2b2   :  { %3718 = vmatmul.mubr.f32.gmra.mrb[2].mxu1 %v17661_v57  ;;  %2508 = vmatprep.mubr.f32.mxu0 %v23218_v32 }
 0x2b3   :  { %3723 = vmatprep.mubr.f32.mxu1 %v23218_v32 }
 0x2b5   :  { %2510 = vmatmul.mubr.f32.gmra.mrb[18].mxu0 %v17887_v35 }
 0x2b6   :  { %3725 = vmatmul.mubr.f32.gmra.mrb[4].mxu1 %v17683_v12  ;;  %2515 = vmatprep.mubr.f32.mxu0 %v23218_v32  ;;  %v23456_v12 = vld [vmem:[#allocation13_spill] sm:$0xff] }
 0x2b7   :  { %3730 = vmatprep.mubr.f32.mxu1 %v23218_v32 }
 0x2b9   :  { %2517 = vmatmul.mubr.f32.gmra.mrb[20].mxu0 %v17912_v20 }
 0x2ba   :  { %3732 = vmatmul.mubr.f32.gmra.mrb[6].mxu1 %v17706_v61  ;;  %2522 = vmatprep.mubr.f32.mxu0 %v23218_v32 }
 0x2bb   :  { %3737 = vmatprep.mubr.f32.mxu1 %v23218_v32 }
 0x2bd   :  { %2524 = vmatmul.mubr.f32.gmra.mrb[22].mxu0 %v17940_v62 }
 0x2be   :  { %3739 = vmatmul.mubr.f32.gmra.mrb[8].mxu1 %v17721_v63  ;;  %3880 = vmatprep.mubr.f32.mxu0 %v23218_v32 }
 0x2bf   :  { %3744 = vmatprep.mubr.f32.mxu1 %v23218_v32 }
 0x2c2   :  { %3746 = vmatmul.mubr.f32.gmra.mrb[10].mxu1 %v23267_v4 }
 0x2c3   :  { %3751 = vmatprep.mubr.f32.mxu1 %v23218_v32 }
 0x2c6   :  { %3753 = vmatmul.mubr.f32.gmra.mrb[12].mxu1 %v23269_v50 }
 0x2c7   :  { %3758 = vmatprep.mubr.f32.mxu1 %v23218_v32 }
 0x2ca   :  { %3760 = vmatmul.mubr.f32.gmra.mrb[14].mxu1 %v23270_v8 }
 0x2cb   :  { %3765 = vmatprep.mubr.f32.mxu1 %v23218_v32 }
 0x2ce   :  { %3767 = vmatmul.mubr.f32.gmra.mrb[16].mxu1 %v23277_v37 }
 0x2cf   :  { %3772 = vmatprep.mubr.f32.mxu1 %v23218_v32 }
 0x2d2   :  { %3774 = vmatmul.mubr.f32.gmra.mrb[18].mxu1 %v17887_v35 }
 0x2d3   :  { %3779 = vmatprep.mubr.f32.mxu1 %v23218_v32 }
 0x2d6   :  { %3781 = vmatmul.mubr.f32.gmra.mrb[20].mxu1 %v17912_v20 }
 0x2d7   :  { %3786 = vmatprep.mubr.f32.mxu1 %v23218_v32 }
 0x2da   :  { %3788 = vmatmul.mubr.f32.gmra.mrb[22].mxu1 %v17940_v62 }
 0x2db   :  { %v18441_v21 = vpop.permute.xlu0 %1171 }
 0x2dc   :  { %23357 = vst [vmem:[#allocation15_spill] sm:$0xff] %v18441_v21  ;;  %v18449_v46 = vpop.permute.xlu1 %1176 }
 0x2dd   :  { %23360 = vst [vmem:[#allocation20_spill] sm:$0xff] %v18449_v46 }
 0x2e0   :  { %v18472_v56 = vpop.permute.xlu1 %1181 }
 0x2e1   :  { %23365 = vst [vmem:[#allocation41_spill] sm:$0xff] %v18472_v56 }
 0x364   :  { %v2448_v48 = vpop.f32.mrb[0].mxu0 }
 0x365   :  { %v2450_v58 = vpop.f32.mrb[1].mxu0  ;;  %v18444_v51 = vadd.f32 %v2448_v48, %v18441_v21  ;;  %v5142_v48 = vsub.s32 2, %v5133_v52 }
 0x366   :  { %v18447_v31 = vadd.f32 %v2450_v58, %v18441_v21 }
 0x367   :  { %23358 = vst [vmem:[#allocation12_spill] sm:$0xff] %v18444_v51  ;;  %v22671_v55 = vmax.f32 %v18444_v51, 0.0 }
 0x368   :  { %v2455_v49 = vpop.f32.mrb[2].mxu0  ;;  %23359 = vst [vmem:[#allocation24_spill] sm:$0xff] %v18447_v31  ;;  %v22673_v19 = vmax.f32 %v18447_v31, 0.0 }
 0x369   :  { %v2457_v2 = vpop.f32.mrb[3].mxu0  ;;  %v18465_v7 = vadd.f32 %v2455_v49, %v18449_v46  ;;  %v5147_v58 = vmul.f32 %v18459_v25, %v22671_v55  ;;  %v18495_v55 = vrot.slane %v5130_v45, %v5142_v48  ;;  %v18501_v49 = vpop.permute.xlu0 %1186 }
 0x36a   :  { %v18468_v34 = vadd.f32 %v2457_v2, %v18449_v46  ;;  %v5148_v26 = vmul.f32 %v18462_v43, %v22673_v19  ;;  %23371 = vst [vmem:[#allocation61_spill] sm:$0xff] %v18501_v49 }
 0x36b   :  { %23363 = vst [vmem:[#allocation26_spill] sm:$0xff] %v18465_v7  ;;  %23369 = vst [vmem:[#allocation58_spill] sm:$0xff] %v18495_v55  ;;  %v23373_v60 = vmax.f32 %v18465_v7, 0.0 }
 0x36c   :  { %v2462_v24 = vpop.f32.mrb[4].mxu0  ;;  %23364 = vst [vmem:[#allocation43_spill] sm:$0xff] %v18468_v34  ;;  %v5183_v2 = vadd.f32 %v5148_v26, %v5147_v58 }
 0x36d   :  { %v2464_v5 = vpop.f32.mrb[5].mxu0  ;;  %v18485_v17 = vadd.f32 %v2462_v24, %v18472_v56  ;;  %v18503_v24 = vpop.permute.xlu1 %1191  ;;  %v5150_v27 = vmul.f32 %v18459_v25, %v23373_v60 }
 0x36e   :  { %v18488_v23 = vadd.f32 %v2464_v5, %v18472_v56  ;;  %23372 = vst [vmem:[#allocation77_spill] sm:$0xff] %v18503_v24  ;;  %v18538_v7 = vpop.permute.xlu0 %1196 }
 0x36f   :  { %23366 = vst [vmem:[#allocation47_spill] sm:$0xff] %v18485_v17  ;;  %23381 = vst [vmem:[#allocation37_spill] sm:$0xff] %v18538_v7 }
 0x370   :  { %v2469_v47 = vpop.f32.mrb[6].mxu0  ;;  %23367 = vst [vmem:[#allocation44_spill] sm:$0xff] %v18488_v23 }
 0x371   :  { %v2471_v33 = vpop.f32.mrb[7].mxu0  ;;  %v18517_v58 = vadd.f32 %v2469_v47, %v18501_v49 }
 0x372   :  { %v18520_v26 = vadd.f32 %v2471_v33, %v18501_v49 }
 0x373   :  { %23375 = vst [vmem:[#allocation75_spill] sm:$0xff] %v18517_v58 }
 0x374   :  { %v2476_v13 = vpop.f32.mrb[8].mxu0  ;;  %23376 = vst [vmem:[#allocation81_spill] sm:$0xff] %v18520_v26 }
 0x375   :  { %v2478_v14 = vpop.f32.mrb[9].mxu0 }
 0x376   :  { %v18536_v47 = vadd.f32 %v2478_v14, %v18503_v24 }
 0x378   :  { %v18454_v38 = vpop.f32.mrb[10].mxu0  ;;  %23380 = vst [vmem:[#allocation23_spill] sm:$0xff] %v18536_v47 }
 0x379   :  { %v18456_v40 = vpop.f32.mrb[11].mxu0 }
 0x37c   :  { %v18470_v11 = vpop.f32.mrb[12].mxu0 }
 0x37d   :  { %v18474_v59 = vpop.f32.mrb[13].mxu0 }
 0x380   :  { %v18490_v42 = vpop.f32.mrb[14].mxu0 }
 0x381   :  { %v3712_v52 = vpop.f32.mrb[0].mxu1  ;;  %v18497_v31 = vpop.f32.mrb[15].mxu0 }
 0x382   :  { %v18493_v51 = vadd.f32 %v3712_v52, %v18441_v21  ;;  %v18499_v19 = vpop.f32.mrb[1].mxu1  ;;  %v23374_v52 = vmax.f32 %v18468_v34, 0.0  ;;  %v18533_v21 = vadd.f32 %v2476_v13, %v18503_v24 }
 0x383   :  { %23370 = vst [vmem:[#allocation64_spill] sm:$0xff] %v18499_v19 }
 0x384   :  { %23368 = vst [vmem:[#allocation60_spill] sm:$0xff] %v18493_v51  ;;  %v22683_v5 = vmax.f32 %v18493_v51, 0.0  ;;  %v5151_v45 = vmul.f32 %v18462_v43, %v23374_v52  ;;  %v18514_v19 = vpop.f32.mrb[16].mxu0  ;;  %23379 = vst [vmem:[#allocation31_spill] sm:$0xff] %v18533_v21 }
 0x385   :  { %v3719_v3 = vpop.f32.mrb[2].mxu1  ;;  %v18528_v52 = vpop.f32.mrb[17].mxu0 }
 0x386   :  { %v5149_v60 = vmul.f32 %v18495_v55, %v22683_v5  ;;  %v18526_v34 = vadd.f32 %v3719_v3, %v18449_v46  ;;  %v18530_v48 = vpop.f32.mrb[3].mxu1  ;;  %v5187_v54 = vadd.f32 %v5151_v45, %v5150_v27  ;;  %v23382_v5 = vmax.f32 %v18485_v17, 0.0 }
 0x387   :  { %23378 = vst [vmem:[#allocation14_spill] sm:$0xff] %v18530_v48  ;;  %v23383_v46 = vmax.f32 %v18488_v23, 0.0  ;;  %v18563_v23 = vpop.permute.xlu1 %1201 }
 0x388   :  { %23377 = vst [vmem:[#allocation78_spill] sm:$0xff] %v18526_v34  ;;  %v22690_v33 = vmax.f32 %v18526_v34, 0.0  ;;  %v5184_v51 = vadd.f32 %v5183_v2, %v5149_v60  ;;  %v5153_v3 = vmul.f32 %v18459_v25, %v23382_v5  ;;  %v18547_v10 = vpop.f32.mrb[18].mxu0  ;;  %23386 = vst [vmem:[#allocation66_spill] sm:$0xff] %v18563_v23 }
 0x389   :  { %v5154_v48 = vmul.f32 %v18462_v43, %v23383_v46  ;;  %v3726_v13 = vpop.f32.mrb[4].mxu1  ;;  %v18557_v45 = vpop.f32.mrb[19].mxu0  ;;  %v23389_v46 = vmax.f32 %v18517_v58, 0.0 }
 0x38a   :  { %v5152_v2 = vmul.f32 %v18495_v55, %v22690_v33  ;;  %v18555_v27 = vadd.f32 %v3726_v13, %v18472_v56  ;;  %v18559_v5 = vpop.f32.mrb[5].mxu1  ;;  %5185 = vadd.xlane.f32.xlu1 %v5184_v51  ;;  %v18568_v33 = vadd.f32 %v18454_v38, %v18538_v7  ;;  %v18572_v13 = vadd.f32 %v18456_v40, %v18538_v7 }
 0x38b   :  { %23385 = vst [vmem:[#allocation54_spill] sm:$0xff] %v18559_v5  ;;  %v5191_v17 = vadd.f32 %v5154_v48, %v5153_v3  ;;  %v5156_v60 = vmul.f32 %v18459_v25, %v23389_v46  ;;  %v23390_v5 = vmax.f32 %v18520_v26, 0.0  ;;  %v23394_v26 = vmax.f32 %v18536_v47, 0.0 }
 0x38c   :  { %23384 = vst [vmem:[#allocation49_spill] sm:$0xff] %v18555_v27  ;;  %v22695_v44 = vmax.f32 %v18555_v27, 0.0  ;;  %v5188_v14 = vadd.f32 %v5187_v54, %v5152_v2  ;;  %23387 = vst [vmem:[#allocation71_spill] sm:$0xff] %v18568_v33  ;;  %v18574_v34 = vpop.f32.mrb[20].mxu0  ;;  %v23393_v2 = vmax.f32 %v18533_v21, 0.0 }
 0x38d   :  { %23388 = vst [vmem:[#allocation83_spill] sm:$0xff] %v18572_v13  ;;  %v3733_v51 = vpop.f32.mrb[6].mxu1  ;;  %v5157_v54 = vmul.f32 %v18462_v43, %v23390_v5  ;;  %v18588_v40 = vpop.f32.mrb[21].mxu0  ;;  %v5160_v5 = vmul.f32 %v18462_v43, %v23394_v26 }
 0x38e   :  { %v5155_v38 = vmul.f32 %v18495_v55, %v22695_v44  ;;  %v18586_v48 = vadd.f32 %v3733_v51, %v18501_v49  ;;  %v18590_v3 = vpop.f32.mrb[7].mxu1  ;;  %5189 = vadd.xlane.f32.xlu0 %v5188_v14  ;;  %v5159_v46 = vmul.f32 %v18459_v25, %v23393_v2  ;;  %v18603_v49 = vadd.f32 %v18470_v11, %v18563_v23  ;;  %v18621_v11 = vpop.permute.xlu0 %1206 }
 0x38f   :  { %23392 = vst [vmem:[#allocation96_spill] sm:$0xff] %v18590_v3  ;;  %v18607_v14 = vadd.f32 %v18474_v59, %v18563_v23  ;;  %v5195_v21 = vadd.f32 %v5157_v54, %v5156_v60  ;;  %23399 = vst [vmem:[#allocation46_spill] sm:$0xff] %v18621_v11  ;;  %v23400_v60 = vmax.f32 %v18568_v33, 0.0 }
 0x390   :  { %23391 = vst [vmem:[#allocation95_spill] sm:$0xff] %v18586_v48  ;;  %v22700_v27 = vmax.f32 %v18586_v48, 0.0  ;;  %v5192_v58 = vadd.f32 %v5191_v17, %v5155_v38  ;;  %23395 = vst [vmem:[#allocation102_spill] sm:$0xff] %v18603_v49  ;;  %v18609_v2 = vpop.f32.mrb[22].mxu0  ;;  %v5199_v59 = vadd.f32 %v5160_v5, %v5159_v46  ;;  %v18636_v46 = vadd.f32 %v18490_v42, %v18621_v11 }
 0x391   :  { %23396 = vst [vmem:[#allocation10_spill] sm:$0xff] %v18607_v14  ;;  %v3740_v47 = vpop.f32.mrb[8].mxu1  ;;  %v18617_v38 = vpop.f32.mrb[23].mxu0  ;;  %v5162_v54 = vmul.f32 %v18459_v25, %v23400_v60 }
 0x392   :  { %v5158_v17 = vmul.f32 %v18495_v55, %v22700_v27  ;;  %v18615_v26 = vadd.f32 %v3740_v47, %v18503_v24  ;;  %v18619_v51 = vpop.f32.mrb[9].mxu1  ;;  %5193 = vadd.xlane.f32.xlu0 %v5192_v58  ;;  %v23401_v27 = vmax.f32 %v18572_v13, 0.0  ;;  %23403 = vst [vmem:[#allocation63_spill] sm:$0xff] %v18636_v46 }
 0x393   :  { %23398 = vst [vmem:[#allocation42_spill] sm:$0xff] %v18619_v51  ;;  %v18632_v51 = vpop.permute.xlu1 %1211 }
 0x394   :  { %23397 = vst [vmem:[#allocation28_spill] sm:$0xff] %v18615_v26  ;;  %v22704_v44 = vmax.f32 %v18615_v26, 0.0  ;;  %v5196_v3 = vadd.f32 %v5195_v21, %v5158_v17  ;;  %v5163_v47 = vmul.f32 %v18462_v43, %v23401_v27  ;;  %23402 = vst [vmem:[#allocation59_spill] sm:$0xff] %v18632_v51  ;;  %v18640_v21 = vadd.f32 %v18497_v31, %v18621_v11 }
 0x395   :  { %v3747_v58 = vpop.f32.mrb[10].mxu1  ;;  %v18652_v60 = vadd.f32 %v18514_v19, %v18632_v51  ;;  %v18656_v42 = vadd.f32 %v18528_v52, %v18632_v51  ;;  %v23410_v26 = vmax.f32 %v18607_v14, 0.0  ;;  %v23416_v14 = vmax.f32 %v18636_v46, 0.0 }
 0x396   :  { %23404 = vst [vmem:[#allocation76_spill] sm:$0xff] %v18640_v21  ;;  %v5161_v5 = vmul.f32 %v18495_v55, %v22704_v44  ;;  %v18646_v27 = vadd.f32 %v3747_v58, %v18538_v7  ;;  %v18648_v17 = vpop.f32.mrb[11].mxu1  ;;  %5197 = vadd.xlane.f32.xlu1 %v5196_v3  ;;  %v5203_v48 = vadd.f32 %v5163_v47, %v5162_v54  ;;  %v23409_v44 = vmax.f32 %v18603_v49, 0.0 }
 0x397   :  { %23406 = vst [vmem:[#allocation119_spill] sm:$0xff] %v18648_v17  ;;  %23407 = vst [vmem:[#allocation127_spill] sm:$0xff] %v18652_v60  ;;  %v5166_v3 = vmul.f32 %v18462_v43, %v23410_v26  ;;  %v18667_v17 = vpop.permute.xlu0 %1216  ;;  %v18694_v47 = vpop.permute.xlu1 %1221 }
 0x398   :  { %23405 = vst [vmem:[#allocation80_spill] sm:$0xff] %v18646_v27  ;;  %23408 = vst [vmem:[#allocation17_spill] sm:$0xff] %v18656_v42  ;;  %v22708_v31 = vmax.f32 %v18646_v27, 0.0  ;;  %v5200_v24 = vadd.f32 %v5199_v59, %v5161_v5  ;;  %v5165_v58 = vmul.f32 %v18459_v25, %v23409_v44  ;;  %v18682_v19 = vadd.f32 %v18547_v10, %v18667_v17 }
 0x399   :  { %v3754_v13 = vpop.f32.mrb[12].mxu1  ;;  %23411 = vst [vmem:[#allocation33_spill] sm:$0xff] %v18667_v17  ;;  %v23417_v44 = vmax.f32 %v18640_v21, 0.0  ;;  %23418 = vst [vmem:[#allocation68_spill] sm:$0xff] %v18694_v47 }
 0x39a   :  { %v5164_v52 = vmul.f32 %v18495_v55, %v22708_v31  ;;  %v18673_v59 = vadd.f32 %v3754_v13, %v18563_v23  ;;  %v18675_v54 = vpop.f32.mrb[13].mxu1  ;;  %5201 = vadd.xlane.f32.xlu0 %v5200_v24  ;;  %v5207_v33 = vadd.f32 %v5166_v3, %v5165_v58  ;;  %23414 = vst [vmem:[#allocation51_spill] sm:$0xff] %v18682_v19  ;;  %v23422_v3 = vmax.f32 %v18652_v60, 0.0 }
 0x39b   :  { %23413 = vst [vmem:[#allocation39_spill] sm:$0xff] %v18675_v54  ;;  %v18686_v31 = vadd.f32 %v18557_v45, %v18667_v17  ;;  %v5168_v24 = vmul.f32 %v18459_v25, %v23416_v14  ;;  %v5169_v26 = vmul.f32 %v18462_v43, %v23417_v44 }
 0x39c   :  { %23412 = vst [vmem:[#allocation25_spill] sm:$0xff] %v18673_v59  ;;  %v5204_v5 = vadd.f32 %v5203_v48, %v5164_v52  ;;  %v23419_v48 = vmax.f32 %v18673_v59, 0.0  ;;  %v5171_v14 = vmul.f32 %v18459_v25, %v23422_v3  ;;  %v23423_v52 = vmax.f32 %v18656_v42, 0.0 }
 0x39d   :  { %23415 = vst [vmem:[#allocation56_spill] sm:$0xff] %v18686_v31  ;;  %v3761_v13 = vpop.f32.mrb[14].mxu1  ;;  %v5211_v60 = vadd.f32 %v5169_v26, %v5168_v24  ;;  %v23430_v24 = vmax.f32 %v18686_v31, 0.0 }
 0x39e   :  { %v5167_v10 = vmul.f32 %v18495_v55, %v23419_v48  ;;  %v18700_v58 = vadd.f32 %v3761_v13, %v18621_v11  ;;  %v18702_v45 = vpop.f32.mrb[15].mxu1  ;;  %5205 = vadd.xlane.f32.xlu1 %v5204_v5  ;;  %v5172_v44 = vmul.f32 %v18462_v43, %v23423_v52  ;;  %v18715_v13 = vadd.f32 %v18574_v34, %v18694_v47  ;;  %v18729_v48 = vpop.permute.xlu0 %1226 }
 0x39f   :  { %23421 = vst [vmem:[#allocation86_spill] sm:$0xff] %v18702_v45  ;;  %v18719_v5 = vadd.f32 %v18588_v40, %v18694_v47  ;;  %23428 = vst [vmem:[#allocation62_spill] sm:$0xff] %v18729_v48  ;;  %v23429_v40 = vmax.f32 %v18682_v19, 0.0 }
 0x3a0   :  { %23420 = vst [vmem:[#allocation73_spill] sm:$0xff] %v18700_v58  ;;  %v22715_v49 = vmax.f32 %v18700_v58, 0.0  ;;  %v5208_v21 = vadd.f32 %v5207_v33, %v5167_v10  ;;  %23424 = vst [vmem:[#allocation104_spill] sm:$0xff] %v18715_v13  ;;  %v5215_v34 = vadd.f32 %v5172_v44, %v5171_v14 }
 0x3a1   :  { %23425 = vst [vmem:[#allocation30_spill] sm:$0xff] %v18719_v5  ;;  %v3768_v3 = vpop.f32.mrb[16].mxu1  ;;  %v5174_v26 = vmul.f32 %v18459_v25, %v23429_v40 }
 0x3a2   :  { %v5170_v52 = vmul.f32 %v18495_v55, %v22715_v49  ;;  %v18725_v33 = vadd.f32 %v3768_v3, %v18632_v51  ;;  %v18727_v10 = vpop.f32.mrb[17].mxu1  ;;  %5209 = vadd.xlane.f32.xlu0 %v5208_v21  ;;  %v5175_v49 = vmul.f32 %v18462_v43, %v23430_v24  ;;  %v22721_v3 = vmax.f32 %v18715_v13, 0.0 }
 0x3a3   :  { %23427 = vst [vmem:[#allocation48_spill] sm:$0xff] %v18727_v10  ;;  %v18742_v21 = vadd.f32 %v18609_v2, %v18729_v48 }
 0x3a4   :  { %23426 = vst [vmem:[#allocation45_spill] sm:$0xff] %v18725_v33  ;;  %v22720_v59 = vmax.f32 %v18725_v33, 0.0  ;;  %v5212_v42 = vadd.f32 %v5211_v60, %v5170_v52  ;;  %v18746_v60 = vadd.f32 %v18617_v38, %v18729_v48  ;;  %v5219_v58 = vadd.f32 %v5175_v49, %v5174_v26 }
 0x3a5   :  { %v3775_v46 = vpop.f32.mrb[18].mxu1  ;;  %23431 = vst [vmem:[#allocation65_spill] sm:$0xff] %v18742_v21  ;;  %v5177_v2 = vmul.f32 %v18459_v25, %v22721_v3  ;;  %v23435_v38 = vmax.f32 %v18719_v5, 0.0 }
 0x3a6   :  { %23432 = vst [vmem:[#allocation79_spill] sm:$0xff] %v18746_v60  ;;  %v5173_v14 = vmul.f32 %v18495_v55, %v22720_v59  ;;  %v18752_v44 = vadd.f32 %v3775_v46, %v18667_v17  ;;  %v18754_v52 = vpop.f32.mrb[19].mxu1  ;;  %5213 = vadd.xlane.f32.xlu1 %v5212_v42  ;;  %v22728_v59 = vmax.f32 %v18742_v21, 0.0  ;;  %v22725_v46 = vmax.f32 %v18746_v60, 0.0  ;;  %v23442_v21 = vld [vmem:[#allocation22_spill] sm:$0xff] }
 0x3a7   :  { %23434 = vst [vmem:[#allocation123_spill] sm:$0xff] %v18754_v52  ;;  %v5178_v33 = vmul.f32 %v18462_v43, %v23435_v38 }
 0x3a8   :  { %23433 = vst [vmem:[#allocation82_spill] sm:$0xff] %v18752_v44  ;;  %v22724_v40 = vmax.f32 %v18752_v44, 0.0  ;;  %v5216_v24 = vadd.f32 %v5215_v34, %v5173_v14  ;;  %v5180_v5 = vmul.f32 %v18459_v25, %v22728_v59  ;;  %v5181_v13 = vmul.f32 %v18462_v43, %v22725_v46 }
 0x3a9   :  { %v3782_v31 = vpop.f32.mrb[20].mxu1  ;;  %v5223_v3 = vadd.f32 %v5178_v33, %v5177_v2 }
 0x3aa   :  { %v5176_v42 = vmul.f32 %v18495_v55, %v22724_v40  ;;  %v18769_v34 = vadd.f32 %v3782_v31, %v18694_v47  ;;  %v18771_v49 = vpop.f32.mrb[21].mxu1  ;;  %5217 = vadd.xlane.f32.xlu0 %v5216_v24  ;;  %v5227_v2 = vadd.f32 %v5181_v13, %v5180_v5 }
 0x3ab   :  { %23437 = vst [vmem:[#allocation133_spill] sm:$0xff] %v18771_v49 }
 0x3ac   :  { %23436 = vst [vmem:[#allocation129_spill] sm:$0xff] %v18769_v34  ;;  %v22726_v26 = vmax.f32 %v18769_v34, 0.0  ;;  %v5220_v14 = vadd.f32 %v5219_v58, %v5176_v42 }
 0x3ad   :  { %v3789_v38 = vpop.f32.mrb[22].mxu1 }
 0x3ae   :  { %v5179_v31 = vmul.f32 %v18495_v55, %v22726_v26  ;;  %v18784_v40 = vadd.f32 %v3789_v38, %v18729_v48  ;;  %v18786_v24 = vpop.f32.mrb[23].mxu1  ;;  %5221 = vadd.xlane.f32.xlu1 %v5220_v14  ;;  %v5231_v26 = vld [vmem:[%s22469_s4] sm:$0xff] }
 0x3af   :  { %23439 = vst [vmem:[#allocation135_spill] sm:$0xff] %v18786_v24  ;;  %v5237_v38 = vsel %vm5235_vm15, %v5231_v26, 0  ;;  %v16491_v14 = vld [vmem:[%s22465_s0 + $0x1c] sm:$0x77] }
 0x3b0   :  { %23438 = vst [vmem:[#allocation134_spill] sm:$0xff] %v18784_v40  ;;  %v22727_v58 = vmax.f32 %v18784_v40, 0.0  ;;  %v5224_v33 = vadd.f32 %v5223_v3, %v5179_v31  ;;  %v18799_v3 = vcombine.high %v16491_v14, %v16491_v14  ;;  %v18801_v13 = vand.u32 4294901760, %v5237_v38 }
 0x3b1   :  { %v708_v34 = vrot.slane %v16491_v14, 6 }
 0x3b2   :  { %v5182_v42 = vmul.f32 %v18495_v55, %v22727_v58  ;;  %5225 = vadd.xlane.f32.xlu0 %v5224_v33  ;;  %v18804_v5 = vsub.f32 %v5237_v38, %v18801_v13  ;;  %v18811_v26 = vrot.slane %v18799_v3, 5  ;;  %v23440_v33 = vld [vmem:[#allocation35_spill] sm:$0xff]  ;;  %v23441_v38 = vld [vmem:[#allocation21_spill] sm:$0xff]  ;;  %v644_v58 = vrot.slane %v16491_v14, 7 }
 0x3b3   :  { %v645_v59 = vrot.slane %v18799_v3, 7  ;;  %v709_v40 = vrot.slane %v18799_v3, 6  ;;  %v730_v60 = vrot.slane %v18799_v3, 3 }
 0x3b4   :  { %v5228_v46 = vadd.f32 %v5227_v2, %v5182_v42  ;;  %v18821_v42 = vrot.slane %v18799_v3, 2 }
 0x3b6   :  { %5229 = vadd.xlane.f32.xlu1 %v5228_v46  ;;  %v22729_v46 = vand.u32 4294901760, %v18804_v5 }
 0x3b8   :  { %v5322_v31 = vsub.f32 %v18804_v5, %v22729_v46  ;;  %v664_v46 = vcombine.low %v16491_v14, %v16491_v14 }
 0x3ba   :  { %v5323_v2 = vand.u32 4294901760, %v5322_v31  ;;  %v684_v31 = vrot.slane %v16491_v14, 1 }
 0x3bc   :  { %13308 = vmatprep.mubr.f32.mxu1 %v5323_v2  ;;  %v685_v2 = vrot.slane %v18799_v3, 1 }
 0x3c7   :  { %586 = vrot.lane.b32.xlu1 %v18799_v3, %s16517_s18 }
 0x3c8   :  { %584 = vrot.lane.b32.xlu0 %v16491_v14, %s16517_s18 }
 0x3cb   :  { %605 = vrot.lane.b32.xlu1 %v23440_v33, %s16516_s17 }
 0x3cc   :  { %607 = vrot.lane.b32.xlu0 %v18811_v26, %s16516_s17 }
 0x3cf   :  { %626 = vrot.lane.b32.xlu1 %v23441_v38, %s16518_s21 }
 0x3d0   :  { %628 = vrot.lane.b32.xlu0 %v18821_v42, %s16518_s21  ;;  %s23443_s21 = smov 106  }
 0x3d3   :  { %650 = vrot.lane.b32.xlu1 %v644_v58, %s16519_s22 }
 0x3d4   :  { %652 = vrot.lane.b32.xlu0 %v645_v59, %s16519_s22  ;;  %s23445_s22 = smov 120  }
 0x3d7   :  { %669 = vrot.lane.b32.xlu1 %v664_v46, %s16520_s23 }
 0x3d8   :  { %671 = vrot.lane.b32.xlu0 %v16491_v14, %s16520_s23 }
 0x3db   :  { %690 = vrot.lane.b32.xlu1 %v684_v31, %s16521_s24 }
 0x3dc   :  { %692 = vrot.lane.b32.xlu0 %v685_v2, %s16521_s24  ;;  %s23446_s24 = smov 32  }
 0x3df   :  { %714 = vrot.lane.b32.xlu1 %v708_v34, %s16522_s25 }
 0x3e0   :  { %716 = vrot.lane.b32.xlu0 %v709_v40, %s16522_s25  ;;  %s23447_s25 = smov 24  }
 0x3e3   :  { %735 = vrot.lane.b32.xlu1 %v23442_v21, %s16523_s26 }
 0x3e4   :  { %737 = vrot.lane.b32.xlu0 %v730_v60, %s16523_s26  ;;  %s23449_s26 = smov 60  }
 0x3e7   :  { %752 = vrot.lane.b32.xlu1 %v16491_v14, %s16524_s27 }
 0x3e8   :  { %754 = vrot.lane.b32.xlu0 %v18799_v3, %s16524_s27  ;;  %s23450_s27 = smov 56  }
 0x3eb   :  { %769 = vrot.lane.b32.xlu1 %v23440_v33, %s16525_s28  ;;  %v12707_v33 = vld [vmem:[%s22465_s0 + $0x24] sm:$0x7]  ;;  %s23444_s0 = smov 124  }
 0x3ec   :  { %771 = vrot.lane.b32.xlu0 %v18811_v26, %s16525_s28  ;;  %v909_v44 = vrot.slane %v12707_v33, 5 }
 0x3ef   :  { %786 = vrot.lane.b32.xlu1 %v23441_v38, %s16526_s29  ;;  %v874_v38 = vrot.slane %v12707_v33, 3 }
 0x3f0   :  { %788 = vrot.lane.b32.xlu0 %v18821_v42, %s16526_s29 }
 0x3f3   :  { %806 = vrot.lane.b32.xlu1 %v644_v58, %s16527_s30 }
 0x3f4   :  { %808 = vrot.lane.b32.xlu0 %v645_v59, %s16527_s30 }
 0x3f7   :  { %823 = vrot.lane.b32.xlu1 %v664_v46, %s16528_s11 }
 0x3f8   :  { %825 = vrot.lane.b32.xlu0 %v16491_v14, %s16528_s11 }
 0x3fb   :  { %840 = vrot.lane.b32.xlu1 %v684_v31, %s16520_s23 }
 0x3fc   :  { %842 = vrot.lane.b32.xlu0 %v685_v2, %s16520_s23 }
 0x3ff   :  { %860 = vrot.lane.b32.xlu1 %v708_v34, %s16529_s12 }
 0x400   :  { %862 = vrot.lane.b32.xlu0 %v709_v40, %s16529_s12 }
 0x403   :  { %879 = vrot.lane.b32.xlu1 %v730_v60, %s16530_s13 }
 0x404   :  { %881 = vrot.lane.b32.xlu0 %v874_v38, %s16530_s13 }
 0x407   :  { %896 = vrot.lane.b32.xlu1 %v18799_v3, %s16531_s20 }
 0x408   :  { %898 = vrot.lane.b32.xlu0 %v12707_v33, %s16531_s20 }
 0x40b   :  { %914 = vrot.lane.b32.xlu1 %v18811_v26, %s23443_s21 }
 0x40c   :  { %916 = vrot.lane.b32.xlu0 %v909_v44, %s23443_s21 }
 0x40f   :  { %940 = vrot.lane.b32.xlu1 %v644_v58, %s23444_s0 }
 0x410   :  { %942 = vrot.lane.b32.xlu0 %v645_v59, %s23444_s0 }
 0x413   :  { %957 = vrot.lane.b32.xlu1 %v664_v46, %s23445_s22 }
 0x414   :  { %959 = vrot.lane.b32.xlu0 %v16491_v14, %s23445_s22 }
 0x417   :  { %v5186_v38 = vpop.xlane.xlu1 %5185  ;;  %974 = vrot.lane.b32.xlu1 %v684_v31, %s23446_s24 }
 0x418   :  { %v5243_v19 = vand.u32 4294901760, %v5186_v38  ;;  %976 = vrot.lane.b32.xlu0 %v685_v2, %s23446_s24 }
 0x41a   :  { %v18879_v24 = vsub.f32 %v5186_v38, %v5243_v19 }
 0x41b   :  { %v5190_v27 = vpop.xlane.xlu0 %5189  ;;  %994 = vrot.lane.b32.xlu1 %v708_v34, %s16520_s23 }
 0x41c   :  { %v5246_v48 = vand.u32 4294901760, %v5190_v27  ;;  %996 = vrot.lane.b32.xlu0 %v709_v40, %s16520_s23  ;;  %v22739_v14 = vand.u32 4294901760, %v18879_v24  ;;  %s23448_s23 = smov 64  }
 0x41e   :  { %v18882_v58 = vpack.c.bf16 %v5246_v48, %v5243_v19  ;;  %v18884_v59 = vsub.f32 %v5190_v27, %v5246_v48 }
 0x41f   :  { %v5194_v46 = vpop.xlane.xlu0 %5193  ;;  %1011 = vrot.lane.b32.xlu1 %v23442_v21, %s23447_s25 }
 0x420   :  { %v5349_v31 = vand.u32 4294901760, %v18884_v59  ;;  %v5249_v2 = vand.u32 4294901760, %v5194_v46  ;;  %14629 = vmatprep.subr.bf16.mxu1 %v18882_v58  ;;  %1013 = vrot.lane.b32.xlu0 %v730_v60, %s23447_s25 }
 0x421   :  { %14631 = vmatpush3.bf16.msra.mxu1 %v18882_v58 }
 0x422   :  { %v18895_v19 = vpack.c.bf16 %v5349_v31, %v22739_v14  ;;  %v18899_v48 = vsub.f32 %v5194_v46, %v5249_v2  ;;  %v5350_v23 = vsub.f32 %v18884_v59, %v5349_v31 }
 0x423   :  { %v5198_v27 = vpop.xlane.xlu1 %5197  ;;  %1028 = vrot.lane.b32.xlu1 %v18799_v3, %s23448_s23  ;;  %v1058_v3 = vrot.slane %v12707_v33, 2 }
 0x424   :  { %v5252_v21 = vand.u32 4294901760, %v5198_v27  ;;  %1030 = vrot.lane.b32.xlu0 %v12707_v33, %s23448_s23  ;;  %v22744_v38 = vand.u32 4294901760, %v18899_v48 }
 0x426   :  { %v18902_v40 = vpack.c.bf16 %v5252_v21, %v5249_v2  ;;  %v18904_v34 = vsub.f32 %v5198_v27, %v5252_v21 }
 0x427   :  { %v5202_v60 = vpop.xlane.xlu0 %5201  ;;  %1045 = vrot.lane.b32.xlu1 %v18811_v26, %s23449_s26 }
 0x428   :  { %v5363_v14 = vand.u32 4294901760, %v18904_v34  ;;  %v5255_v52 = vand.u32 4294901760, %v5202_v60  ;;  %14633 = vmatprep.subr.bf16.mxu1 %v18902_v40  ;;  %1047 = vrot.lane.b32.xlu0 %v909_v44, %s23449_s26 }
 0x429   :  { %14635 = vmatpush3.bf16.msra.mxu1 %v18902_v40 }
 0x42a   :  { %v18915_v46 = vpack.c.bf16 %v5363_v14, %v22744_v38  ;;  %v18919_v26 = vsub.f32 %v5202_v60, %v5255_v52  ;;  %v5364_v6 = vsub.f32 %v18904_v34, %v5363_v14 }
 0x42b   :  { %v5206_v2 = vpop.xlane.xlu1 %5205  ;;  %1063 = vrot.lane.b32.xlu1 %v18821_v42, %s23450_s27  ;;  %v5232_v42 = vld [vmem:[%s22469_s4 + $0x8] sm:$0xf] }
 0x42c   :  { %v5258_v27 = vand.u32 4294901760, %v5206_v2  ;;  %1065 = vrot.lane.b32.xlu0 %v1058_v3, %s23450_s27  ;;  %v22753_v33 = vand.u32 4294901760, %v18919_v26 }
 0x42e   :  { %v18922_v21 = vpack.c.bf16 %v5258_v27, %v5255_v52  ;;  %v18924_v17 = vsub.f32 %v5206_v2, %v5258_v27  ;;  %v5240_v27 = vsel %vm5235_vm15, %v5232_v42, 0 }
 0x42f   :  { %v5210_v44 = vpop.xlane.xlu0 %5209  ;;  %v18944_v10 = vand.u32 4294901760, %v5240_v27 }
 0x430   :  { %v5377_v55 = vand.u32 4294901760, %v18924_v17  ;;  %v5261_v38 = vand.u32 4294901760, %v5210_v44  ;;  %14637 = vmatprep.subr.bf16.mxu1 %v18922_v21 }
 0x431   :  { %14639 = vmatpush3.bf16.msra.mxu1 %v18922_v21 }
 0x432   :  { %v18935_v52 = vpack.c.bf16 %v5377_v55, %v22753_v33  ;;  %v18937_v3 = vsub.f32 %v5210_v44, %v5261_v38 }
 0x433   :  { %v5214_v60 = vpop.xlane.xlu1 %5213 }
 0x434   :  { %v5264_v2 = vand.u32 4294901760, %v5214_v60  ;;  %v5384_v51 = vand.u32 4294901760, %v18937_v3 }
 0x436   :  { %v18940_v49 = vpack.c.bf16 %v5264_v2, %v5261_v38  ;;  %v18942_v47 = vsub.f32 %v5214_v60, %v5264_v2  ;;  %v18953_v38 = vsub.f32 %v5240_v27, %v18944_v10 }
 0x437   :  { %v5218_v43 = vpop.xlane.xlu0 %5217 }
 0x438   :  { %v5391_v45 = vand.u32 4294901760, %v18942_v47  ;;  %v5267_v11 = vand.u32 4294901760, %v5218_v43  ;;  %14641 = vmatprep.subr.bf16.mxu1 %v18940_v49  ;;  %v22777_v7 = vand.u32 4294901760, %v18953_v38 }
 0x439   :  { %14643 = vmatpush3.bf16.msra.mxu1 %v18940_v49 }
 0x43a   :  { %v18950_v44 = vpack.c.bf16 %v5391_v45, %v5384_v51  ;;  %v18955_v42 = vsub.f32 %v5218_v43, %v5267_v11  ;;  %v23451_v43 = vand.u32 4294901760, %v18879_v24  ;;  %v5332_v22 = vsub.f32 %v18953_v38, %v22777_v7 }
 0x43b   :  { %v5222_v33 = vpop.xlane.xlu1 %5221 }
 0x43c   :  { %v5270_v60 = vand.u32 4294901760, %v5222_v33  ;;  %v22774_v56 = vand.u32 4294901760, %v18955_v42  ;;  %v5333_v14 = vand.u32 4294901760, %v5332_v22 }
 0x43e   :  { %v18957_v2 = vpack.c.bf16 %v5270_v60, %v5267_v11  ;;  %v18959_v25 = vsub.f32 %v5222_v33, %v5270_v60  ;;  %v5343_v11 = vsub.f32 %v18879_v24, %v23451_v43  ;;  %v5351_v60 = vand.u32 4294901760, %v5350_v23 }
 0x43f   :  { %v5226_v54 = vpop.xlane.xlu0 %5225  ;;  %v23453_v23 = vand.u32 4294901760, %v18899_v48 }
 0x440   :  { %v5405_v53 = vand.u32 4294901760, %v18959_v25  ;;  %v5273_v16 = vand.u32 4294901760, %v5226_v54  ;;  %14645 = vmatprep.subr.bf16.mxu1 %v18957_v2  ;;  %v5344_v43 = vand.u32 4294901760, %v5343_v11  ;;  %v23454_v11 = vand.u32 4294901760, %v18919_v26 }
 0x441   :  { %14647 = vmatpush3.bf16.msra.mxu1 %v18957_v2  ;;  %v5357_v37 = vsub.f32 %v18899_v48, %v23453_v23 }
 0x442   :  { %v18972_v33 = vpack.c.bf16 %v5405_v53, %v22774_v56  ;;  %v18978_v36 = vsub.f32 %v5226_v54, %v5273_v16  ;;  %v14652_v7 = vpack.c.bf16 %v5351_v60, %v5344_v43  ;;  %v5365_v54 = vand.u32 4294901760, %v5364_v6 }
 0x443   :  { %v585_v31 = vpop.permute.xlu0 %584  ;;  %v5230_v27 = vpop.xlane.xlu1 %5229  ;;  %v5371_v22 = vsub.f32 %v18919_v26, %v23454_v11  ;;  %v5392_v43 = vsub.f32 %v18942_v47, %v5391_v45 }
 0x444   :  { %v589_v62 = vsel %vm57_vm0, %v23452_v41, %v585_v31  ;;  %v5276_v20 = vand.u32 4294901760, %v5230_v27  ;;  %v5412_v4 = vand.u32 4294901760, %v18978_v36 }
 0x445   :  { %595 = vst [vmem:[#allocation2 + $0x20] sm:$0x7] %v589_v62  ;;  %v5372_v11 = vand.u32 4294901760, %v5371_v22  ;;  %v5393_v45 = vand.u32 4294901760, %v5392_v43  ;;  %v23458_v43 = vld [vmem:[#allocation16_spill] sm:$0xff] }
 0x446   :  { %v18982_v35 = vpack.c.bf16 %v5276_v20, %v5273_v16  ;;  %v18984_v56 = vsub.f32 %v5230_v27, %v5276_v20  ;;  %v5378_v20 = vsub.f32 %v18924_v17, %v5377_v55  ;;  %v5358_v16 = vand.u32 4294901760, %v5357_v37 }
 0x447   :  { %v587_v8 = vpop.permute.xlu1 %586  ;;  %v608_v50 = vpop.permute.xlu0 %607  ;;  %v5385_v37 = vsub.f32 %v18937_v3, %v5384_v51  ;;  %v23457_v51 = vand.u32 4294901760, %v18955_v42 }
 0x448   :  { %v5419_v41 = vand.u32 4294901760, %v18984_v56  ;;  %v590_v62 = vsel %vm57_vm0, %v585_v31, %v587_v8  ;;  %14649 = vmatprep.subr.bf16.mxu1 %v18982_v35  ;;  %v23455_v8 = vld [vmem:[#allocation11_spill] sm:$0xff]  ;;  %v14656_v23 = vpack.c.bf16 %v5365_v54, %v5358_v16  ;;  %v5406_v54 = vsub.f32 %v18959_v25, %v5405_v53 }
 0x449   :  { %596 = vst [vmem:[#allocation2 + $0x28] sm:$0x7] %v590_v62  ;;  %14651 = vmatpush3.bf16.msra.mxu1 %v18982_v35  ;;  %v5379_v62 = vand.u32 4294901760, %v5378_v20  ;;  %v5399_v20 = vsub.f32 %v18955_v42, %v23457_v51  ;;  %vm23468_vm0 = vcmask 605184  }
 0x44a   :  { %14653 = vmatprep.subr.bf16.mxu1 %v14652_v7  ;;  %v18998_v6 = vpack.c.bf16 %v5419_v41, %v5412_v4  ;;  %v5420_v53 = vsub.f32 %v18984_v56, %v5419_v41 }
 0x44b   :  { %v606_v27 = vpop.permute.xlu1 %605  ;;  %v629_v60 = vpop.permute.xlu0 %628 }
 0x44c   :  { %v610_v31 = vsel %vm79_vm1, %v23455_v8, %v606_v27  ;;  %v611_v55 = vsel %vm79_vm1, %v606_v27, %v608_v50  ;;  %13309 = vmatmul.mubr.f32.vlgmr.msra.gmra.mrb[24].mxu1 %v5333_v14  ;;  %v14660_v14 = vpack.c.bf16 %v5379_v62, %v5372_v11  ;;  %vm23469_vm1 = vmmov %vm23468_vm0 }
 0x44d   :  { %616 = vst [vmem:[#allocation2 + $0x20] sm:$0x38] %v610_v31  ;;  %617 = vst [vmem:[#allocation2 + $0x28] sm:$0x38] %v611_v55  ;;  %14655 = vmatpush3.bf16.msra.mxu1 %v14652_v7  ;;  %13335 = vmatprep.mubr.f32.mxu1 %v18801_v13  ;;  %v5386_v7 = vand.u32 4294901760, %v5385_v37  ;;  %v5400_v31 = vand.u32 4294901760, %v5399_v20  ;;  %v5413_v55 = vsub.f32 %v18978_v36, %v5412_v4 }
 0x44e   :  { %14657 = vmatprep.subr.bf16.mxu1 %v14656_v23  ;;  %v23459_v37 = vld [vmem:[#allocation18_spill] sm:$0xff] }
 0x44f   :  { %v627_v63 = vpop.permute.xlu1 %626  ;;  %v653_v61 = vpop.permute.xlu0 %652  ;;  %v14664_v22 = vpack.c.bf16 %v5393_v45, %v5386_v7  ;;  %v5414_v7 = vand.u32 4294901760, %v5413_v55 }
 0x450   :  { %v631_v8 = vsel %vm101_vm2, %v23456_v12, %v627_v63  ;;  %v632_v50 = vsel %vm101_vm2, %v627_v63, %v629_v60  ;;  %v5407_v60 = vand.u32 4294901760, %v5406_v54  ;;  %vm23471_vm2 = vcmask 244736  }
 0x451   :  { %637 = vst [vmem:[#allocation2 + $0x50] ss:$-44 sps:$4 sm:$0xc1] %v631_v8   ;;  %638 = vst [vmem:[#allocation2 + $0x58] ss:$-44 sps:$4 sm:$0xc1] %v632_v50   ;;  %14659 = vmatpush3.bf16.msra.mxu1 %v14656_v23 }
 0x452   :  { %14661 = vmatprep.subr.bf16.mxu1 %v14660_v14  ;;  %v14668_v8 = vpack.c.bf16 %v5407_v60, %v5400_v31  ;;  %v5421_v50 = vand.u32 4294901760, %v5420_v53  ;;  %v23461_v53 = vld [vmem:[#allocation32_spill] sm:$0xff] }
 0x453   :  { %v651_v16 = vpop.permute.xlu1 %650  ;;  %v672_v27 = vpop.permute.xlu0 %671 }
 0x454   :  { %v655_v12 = vsel %vm126_vm3, %v23458_v43, %v651_v16  ;;  %v656_v63 = vsel %vm126_vm3, %v651_v16, %v653_v61  ;;  %v23460_v43 = vld [vmem:[#allocation19_spill] sm:$0xff]  ;;  %vm23472_vm3 = vmmov %vm23471_vm2 }
 0x455   :  { %661 = vst [vmem:[#allocation2 + $0x50] sm:$0xe] %v655_v12  ;;  %662 = vst [vmem:[#allocation2 + $0x58] sm:$0xe] %v656_v63  ;;  %14663 = vmatpush3.bf16.msra.mxu1 %v14660_v14  ;;  %v14672_v63 = vpack.c.bf16 %v5421_v50, %v5414_v7 }
 0x456   :  { %14665 = vmatprep.subr.bf16.mxu1 %v14664_v22 }
 0x457   :  { %v670_v23 = vpop.permute.xlu1 %669  ;;  %v693_v62 = vpop.permute.xlu0 %692 }
 0x458   :  { %v674_v11 = vsel %vm146_vm4, %v23459_v37, %v670_v23  ;;  %v675_v45 = vsel %vm146_vm4, %v670_v23, %v672_v27  ;;  %v1084_v61 = vld [vmem:[#allocation2 + $0x28] sm:$0xff]  ;;  %v1083_v54 = vld [vmem:[#allocation2 + $0x20] sm:$0xff]  ;;  %v14676_v23 = vpack.c.bf16 %v18884_v59, %v18879_v24 }
 0x459   :  { %680 = vst [vmem:[#allocation2 + $0x50] sm:$0x70] %v674_v11  ;;  %681 = vst [vmem:[#allocation2 + $0x58] sm:$0x70] %v675_v45  ;;  %14667 = vmatpush3.bf16.msra.mxu1 %v14664_v22  ;;  %v3794_v41 = vand.u32 4294901760, %v1084_v61  ;;  %v3796_v14 = vand.u32 4294901760, %v1083_v54 }
 0x45a   :  { %14669 = vmatprep.subr.bf16.mxu1 %v14668_v8  ;;  %v23462_v45 = vld [vmem:[#allocation34_spill] sm:$0xff] }
 0x45b   :  { %v691_v51 = vpop.permute.xlu1 %690  ;;  %v717_v4 = vpop.permute.xlu0 %716  ;;  %v19021_v20 = vsub.f32 %v1084_v61, %v3794_v41  ;;  %v19023_v16 = vsub.f32 %v1083_v54, %v3796_v14  ;;  %v14680_v61 = vpack.c.bf16 %v18904_v34, %v18899_v48 }
 0x45c   :  { %v695_v27 = vsel %vm168_vm5, %v23460_v43, %v691_v51  ;;  %v696_v12 = vsel %vm168_vm5, %v691_v51, %v693_v62  ;;  %vm23477_vm5 = vcmask 211968  }
 0x45d   :  { %701 = vst [vmem:[#allocation2 + $0x80] ss:$-44 sps:$4 sm:$0x83] %v695_v27   ;;  %702 = vst [vmem:[#allocation2 + $0x88] ss:$-44 sps:$4 sm:$0x83] %v696_v12   ;;  %14671 = vmatpush3.bf16.msra.mxu1 %v14668_v8 }
 0x45e   :  { %14673 = vmatprep.subr.bf16.mxu1 %v14672_v63  ;;  %v22787_v62 = vand.u32 4294901760, %v19021_v20  ;;  %v4021_v51 = vand.u32 4294901760, %v19023_v16 }
 0x45f   :  { %v715_v22 = vpop.permute.xlu1 %714  ;;  %v738_v60 = vpop.permute.xlu0 %737 }
 0x460   :  { %v719_v31 = vsel %vm193_vm6, %v23461_v53, %v715_v22  ;;  %v720_v55 = vsel %vm193_vm6, %v715_v22, %v717_v4  ;;  %v4016_v4 = vsub.f32 %v19021_v20, %v22787_v62  ;;  %v23463_v22 = vld [vmem:[#allocation36_spill] sm:$0xff]  ;;  %vm23478_vm6 = vmmov %vm23477_vm5 }
 0x461   :  { %725 = vst [vmem:[#allocation2 + $0x80] sm:$0x1c] %v719_v31  ;;  %726 = vst [vmem:[#allocation2 + $0x88] sm:$0x1c] %v720_v55  ;;  %14675 = vmatpush3.bf16.msra.mxu1 %v14672_v63  ;;  %v14684_v31 = vpack.c.bf16 %v18924_v17, %v18919_v26 }
 0x462   :  { %14677 = vmatprep.subr.bf16.mxu1 %v14676_v23  ;;  %v4017_v17 = vand.u32 4294901760, %v4016_v4 }
 0x463   :  { %v736_v37 = vpop.permute.xlu1 %735  ;;  %v755_v11 = vpop.permute.xlu0 %754 }
 0x464   :  { %v740_v8 = vsel %vm215_vm7, %v23462_v45, %v736_v37  ;;  %v741_v50 = vsel %vm215_vm7, %v736_v37, %v738_v60  ;;  %13336 = vmatmul.mubr.f32.vlgmr.msra.gmra.mrb[24].mxu1 %v18944_v10  ;;  %v1090_v54 = vld [vmem:[#allocation2 + $0x58] sm:$0xff]  ;;  %v1089_v24 = vld [vmem:[#allocation2 + $0x50] sm:$0xff]  ;;  %vm23480_vm7 = vcmask 900096  }
 0x465   :  { %746 = vst [vmem:[#allocation2 + $0x80] sm:$0xe0] %v740_v8  ;;  %747 = vst [vmem:[#allocation2 + $0x88] sm:$0xe0] %v741_v50  ;;  %14679 = vmatpush3.bf16.msra.mxu1 %v14676_v23  ;;  %v3798_v59 = vand.u32 4294901760, %v1090_v54  ;;  %v3800_v7 = vand.u32 4294901760, %v1089_v24  ;;  %13362 = vmatprep.mubr.f32.mxu1 %v18804_v5 }
 0x466   :  { %14681 = vmatprep.subr.bf16.mxu1 %v14680_v61  ;;  %v23465_v50 = vld [vmem:[#allocation38_spill] sm:$0xff] }
 0x467   :  { %v753_v43 = vpop.permute.xlu1 %752  ;;  %v19045_v27 = vpack.c.bf16 %v3798_v59, %v3794_v41  ;;  %v19047_v48 = vsub.f32 %v1090_v54, %v3798_v59  ;;  %v19049_v34 = vpack.c.bf16 %v3800_v7, %v3796_v14  ;;  %v19051_v12 = vsub.f32 %v1089_v24, %v3800_v7  ;;  %v772_v63 = vpop.permute.xlu0 %771 }
 0x468   :  { %v757_v60 = vsel %vm233_vm8, %v23463_v22, %v753_v43  ;;  %v758_v53 = vsel %vm233_vm8, %v753_v43, %v755_v11  ;;  %v4022_v14 = vsub.f32 %v19023_v16, %v4021_v51  ;;  %v14688_v24 = vpack.c.bf16 %v18942_v47, %v18937_v3  ;;  %vm23481_vm8 = vmmov %vm23480_vm7 }
 0x469   :  { %763 = vst [vmem:[#allocation2 + $0xb0] sm:$0x7] %v757_v60  ;;  %764 = vst [vmem:[#allocation2 + $0xb8] sm:$0x7] %v758_v53  ;;  %14509 = vmatprep.subr.bf16.mxu0 %v19045_v27  ;;  %14683 = vmatpush3.bf16.msra.mxu1 %v14680_v61  ;;  %v22786_v41 = vand.u32 4294901760, %v19047_v48  ;;  %v4033_v55 = vand.u32 4294901760, %v19051_v12 }
 0x46a   :  { %14511 = vmatpush1.bf16.msra.mxu0 %v19049_v34  ;;  %14685 = vmatprep.subr.bf16.mxu1 %v14684_v31  ;;  %v4023_v4 = vand.u32 4294901760, %v4022_v14 }
 0x46b   :  { %v770_v37 = vpop.permute.xlu1 %769  ;;  %v789_v11 = vpop.permute.xlu0 %788  ;;  %v4028_v26 = vsub.f32 %v19047_v48, %v22786_v41  ;;  %v4034_v45 = vsub.f32 %v19051_v12, %v4033_v55  ;;  %v19069_v8 = vpack.c.bf16 %v4033_v55, %v4021_v51  ;;  %v23479_v41 = vld [vmem:[#allocation57_spill] sm:$0xff] }
 0x46c   :  { %v774_v61 = vsel %vm251_vm9, %v23465_v50, %v770_v37  ;;  %v775_v54 = vsel %vm251_vm9, %v770_v37, %v772_v63  ;;  %v1095_v51 = vld [vmem:[#allocation2 + $0x80] sm:$0xff]  ;;  %v14692_v37 = vpack.c.bf16 %v18959_v25, %v18955_v42  ;;  %vm23483_vm9 = vcmask 883712  }
 0x46d   :  { %23464 = vst [vmem:[#allocation35_spill] sm:$0xff] %v19069_v8  ;;  %780 = vst [vmem:[#allocation2 + $0xb0] sm:$0x38] %v774_v61  ;;  %14687 = vmatpush3.bf16.msra.mxu1 %v14684_v31  ;;  %v4029_v7 = vand.u32 4294901760, %v4028_v26  ;;  %v4035_v43 = vand.u32 4294901760, %v4034_v45  ;;  %v23466_v63 = vld [vmem:[#allocation40_spill] sm:$0xff]  ;;  %v14696_v61 = vpack.c.bf16 %v18984_v56, %v18978_v36 }
 0x46e   :  { %781 = vst [vmem:[#allocation2 + $0xb8] sm:$0x38] %v775_v54  ;;  %14689 = vmatprep.subr.bf16.mxu1 %v14688_v24  ;;  %v3804_v31 = vand.u32 4294901760, %v1095_v51  ;;  %v23467_v45 = vld [vmem:[#allocation50_spill] sm:$0xff]  ;;  %v19092_v54 = vld [vmem:[#allocation2 + $0x88] sm:$0xff] }
 0x46f   :  { %v787_v22 = vpop.permute.xlu1 %786  ;;  %v809_v60 = vpop.permute.xlu0 %808  ;;  %v19078_v53 = vpack.c.bf16 %v4029_v7, %v4017_v17  ;;  %v19080_v55 = vpack.c.bf16 %v4035_v43, %v4023_v4  ;;  %v23470_v7 = vld [vmem:[#allocation52_spill] sm:$0xff] }
 0x470   :  { %v791_v47 = vsel %vm269_vm10, %v23466_v63, %v787_v22  ;;  %v792_v3 = vsel %vm269_vm10, %v787_v22, %v789_v11  ;;  %v19094_v25 = vsub.f32 %v1095_v51, %v3804_v31  ;;  %vm23484_vm10 = vmmov %vm23483_vm9 }
 0x471   :  { %797 = vst [vmem:[#allocation2 + $0xe0] ss:$-44 sps:$4 sm:$0xc1] %v791_v47   ;;  %798 = vst [vmem:[#allocation2 + $0xe8] ss:$-44 sps:$4 sm:$0xc1] %v792_v3   ;;  %14691 = vmatpush3.bf16.msra.mxu1 %v14688_v24 }
 0x472   :  { %14693 = vmatprep.subr.bf16.mxu1 %v14692_v37  ;;  %v22793_v24 = vand.u32 4294901760, %v19092_v54 }
 0x473   :  { %v807_v14 = vpop.permute.xlu1 %806  ;;  %v826_v26 = vpop.permute.xlu0 %825 }
 0x474   :  { %v811_v17 = vsel %vm23468_vm0, %v23467_v45, %v807_v14  ;;  %v812_v50 = vsel %vm23469_vm1, %v807_v14, %v809_v60  ;;  %v4045_v60 = vand.u32 4294901760, %v19094_v25  ;;  %vm23486_vm0 = vcmask 867328  }
 0x475   :  { %817 = vst [vmem:[#allocation2 + $0xe0] sm:$0xe] %v811_v17  ;;  %818 = vst [vmem:[#allocation2 + $0xe8] sm:$0xe] %v812_v50  ;;  %14695 = vmatpush3.bf16.msra.mxu1 %v14692_v37 }
 0x476   :  { %14697 = vmatprep.subr.bf16.mxu1 %v14696_v61  ;;  %v4046_v50 = vsub.f32 %v19094_v25, %v4045_v60  ;;  %vm23487_vm1 = vmmov %vm23486_vm0 }
 0x477   :  { %v824_v42 = vpop.permute.xlu1 %823  ;;  %v843_v11 = vpop.permute.xlu0 %842 }
 0x478   :  { %v828_v4 = vsel %vm23471_vm2, %v23470_v7, %v824_v42  ;;  %v829_v43 = vsel %vm23472_vm3, %v824_v42, %v826_v26  ;;  %v19100_v22 = vld [vmem:[#allocation2 + $0xb8] sm:$0xff]  ;;  %v1101_v36 = vld [vmem:[#allocation2 + $0xb0] sm:$0xff]  ;;  %v23473_v26 = vld [vmem:[#allocation53_spill] sm:$0xff]  ;;  %v23474_v7 = vand.u32 4294901760, %v18804_v5  ;;  %vm23489_vm2 = vcmask 1014784  }
 0x479   :  { %834 = vst [vmem:[#allocation2 + $0xe0] sm:$0x70] %v828_v4  ;;  %835 = vst [vmem:[#allocation2 + $0xe8] sm:$0x70] %v829_v43  ;;  %14699 = vmatpush3.bf16.msra.mxu1 %v14696_v61  ;;  %v22792_v56 = vand.u32 4294901760, %v19100_v22  ;;  %v3808_v51 = vand.u32 4294901760, %v1101_v36 }
 0x47a   :  { %14701 = vmatprep.subr.bf16.mxu1 %v18882_v58  ;;  %vm23490_vm3 = vmmov %vm23489_vm2 }
 0x47b   :  { %v841_v63 = vpop.permute.xlu1 %840  ;;  %v19109_v47 = vpack.c.bf16 %v22792_v56, %v22793_v24  ;;  %v19111_v3 = vpack.c.bf16 %v3808_v51, %v3804_v31  ;;  %v19113_v37 = vsub.f32 %v1101_v36, %v3808_v51  ;;  %v863_v14 = vpop.permute.xlu0 %862  ;;  %v23476_v36 = vld [vmem:[#allocation55_spill] sm:$0xff] }
 0x47c   :  { %v845_v45 = vsel %vm146_vm4, %v23473_v26, %v841_v63  ;;  %v846_v17 = vsel %vm146_vm4, %v841_v63, %v843_v11  ;;  %13363 = vmatmul.mubr.f32.vlgmr.msra.gmra.mrb[24].mxu1 %v18953_v38  ;;  %v4047_v26 = vand.u32 4294901760, %v4046_v50 }
 0x47d   :  { %851 = vst [vmem:[#allocation2 + $0x110] ss:$-44 sps:$4 sm:$0x83] %v845_v45   ;;  %852 = vst [vmem:[#allocation2 + $0x118] ss:$-44 sps:$4 sm:$0x83] %v846_v17   ;;  %14513 = vmatprep.subr.bf16.mxu0 %v19109_v47  ;;  %14703 = vmatpush3.bf16.msra.mxu1 %v18882_v58 }
 0x47e   :  { %v4057_v31 = vand.u32 4294901760, %v19113_v37  ;;  %14515 = vmatpush1.bf16.msra.mxu0 %v19111_v3  ;;  %14705 = vmatprep.subr.bf16.mxu1 %v18902_v40 }
 0x47f   :  { %v861_v42 = vpop.permute.xlu1 %860  ;;  %v882_v11 = vpop.permute.xlu0 %881  ;;  %13389 = vmatprep.mubr.f32.mxu1 %v23474_v7 }
 0x480   :  { %v4058_v4 = vsub.f32 %v19113_v37, %v4057_v31  ;;  %v19130_v43 = vpack.c.bf16 %v4057_v31, %v4045_v60  ;;  %v865_v51 = vsel %vm23477_vm5, %v23476_v36, %v861_v42  ;;  %v866_v63 = vsel %vm23478_vm6, %v861_v42, %v863_v14 }
 0x481   :  { %871 = vst [vmem:[#allocation2 + $0x110] sm:$0x1c] %v865_v51  ;;  %872 = vst [vmem:[#allocation2 + $0x118] sm:$0x1c] %v866_v63  ;;  %14707 = vmatpush3.bf16.msra.mxu1 %v18902_v40  ;;  %vm23493_vm5 = vcmask 982016  }
 0x482   :  { %23475 = vst [vmem:[#allocation21_spill] sm:$0xff] %v19130_v43  ;;  %v4059_v45 = vand.u32 4294901760, %v4058_v4  ;;  %14709 = vmatprep.subr.bf16.mxu1 %v18922_v21  ;;  %v23482_v4 = vld [vmem:[#allocation67_spill] sm:$0xff]  ;;  %vm23494_vm6 = vmmov %vm23493_vm5 }
 0x483   :  { %v880_v17 = vpop.permute.xlu1 %879  ;;  %v899_v5 = vpop.permute.xlu0 %898 }
 0x484   :  { %v19137_v7 = vpack.c.bf16 %v4059_v45, %v4047_v26  ;;  %v884_v60 = vsel %vm23480_vm7, %v23479_v41, %v880_v17  ;;  %v885_v31 = vsel %vm23481_vm8, %v880_v17, %v882_v11  ;;  %v1107_v14 = vld [vmem:[#allocation2 + $0xe0] sm:$0xff]  ;;  %v19147_v63 = vld [vmem:[#allocation2 + $0xe8] sm:$0xff]  ;;  %vm23497_vm7 = vcmask 261120  }
 0x485   :  { %890 = vst [vmem:[#allocation2 + $0x110] sm:$0xe0] %v884_v60  ;;  %891 = vst [vmem:[#allocation2 + $0x118] sm:$0xe0] %v885_v31  ;;  %14711 = vmatpush3.bf16.msra.mxu1 %v18922_v21  ;;  %v3812_v41 = vand.u32 4294901760, %v1107_v14  ;;  %v22791_v45 = vand.u32 4294901760, %v19147_v63 }
 0x486   :  { %14713 = vmatprep.subr.bf16.mxu1 %v18940_v49  ;;  %v23485_v17 = vld [vmem:[#allocation69_spill] sm:$0xff]  ;;  %vm23498_vm8 = vmmov %vm23497_vm7 }
 0x487   :  { %v897_v50 = vpop.permute.xlu1 %896  ;;  %v917_v42 = vpop.permute.xlu0 %916 }
 0x488   :  { %v901_v36 = vsel %vm23483_vm9, %v23482_v4, %v897_v50  ;;  %v902_v51 = vsel %vm23484_vm10, %v897_v50, %v899_v5 }
 0x489   :  { %907 = vst [vmem:[#allocation2 + $0x140] sm:$0x7] %v901_v36  ;;  %908 = vst [vmem:[#allocation2 + $0x148] sm:$0x7] %v902_v51  ;;  %14715 = vmatpush3.bf16.msra.mxu1 %v18940_v49  ;;  %v19159_v51 = vsub.f32 %v1107_v14, %v3812_v41 }
 0x48a   :  { %14717 = vmatprep.subr.bf16.mxu1 %v18957_v2 }
 0x48b   :  { %v915_v11 = vpop.permute.xlu1 %914  ;;  %v943_v26 = vpop.permute.xlu0 %942  ;;  %v22789_v23 = vand.u32 4294901760, %v19159_v51 }
 0x48c   :  { %v919_v60 = vsel %vm23486_vm0, %v23485_v17, %v915_v11  ;;  %v920_v31 = vsel %vm23487_vm1, %v915_v11, %v917_v42  ;;  %v19155_v4 = vld [vmem:[#allocation2 + $0x118] sm:$0xff]  ;;  %v1113_v5 = vld [vmem:[#allocation2 + $0x110] sm:$0xff] }
 0x48d   :  { %925 = vst [vmem:[#allocation2 + $0x140] sm:$0x38] %v919_v60  ;;  %926 = vst [vmem:[#allocation2 + $0x148] sm:$0x38] %v920_v31  ;;  %14719 = vmatpush3.bf16.msra.mxu1 %v18957_v2  ;;  %v22788_v50 = vand.u32 4294901760, %v19155_v4  ;;  %v3816_v36 = vand.u32 4294901760, %v1113_v5 }
 0x48e   :  { %14721 = vmatprep.subr.bf16.mxu1 %v18982_v35  ;;  %v23488_v31 = vld [vmem:[#allocation70_spill] sm:$0xff] }
 0x48f   :  { %v941_v62 = vpop.permute.xlu1 %940  ;;  %v19166_v42 = vpack.c.bf16 %v22788_v50, %v22791_v45  ;;  %v19168_v11 = vpack.c.bf16 %v3816_v36, %v3812_v41  ;;  %v19170_v17 = vsub.f32 %v1113_v5, %v3816_v36  ;;  %v960_v60 = vpop.permute.xlu0 %959 }
 0x490   :  { %v945_v61 = vsel %vm23489_vm2, %v23488_v31, %v941_v62  ;;  %v946_v14 = vsel %vm23490_vm3, %v941_v62, %v943_v26  ;;  %v23495_v31 = vand.u32 4294901760, %v18953_v38 }
 0x491   :  { %951 = vst [vmem:[#allocation2 + $0x170] sm:$0xe] %v945_v61  ;;  %952 = vst [vmem:[#allocation2 + $0x178] sm:$0xe] %v946_v14  ;;  %14517 = vmatprep.subr.bf16.mxu0 %v19166_v42  ;;  %14723 = vmatpush3.bf16.msra.mxu1 %v18982_v35  ;;  %v22790_v59 = vand.u32 4294901760, %v19170_v17  ;;  %v23492_v61 = vld [vmem:[#allocation72_spill] sm:$0xff] }
 0x492   :  { %14519 = vmatpush1.bf16.msra.mxu0 %v19168_v11  ;;  %14725 = vmatprep.subr.bf16.mxu1 %v18895_v19 }
 0x493   :  { %v958_v41 = vpop.permute.xlu1 %957  ;;  %v977_v5 = vpop.permute.xlu0 %976  ;;  %v19185_v62 = vpack.c.bf16 %v22790_v59, %v22789_v23  ;;  %v23496_v23 = vld [vmem:[#allocation74_spill] sm:$0xff] }
 0x494   :  { %v962_v26 = vsel %vm23493_vm5, %v23492_v61, %v958_v41  ;;  %v963_v36 = vsel %vm23494_vm6, %v958_v41, %v960_v60  ;;  %13390 = vmatmul.mubr.f32.vlgmr.msra.gmra.mrb[24].mxu1 %v23495_v31  ;;  %v1119_v38 = vld [vmem:[#allocation2 + $0x140] sm:$0xff]  ;;  %v23499_v41 = vld [vmem:[#allocation85_spill] sm:$0xff] }
 0x495   :  { %23491 = vst [vmem:[#allocation22_spill] sm:$0xff] %v19185_v62  ;;  %968 = vst [vmem:[#allocation2 + $0x170] sm:$0x70] %v962_v26  ;;  %14727 = vmatpush3.bf16.msra.mxu1 %v18895_v19  ;;  %13416 = vmatprep.mubr.f32.mxu1 %v18801_v13  ;;  %v19203_v31 = vld [vmem:[#allocation2 + $0x148] sm:$0xff] }
 0x496   :  { %969 = vst [vmem:[#allocation2 + $0x178] sm:$0x70] %v963_v36  ;;  %14729 = vmatprep.subr.bf16.mxu1 %v18915_v46 }
 0x497   :  { %v975_v14 = vpop.permute.xlu1 %974  ;;  %v997_v50 = vpop.permute.xlu0 %996 }
 0x498   :  { %v979_v59 = vsel %vm23497_vm7, %v23496_v23, %v975_v14  ;;  %v980_v61 = vsel %vm23498_vm8, %v975_v14, %v977_v5  ;;  %v3820_v23 = vand.u32 4294901760, %v1119_v38  ;;  %v3818_v5 = vand.u32 4294901760, %v19203_v31  ;;  %v23500_v14 = vld [vmem:[#allocation90_spill] sm:$0xff] }
 0x499   :  { %985 = vst [vmem:[#allocation2 + $0x1a0] ss:$-44 sps:$4 sm:$0x83] %v979_v59   ;;  %986 = vst [vmem:[#allocation2 + $0x1a8] ss:$-44 sps:$4 sm:$0x83] %v980_v61   ;;  %14731 = vmatpush3.bf16.msra.mxu1 %v18915_v46 }
 0x49a   :  { %14733 = vmatprep.subr.bf16.mxu1 %v18935_v52 }
 0x49b   :  { %v995_v60 = vpop.permute.xlu1 %994  ;;  %v1014_v19 = vpop.permute.xlu0 %1013 }
 0x49c   :  { %v999_v26 = vsel %vm146_vm4, %v23499_v41, %v995_v60  ;;  %v1000_v36 = vsel %vm146_vm4, %v995_v60, %v997_v50  ;;  %vm5900_vm4 = vcmask 97280  }
 0x49d   :  { %1005 = vst [vmem:[#allocation2 + $0x1a0] sm:$0x1c] %v999_v26  ;;  %1006 = vst [vmem:[#allocation2 + $0x1a8] sm:$0x1c] %v1000_v36  ;;  %14735 = vmatpush3.bf16.msra.mxu1 %v18935_v52  ;;  %v19212_v26 = vsub.f32 %v1119_v38, %v3820_v23 }
 0x49e   :  { %14737 = vmatprep.subr.bf16.mxu1 %v18950_v44 }
 0x49f   :  { %v1012_v46 = vpop.permute.xlu1 %1011  ;;  %v1031_v59 = vpop.permute.xlu0 %1030 }
 0x4a0   :  { %v1016_v61 = vsel %vm504_vm12, %v23500_v14, %v1012_v46  ;;  %v1017_v41 = vsel %vm504_vm12, %v1012_v46, %v1014_v19  ;;  %v1126_v45 = vld [vmem:[#allocation2 + $0x178] sm:$0xff]  ;;  %v1125_v50 = vld [vmem:[#allocation2 + $0x170] sm:$0xff] }
 0x4a1   :  { %1022 = vst [vmem:[#allocation2 + $0x1a0] sm:$0xe0] %v1016_v61  ;;  %1023 = vst [vmem:[#allocation2 + $0x1a8] sm:$0xe0] %v1017_v41  ;;  %14739 = vmatpush3.bf16.msra.mxu1 %v18950_v44  ;;  %v3822_v60 = vand.u32 4294901760, %v1126_v45  ;;  %v3824_v52 = vand.u32 4294901760, %v1125_v50 }
 0x4a2   :  { %14741 = vmatprep.subr.bf16.mxu1 %v18972_v33  ;;  %v23502_v46 = vld [vmem:[#allocation94_spill] sm:$0xff]  ;;  %v22794_v44 = vand.u32 4294901760, %v19212_v26 }
 0x4a3   :  { %v1029_v36 = vpop.permute.xlu1 %1028  ;;  %v19215_v56 = vpack.c.bf16 %v3822_v60, %v3818_v5  ;;  %v19217_v24 = vpack.c.bf16 %v3824_v52, %v3820_v23  ;;  %v19219_v14 = vsub.f32 %v1125_v50, %v3824_v52  ;;  %v1048_v19 = vpop.permute.xlu0 %1047  ;;  %v23504_v50 = vld [vmem:[#allocation101_spill] sm:$0xff] }
 0x4a4   :  { %v1033_v61 = vsel %vm522_vm11, %v23502_v46, %v1029_v36  ;;  %v1034_v41 = vsel %vm522_vm11, %v1029_v36, %v1031_v59  ;;  %v23505_v46 = vand.u32 4294901760, %v19092_v54  ;;  %vm5937_vm11 = vcmask 1043456  }
 0x4a5   :  { %23501 = vst [vmem:[#allocation9_spill] sm:$0xff] %v19217_v24  ;;  %1039 = vst [vmem:[#allocation2 + $0x1d0] sm:$0x7] %v1033_v61  ;;  %14521 = vmatprep.subr.bf16.mxu0 %v19215_v56  ;;  %14743 = vmatpush3.bf16.msra.mxu1 %v18972_v33  ;;  %v22795_v38 = vand.u32 4294901760, %v19219_v14 }
 0x4a6   :  { %1040 = vst [vmem:[#allocation2 + $0x1d8] sm:$0x7] %v1034_v41  ;;  %14523 = vmatpush1.bf16.msra.mxu0 %v19217_v24  ;;  %14745 = vmatprep.subr.bf16.mxu1 %v18998_v6  ;;  %v19243_v61 = vsub.f32 %v19092_v54, %v23505_v46  ;;  %v23506_v41 = vand.u32 4294901760, %v19100_v22 }
 0x4a7   :  { %v1046_v23 = vpop.permute.xlu1 %1045  ;;  %v19234_v59 = vpack.c.bf16 %v22795_v38, %v22794_v44  ;;  %v1066_v36 = vpop.permute.xlu0 %1065  ;;  %v23507_v38 = vld [vmem:[#allocation108_spill] sm:$0xff] }
 0x4a8   :  { %v1050_v52 = vsel %vm540_vm13, %v23504_v50, %v1046_v23  ;;  %v1051_v33 = vsel %vm540_vm13, %v1046_v23, %v1048_v19  ;;  %v19248_v44 = vsub.f32 %v19100_v22, %v23506_v41  ;;  %v22796_v54 = vand.u32 4294901760, %v19243_v61 }
 0x4a9   :  { %23503 = vst [vmem:[#allocation11_spill] sm:$0xff] %v19234_v59  ;;  %1056 = vst [vmem:[#allocation2 + $0x1d0] sm:$0x38] %v1050_v52  ;;  %14747 = vmatpush3.bf16.msra.mxu1 %v18998_v6  ;;  %v1131_v6 = vld [vmem:[#allocation2 + $0x1a0] sm:$0xff]  ;;  %v23508_v52 = vand.u32 4294901760, %v19147_v63 }
 0x4aa   :  { %1057 = vst [vmem:[#allocation2 + $0x1d8] sm:$0x38] %v1051_v33  ;;  %14749 = vmatprep.subr.bf16.mxu1 %v18882_v58  ;;  %v22797_v22 = vand.u32 4294901760, %v19248_v44  ;;  %v23509_v33 = vand.u32 4294901760, %v19155_v4  ;;  %v4040_v46 = vsub.f32 %v19243_v61, %v22796_v54 }
 0x4ab   :  { %v1064_v50 = vpop.permute.xlu1 %1063 }
 0x4ac   :  { %v1068_v19 = vsel %vm559_vm14, %v23507_v38, %v1064_v50  ;;  %v1069_v23 = vsel %vm559_vm14, %v1064_v50, %v1066_v36  ;;  %13417 = vmatmul.mubr.f32.vlgmr.msra.gmra.mrb[24].mxu1 %v18944_v10  ;;  %v19263_v38 = vsub.f32 %v19147_v63, %v23508_v52  ;;  %v19268_v36 = vsub.f32 %v19155_v4, %v23509_v33 }
 0x4ad   :  { %1074 = vst [vmem:[#allocation2 + $0x200] ss:$-44 sps:$4 sm:$0xc1] %v1068_v19   ;;  %1075 = vst [vmem:[#allocation2 + $0x208] ss:$-44 sps:$4 sm:$0xc1] %v1069_v23   ;;  %14751 = vmatpush3.bf16.msra.mxu1 %v18882_v58  ;;  %13443 = vmatprep.mubr.f32.mxu1 %v18801_v13  ;;  %v4052_v63 = vsub.f32 %v19248_v44, %v22797_v22  ;;  %v19279_v50 = vsub.f32 %v19203_v31, %v3818_v5 }
 0x4ae   :  { %14753 = vmatprep.subr.bf16.mxu1 %v18902_v40  ;;  %v1132_v58 = vld [vmem:[#allocation2 + $0x1a8] sm:$0xff]  ;;  %v3828_v13 = vand.u32 4294901760, %v1131_v6  ;;  %v19281_v4 = vsub.f32 %v1126_v45, %v3822_v60  ;;  %v22798_v52 = vand.u32 4294901760, %v19263_v38  ;;  %v22799_v33 = vand.u32 4294901760, %v19268_v36 }
 0x4af   :  { %v3826_v41 = vand.u32 4294901760, %v1132_v58  ;;  %v4041_v22 = vand.u32 4294901760, %v4040_v46  ;;  %v4053_v31 = vand.u32 4294901760, %v4052_v63  ;;  %v22806_v8 = vand.u32 4294901760, %v19279_v50 }
 0x4b0   :  { %v19286_v62 = vsub.f32 %v1131_v6, %v3828_v13  ;;  %v4076_v6 = vsub.f32 %v19268_v36, %v22799_v33 }
 0x4b1   :  { %14755 = vmatpush3.bf16.msra.mxu1 %v18902_v40 }
 0x4b2   :  { %14757 = vmatprep.subr.bf16.mxu1 %v18922_v21 }
 0x4b4   :  { %v1138_v19 = vld [vmem:[#allocation2 + $0x1d8] sm:$0xff]  ;;  %v1137_v23 = vld [vmem:[#allocation2 + $0x1d0] sm:$0xff]  ;;  %v1144_v40 = vld [vmem:[#allocation2 + $0x208] sm:$0xff] }
 0x4b5   :  { %14759 = vmatpush3.bf16.msra.mxu1 %v18922_v21  ;;  %v3830_v54 = vand.u32 4294901760, %v1138_v19  ;;  %v3832_v59 = vand.u32 4294901760, %v1137_v23  ;;  %v19295_v43 = vand.u32 4294901760, %v1144_v40  ;;  %v4064_v21 = vsub.f32 %v19263_v38, %v22798_v52  ;;  %v1143_v63 = vld [vmem:[#allocation2 + $0x200] sm:$0xff] }
 0x4b6   :  { %14761 = vmatprep.subr.bf16.mxu1 %v18940_v49  ;;  %v19318_v46 = vand.u32 4294901760, %v1143_v63 }
 0x4b7   :  { %v19289_v5 = vpack.c.bf16 %v3830_v54, %v3826_v41  ;;  %v19291_v45 = vpack.c.bf16 %v3832_v59, %v3828_v13  ;;  %v19293_v60 = vsub.f32 %v1137_v23, %v3832_v59  ;;  %v19306_v13 = vsub.f32 %v1132_v58, %v3826_v41 }
 0x4b8   :  { %v19308_v59 = vsub.f32 %v1138_v19, %v3830_v54  ;;  %v4117_v23 = vand.u32 4294901760, %v19286_v62  ;;  %v4065_v58 = vand.u32 4294901760, %v4064_v21  ;;  %v4077_v54 = vand.u32 4294901760, %v4076_v6 }
 0x4b9   :  { %23510 = vst [vmem:[#allocation13_spill] sm:$0xff] %v19289_v5  ;;  %23511 = vst [vmem:[#allocation16_spill] sm:$0xff] %v19291_v45  ;;  %14525 = vmatprep.subr.bf16.mxu0 %v19289_v5  ;;  %14763 = vmatpush3.bf16.msra.mxu1 %v18940_v49  ;;  %v4129_v52 = vand.u32 4294901760, %v19293_v60  ;;  %v4088_v49 = vsub.f32 %v19279_v50, %v22806_v8  ;;  %v14532_v41 = vpack.c.bf16 %v4053_v31, %v4041_v22  ;;  %v23514_v8 = vld [vmem:[#allocation98_spill] sm:$0xff] }
 0x4ba   :  { %14527 = vmatpush1.bf16.msra.mxu0 %v19291_v45  ;;  %14765 = vmatprep.subr.bf16.mxu1 %v18957_v2  ;;  %v23512_v19 = vand.u32 4294901760, %v19281_v4  ;;  %v22807_v5 = vand.u32 4294901760, %v19306_v13  ;;  %v23513_v21 = vand.u32 4294901760, %v19170_v17  ;;  %v23515_v22 = vand.u32 4294901760, %v19159_v51 }
 0x4bb   :  { %3835 = vmatprep.subr.mxu0 %v19295_v43  ;;  %v19316_v33 = vpack.c.bf16 %v4129_v52, %v4117_v23 }
 0x4bc   :  { %v4100_v45 = vsub.f32 %v19281_v4, %v23512_v19  ;;  %v4082_v6 = vsub.f32 %v19170_v17, %v23513_v21  ;;  %v4070_v31 = vsub.f32 %v19159_v51, %v23515_v22  ;;  %v4089_v19 = vand.u32 4294901760, %v4088_v49  ;;  %v23518_v22 = vld [vmem:[#allocation106_spill] sm:$0xff] }
 0x4bd   :  { %14767 = vmatpush3.bf16.msra.mxu1 %v18957_v2  ;;  %v14536_v2 = vpack.c.bf16 %v4077_v54, %v4065_v58  ;;  %v19349_v21 = vsub.f32 %v1144_v40, %v19295_v43  ;;  %v23517_v54 = vand.u32 4294901760, %v19219_v14 }
 0x4be   :  { %3837 = vmatpush1.msra.mxu0 %v19318_v46  ;;  %14769 = vmatprep.subr.bf16.mxu1 %v18982_v35  ;;  %v4101_v24 = vand.u32 4294901760, %v4100_v45  ;;  %v4083_v58 = vand.u32 4294901760, %v4082_v6  ;;  %v23519_v45 = vand.u32 4294901760, %v19212_v26 }
 0x4bf   :  { %3886 = vmatmul.mubr.f32.vlgmr.msra.gmra.mrb[24].mxu0 %v23514_v8  ;;  %14529 = vmatprep.subr.bf16.mxu0 %v19078_v53  ;;  %v4112_v8 = vsub.f32 %v19306_v13, %v22807_v5  ;;  %v23516_v53 = vand.u32 4294901760, %v19308_v59  ;;  %v4106_v49 = vsub.f32 %v19219_v14, %v23517_v54  ;;  %v4135_v5 = vand.u32 4294901760, %v19349_v21 }
 0x4c0   :  { %14531 = vmatpush1.bf16.msra.mxu0 %v19080_v55  ;;  %3891 = vmatprep.mubr.f32.mxu0 %v23218_v32  ;;  %v14540_v40 = vpack.c.bf16 %v4101_v24, %v4089_v19  ;;  %v19363_v54 = vsub.f32 %v1143_v63, %v19318_v46 }
 0x4c1   :  { %14771 = vmatpush3.bf16.msra.mxu1 %v18982_v35  ;;  %14533 = vmatprep.subr.bf16.mxu0 %v14532_v41  ;;  %v4124_v55 = vsub.f32 %v19308_v59, %v23516_v53  ;;  %v4071_v35 = vand.u32 4294901760, %v4070_v31  ;;  %v4094_v41 = vsub.f32 %v19212_v26, %v23519_v45  ;;  %v4113_v6 = vand.u32 4294901760, %v4112_v8  ;;  %v23520_v31 = vld [vmem:[#allocation112_spill] sm:$0xff] }
 0x4c2   :  { %v4136_v19 = vsub.f32 %v19349_v21, %v4135_v5 }
 0x4c3   :  { %3897 = vmatmul.mubr.f32.gmra.mrb[26].mxu0 %v23518_v22  ;;  %v4125_v53 = vand.u32 4294901760, %v4124_v55  ;;  %v14538_v22 = vpack.c.bf16 %v4083_v58, %v4071_v35  ;;  %v4095_v45 = vand.u32 4294901760, %v4094_v41  ;;  %v4141_v55 = vand.u32 4294901760, %v19363_v54 }
 0x4c4   :  { %14535 = vmatpush1.bf16.msra.mxu0 %v19137_v7  ;;  %13444 = vmatmul.mubr.f32.vlgmr.msra.gmra.mrb[24].mxu1 %v18944_v10  ;;  %v4107_v7 = vand.u32 4294901760, %v4106_v49  ;;  %v4130_v10 = vsub.f32 %v19293_v60, %v4129_v52  ;;  %v4137_v58 = vand.u32 4294901760, %v4136_v19  ;;  %v23523_v41 = vand.u32 4294901760, %v19281_v4 }
 0x4c5   :  { %3902 = vmatprep.mubr.f32.mxu0 %v23218_v32  ;;  %14537 = vmatprep.subr.bf16.mxu0 %v14536_v2  ;;  %v4118_v2 = vsub.f32 %v19286_v62, %v4117_v23  ;;  %v14544_v24 = vpack.c.bf16 %v4125_v53, %v4113_v6  ;;  %v4142_v23 = vsub.f32 %v19363_v54, %v4141_v55  ;;  %v23525_v6 = vand.u32 4294901760, %v19308_v59 }
 0x4c6   :  { %v14542_v63 = vpack.c.bf16 %v4107_v7, %v4095_v45  ;;  %v4131_v8 = vand.u32 4294901760, %v4130_v10  ;;  %v14564_v7 = vpack.c.bf16 %v19308_v59, %v19306_v13  ;;  %v23538_v10 = vld [vmem:[#allocation128_spill] sm:$0xff] }
 0x4c7   :  { %3908 = vmatmul.mubr.f32.gmra.mrb[28].mxu0 %v23520_v31  ;;  %v4119_v52 = vand.u32 4294901760, %v4118_v2  ;;  %v4143_v35 = vand.u32 4294901760, %v4142_v23  ;;  %v23539_v2 = vld [vmem:[#allocation84_spill] sm:$0xff]  ;;  %v23544_v23 = vld [vmem:[#allocation13_spill] sm:$0xff] }
 0x4c8   :  { %14539 = vmatpush1.bf16.msra.mxu0 %v14538_v22  ;;  %3913 = vmatprep.mubr.f32.mxu0 %v23218_v32  ;;  %v14560_v22 = vpack.c.bf16 %v19281_v4, %v19279_v50  ;;  %v23536_v4 = vld [vmem:[#allocation122_spill] sm:$0xff] }
 0x4c9   :  { %14541 = vmatprep.subr.bf16.mxu0 %v14540_v40  ;;  %v14546_v49 = vpack.c.bf16 %v4131_v8, %v4119_v52  ;;  %v23541_v52 = vld [vmem:[#allocation92_spill] sm:$0xff] }
 0x4cb   :  { %3919 = vmatmul.mubr.f32.gmra.mrb[30].mxu0 %v17825_v1  ;;  %v23521_v1 = vpack.c.bf16 %v19047_v48, %v19021_v20 }
 0x4cc   :  { %14543 = vmatpush1.bf16.msra.mxu0 %v14542_v63  ;;  %3924 = vmatprep.mubr.f32.mxu0 %v23218_v32  ;;  %v23540_v63 = vld [vmem:[#allocation88_spill] sm:$0xff] }
 0x4cd   :  { %14545 = vmatprep.subr.bf16.mxu0 %v14544_v24 }
 0x4cf   :  { %3930 = vmatmul.mubr.f32.gmra.mrb[32].mxu0 %v17850_v15  ;;  %v23522_v15 = vand.u32 4294901760, %v19279_v50  ;;  %v23532_v50 = vld [vmem:[#allocation103_spill] sm:$0xff] }
 0x4d0   :  { %14547 = vmatpush1.bf16.msra.mxu0 %v14546_v49  ;;  %3935 = vmatprep.mubr.f32.mxu0 %v23218_v32  ;;  %v23543_v49 = vld [vmem:[#allocation9_spill] sm:$0xff] }
 0x4d1   :  { %4138 = vmatprep.subr.mxu0 %v4137_v58  ;;  %v19391_v40 = vpack.c.bf16 %v23523_v41, %v23522_v15  ;;  %v23542_v58 = vld [vmem:[#allocation100_spill] sm:$0xff]  ;;  %v23547_v15 = vand.u32 4294901760, %v19021_v20  ;;  %v23548_v41 = vand.u32 4294901760, %v19047_v48  ;;  %v23553_v20 = vld [vmem:[#allocation125_spill] sm:$0xff]  ;;  %v23554_v48 = vld [vmem:[#allocation6_spill] sm:$0xff] }
 0x4d3   :  { %3941 = vmatmul.mubr.f32.gmra.mrb[34].mxu0 %v17868_v28  ;;  %v23524_v28 = vand.u32 4294901760, %v19306_v13  ;;  %v5876_v13 = vld [vmem:[%s22471_s6] sm:$0xff] }
 0x4d4   :  { %4144 = vmatpush1.msra.mxu0 %v4143_v35  ;;  %3946 = vmatprep.mubr.f32.mxu0 %v23218_v32  ;;  %v5902_v59 = vsel %vm5900_vm4, %v5876_v13, 0  ;;  %v23545_v35 = vld [vmem:[#allocation105_spill] sm:$0xff]  ;;  %v23561_v13 = vand.u32 4294901760, %v19268_v36 }
 0x4d5   :  { %14549 = vmatprep.subr.bf16.mxu0 %v23521_v1  ;;  %v19399_v53 = vpack.c.bf16 %v23525_v6, %v23524_v28  ;;  %v19459_v31 = vand.u32 4294901760, %v5902_v59  ;;  %v23546_v1 = vld [vmem:[#allocation16_spill] sm:$0xff]  ;;  %v14588_v28 = vpack.c.bf16 %v23548_v41, %v23547_v15  ;;  %v23549_v6 = vld [vmem:[#allocation109_spill] sm:$0xff] }
 0x4d6   :  { %v5234_v41 = vld [vmem:[%s22470_s5 + $0x8] sm:$0xf] }
 0x4d7   :  { %3952 = vmatmul.mubr.f32.gmra.mrb[36].mxu0 %v17904_v9  ;;  %v23526_v9 = vld [vmem:[#allocation132_spill] sm:$0xff]  ;;  %v19463_v45 = vsub.f32 %v5902_v59, %v19459_v31 }
 0x4d8   :  { %3957 = vmatprep.mubr.f32.mxu0 %v23218_v32 }
 0x4d9   :  { %v6010_v24 = vand.u32 4294901760, %v19463_v45 }
 0x4db   :  { %3963 = vmatmul.mubr.f32.gmra.mrb[38].mxu0 %v17926_v39  ;;  %v14552_v39 = vpack.c.bf16 %v19248_v44, %v19243_v61  ;;  %v6011_v19 = vsub.f32 %v19463_v45, %v6010_v24 }
 0x4dc   :  { %3968 = vmatprep.mubr.f32.mxu0 %v23218_v32 }
 0x4dd   :  { %v6012_v8 = vand.u32 4294901760, %v6011_v19  ;;  %v23563_v19 = vld [vmem:[#allocation21_spill] sm:$0xff] }
 0x4df   :  { %3974 = vmatmul.mubr.f32.gmra.mrb[40].mxu0 %v17950_v18  ;;  %v23527_v18 = vpack.c.bf16 %v19051_v12, %v19023_v16  ;;  %v14558_v16 = vpack.c.bf16 %v19170_v17, %v19159_v51  ;;  %v23529_v12 = vld [vmem:[#allocation89_spill] sm:$0xff]  ;;  %v14566_v51 = vpack.c.bf16 %v19293_v60, %v19286_v62  ;;  %v23534_v62 = vld [vmem:[#allocation115_spill] sm:$0xff]  ;;  %v23537_v60 = vld [vmem:[#allocation126_spill] sm:$0xff]  ;;  %13450 = vmatprep.mubr.f32.mxu1 %v6012_v8 }
 0x4e0   :  { %3979 = vmatprep.mubr.f32.mxu0 %v23218_v32  ;;  %v23531_v17 = vld [vmem:[#allocation97_spill] sm:$0xff] }
 0x4e1   :  { %v23569_v8 = vld [vmem:[#allocation113_spill] sm:$0xff] }
 0x4e3   :  { %3985 = vmatmul.mubr.f32.gmra.mrb[42].mxu0 %v17967_v29  ;;  %v23528_v29 = vpack.c.bf16 %v19113_v37, %v19094_v25  ;;  %v14562_v25 = vpack.c.bf16 %v19219_v14, %v19212_v26  ;;  %v23530_v37 = vld [vmem:[#allocation93_spill] sm:$0xff]  ;;  %v23533_v26 = vld [vmem:[#allocation110_spill] sm:$0xff] }
 0x4e4   :  { %3990 = vmatprep.mubr.f32.mxu0 %v23218_v32  ;;  %v23535_v14 = vld [vmem:[#allocation118_spill] sm:$0xff] }
 0x4e7   :  { %3996 = vmatmul.mubr.f32.gmra.mrb[44].mxu0 %v17990_v0  ;;  %v14556_v0 = vpack.c.bf16 %v19268_v36, %v19263_v38  ;;  %v23568_v36 = vld [vmem:[#allocation111_spill] sm:$0xff] }
 0x4e8   :  { %4001 = vmatprep.mubr.f32.mxu0 %v23218_v32 }
 0x4eb   :  { %4007 = vmatmul.mubr.f32.gmra.mrb[46].mxu0 %v23526_v9  ;;  %v23550_v9 = vld [vmem:[#allocation114_spill] sm:$0xff] }
 0x4ec   :  { %4187 = vmatprep.mubr.f32.mxu0 %v23218_v32 }
 0x4ef   :  { %4189 = vmatmul.mubr.f32.vlgmr.msra.gmra.mrb[24].mxu0 %v17644_v30 }
 0x4f0   :  { %14551 = vmatpush1.bf16.msra.mxu0 %v23527_v18  ;;  %4194 = vmatprep.mubr.f32.mxu0 %v23218_v32  ;;  %v23552_v18 = vld [vmem:[#allocation121_spill] sm:$0xff] }
 0x4f1   :  { %14553 = vmatprep.subr.bf16.mxu0 %v14552_v39  ;;  %v23551_v39 = vld [vmem:[#allocation117_spill] sm:$0xff] }
 0x4f3   :  { %4196 = vmatmul.mubr.f32.gmra.mrb[26].mxu0 %v17661_v57 }
 0x4f4   :  { %14555 = vmatpush1.bf16.msra.mxu0 %v23528_v29  ;;  %4201 = vmatprep.mubr.f32.mxu0 %v23218_v32  ;;  %v23556_v29 = vand.u32 4294901760, %v19243_v61  ;;  %v23565_v61 = vld [vmem:[#allocation22_spill] sm:$0xff] }
 0x4f5   :  { %14557 = vmatprep.subr.bf16.mxu0 %v14556_v0  ;;  %v23555_v0 = vld [vmem:[#allocation131_spill] sm:$0xff] }
 0x4f7   :  { %4203 = vmatmul.mubr.f32.gmra.mrb[28].mxu0 %v23529_v12 }
 0x4f8   :  { %14559 = vmatpush1.bf16.msra.mxu0 %v14558_v16  ;;  %4208 = vmatprep.mubr.f32.mxu0 %v23218_v32 }
 0x4f9   :  { %14561 = vmatprep.subr.bf16.mxu0 %v14560_v22  ;;  %v23557_v22 = vand.u32 4294901760, %v19248_v44  ;;  %v23564_v44 = vld [vmem:[#allocation99_spill] sm:$0xff] }
 0x4fb   :  { %4210 = vmatmul.mubr.f32.gmra.mrb[30].mxu0 %v23530_v37  ;;  %v14592_v16 = vpack.c.bf16 %v23557_v22, %v23556_v29 }
 0x4fc   :  { %14563 = vmatpush1.bf16.msra.mxu0 %v14562_v25  ;;  %4215 = vmatprep.mubr.f32.mxu0 %v23218_v32  ;;  %v23559_v25 = vld [vmem:[#allocation35_spill] sm:$0xff] }
 0x4fd   :  { %14565 = vmatprep.subr.bf16.mxu0 %v14564_v7  ;;  %v23558_v7 = vld [vmem:[#allocation87_spill] sm:$0xff] }
 0x4ff   :  { %4217 = vmatmul.mubr.f32.gmra.mrb[32].mxu0 %v23531_v17 }
 0x500   :  { %14567 = vmatpush1.bf16.msra.mxu0 %v14566_v51  ;;  %4222 = vmatprep.mubr.f32.mxu0 %v23218_v32  ;;  %v23560_v51 = vand.u32 4294901760, %v19263_v38  ;;  %v23567_v38 = vld [vmem:[#allocation11_spill] sm:$0xff] }
 0x501   :  { %4334 = vmatprep.subr.mxu0 %v19349_v21  ;;  %v23574_v21 = vld [vmem:[#allocation130_spill] sm:$0xff] }
 0x502   :  { %v14596_v59 = vpack.c.bf16 %v23561_v13, %v23560_v51 }
 0x503   :  { %4224 = vmatmul.mubr.f32.gmra.mrb[34].mxu0 %v23532_v50 }
 0x504   :  { %4337 = vmatpush1.msra.mxu0 %v19363_v54  ;;  %4229 = vmatprep.mubr.f32.mxu0 %v23218_v32  ;;  %v5877_v54 = vld [vmem:[%s22471_s6 + $0x8] sm:$0xff] }
 0x505   :  { %14569 = vmatprep.subr.bf16.mxu0 %v19045_v27 }
 0x507   :  { %4231 = vmatmul.mubr.f32.gmra.mrb[36].mxu0 %v23533_v26 }
 0x508   :  { %4236 = vmatprep.mubr.f32.mxu0 %v23218_v32 }
 0x50b   :  { %4238 = vmatmul.mubr.f32.gmra.mrb[38].mxu0 %v23534_v62 }
 0x50c   :  { %4243 = vmatprep.mubr.f32.mxu0 %v23218_v32 }
 0x50f   :  { %4245 = vmatmul.mubr.f32.gmra.mrb[40].mxu0 %v23535_v14 }
 0x510   :  { %4250 = vmatprep.mubr.f32.mxu0 %v23218_v32 }
 0x513   :  { %4252 = vmatmul.mubr.f32.gmra.mrb[42].mxu0 %v23536_v4 }
 0x514   :  { %4257 = vmatprep.mubr.f32.mxu0 %v23218_v32 }
 0x517   :  { %4259 = vmatmul.mubr.f32.gmra.mrb[44].mxu0 %v23537_v60 }
 0x518   :  { %4264 = vmatprep.mubr.f32.mxu0 %v23218_v32 }
 0x51b   :  { %4266 = vmatmul.mubr.f32.gmra.mrb[46].mxu0 %v23538_v10 }
 0x51c   :  { %4380 = vmatprep.mubr.f32.mxu0 %v23218_v32 }
 0x51f   :  { %4383 = vmatmul.mubr.f32.vlgmr.msra.gmra.mrb[24].mxu0 %v23539_v2  ;;  %v23562_v2 = vld [vmem:[#allocation91_spill] sm:$0xff] }
 0x520   :  { %14571 = vmatpush1.bf16.msra.mxu0 %v19049_v34  ;;  %4388 = vmatprep.mubr.f32.mxu0 %v23218_v32 }
 0x521   :  { %14573 = vmatprep.subr.bf16.mxu0 %v19109_v47 }
 0x523   :  { %4391 = vmatmul.mubr.f32.gmra.mrb[26].mxu0 %v23540_v63  ;;  %v23566_v63 = vld [vmem:[#allocation107_spill] sm:$0xff] }
 0x524   :  { %14575 = vmatpush1.bf16.msra.mxu0 %v19111_v3  ;;  %4396 = vmatprep.mubr.f32.mxu0 %v23218_v32 }
 0x525   :  { %14577 = vmatprep.subr.bf16.mxu0 %v19166_v42 }
 0x527   :  { %4399 = vmatmul.mubr.f32.gmra.mrb[28].mxu0 %v23541_v52 }
 0x528   :  { %14579 = vmatpush1.bf16.msra.mxu0 %v19168_v11  ;;  %4404 = vmatprep.mubr.f32.mxu0 %v23218_v32 }
 0x529   :  { %14581 = vmatprep.subr.bf16.mxu0 %v19215_v56 }
 0x52b   :  { %4407 = vmatmul.mubr.f32.gmra.mrb[30].mxu0 %v23542_v58 }
 0x52c   :  { %14583 = vmatpush1.bf16.msra.mxu0 %v23543_v49  ;;  %4412 = vmatprep.mubr.f32.mxu0 %v23218_v32 }
 0x52d   :  { %14585 = vmatprep.subr.bf16.mxu0 %v23544_v23 }
 0x52f   :  { %4415 = vmatmul.mubr.f32.gmra.mrb[32].mxu0 %v23545_v35  ;;  %v5881_v35 = vld [vmem:[%s22471_s6 + $0x28] sm:$0xff] }
 0x530   :  { %14587 = vmatpush1.bf16.msra.mxu0 %v23546_v1  ;;  %4420 = vmatprep.mubr.f32.mxu0 %v23218_v32 }
 0x531   :  { %4518 = vmatprep.subr.mxu0 %v19295_v43 }
 0x533   :  { %4423 = vmatmul.mubr.f32.gmra.mrb[34].mxu0 %v23549_v6  ;;  %v5917_v6 = vsel %vm5900_vm4, %v5881_v35, 0  ;;  %v5887_v35 = vld [vmem:[%s22471_s6 + $0x58] sm:$0xff] }
 0x534   :  { %4520 = vmatpush1.msra.mxu0 %v19318_v46  ;;  %4428 = vmatprep.mubr.f32.mxu0 %v23218_v32 }
 0x535   :  { %14589 = vmatprep.subr.bf16.mxu0 %v14588_v28 }
 0x537   :  { %4431 = vmatmul.mubr.f32.gmra.mrb[36].mxu0 %v23550_v9 }
 0x538   :  { %4436 = vmatprep.mubr.f32.mxu0 %v23218_v32 }
 0x53b   :  { %4439 = vmatmul.mubr.f32.gmra.mrb[38].mxu0 %v23551_v39  ;;  %v5883_v39 = vld [vmem:[%s22471_s6 + $0x38] sm:$0xff] }
 0x53c   :  { %4444 = vmatprep.mubr.f32.mxu0 %v23218_v32  ;;  %v5923_v13 = vsel %vm5900_vm4, %v5883_v39, 0 }
 0x53f   :  { %4447 = vmatmul.mubr.f32.gmra.mrb[40].mxu0 %v23552_v18 }
 0x540   :  { %4452 = vmatprep.mubr.f32.mxu0 %v23218_v32 }
 0x543   :  { %4455 = vmatmul.mubr.f32.gmra.mrb[42].mxu0 %v23553_v20 }
 0x544   :  { %4460 = vmatprep.mubr.f32.mxu0 %v23218_v32 }
 0x547   :  { %4463 = vmatmul.mubr.f32.gmra.mrb[44].mxu0 %v23554_v48 }
 0x548   :  { %4468 = vmatprep.mubr.f32.mxu0 %v23218_v32 }
 0x54b   :  { %4471 = vmatmul.mubr.f32.gmra.mrb[46].mxu0 %v23555_v0 }
 0x54c   :  { %4563 = vmatprep.mubr.f32.mxu0 %v23218_v32 }
 0x54f   :  { %4567 = vmatmul.mubr.f32.vlgmr.msra.gmra.mrb[24].mxu0 %v23558_v7  ;;  %v5884_v7 = vld [vmem:[%s22471_s6 + $0x40] sm:$0xff] }
 0x550   :  { %14591 = vmatpush1.bf16.msra.mxu0 %v23559_v25  ;;  %4572 = vmatprep.mubr.f32.mxu0 %v23218_v32 }
 0x551   :  { %14593 = vmatprep.subr.bf16.mxu0 %v14592_v16  ;;  %v19632_v16 = vand.u32 4294901760, %v5917_v6 }
 0x553   :  { %4576 = vmatmul.mubr.f32.gmra.mrb[26].mxu0 %v23562_v2 }
 0x554   :  { %14595 = vmatpush1.bf16.msra.mxu0 %v23563_v19  ;;  %4581 = vmatprep.mubr.f32.mxu0 %v23218_v32 }
 0x555   :  { %14597 = vmatprep.subr.bf16.mxu0 %v14596_v59 }
 0x557   :  { %4585 = vmatmul.mubr.f32.gmra.mrb[28].mxu0 %v23564_v44 }
 0x558   :  { %14599 = vmatpush1.bf16.msra.mxu0 %v23565_v61  ;;  %4590 = vmatprep.mubr.f32.mxu0 %v23218_v32 }
 0x559   :  { %14601 = vmatprep.subr.bf16.mxu0 %v19391_v40  ;;  %v23570_v40 = vld [vmem:[#allocation116_spill] sm:$0xff] }
 0x55b   :  { %4594 = vmatmul.mubr.f32.gmra.mrb[30].mxu0 %v23566_v63  ;;  %v5926_v63 = vsel %vm5900_vm4, %v5884_v7, 0 }
 0x55c   :  { %14603 = vmatpush1.bf16.msra.mxu0 %v23567_v38  ;;  %4599 = vmatprep.mubr.f32.mxu0 %v23218_v32  ;;  %v5885_v38 = vld [vmem:[%s22471_s6 + $0x48] sm:$0xff] }
 0x55d   :  { %14605 = vmatprep.subr.bf16.mxu0 %v19399_v53  ;;  %v23571_v53 = vld [vmem:[#allocation120_spill] sm:$0xff] }
 0x55f   :  { %4603 = vmatmul.mubr.f32.gmra.mrb[32].mxu0 %v23568_v36 }
 0x560   :  { %14607 = vmatpush1.bf16.msra.mxu0 %v19316_v33  ;;  %4608 = vmatprep.mubr.f32.mxu0 %v23218_v32  ;;  %v23572_v33 = vld [vmem:[#allocation124_spill] sm:$0xff] }
 0x561   :  { %4755 = vmatprep.subr.mxu0 %v4135_v5  ;;  %v23573_v5 = vld [vmem:[#allocation8_spill] sm:$0xff] }
 0x563   :  { %4612 = vmatmul.mubr.f32.gmra.mrb[34].mxu0 %v23569_v8 }
 0x564   :  { %4759 = vmatpush1.msra.mxu0 %v4141_v55  ;;  %4617 = vmatprep.mubr.f32.mxu0 %v23218_v32 }
 0x565   :  { %14609 = vmatprep.subr.bf16.mxu0 %v19045_v27  ;;  %v23575_v27 = vld [vmem:[#allocation27_spill] sm:$0xff] }
 0x567   :  { %4621 = vmatmul.mubr.f32.gmra.mrb[36].mxu0 %v23570_v40  ;;  %v19656_v40 = vsub.f32 %v5917_v6, %v19632_v16 }
 0x568   :  { %4626 = vmatprep.mubr.f32.mxu0 %v23218_v32 }
 0x569   :  { %v6060_v6 = vand.u32 4294901760, %v19656_v40 }
 0x56b   :  { %4630 = vmatmul.mubr.f32.gmra.mrb[38].mxu0 %v23571_v53  ;;  %v19658_v53 = vand.u32 4294901760, %v5923_v13 }
 0x56c   :  { %4635 = vmatprep.mubr.f32.mxu0 %v23218_v32 }
 0x56f   :  { %4639 = vmatmul.mubr.f32.gmra.mrb[40].mxu0 %v23572_v33  ;;  %v5886_v33 = vld [vmem:[%s22471_s6 + $0x50] sm:$0xff] }
 0x570   :  { %4644 = vmatprep.mubr.f32.mxu0 %v23218_v32 }
 0x573   :  { %4648 = vmatmul.mubr.f32.gmra.mrb[42].mxu0 %v23573_v5 }
 0x574   :  { %4653 = vmatprep.mubr.f32.mxu0 %v23218_v32 }
 0x577   :  { %4657 = vmatmul.mubr.f32.gmra.mrb[44].mxu0 %v23574_v21 }
 0x578   :  { %4662 = vmatprep.mubr.f32.mxu0 %v23218_v32 }
 0x57b   :  { %4666 = vmatmul.mubr.f32.gmra.mrb[46].mxu0 %v23575_v27 }
 0x57c   :  { %4802 = vmatprep.mubr.f32.mxu0 %v23218_v32 }
 0x57f   :  { %4804 = vmatmul.mubr.f32.vlgmr.msra.gmra.mrb[24].mxu0 %v17644_v30 }
 0x580   :  { %14611 = vmatpush1.bf16.msra.mxu0 %v19049_v34  ;;  %4809 = vmatprep.mubr.f32.mxu0 %v23218_v32  ;;  %v5878_v34 = vld [vmem:[%s22471_s6 + $0x10] sm:$0xff] }
 0x581   :  { %14613 = vmatprep.subr.bf16.mxu0 %v19109_v47  ;;  %v5905_v47 = vsel %vm5900_vm4, %v5877_v54, 0 }
 0x583   :  { %4811 = vmatmul.mubr.f32.gmra.mrb[26].mxu0 %v17661_v57 }
 0x584   :  { %14615 = vmatpush1.bf16.msra.mxu0 %v19111_v3  ;;  %4816 = vmatprep.mubr.f32.mxu0 %v23218_v32  ;;  %v5908_v3 = vsel %vm5900_vm4, %v5878_v34, 0 }
 0x585   :  { %14617 = vmatprep.subr.bf16.mxu0 %v19166_v42  ;;  %v5879_v42 = vld [vmem:[%s22471_s6 + $0x18] sm:$0xff]  ;;  %v19585_v55 = vand.u32 4294901760, %v5908_v3 }
 0x586   :  { %v5911_v52 = vsel %vm5900_vm4, %v5879_v42, 0 }
 0x587   :  { %4818 = vmatmul.mubr.f32.gmra.mrb[28].mxu0 %v23529_v12  ;;  %v19602_v15 = vsub.f32 %v5908_v3, %v19585_v55  ;;  %v5929_v3 = vsel %vm5900_vm4, %v5885_v38, 0  ;;  %v6061_v38 = vsub.f32 %v19656_v40, %v6060_v6 }
 0x588   :  { %14619 = vmatpush1.bf16.msra.mxu0 %v19168_v11  ;;  %4823 = vmatprep.mubr.f32.mxu0 %v23218_v32  ;;  %v5880_v11 = vld [vmem:[%s22471_s6 + $0x20] sm:$0xff] }
 0x589   :  { %14621 = vmatprep.subr.bf16.mxu0 %v19215_v56  ;;  %v19579_v56 = vand.u32 4294901760, %v5905_v47  ;;  %v6030_v20 = vand.u32 4294901760, %v19602_v15 }
 0x58b   :  { %4825 = vmatmul.mubr.f32.gmra.mrb[30].mxu0 %v23530_v37  ;;  %v19592_v58 = vsub.f32 %v5905_v47, %v19579_v56  ;;  %v6031_v61 = vsub.f32 %v19602_v15, %v6030_v20  ;;  %v19669_v47 = vand.u32 4294901760, %v5926_v63 }
 0x58c   :  { %14623 = vmatpush1.bf16.msra.mxu0 %v23543_v49  ;;  %4830 = vmatprep.mubr.f32.mxu0 %v23218_v32  ;;  %v5914_v49 = vsel %vm5900_vm4, %v5880_v11, 0 }
 0x58d   :  { %14625 = vmatprep.subr.bf16.mxu0 %v23544_v23  ;;  %v19595_v23 = vand.u32 4294901760, %v5911_v52  ;;  %v6020_v28 = vand.u32 4294901760, %v19592_v58  ;;  %v19695_v7 = vsub.f32 %v5926_v63, %v19669_v47 }
 0x58f   :  { %4832 = vmatmul.mubr.f32.gmra.mrb[32].mxu0 %v23531_v17  ;;  %v19620_v9 = vsub.f32 %v5911_v52, %v19595_v23  ;;  %v6021_v51 = vsub.f32 %v19592_v58, %v6020_v28 }
 0x590   :  { %14627 = vmatpush1.bf16.msra.mxu0 %v23546_v1  ;;  %4837 = vmatprep.mubr.f32.mxu0 %v23218_v32  ;;  %v5882_v1 = vld [vmem:[%s22471_s6 + $0x30] sm:$0xff] }
 0x591   :  { %4928 = vmatprep.subr.mxu0 %v19295_v43  ;;  %v19606_v43 = vand.u32 4294901760, %v5914_v49  ;;  %v5920_v48 = vsel %vm5900_vm4, %v5882_v1, 0  ;;  %v6040_v2 = vand.u32 4294901760, %v19620_v9  ;;  %v6022_v27 = vand.u32 4294901760, %v6021_v51 }
 0x592   :  { %v19642_v19 = vand.u32 4294901760, %v5920_v48  ;;  %v6032_v1 = vand.u32 4294901760, %v6031_v61  ;;  %v5935_v51 = vsel %vm5900_vm4, %v5887_v35, 0 }
 0x593   :  { %4839 = vmatmul.mubr.f32.gmra.mrb[34].mxu0 %v23532_v50  ;;  %v19630_v22 = vsub.f32 %v5914_v49, %v19606_v43  ;;  %v6041_v54 = vsub.f32 %v19620_v9, %v6040_v2  ;;  %v5932_v49 = vsel %vm5900_vm4, %v5886_v33, 0 }
 0x594   :  { %4930 = vmatpush1.msra.mxu0 %v19318_v46  ;;  %4844 = vmatprep.mubr.f32.mxu0 %v23218_v32  ;;  %v5233_v46 = vld [vmem:[%s22470_s5] sm:$0xff]  ;;  %v19667_v34 = vsub.f32 %v5920_v48, %v19642_v19 }
 0x595   :  { %v6050_v8 = vand.u32 4294901760, %v19630_v22  ;;  %v6042_v61 = vand.u32 4294901760, %v6041_v54 }
 0x597   :  { %4846 = vmatmul.mubr.f32.gmra.mrb[36].mxu0 %v23533_v26  ;;  %v13445_v18 = vpop.f32.mrb[24].mxu1 }
 0x598   :  { %v15612_v0 = vadd.f32 %v13445_v18, %v5234_v41  ;;  %v5864_v29 = vpop.f32.mrb[25].mxu1  ;;  %4851 = vmatprep.mubr.f32.mxu0 %v23218_v32  ;;  %v6051_v41 = vsub.f32 %v19630_v22, %v6050_v8 }
 0x599   :  { %v15613_v25 = vadd.f32 %v5864_v29, %v5233_v46  ;;  %v19685_v46 = vsub.f32 %v5923_v13, %v19658_v53  ;;  %v6070_v29 = vand.u32 4294901760, %v19667_v34 }
 0x59a   :  { %v5875_v59 = vmax.f32 %v15612_v0, 0.0  ;;  %v19690_v0 = vand.u32 4294901760, %v5929_v3 }
 0x59b   :  { %v5874_v44 = vmax.f32 %v15613_v25, 0.0  ;;  %4853 = vmatmul.mubr.f32.gmra.mrb[38].mxu0 %v23534_v62  ;;  %v19697_v25 = vand.u32 4294901760, %v5932_v49  ;;  %v6080_v63 = vand.u32 4294901760, %v19685_v46  ;;  %v6071_v54 = vsub.f32 %v19667_v34, %v6070_v29 }
 0x59c   :  { %v5939_v36 = vsel %vm5937_vm11, %v5875_v59, 0  ;;  %4858 = vmatprep.mubr.f32.mxu0 %v23218_v32 }
 0x59d   :  { %v5945_v5 = vand.u32 4294901760, %v5939_v36  ;;  %v5942_v21 = vand.u32 4294901760, %v5874_v44  ;;  %v19718_v35 = vsub.f32 %v5932_v49, %v19697_v25  ;;  %v6072_v49 = vand.u32 4294901760, %v6071_v54 }
 0x59f   :  { %v6137_v42 = vsub.f32 %v5939_v36, %v5945_v5  ;;  %v19672_v11 = vpack.c.bf16 %v5945_v5, %v5942_v21  ;;  %v6130_v52 = vsub.f32 %v5874_v44, %v5942_v21  ;;  %4860 = vmatmul.mubr.f32.gmra.mrb[40].mxu0 %v23535_v14  ;;  %v19709_v5 = vsub.f32 %v5929_v3, %v19690_v0 }
 0x5a0   :  { %4865 = vmatprep.mubr.f32.mxu0 %v23218_v32  ;;  %v19711_v21 = vand.u32 4294901760, %v5935_v51  ;;  %v6062_v3 = vand.u32 4294901760, %v6061_v38 }
 0x5a1   :  { %v6131_v39 = vand.u32 4294901760, %v6130_v52  ;;  %14773 = vmatprep.subr.bf16.mxu1 %v19672_v11  ;;  %v6138_v18 = vand.u32 4294901760, %v6137_v42  ;;  %v19688_v48 = vpack.c.bf16 %v6137_v42, %v6130_v52 }
 0x5a2   :  { %14775 = vmatpush3.bf16.msra.mxu1 %v19672_v11 }
 0x5a3   :  { %4867 = vmatmul.mubr.f32.gmra.mrb[42].mxu0 %v23536_v4  ;;  %v6132_v13 = vsub.f32 %v6130_v52, %v6131_v39  ;;  %v6139_v59 = vsub.f32 %v6137_v42, %v6138_v18  ;;  %v19701_v44 = vpack.c.bf16 %v6138_v18, %v6131_v39  ;;  %v6052_v42 = vand.u32 4294901760, %v6051_v41 }
 0x5a4   :  { %4872 = vmatprep.mubr.f32.mxu0 %v23218_v32  ;;  %v6090_v52 = vand.u32 4294901760, %v19695_v7  ;;  %v6100_v41 = vand.u32 4294901760, %v19709_v5  ;;  %v19727_v39 = vsub.f32 %v5935_v51, %v19711_v21 }
 0x5a5   :  { %13451 = vmatmul.mubr.f32.vlgmr.msra.gmra.mrb[26].mxu1 %v6022_v27  ;;  %v6133_v36 = vand.u32 4294901760, %v6132_v13  ;;  %v6140_v33 = vand.u32 4294901760, %v6139_v59  ;;  %v6110_v13 = vand.u32 4294901760, %v19718_v35 }
 0x5a6   :  { %13453 = vmatprep.mubr.f32.mxu1 %v6032_v1  ;;  %v6081_v1 = vsub.f32 %v19685_v46, %v6080_v63  ;;  %v6091_v18 = vsub.f32 %v19695_v7, %v6090_v52  ;;  %v6101_v51 = vsub.f32 %v19709_v5, %v6100_v41 }
 0x5a7   :  { %4874 = vmatmul.mubr.f32.gmra.mrb[44].mxu0 %v23537_v60  ;;  %v14776_v27 = vpack.c.bf16 %v6140_v33, %v6133_v36  ;;  %v6111_v36 = vsub.f32 %v19718_v35, %v6110_v13 }
 0x5a8   :  { %4879 = vmatprep.mubr.f32.mxu0 %v23218_v32  ;;  %v6082_v59 = vand.u32 4294901760, %v6081_v1  ;;  %v6092_v38 = vand.u32 4294901760, %v6091_v18  ;;  %v6102_v33 = vand.u32 4294901760, %v6101_v51  ;;  %v5894_v1 = vld [vmem:[%s22472_s7 + $0x30] sm:$0xff] }
 0x5a9   :  { %13454 = vmatmul.mubr.f32.gmra.mrb[28].mxu1 %v6042_v61  ;;  %14777 = vmatprep.subr.bf16.mxu1 %v14776_v27  ;;  %v6120_v61 = vand.u32 4294901760, %v19727_v39  ;;  %v6112_v54 = vand.u32 4294901760, %v6111_v36 }
 0x5aa   :  { %14779 = vmatpush3.bf16.msra.mxu1 %v14776_v27  ;;  %13456 = vmatprep.mubr.f32.mxu1 %v6052_v42 }
 0x5ab   :  { %4881 = vmatmul.mubr.f32.gmra.mrb[46].mxu0 %v23538_v10  ;;  %14781 = vmatprep.subr.bf16.mxu1 %v19688_v48  ;;  %v6121_v42 = vsub.f32 %v19727_v39, %v6120_v61 }
 0x5ac   :  { %4973 = vmatprep.mubr.f32.mxu0 %v23218_v32 }
 0x5ad   :  { %13457 = vmatmul.mubr.f32.gmra.mrb[30].mxu1 %v6062_v3  ;;  %v6122_v27 = vand.u32 4294901760, %v6121_v42 }
 0x5ae   :  { %13459 = vmatprep.mubr.f32.mxu1 %v6072_v49 }
 0x5af   :  { %4975 = vmatmul.mubr.f32.vlgmr.msra.gmra.mrb[24].mxu0 %v17644_v30 }
 0x5b0   :  { %4980 = vmatprep.mubr.f32.mxu0 %v23218_v32 }
 0x5b1   :  { %13460 = vmatmul.mubr.f32.gmra.mrb[32].mxu1 %v6082_v59  ;;  %v5897_v59 = vld [vmem:[%s22472_s7 + $0x48] sm:$0xff] }
 0x5b2   :  { %13462 = vmatprep.mubr.f32.mxu1 %v6092_v38  ;;  %v5896_v38 = vld [vmem:[%s22472_s7 + $0x40] sm:$0xff] }
 0x5b3   :  { %4982 = vmatmul.mubr.f32.gmra.mrb[26].mxu0 %v17661_v57 }
 0x5b4   :  { %4987 = vmatprep.mubr.f32.mxu0 %v23218_v32 }
 0x5b5   :  { %13463 = vmatmul.mubr.f32.gmra.mrb[34].mxu1 %v6102_v33 }
 0x5b6   :  { %13465 = vmatprep.mubr.f32.mxu1 %v6112_v54 }
 0x5b7   :  { %4989 = vmatmul.mubr.f32.gmra.mrb[28].mxu0 %v23529_v12 }
 0x5b8   :  { %4994 = vmatprep.mubr.f32.mxu0 %v23218_v32 }
 0x5b9   :  { %13466 = vmatmul.mubr.f32.gmra.mrb[36].mxu1 %v6122_v27 }
 0x5ba   :  { %13472 = vmatprep.mubr.f32.mxu1 %v19459_v31 }
 0x5bb   :  { %4996 = vmatmul.mubr.f32.gmra.mrb[30].mxu0 %v23530_v37 }
 0x5bc   :  { %5001 = vmatprep.mubr.f32.mxu0 %v23218_v32 }
 0x5bd   :  { %13473 = vmatmul.mubr.f32.vlgmr.msra.gmra.mrb[26].mxu1 %v19579_v56 }
 0x5be   :  { %14783 = vmatpush3.bf16.msra.mxu1 %v19688_v48  ;;  %13475 = vmatprep.mubr.f32.mxu1 %v19585_v55 }
 0x5bf   :  { %14785 = vmatprep.subr.bf16.mxu1 %v19672_v11  ;;  %5003 = vmatmul.mubr.f32.gmra.mrb[32].mxu0 %v23531_v17 }
 0x5c0   :  { %5008 = vmatprep.mubr.f32.mxu0 %v23218_v32 }
 0x5c1   :  { %13476 = vmatmul.mubr.f32.gmra.mrb[28].mxu1 %v19595_v23 }
 0x5c2   :  { %13478 = vmatprep.mubr.f32.mxu1 %v19606_v43 }
 0x5c3   :  { %5010 = vmatmul.mubr.f32.gmra.mrb[34].mxu0 %v23532_v50 }
 0x5c4   :  { %5015 = vmatprep.mubr.f32.mxu0 %v23218_v32 }
 0x5c5   :  { %13479 = vmatmul.mubr.f32.gmra.mrb[30].mxu1 %v19632_v16 }
 0x5c6   :  { %13481 = vmatprep.mubr.f32.mxu1 %v19642_v19 }
 0x5c7   :  { %5017 = vmatmul.mubr.f32.gmra.mrb[36].mxu0 %v23533_v26 }
 0x5c8   :  { %5022 = vmatprep.mubr.f32.mxu0 %v23218_v32 }
 0x5c9   :  { %13482 = vmatmul.mubr.f32.gmra.mrb[32].mxu1 %v19658_v53 }
 0x5ca   :  { %13484 = vmatprep.mubr.f32.mxu1 %v19669_v47 }
 0x5cb   :  { %5024 = vmatmul.mubr.f32.gmra.mrb[38].mxu0 %v23534_v62 }
 0x5cc   :  { %5029 = vmatprep.mubr.f32.mxu0 %v23218_v32 }
 0x5cd   :  { %13485 = vmatmul.mubr.f32.gmra.mrb[34].mxu1 %v19690_v0 }
 0x5ce   :  { %13487 = vmatprep.mubr.f32.mxu1 %v19697_v25 }
 0x5cf   :  { %5031 = vmatmul.mubr.f32.gmra.mrb[40].mxu0 %v23535_v14 }
 0x5d0   :  { %5036 = vmatprep.mubr.f32.mxu0 %v23218_v32 }
 0x5d1   :  { %13488 = vmatmul.mubr.f32.gmra.mrb[36].mxu1 %v19711_v21 }
 0x5d2   :  { %13494 = vmatprep.mubr.f32.mxu1 %v19463_v45 }
 0x5d3   :  { %5038 = vmatmul.mubr.f32.gmra.mrb[42].mxu0 %v23536_v4 }
 0x5d4   :  { %5043 = vmatprep.mubr.f32.mxu0 %v23218_v32 }
 0x5d5   :  { %13495 = vmatmul.mubr.f32.vlgmr.msra.gmra.mrb[26].mxu1 %v19592_v58 }
 0x5d6   :  { %14787 = vmatpush3.bf16.msra.mxu1 %v19672_v11  ;;  %13497 = vmatprep.mubr.f32.mxu1 %v19602_v15 }
 0x5d7   :  { %14789 = vmatprep.subr.bf16.mxu1 %v19701_v44  ;;  %5045 = vmatmul.mubr.f32.gmra.mrb[44].mxu0 %v23537_v60 }
 0x5d8   :  { %5050 = vmatprep.mubr.f32.mxu0 %v23218_v32 }
 0x5d9   :  { %13498 = vmatmul.mubr.f32.gmra.mrb[28].mxu1 %v19620_v9 }
 0x5da   :  { %13500 = vmatprep.mubr.f32.mxu1 %v19630_v22  ;;  %v5889_v22 = vld [vmem:[%s22472_s7 + $0x8] sm:$0xff] }
 0x5db   :  { %5052 = vmatmul.mubr.f32.gmra.mrb[46].mxu0 %v23538_v10 }
 0x5dd   :  { %13501 = vmatmul.mubr.f32.gmra.mrb[30].mxu1 %v19656_v40 }
 0x5de   :  { %13503 = vmatprep.mubr.f32.mxu1 %v19667_v34 }
 0x5e1   :  { %13504 = vmatmul.mubr.f32.gmra.mrb[32].mxu1 %v19685_v46 }
 0x5e2   :  { %13506 = vmatprep.mubr.f32.mxu1 %v19695_v7 }
 0x5e5   :  { %13507 = vmatmul.mubr.f32.gmra.mrb[34].mxu1 %v19709_v5 }
 0x5e6   :  { %13509 = vmatprep.mubr.f32.mxu1 %v19718_v35  ;;  %v5895_v35 = vld [vmem:[%s22472_s7 + $0x38] sm:$0xff] }
 0x5e9   :  { %13510 = vmatmul.mubr.f32.gmra.mrb[36].mxu1 %v19727_v39 }
 0x5ea   :  { %13516 = vmatprep.mubr.f32.mxu1 %v6010_v24 }
 0x5ed   :  { %13517 = vmatmul.mubr.f32.vlgmr.msra.gmra.mrb[26].mxu1 %v6020_v28 }
 0x5ee   :  { %14791 = vmatpush3.bf16.msra.mxu1 %v19701_v44  ;;  %13519 = vmatprep.mubr.f32.mxu1 %v6030_v20 }
 0x5ef   :  { %14793 = vmatprep.subr.bf16.mxu1 %v19672_v11 }
 0x5f1   :  { %13520 = vmatmul.mubr.f32.gmra.mrb[28].mxu1 %v6040_v2 }
 0x5f2   :  { %13522 = vmatprep.mubr.f32.mxu1 %v6050_v8 }
 0x5f5   :  { %13523 = vmatmul.mubr.f32.gmra.mrb[30].mxu1 %v6060_v6 }
 0x5f6   :  { %13525 = vmatprep.mubr.f32.mxu1 %v6070_v29  ;;  %v5893_v29 = vld [vmem:[%s22472_s7 + $0x28] sm:$0xff] }
 0x5f9   :  { %13526 = vmatmul.mubr.f32.gmra.mrb[32].mxu1 %v6080_v63 }
 0x5fa   :  { %13528 = vmatprep.mubr.f32.mxu1 %v6090_v52 }
 0x5fd   :  { %13529 = vmatmul.mubr.f32.gmra.mrb[34].mxu1 %v6100_v41 }
 0x5fe   :  { %13531 = vmatprep.mubr.f32.mxu1 %v6110_v13 }
 0x601   :  { %13532 = vmatmul.mubr.f32.gmra.mrb[36].mxu1 %v6120_v61 }
 0x602   :  { %13538 = vmatprep.mubr.f32.mxu1 %v19459_v31 }
 0x605   :  { %13539 = vmatmul.mubr.f32.vlgmr.msra.gmra.mrb[26].mxu1 %v19579_v56 }
 0x606   :  { %14795 = vmatpush3.bf16.msra.mxu1 %v19672_v11  ;;  %13541 = vmatprep.mubr.f32.mxu1 %v19585_v55 }
 0x609   :  { %13542 = vmatmul.mubr.f32.gmra.mrb[28].mxu1 %v19595_v23 }
 0x60a   :  { %13544 = vmatprep.mubr.f32.mxu1 %v19606_v43 }
 0x60d   :  { %13545 = vmatmul.mubr.f32.gmra.mrb[30].mxu1 %v19632_v16 }
 0x60e   :  { %13547 = vmatprep.mubr.f32.mxu1 %v19642_v19 }
 0x611   :  { %13548 = vmatmul.mubr.f32.gmra.mrb[32].mxu1 %v19658_v53 }
 0x612   :  { %13550 = vmatprep.mubr.f32.mxu1 %v19669_v47 }
 0x615   :  { %13551 = vmatmul.mubr.f32.gmra.mrb[34].mxu1 %v19690_v0 }
 0x616   :  { %13553 = vmatprep.mubr.f32.mxu1 %v19697_v25 }
 0x619   :  { %13554 = vmatmul.mubr.f32.gmra.mrb[36].mxu1 %v19711_v21 }
 0x61a   :  { %13560 = vmatprep.mubr.f32.mxu1 %v19459_v31 }
 0x61d   :  { %13561 = vmatmul.mubr.f32.vlgmr.msra.gmra.mrb[26].mxu1 %v19579_v56 }
 0x61e   :  { %13563 = vmatprep.mubr.f32.mxu1 %v19585_v55 }
 0x621   :  { %13564 = vmatmul.mubr.f32.gmra.mrb[28].mxu1 %v19595_v23 }
 0x622   :  { %13566 = vmatprep.mubr.f32.mxu1 %v19606_v43 }
 0x625   :  { %13567 = vmatmul.mubr.f32.gmra.mrb[30].mxu1 %v19632_v16  ;;  %v5888_v16 = vld [vmem:[%s22472_s7] sm:$0xff] }
 0x626   :  { %13569 = vmatprep.mubr.f32.mxu1 %v19642_v19 }
 0x629   :  { %13570 = vmatmul.mubr.f32.gmra.mrb[32].mxu1 %v19658_v53  ;;  %v5891_v53 = vld [vmem:[%s22472_s7 + $0x18] sm:$0xff] }
 0x62a   :  { %13572 = vmatprep.mubr.f32.mxu1 %v19669_v47  ;;  %v5890_v47 = vld [vmem:[%s22472_s7 + $0x10] sm:$0xff] }
 0x62d   :  { %13573 = vmatmul.mubr.f32.gmra.mrb[34].mxu1 %v19690_v0 }
 0x62e   :  { %13575 = vmatprep.mubr.f32.mxu1 %v19697_v25  ;;  %v5892_v25 = vld [vmem:[%s22472_s7 + $0x20] sm:$0xff] }
 0x631   :  { %13576 = vmatmul.mubr.f32.gmra.mrb[36].mxu1 %v19711_v21 }
 0x632   :  { %7189 = vmatprep.mubr.f32.mxu1 %v23218_v32 }
 0x682   :  { %v19849_v30 = vpop.f32.mrb[24].mxu0 }
 0x683   :  { %v19851_v57 = vpop.f32.mrb[25].mxu0 }
 0x686   :  { %v19853_v12 = vpop.f32.mrb[26].mxu0 }
 0x687   :  { %v19855_v37 = vpop.f32.mrb[27].mxu0 }
 0x68a   :  { %v19857_v17 = vpop.f32.mrb[28].mxu0 }
 0x68b   :  { %v19859_v50 = vpop.f32.mrb[29].mxu0 }
 0x68e   :  { %v19861_v26 = vpop.f32.mrb[30].mxu0 }
 0x68f   :  { %v19863_v62 = vpop.f32.mrb[31].mxu0 }
 0x692   :  { %v19865_v14 = vpop.f32.mrb[32].mxu0 }
 0x693   :  { %v19867_v4 = vpop.f32.mrb[33].mxu0 }
 0x696   :  { %v19869_v60 = vpop.f32.mrb[34].mxu0 }
 0x697   :  { %v19871_v10 = vpop.f32.mrb[35].mxu0 }
 0x69a   :  { %v19873_v31 = vpop.f32.mrb[36].mxu0 }
 0x69b   :  { %v19875_v45 = vpop.f32.mrb[37].mxu0 }
 0x69e   :  { %v19877_v24 = vpop.f32.mrb[38].mxu0 }
 0x69f   :  { %v19879_v56 = vpop.f32.mrb[39].mxu0 }
 0x6a2   :  { %v19881_v55 = vpop.f32.mrb[40].mxu0 }
 0x6a3   :  { %v19883_v58 = vpop.f32.mrb[41].mxu0 }
 0x6a6   :  { %v19885_v23 = vpop.f32.mrb[42].mxu0 }
 0x6a7   :  { %v19887_v15 = vpop.f32.mrb[43].mxu0 }
 0x6aa   :  { %v19889_v43 = vpop.f32.mrb[44].mxu0 }
 0x6ab   :  { %v19891_v28 = vpop.f32.mrb[45].mxu0 }
 0x6ae   :  { %v19893_v9 = vpop.f32.mrb[46].mxu0 }
 0x6af   :  { %v19895_v20 = vpop.f32.mrb[47].mxu0 }
 0x6f0   :  { %v13562_v2 = vpop.f32.mrb[26].mxu1 }
 0x6f1   :  { %v15614_v19 = vadd.f32 %v13562_v2, %v5889_v22  ;;  %v6803_v8 = vpop.f32.mrb[27].mxu1 }
 0x6f2   :  { %v15615_v40 = vadd.f32 %v6803_v8, %v5888_v16 }
 0x6f3   :  { %v12709_v34 = vmul.f32 -1.442695, %v15614_v19  ;;  %v5899_v19 = vld [vmem:[%s22472_s7 + $0x58] sm:$0xff] }
 0x6f4   :  { %v12708_v11 = vmul.f32 -1.442695, %v15615_v40  ;;  %v13565_v6 = vpop.f32.mrb[28].mxu1 }
 0x6f5   :  { %16394 = vpow2.f32 %v12709_v34  ;;  %v15616_v46 = vadd.f32 %v13565_v6, %v5891_v53  ;;  %v6815_v48 = vpop.f32.mrb[29].mxu1  ;;  %v5898_v53 = vld [vmem:[%s22472_s7 + $0x50] sm:$0xff] }
 0x6f6   :  { %16396 = vpow2.f32 %v12708_v11  ;;  %v15617_v0 = vadd.f32 %v6815_v48, %v5890_v47 }
 0x6f7   :  { %v12711_v7 = vmul.f32 -1.442695, %v15616_v46 }
 0x6f8   :  { %v12710_v44 = vmul.f32 -1.442695, %v15617_v0  ;;  %v13568_v63 = vpop.f32.mrb[30].mxu1 }
 0x6f9   :  { %16398 = vpow2.f32 %v12711_v7  ;;  %v15618_v5 = vadd.f32 %v13568_v63, %v5893_v29  ;;  %v6827_v21 = vpop.f32.mrb[31].mxu1 }
 0x6fa   :  { %16400 = vpow2.f32 %v12710_v44  ;;  %v15619_v52 = vadd.f32 %v6827_v21, %v5892_v25 }
 0x6fb   :  { %v12713_v3 = vmul.f32 -1.442695, %v15618_v5 }
 0x6fc   :  { %v12712_v41 = vmul.f32 -1.442695, %v15619_v52  ;;  %v13571_v39 = vpop.f32.mrb[32].mxu1 }
 0x6fd   :  { %16402 = vpow2.f32 %v12713_v3  ;;  %v15620_v49 = vadd.f32 %v13571_v39, %v5895_v35  ;;  %v6839_v18 = vpop.f32.mrb[33].mxu1 }
 0x6fe   :  { %16404 = vpow2.f32 %v12712_v41  ;;  %v15621_v13 = vadd.f32 %v6839_v18, %v5894_v1 }
 0x6ff   :  { %v16395_v51 = vpop.eup %16394  ;;  %v12715_v61 = vmul.f32 -1.442695, %v15620_v49 }
 0x700   :  { %v16397_v36 = vpop.eup %16396  ;;  %v6910_v33 = vadd.f32 1.0, %v16395_v51  ;;  %v12714_v42 = vmul.f32 -1.442695, %v15621_v13  ;;  %v13574_v54 = vpop.f32.mrb[34].mxu1 }
 0x701   :  { %v6909_v27 = vadd.f32 1.0, %v16397_v36  ;;  %16406 = vpow2.f32 %v12715_v61  ;;  %v15622_v22 = vadd.f32 %v13574_v54, %v5897_v59  ;;  %v6851_v16 = vpop.f32.mrb[35].mxu1 }
 0x702   :  { %16408 = vrcp.f32 %v6910_v33  ;;  %v15623_v2 = vadd.f32 %v6851_v16, %v5896_v38 }
 0x703   :  { %v16399_v8 = vpop.eup %16398  ;;  %16410 = vrcp.f32 %v6909_v27  ;;  %v12717_v40 = vmul.f32 -1.442695, %v15622_v22 }
 0x704   :  { %v16401_v34 = vpop.eup %16400  ;;  %v6912_v47 = vadd.f32 1.0, %v16399_v8  ;;  %16412 = vpow2.f32 %v12714_v42  ;;  %v12716_v11 = vmul.f32 -1.442695, %v15623_v2  ;;  %v13577_v6 = vpop.f32.mrb[36].mxu1 }
 0x705   :  { %v6911_v46 = vadd.f32 1.0, %v16401_v34  ;;  %16414 = vpow2.f32 %v12717_v40  ;;  %v15624_v48 = vadd.f32 %v13577_v6, %v5899_v19  ;;  %v6863_v0 = vpop.f32.mrb[37].mxu1  ;;  %v23577_v34 = vld [vmem:[#allocation64_spill] sm:$0xff]  ;;  %v23580_v6 = vld [vmem:[#allocation14_spill] sm:$0xff] }
 0x706   :  { %16416 = vrcp.f32 %v6912_v47  ;;  %v15625_v29 = vadd.f32 %v6863_v0, %v5898_v53  ;;  %v23576_v53 = vld [vmem:[#allocation15_spill] sm:$0xff]  ;;  %v23583_v0 = vld [vmem:[#allocation54_spill] sm:$0xff] }
 0x707   :  { %v16403_v7 = vpop.eup %16402  ;;  %16418 = vrcp.f32 %v6911_v46  ;;  %v12719_v25 = vmul.f32 -1.442695, %v15624_v48  ;;  %v19935_v47 = vadd.f32 %v23577_v34, %v23576_v53  ;;  %v23582_v48 = vld [vmem:[#allocation41_spill] sm:$0xff]  ;;  %v23607_v34 = vld [vmem:[#allocation48_spill] sm:$0xff] }
 0x708   :  { %v16405_v44 = vpop.eup %16404  ;;  %v6914_v63 = vadd.f32 1.0, %v16403_v7  ;;  %16420 = vpow2.f32 %v12716_v11  ;;  %v12718_v5 = vmul.f32 -1.442695, %v15625_v29  ;;  %v23579_v11 = vld [vmem:[#allocation20_spill] sm:$0xff]  ;;  %v19943_v29 = vadd.f32 %v23583_v0, %v23582_v48  ;;  %v23585_v7 = vld [vmem:[#allocation61_spill] sm:$0xff] }
 0x709   :  { %v6913_v21 = vadd.f32 1.0, %v16405_v44  ;;  %16422 = vpow2.f32 %v12719_v25  ;;  %23578 = vst [vmem:[#allocation18_spill] sm:$0xff] %v19935_v47  ;;  %v19939_v46 = vadd.f32 %v23580_v6, %v23579_v11  ;;  %v23586_v25 = vld [vmem:[#allocation96_spill] sm:$0xff]  ;;  %v23611_v0 = vld [vmem:[#allocation29_spill] sm:$0xff] }
 0x70a   :  { %16424 = vrcp.f32 %v6914_v63  ;;  %23584 = vst [vmem:[#allocation32_spill] sm:$0xff] %v19943_v29  ;;  %v19947_v44 = vadd.f32 %v23586_v25, %v23585_v7  ;;  %v19951_v63 = vadd.f32 %v19853_v12, %v23579_v11 }
 0x70b   :  { %v16407_v52 = vpop.eup %16406  ;;  %16426 = vrcp.f32 %v6913_v21  ;;  %23581 = vst [vmem:[#allocation19_spill] sm:$0xff] %v19939_v46  ;;  %v23589_v21 = vld [vmem:[#allocation77_spill] sm:$0xff]  ;;  %v22815_v12 = vmax.f32 %v19939_v46, 0.0 }
 0x70c   :  { %v16409_v35 = vpop.eup %16408  ;;  %v6916_v3 = vadd.f32 1.0, %v16407_v52  ;;  %16428 = vpow2.f32 %v12718_v5  ;;  %23587 = vst [vmem:[#allocation34_spill] sm:$0xff] %v19947_v44  ;;  %23588 = vst [vmem:[#allocation36_spill] sm:$0xff] %v19951_v63  ;;  %v22812_v5 = vmax.f32 %v19935_v47, 0.0  ;;  %v23590_v52 = vld [vmem:[#allocation42_spill] sm:$0xff]  ;;  %v20010_v6 = vadd.f32 %v19865_v14, %v23589_v21 }
 0x70d   :  { %v16411_v1 = vpop.eup %16410  ;;  %6952 = vperm.xlu0 %16384, %v16409_v35   ;;  %v19956_v35 = vadd.f32 %v23590_v52, %v23589_v21 }
 0x70e   :  { %v16413_v41 = vpop.eup %16412  ;;  %16430 = vrcp.f32 %v6916_v3  ;;  %6947 = vperm.xlu1 %16385, %v16411_v1   ;;  %v23592_v3 = vld [vmem:[#allocation37_spill] sm:$0xff]  ;;  %v23593_v1 = vld [vmem:[#allocation119_spill] sm:$0xff]  ;;  %23610 = vst [vmem:[#allocation72_spill] sm:$0xff] %v20010_v6 }
 0x70f   :  { %v16415_v39 = vpop.eup %16414  ;;  %v6915_v49 = vadd.f32 1.0, %v16413_v41  ;;  %23591 = vst [vmem:[#allocation38_spill] sm:$0xff] %v19956_v35  ;;  %v19960_v41 = vadd.f32 %v23593_v1, %v23592_v3  ;;  %v20033_v1 = vadd.f32 %v19861_v26, %v23585_v7  ;;  %v20048_v26 = vadd.f32 %v19867_v4, %v23589_v21 }
 0x710   :  { %v16417_v18 = vpop.eup %16416  ;;  %v6918_v13 = vadd.f32 1.0, %v16415_v39  ;;  %v23595_v39 = vld [vmem:[#allocation66_spill] sm:$0xff] }
 0x711   :  { %v16419_v59 = vpop.eup %16418  ;;  %16432 = vrcp.f32 %v6915_v49  ;;  %6962 = vperm.xlu0 %16384, %v16417_v18   ;;  %23594 = vst [vmem:[#allocation40_spill] sm:$0xff] %v19960_v41  ;;  %v23596_v49 = vld [vmem:[#allocation39_spill] sm:$0xff]  ;;  %23612 = vst [vmem:[#allocation74_spill] sm:$0xff] %v20033_v1 }
 0x712   :  { %v16421_v51 = vpop.eup %16420  ;;  %16434 = vrcp.f32 %v6918_v13  ;;  %6957 = vperm.xlu1 %16385, %v16419_v59   ;;  %v19964_v18 = vadd.f32 %v23596_v49, %v23595_v39  ;;  %v19968_v13 = vadd.f32 %v19857_v17, %v23582_v48  ;;  %v22811_v59 = vmax.f32 %v19943_v29, 0.0  ;;  %23613 = vst [vmem:[#allocation85_spill] sm:$0xff] %v20048_v26 }
 0x713   :  { %v16423_v61 = vpop.eup %16422  ;;  %v6917_v38 = vadd.f32 1.0, %v16421_v51  ;;  %v22810_v51 = vmax.f32 %v19947_v44, 0.0  ;;  %v22809_v17 = vmax.f32 %v19960_v41, 0.0  ;;  %v23627_v41 = vmax.f32 %v20033_v1, 0.0  ;;  %v23686_v44 = vld [vmem:[#allocation44_spill] sm:$0xff] }
 0x714   :  { %v16425_v36 = vpop.eup %16424  ;;  %v6920_v33 = vadd.f32 1.0, %v16423_v61  ;;  %23597 = vst [vmem:[#allocation50_spill] sm:$0xff] %v19964_v18  ;;  %23598 = vst [vmem:[#allocation52_spill] sm:$0xff] %v19968_v13  ;;  %v22814_v61 = vmax.f32 %v19951_v63, 0.0 }
 0x715   :  { %v16427_v42 = vpop.eup %16426  ;;  %16436 = vrcp.f32 %v6917_v38  ;;  %6972 = vperm.xlu0 %16384, %v16425_v36   ;;  %v19976_v38 = vadd.f32 %v19855_v37, %v23579_v11  ;;  %v23600_v36 = vld [vmem:[#allocation7_spill] sm:$0xff]  ;;  %v22816_v37 = vmax.f32 %v19968_v13, 0.0  ;;  %v20006_v11 = vadd.f32 %v19851_v57, %v23576_v53 }
 0x716   :  { %v16429_v54 = vpop.eup %16428  ;;  %16438 = vrcp.f32 %v6920_v33  ;;  %6967 = vperm.xlu1 %16385, %v16427_v42   ;;  %v8919_v33 = vmul.f32 %v23600_v36, %v22812_v5  ;;  %v22808_v42 = vmax.f32 %v19956_v35, 0.0  ;;  %v8923_v25 = vmul.f32 %v23611_v0, %v22814_v61  ;;  %v23614_v5 = vld [vmem:[#allocation68_spill] sm:$0xff] }
 0x717   :  { %v6919_v27 = vadd.f32 1.0, %v16429_v54  ;;  %23599 = vst [vmem:[#allocation53_spill] sm:$0xff] %v19976_v38  ;;  %v19985_v54 = vadd.f32 %v19849_v30, %v23576_v53  ;;  %23609 = vst [vmem:[#allocation70_spill] sm:$0xff] %v20006_v11  ;;  %v22817_v52 = vmax.f32 %v19976_v38, 0.0  ;;  %v20028_v14 = vmul.f32 %v23600_v36, %v22809_v17 }
 0x718   :  { %v16431_v22 = vpop.eup %16430  ;;  %v8931_v57 = vmul.f32 %v23600_v36, %v22808_v42  ;;  %v20059_v17 = vadd.f32 %v19873_v31, %v23595_v39 }
 0x719   :  { %16440 = vrcp.f32 %v6919_v27  ;;  %6982 = vperm.xlu0 %16384, %v16431_v22   ;;  %23601 = vst [vmem:[#allocation55_spill] sm:$0xff] %v19985_v54  ;;  %v22813_v27 = vmax.f32 %v19964_v18, 0.0  ;;  %v23602_v22 = vld [vmem:[#allocation46_spill] sm:$0xff]  ;;  %v22818_v53 = vmax.f32 %v19985_v54, 0.0  ;;  %v23694_v54 = vld [vmem:[#allocation80_spill] sm:$0xff] }
 0x71a   :  { %23618 = vst [vmem:[#allocation94_spill] sm:$0xff] %v20059_v17 }
 0x71b   :  { %v16433_v16 = vpop.eup %16432  ;;  %v8937_v49 = vmul.f32 %v23600_v36, %v22813_v27  ;;  %v23615_v27 = vld [vmem:[#allocation133_spill] sm:$0xff]  ;;  %v8920_v4 = vmul.f32 %v23611_v0, %v22818_v53  ;;  %v23622_v53 = vmax.f32 %v20006_v11, 0.0 }
 0x71c   :  { %v16435_v2 = vpop.eup %16434  ;;  %6977 = vperm.xlu1 %16385, %v16433_v16   ;;  %v23603_v16 = vld [vmem:[#allocation86_spill] sm:$0xff]  ;;  %v20052_v61 = vadd.f32 %v23615_v27, %v23614_v5  ;;  %v20070_v27 = vadd.f32 %v19863_v62, %v23585_v7  ;;  %v23623_v62 = vmax.f32 %v20010_v6, 0.0 }
 0x71d   :  { %6992 = vperm.xlu0 %16384, %v16435_v2   ;;  %v19990_v2 = vadd.f32 %v23603_v16, %v23602_v22 }
 0x71e   :  { %23616 = vst [vmem:[#allocation90_spill] sm:$0xff] %v20052_v61  ;;  %23619 = vst [vmem:[#allocation101_spill] sm:$0xff] %v20070_v27  ;;  %v8932_v7 = vmul.f32 %v23611_v0, %v23623_v62  ;;  %v8929_v62 = vmul.f32 %v23611_v0, %v23627_v41  ;;  %v23631_v41 = vmax.f32 %v20048_v26, 0.0 }
 0x71f   :  { %v16437_v19 = vpop.eup %16436  ;;  %23604 = vst [vmem:[#allocation57_spill] sm:$0xff] %v19990_v2 }
 0x720   :  { %v16439_v8 = vpop.eup %16438  ;;  %6987 = vperm.xlu1 %16385, %v16437_v19   ;;  %v19995_v19 = vadd.f32 %v19859_v50, %v23582_v48  ;;  %v8925_v50 = vmul.f32 %v23600_v36, %v22811_v59  ;;  %v8928_v48 = vmul.f32 %v23600_v36, %v22810_v51  ;;  %v7041_v59 = vld [vmem:[%s22473_s8] sm:$0xff] }
 0x721   :  { %7002 = vperm.xlu0 %16384, %v16439_v8   ;;  %v8922_v8 = vmul.f32 %v23600_v36, %v22815_v12 }
 0x722   :  { %23605 = vst [vmem:[#allocation67_spill] sm:$0xff] %v19995_v19  ;;  %v22819_v42 = vmax.f32 %v19995_v19, 0.0 }
 0x723   :  { %v16441_v40 = vpop.eup %16440  ;;  %v8959_v12 = vadd.f32 %v8923_v25, %v8922_v8  ;;  %v7084_v8 = vsel %vm5235_vm15, %v7041_v59, 0  ;;  %v22823_v59 = vmax.f32 %v20070_v27, 0.0 }
 0x724   :  { %6997 = vperm.xlu1 %16385, %v16441_v40   ;;  %v23606_v40 = vld [vmem:[#allocation59_spill] sm:$0xff]  ;;  %v20080_v51 = vand.u32 4294901760, %v7084_v8 }
 0x725   :  { %v20002_v30 = vadd.f32 %v23607_v34, %v23606_v40  ;;  %v8926_v34 = vmul.f32 %v23611_v0, %v22816_v37  ;;  %v23617_v37 = vld [vmem:[#allocation58_spill] sm:$0xff] }
 0x726   :  { %v8924_v16 = vmul.f32 %v23617_v37, %v22817_v52  ;;  %v8927_v31 = vmul.f32 %v23617_v37, %v22819_v42  ;;  %v20078_v52 = vadd.f32 %v19869_v60, %v23592_v3  ;;  %23621 = vst [vmem:[#allocation98_spill] sm:$0xff] %v20080_v51  ;;  %v8921_v21 = vmul.f32 %v23617_v37, %v23622_v53 }
 0x727   :  { %23608 = vst [vmem:[#allocation69_spill] sm:$0xff] %v20002_v30  ;;  %v8963_v25 = vadd.f32 %v8926_v34, %v8925_v50  ;;  %v20091_v50 = vadd.f32 %v19881_v55, %v23606_v40  ;;  %v20096_v60 = vadd.f32 %v19875_v45, %v23595_v39  ;;  %v20099_v18 = vsub.f32 %v7084_v8, %v20080_v51 }
 0x728   :  { %23620 = vst [vmem:[#allocation108_spill] sm:$0xff] %v20078_v52  ;;  %v8960_v42 = vadd.f32 %v8959_v12, %v8924_v16  ;;  %v8955_v53 = vadd.f32 %v8920_v4, %v8919_v33  ;;  %v20107_v55 = vadd.f32 %v19871_v10, %v23592_v3  ;;  %v22822_v34 = vmax.f32 %v20078_v52, 0.0 }
 0x729   :  { %23624 = vst [vmem:[#allocation106_spill] sm:$0xff] %v20091_v50  ;;  %23625 = vst [vmem:[#allocation112_spill] sm:$0xff] %v20096_v60  ;;  %v20112_v45 = vadd.f32 %v19877_v24, %v23602_v22  ;;  %v8964_v39 = vadd.f32 %v8963_v25, %v8927_v31  ;;  %v20115_v12 = vand.u32 4294901760, %v20099_v18  ;;  %v8971_v33 = vadd.f32 %v8932_v7, %v8931_v57 }
 0x72a   :  { %23626 = vst [vmem:[#allocation132_spill] sm:$0xff] %v20099_v18  ;;  %23628 = vst [vmem:[#allocation89_spill] sm:$0xff] %v20107_v55  ;;  %v8933_v16 = vmul.f32 %v23617_v37, %v23631_v41  ;;  %v22824_v4 = vmax.f32 %v20091_v50, 0.0  ;;  %v20123_v10 = vadd.f32 %v19883_v58, %v23606_v40  ;;  %v23633_v3 = vmax.f32 %v20059_v17, 0.0 }
 0x72b   :  { %23629 = vst [vmem:[#allocation93_spill] sm:$0xff] %v20112_v45  ;;  %23630 = vst [vmem:[#allocation97_spill] sm:$0xff] %v20115_v12  ;;  %v20131_v8 = vadd.f32 %v19889_v43, %v23614_v5  ;;  %v7193_v57 = vsub.f32 %v20099_v18, %v20115_v12  ;;  %v8967_v25 = vadd.f32 %v8929_v62, %v8928_v48  ;;  %v22830_v58 = vmax.f32 %v20107_v55, 0.0  ;;  %v23709_v12 = vld [vmem:[#allocation73_spill] sm:$0xff] }
 0x72c   :  { %23632 = vst [vmem:[#allocation103_spill] sm:$0xff] %v20123_v10  ;;  %v8938_v24 = vmul.f32 %v23611_v0, %v23633_v3  ;;  %v8930_v31 = vmul.f32 %v23617_v37, %v22823_v59  ;;  %v8956_v40 = vadd.f32 %v8955_v53, %v8921_v21  ;;  %v8935_v7 = vmul.f32 %v23611_v0, %v22822_v34  ;;  %v23636_v21 = vld [vmem:[#allocation33_spill] sm:$0xff] }
 0x72d   :  { %23634 = vst [vmem:[#allocation110_spill] sm:$0xff] %v20131_v8  ;;  %v22826_v41 = vmax.f32 %v20112_v45, 0.0  ;;  %v20145_v43 = vadd.f32 %v19879_v56, %v23602_v22  ;;  %v20147_v3 = vand.u32 4294901760, %v7193_v57  ;;  %v8944_v48 = vmul.f32 %v23611_v0, %v22824_v4  ;;  %v23675_v45 = vld [vmem:[#allocation60_spill] sm:$0xff] }
 0x72e   :  { %v22827_v62 = vmax.f32 %v20123_v10, 0.0  ;;  %v20155_v53 = vadd.f32 %v19885_v23, %v23636_v21  ;;  %v8972_v34 = vadd.f32 %v8971_v33, %v8933_v16  ;;  %v8979_v59 = vadd.f32 %v8938_v24, %v8937_v49  ;;  %v23640_v23 = vld [vmem:[#allocation123_spill] sm:$0xff] }
 0x72f   :  { %23635 = vst [vmem:[#allocation115_spill] sm:$0xff] %v20145_v43  ;;  %v22828_v22 = vmax.f32 %v20131_v8, 0.0  ;;  %13602 = vmatprep.mubr.f32.mxu0 %v20147_v3  ;;  %v23639_v57 = vmax.f32 %v20002_v30, 0.0  ;;  %v20171_v33 = vadd.f32 %v23640_v23, %v23636_v21  ;;  %v22829_v49 = vmax.f32 %v20052_v61, 0.0 }
 0x730   :  { %23637 = vst [vmem:[#allocation118_spill] sm:$0xff] %v20155_v53  ;;  %v8968_v16 = vadd.f32 %v8967_v25, %v8930_v31  ;;  %v8975_v24 = vadd.f32 %v8935_v7, %v20028_v14  ;;  %v8945_v23 = vmul.f32 %v23617_v37, %v22827_v62  ;;  %v22837_v25 = vmax.f32 %v20155_v53, 0.0  ;;  %v23646_v62 = vld [vmem:[#allocation135_spill] sm:$0xff] }
 0x731   :  { %v8943_v4 = vmul.f32 %v23600_v36, %v23639_v57  ;;  %23641 = vst [vmem:[#allocation126_spill] sm:$0xff] %v20171_v33  ;;  %v20188_v14 = vadd.f32 %v19887_v15, %v23636_v21  ;;  %v8950_v31 = vmul.f32 %v23611_v0, %v22828_v22  ;;  %v8949_v15 = vmul.f32 %v23600_v36, %v22829_v49 }
 0x733   :  { %v8987_v57 = vadd.f32 %v8944_v48, %v8943_v4  ;;  %23642 = vst [vmem:[#allocation128_spill] sm:$0xff] %v20188_v14  ;;  %v22836_v49 = vmax.f32 %v20188_v14, 0.0  ;;  %v8995_v21 = vadd.f32 %v8950_v31, %v8949_v15 }
 0x740   :  { %8961 = vadd.xlane.f32.xlu0 %v8960_v42  ;;  %v22825_v42 = vmax.f32 %v20096_v60, 0.0 }
 0x742   :  { %v8939_v56 = vmul.f32 %v23617_v37, %v22825_v42  ;;  %v22838_v42 = vmax.f32 %v20145_v43, 0.0 }
 0x744   :  { %8965 = vadd.xlane.f32.xlu0 %v8964_v39  ;;  %v20163_v39 = vadd.f32 %v19891_v28, %v23614_v5  ;;  %v8936_v28 = vmul.f32 %v23617_v37, %v22830_v58  ;;  %v8941_v5 = vmul.f32 %v23611_v0, %v22826_v41  ;;  %v23643_v41 = vld [vmem:[#allocation62_spill] sm:$0xff]  ;;  %v8980_v4 = vadd.f32 %v8979_v59, %v8939_v56 }
 0x745   :  { %v20207_v22 = vadd.f32 %v23646_v62, %v23643_v41  ;;  %v8988_v58 = vadd.f32 %v8987_v57, %v8945_v23  ;;  %v8948_v57 = vmul.f32 %v23617_v37, %v22836_v49 }
 0x746   :  { %23638 = vst [vmem:[#allocation122_spill] sm:$0xff] %v20163_v39  ;;  %v22835_v7 = vmax.f32 %v20163_v39, 0.0  ;;  %v8976_v59 = vadd.f32 %v8975_v24, %v8936_v28  ;;  %v23649_v24 = vmax.f32 %v20171_v33, 0.0  ;;  %v23671_v33 = vld [vmem:[#allocation12_spill] sm:$0xff] }
 0x747   :  { %23647 = vst [vmem:[#allocation88_spill] sm:$0xff] %v20207_v22  ;;  %v23672_v10 = vmax.f32 %v23671_v33, 0.0 }
 0x748   :  { %8957 = vadd.xlane.f32.xlu1 %v8956_v40  ;;  %8973 = vadd.xlane.f32.xlu0 %v8972_v34  ;;  %v20196_v34 = vadd.f32 %v19893_v9, %v23643_v41  ;;  %v23645_v40 = vmax.f32 %v19990_v2, 0.0  ;;  %v8942_v9 = vmul.f32 %v23617_v37, %v22838_v42  ;;  %v8951_v62 = vmul.f32 %v23617_v37, %v22835_v7  ;;  %v23665_v7 = vld [vmem:[#allocation26_spill] sm:$0xff]  ;;  %v23667_v42 = vld [vmem:[#allocation43_spill] sm:$0xff] }
 0x749   :  { %v8946_v28 = vmul.f32 %v23600_v36, %v23649_v24  ;;  %v23666_v49 = vmax.f32 %v23665_v7, 0.0  ;;  %v23676_v2 = vmax.f32 %v23675_v45, 0.0 }
 0x74a   :  { %23644 = vst [vmem:[#allocation84_spill] sm:$0xff] %v20196_v34  ;;  %v8940_v48 = vmul.f32 %v23600_v36, %v23645_v40  ;;  %v8947_v40 = vmul.f32 %v23611_v0, %v22837_v25  ;;  %v22833_v8 = vmax.f32 %v20196_v34, 0.0 }
 0x74c   :  { %8969 = vadd.xlane.f32.xlu1 %v8968_v16  ;;  %8981 = vadd.xlane.f32.xlu0 %v8980_v4  ;;  %v8983_v56 = vadd.f32 %v8941_v5, %v8940_v48  ;;  %v20222_v16 = vadd.f32 %v19895_v20, %v23643_v41  ;;  %v22834_v5 = vmax.f32 %v20207_v22, 0.0  ;;  %v8991_v31 = vadd.f32 %v8947_v40, %v8946_v28  ;;  %v23669_v22 = vld [vmem:[#allocation78_spill] sm:$0xff] }
 0x74d   :  { %v8953_v4 = vmul.f32 %v23611_v0, %v22833_v8  ;;  %v8996_v41 = vadd.f32 %v8995_v21, %v8951_v62  ;;  %v7042_v0 = vld [vmem:[%s22473_s8 + $0x8] sm:$0xff]  ;;  %v7043_v21 = vld [vmem:[%s22473_s8 + $0x10] sm:$0xff]  ;;  %v23670_v39 = vmax.f32 %v23669_v22, 0.0 }
 0x74e   :  { %23648 = vst [vmem:[#allocation92_spill] sm:$0xff] %v20222_v16  ;;  %v8984_v23 = vadd.f32 %v8983_v56, %v8942_v9  ;;  %v22832_v20 = vmax.f32 %v20222_v16, 0.0  ;;  %v8952_v48 = vmul.f32 %v23600_v36, %v22834_v5  ;;  %v8992_v9 = vadd.f32 %v8991_v31, %v8948_v57  ;;  %v7044_v36 = vld [vmem:[%s22473_s8 + $0x18] sm:$0xff]  ;;  %v7046_v62 = vld [vmem:[%s22473_s8 + $0x28] sm:$0xff] }
 0x74f   :  { %v7087_v56 = vsel %vm5235_vm15, %v7042_v0, 0  ;;  %v7090_v40 = vsel %vm5235_vm15, %v7043_v21, 0  ;;  %v7093_v24 = vsel %vm5235_vm15, %v7044_v36, 0  ;;  %v7099_v31 = vsel %vm5235_vm15, %v7046_v62, 0 }
 0x750   :  { %8977 = vadd.xlane.f32.xlu1 %v8976_v59  ;;  %8989 = vadd.xlane.f32.xlu0 %v8988_v58  ;;  %v8999_v58 = vadd.f32 %v8953_v4, %v8952_v48  ;;  %v8954_v15 = vmul.f32 %v23617_v37, %v22832_v20  ;;  %v7045_v37 = vld [vmem:[%s22473_s8 + $0x20] sm:$0xff]  ;;  %v20259_v28 = vand.u32 4294901760, %v7087_v56  ;;  %v20265_v4 = vand.u32 4294901760, %v7093_v24 }
 0x751   :  { %v7096_v57 = vsel %vm5235_vm15, %v7045_v37, 0  ;;  %v23668_v16 = vmax.f32 %v23667_v42, 0.0 }
 0x752   :  { %v9000_v59 = vadd.f32 %v8999_v58, %v8954_v15  ;;  %23650 = vst [vmem:[#allocation100_spill] sm:$0xff] %v20259_v28  ;;  %23652 = vst [vmem:[#allocation13_spill] sm:$0xff] %v20265_v4  ;;  %v20270_v48 = vsub.f32 %v7087_v56, %v20259_v28  ;;  %v20272_v58 = vand.u32 4294901760, %v7099_v31 }
 0x754   :  { %8985 = vadd.xlane.f32.xlu1 %v8984_v23  ;;  %8997 = vadd.xlane.f32.xlu0 %v8996_v41  ;;  %v20262_v23 = vand.u32 4294901760, %v7090_v40  ;;  %v20267_v41 = vand.u32 4294901760, %v7096_v57  ;;  %23654 = vst [vmem:[#allocation16_spill] sm:$0xff] %v20270_v48  ;;  %23655 = vst [vmem:[#allocation109_spill] sm:$0xff] %v20272_v58  ;;  %v20284_v0 = vand.u32 4294901760, %v20270_v48  ;;  %v20287_v21 = vsub.f32 %v7099_v31, %v20272_v58 }
 0x756   :  { %23651 = vst [vmem:[#allocation9_spill] sm:$0xff] %v20262_v23  ;;  %23653 = vst [vmem:[#allocation105_spill] sm:$0xff] %v20267_v41  ;;  %v20275_v15 = vsub.f32 %v7090_v40, %v20262_v23  ;;  %v7204_v40 = vsub.f32 %v20270_v48, %v20284_v0  ;;  %v20301_v62 = vand.u32 4294901760, %v20287_v21 }
 0x757   :  { %23659 = vst [vmem:[#allocation125_spill] sm:$0xff] %v20284_v0  ;;  %23660 = vst [vmem:[#allocation6_spill] sm:$0xff] %v20287_v21 }
 0x758   :  { %8993 = vadd.xlane.f32.xlu1 %v8992_v9  ;;  %23656 = vst [vmem:[#allocation114_spill] sm:$0xff] %v20275_v15  ;;  %v20278_v9 = vsub.f32 %v7093_v24, %v20265_v4  ;;  %v20290_v36 = vand.u32 4294901760, %v20275_v15  ;;  %23664 = vst [vmem:[#allocation91_spill] sm:$0xff] %v20301_v62  ;;  %v20309_v8 = vand.u32 4294901760, %v7204_v40  ;;  %v7248_v5 = vsub.f32 %v20287_v21, %v20301_v62  ;;  %v23673_v40 = vld [vmem:[#allocation24_spill] sm:$0xff]  ;;  %v23737_v4 = vld [vmem:[#allocation79_spill] sm:$0xff] }
 0x759   :  { %v23674_v30 = vmax.f32 %v23673_v40, 0.0 }
 0x75a   :  { %23657 = vst [vmem:[#allocation117_spill] sm:$0xff] %v20278_v9  ;;  %23661 = vst [vmem:[#allocation131_spill] sm:$0xff] %v20290_v36  ;;  %v20293_v56 = vand.u32 4294901760, %v20278_v9  ;;  %v7215_v24 = vsub.f32 %v20275_v15, %v20290_v36  ;;  %v20331_v55 = vand.u32 4294901760, %v7248_v5  ;;  %v23680_v5 = vld [vmem:[#allocation81_spill] sm:$0xff] }
 0x75c   :  { %9001 = vadd.xlane.f32.xlu1 %v9000_v59  ;;  %v20281_v59 = vsub.f32 %v7096_v57, %v20267_v41  ;;  %23662 = vst [vmem:[#allocation87_spill] sm:$0xff] %v20293_v56  ;;  %v7226_v57 = vsub.f32 %v20278_v9, %v20293_v56  ;;  %v20319_v53 = vand.u32 4294901760, %v7215_v24 }
 0x75e   :  { %23658 = vst [vmem:[#allocation121_spill] sm:$0xff] %v20281_v59  ;;  %v20296_v37 = vand.u32 4294901760, %v20281_v59  ;;  %v20327_v7 = vand.u32 4294901760, %v7226_v57 }
 0x760   :  { %23663 = vst [vmem:[#allocation35_spill] sm:$0xff] %v20296_v37  ;;  %v7237_v31 = vsub.f32 %v20281_v59, %v20296_v37 }
 0x762   :  { %v20329_v17 = vand.u32 4294901760, %v7237_v31 }
 0x78c   :  { %v6953_v20 = vpop.permute.xlu0 %6952 }
 0x78d   :  { %v7008_v25 = vmul.f32 %v6953_v20, %v23666_v49  ;;  %v7009_v34 = vmul.f32 %v6953_v20, %v23668_v16  ;;  %v7010_v61 = vmul.f32 %v6953_v20, %v23670_v39  ;;  %v6948_v14 = vpop.permute.xlu1 %6947 }
 0x78e   :  { %v7005_v50 = vmul.f32 %v6948_v14, %v23672_v10  ;;  %v7006_v43 = vmul.f32 %v6948_v14, %v23674_v30  ;;  %v7007_v60 = vmul.f32 %v6948_v14, %v23676_v2  ;;  %v23677_v2 = vld [vmem:[#allocation75_spill] sm:$0xff] }
 0x78f   :  { %v7105_v49 = vand.u32 4294901760, %v7009_v34  ;;  %v7107_v42 = vand.u32 4294901760, %v7008_v25  ;;  %v8101_v16 = vand.u32 4294901760, %v7010_v61  ;;  %v23678_v45 = vmax.f32 %v23677_v2, 0.0 }
 0x790   :  { %v7101_v22 = vand.u32 4294901760, %v7006_v43  ;;  %v7103_v39 = vand.u32 4294901760, %v7005_v50  ;;  %v8098_v20 = vand.u32 4294901760, %v7007_v60  ;;  %v6963_v24 = vpop.permute.xlu0 %6962 }
 0x791   :  { %v20333_v10 = vsub.f32 %v7009_v34, %v7105_v49  ;;  %v20335_v33 = vsub.f32 %v7008_v25, %v7107_v42  ;;  %v20337_v30 = vsub.f32 %v7010_v61, %v8101_v16  ;;  %v20341_v14 = vmul.f32 %v6963_v24, %v23678_v45  ;;  %v6958_v57 = vpop.permute.xlu1 %6957  ;;  %v23682_v61 = vld [vmem:[#allocation95_spill] sm:$0xff] }
 0x792   :  { %v20343_v40 = vsub.f32 %v7006_v43, %v7101_v22  ;;  %v20345_v31 = vsub.f32 %v7005_v50, %v7103_v39  ;;  %v20347_v52 = vpack.c.bf16 %v8101_v16, %v8098_v20  ;;  %v20349_v26 = vsub.f32 %v7007_v60, %v8098_v20  ;;  %v23684_v43 = vld [vmem:[#allocation47_spill] sm:$0xff]  ;;  %v23688_v60 = vld [vmem:[#allocation49_spill] sm:$0xff] }
 0x793   :  { %v23681_v25 = vmax.f32 %v23680_v5, 0.0  ;;  %v23683_v35 = vmax.f32 %v23682_v61, 0.0  ;;  %v7115_v2 = vand.u32 4294901760, %v20341_v14  ;;  %v23685_v1 = vmax.f32 %v23684_v43, 0.0 }
 0x794   :  { %23679 = vst [vmem:[#allocation21_spill] sm:$0xff] %v20347_v52  ;;  %v23687_v16 = vmax.f32 %v23686_v44, 0.0  ;;  %v23689_v20 = vmax.f32 %v23688_v60, 0.0  ;;  %v6973_v34 = vpop.permute.xlu0 %6972  ;;  %14941 = vmatprep.subr.bf16.mxu0 %v20347_v52  ;;  %v23692_v60 = vld [vmem:[#allocation83_spill] sm:$0xff] }
 0x795   :  { %v7015_v6 = vmul.f32 %v6963_v24, %v23681_v25  ;;  %v7016_v27 = vmul.f32 %v6963_v24, %v23683_v35  ;;  %v7011_v50 = vmul.f32 %v6958_v57, %v23685_v1  ;;  %v20366_v25 = vsub.f32 %v20341_v14, %v7115_v2  ;;  %v23690_v24 = vld [vmem:[#allocation71_spill] sm:$0xff]  ;;  %14943 = vmatpush3.bf16.msra.mxu0 %v20347_v52  ;;  %v6968_v1 = vpop.permute.xlu1 %6967  ;;  %v23724_v52 = vld [vmem:[#allocation82_spill] sm:$0xff] }
 0x796   :  { %v7012_v19 = vmul.f32 %v6958_v57, %v23687_v16  ;;  %v7013_v13 = vmul.f32 %v6958_v57, %v23689_v20  ;;  %v23691_v61 = vmax.f32 %v23690_v24, 0.0  ;;  %v23693_v57 = vmax.f32 %v23692_v60, 0.0 }
 0x797   :  { %v7113_v5 = vand.u32 4294901760, %v7015_v6  ;;  %v8107_v35 = vand.u32 4294901760, %v7016_v27  ;;  %v7111_v43 = vand.u32 4294901760, %v7011_v50  ;;  %v23695_v24 = vmax.f32 %v23694_v54, 0.0 }
 0x798   :  { %v20370_v45 = vmul.f32 %v6973_v34, %v23691_v61  ;;  %v7109_v44 = vand.u32 4294901760, %v7012_v19  ;;  %v8104_v16 = vand.u32 4294901760, %v7013_v13  ;;  %v20375_v20 = vmul.f32 %v6973_v34, %v23693_v57  ;;  %v6983_v60 = vpop.permute.xlu0 %6982 }
 0x799   :  { %v20377_v29 = vsub.f32 %v7015_v6, %v7113_v5  ;;  %v20380_v11 = vsub.f32 %v7016_v27, %v8107_v35  ;;  %v7022_v61 = vmul.f32 %v6973_v34, %v23695_v24  ;;  %v20386_v38 = vsub.f32 %v7011_v50, %v7111_v43  ;;  %v23701_v24 = vld [vmem:[#allocation23_spill] sm:$0xff] }
 0x79a   :  { %v20384_v47 = vsub.f32 %v7012_v19, %v7109_v44  ;;  %v20388_v63 = vpack.c.bf16 %v8107_v35, %v8104_v16  ;;  %v20390_v46 = vsub.f32 %v7013_v13, %v8104_v16  ;;  %v7121_v57 = vand.u32 4294901760, %v20375_v20  ;;  %v23699_v19 = vld [vmem:[#allocation31_spill] sm:$0xff] }
 0x79b   :  { %v7123_v6 = vand.u32 4294901760, %v20370_v45  ;;  %v8113_v62 = vand.u32 4294901760, %v7022_v61  ;;  %v20394_v14 = vpack.c.bf16 %v7105_v49, %v7101_v22  ;;  %v20397_v54 = vpack.c.bf16 %v7107_v42, %v7103_v39  ;;  %v23703_v42 = vld [vmem:[#allocation28_spill] sm:$0xff] }
 0x79c   :  { %23696 = vst [vmem:[#allocation99_spill] sm:$0xff] %v20388_v63  ;;  %v23700_v34 = vmax.f32 %v23699_v19, 0.0  ;;  %v23702_v35 = vmax.f32 %v23701_v24, 0.0  ;;  %14945 = vmatprep.subr.bf16.mxu0 %v20388_v63  ;;  %v20405_v13 = vsub.f32 %v20375_v20, %v7121_v57  ;;  %v23704_v22 = vmax.f32 %v23703_v42, 0.0  ;;  %v6978_v19 = vpop.permute.xlu1 %6977  ;;  %v23707_v20 = vld [vmem:[#allocation76_spill] sm:$0xff]  ;;  %v6993_v9 = vpop.permute.xlu0 %6992 }
 0x79d   :  { %23697 = vst [vmem:[#allocation22_spill] sm:$0xff] %v20394_v14  ;;  %23698 = vst [vmem:[#allocation107_spill] sm:$0xff] %v20397_v54  ;;  %v20408_v16 = vsub.f32 %v20370_v45, %v7123_v6  ;;  %v20410_v49 = vsub.f32 %v7022_v61, %v8113_v62  ;;  %14797 = vmatprep.subr.bf16.mxu1 %v20394_v14  ;;  %v23708_v36 = vmax.f32 %v23707_v20, 0.0  ;;  %14947 = vmatpush3.bf16.msra.mxu0 %v20388_v63  ;;  %v23718_v63 = vld [vmem:[#allocation25_spill] sm:$0xff] }
 0x79e   :  { %v7017_v50 = vmul.f32 %v6968_v1, %v23700_v34  ;;  %v7018_v37 = vmul.f32 %v6968_v1, %v23702_v35  ;;  %v7019_v39 = vmul.f32 %v6968_v1, %v23704_v22  ;;  %14799 = vmatpush1.bf16.msra.mxu1 %v20397_v54  ;;  %v23705_v35 = vld [vmem:[#allocation63_spill] sm:$0xff]  ;;  %v23710_v42 = vmax.f32 %v23709_v12, 0.0 }
 0x79f   :  { %v23706_v27 = vmax.f32 %v23705_v35, 0.0  ;;  %v7027_v45 = vmul.f32 %v6983_v60, %v23708_v36  ;;  %v20426_v22 = vpack.c.bf16 %v7113_v5, %v7109_v44  ;;  %v20438_v61 = vpack.c.bf16 %v7115_v2, %v7111_v43  ;;  %v23714_v44 = vld [vmem:[#allocation102_spill] sm:$0xff] }
 0x7a0   :  { %v7117_v34 = vand.u32 4294901760, %v7018_v37  ;;  %v7119_v24 = vand.u32 4294901760, %v7017_v50  ;;  %v8110_v0 = vand.u32 4294901760, %v7019_v39  ;;  %v7028_v1 = vmul.f32 %v6983_v60, %v23710_v42  ;;  %v6988_v48 = vpop.permute.xlu1 %6987 }
 0x7a1   :  { %v20418_v56 = vmul.f32 %v6983_v60, %v23706_v27  ;;  %23711 = vst [vmem:[#allocation11_spill] sm:$0xff] %v20426_v22  ;;  %v7129_v35 = vand.u32 4294901760, %v7027_v45  ;;  %14801 = vmatprep.subr.bf16.mxu1 %v20426_v22  ;;  %23713 = vst [vmem:[#allocation113_spill] sm:$0xff] %v20438_v61  ;;  %v23715_v60 = vmax.f32 %v23714_v44, 0.0  ;;  %v23719_v2 = vmax.f32 %v23718_v63, 0.0  ;;  %v23720_v22 = vld [vmem:[#allocation51_spill] sm:$0xff] }
 0x7a2   :  { %v20428_v21 = vsub.f32 %v7018_v37, %v7117_v34  ;;  %v20430_v59 = vsub.f32 %v7017_v50, %v7119_v24  ;;  %v20433_v20 = vpack.c.bf16 %v8113_v62, %v8110_v0  ;;  %v20435_v36 = vsub.f32 %v7019_v39, %v8110_v0  ;;  %14803 = vmatpush1.bf16.msra.mxu1 %v20438_v61  ;;  %v23716_v0 = vld [vmem:[#allocation10_spill] sm:$0xff]  ;;  %v23722_v44 = vld [vmem:[#allocation56_spill] sm:$0xff] }
 0x7a3   :  { %v7131_v27 = vand.u32 4294901760, %v20418_v56  ;;  %v8119_v15 = vand.u32 4294901760, %v7028_v1  ;;  %v20441_v5 = vsub.f32 %v7027_v45, %v7129_v35  ;;  %v7023_v50 = vmul.f32 %v6978_v19, %v23715_v60 }
 0x7a4   :  { %23712 = vst [vmem:[#allocation111_spill] sm:$0xff] %v20433_v20  ;;  %v23717_v62 = vmax.f32 %v23716_v0, 0.0  ;;  %v7025_v43 = vmul.f32 %v6978_v19, %v23719_v2  ;;  %v23721_v12 = vmax.f32 %v23720_v22, 0.0  ;;  %v23723_v60 = vmax.f32 %v23722_v44, 0.0  ;;  %14949 = vmatprep.subr.bf16.mxu0 %v20433_v20  ;;  %v7003_v44 = vpop.permute.xlu0 %7002 }
 0x7a5   :  { %v20444_v37 = vsub.f32 %v20418_v56, %v7131_v27  ;;  %v20448_v42 = vsub.f32 %v7028_v1, %v8119_v15  ;;  %v7127_v54 = vand.u32 4294901760, %v7023_v50  ;;  %v23725_v14 = vmax.f32 %v23724_v52, 0.0  ;;  %14951 = vmatpush3.bf16.msra.mxu0 %v20433_v20 }
 0x7a6   :  { %v7024_v39 = vmul.f32 %v6978_v19, %v23717_v62  ;;  %v20457_v45 = vmul.f32 %v6993_v9, %v23721_v12  ;;  %v7033_v1 = vmul.f32 %v6993_v9, %v23723_v60  ;;  %v8116_v62 = vand.u32 4294901760, %v7025_v43 }
 0x7a7   :  { %v7034_v61 = vmul.f32 %v6993_v9, %v23725_v14  ;;  %v20466_v19 = vpack.c.bf16 %v7121_v57, %v7117_v34  ;;  %v20469_v22 = vsub.f32 %v7023_v50, %v7127_v54  ;;  %v20471_v56 = vpack.c.bf16 %v7123_v6, %v7119_v24  ;;  %v23729_v6 = vld [vmem:[#allocation127_spill] sm:$0xff] }
 0x7a8   :  { %v7125_v0 = vand.u32 4294901760, %v7024_v39  ;;  %v7139_v63 = vand.u32 4294901760, %v20457_v45  ;;  %v7137_v12 = vand.u32 4294901760, %v7033_v1  ;;  %v20475_v52 = vpack.c.bf16 %v8119_v15, %v8116_v62 }
 0x7a9   :  { %23726 = vst [vmem:[#allocation116_spill] sm:$0xff] %v20466_v19  ;;  %v8125_v2 = vand.u32 4294901760, %v7034_v61  ;;  %23727 = vst [vmem:[#allocation120_spill] sm:$0xff] %v20471_v56  ;;  %v20477_v9 = vsub.f32 %v7025_v43, %v8116_v62  ;;  %14805 = vmatprep.subr.bf16.mxu1 %v20466_v19  ;;  %v23730_v24 = vmax.f32 %v23729_v6, 0.0  ;;  %v23731_v43 = vld [vmem:[#allocation17_spill] sm:$0xff]  ;;  %v23739_v6 = vld [vmem:[#allocation134_spill] sm:$0xff] }
 0x7aa   :  { %v20473_v60 = vsub.f32 %v7024_v39, %v7125_v0  ;;  %23728 = vst [vmem:[#allocation124_spill] sm:$0xff] %v20475_v52  ;;  %v20480_v14 = vsub.f32 %v20457_v45, %v7139_v63  ;;  %v20484_v34 = vsub.f32 %v7033_v1, %v7137_v12  ;;  %14807 = vmatpush1.bf16.msra.mxu1 %v20471_v56  ;;  %v23732_v62 = vmax.f32 %v23731_v43, 0.0  ;;  %v23733_v45 = vld [vmem:[#allocation45_spill] sm:$0xff] }
 0x7ab   :  { %v20486_v50 = vsub.f32 %v7034_v61, %v8125_v2  ;;  %v7029_v39 = vmul.f32 %v6988_v48, %v23730_v24  ;;  %v23734_v18 = vmax.f32 %v23733_v45, 0.0  ;;  %v23735_v19 = vld [vmem:[#allocation65_spill] sm:$0xff]  ;;  %14953 = vmatprep.subr.bf16.mxu0 %v20475_v52  ;;  %v6998_v61 = vpop.permute.xlu1 %6997  ;;  %v23738_v56 = vmax.f32 %v23737_v4, 0.0  ;;  %v23743_v4 = vld [vmem:[#allocation104_spill] sm:$0xff] }
 0x7ac   :  { %v7030_v20 = vmul.f32 %v6988_v48, %v23732_v62  ;;  %v23736_v41 = vmax.f32 %v23735_v19, 0.0  ;;  %v23740_v24 = vmax.f32 %v23739_v6, 0.0  ;;  %v20503_v15 = vpack.c.bf16 %v7129_v35, %v7125_v0  ;;  %14955 = vmatpush3.bf16.msra.mxu0 %v20475_v52 }
 0x7ad   :  { %v7031_v58 = vmul.f32 %v6988_v48, %v23734_v18  ;;  %v7135_v1 = vand.u32 4294901760, %v7029_v39  ;;  %v7039_v23 = vmul.f32 %v7003_v44, %v23738_v56  ;;  %v20506_v48 = vpack.c.bf16 %v7131_v27, %v7127_v54 }
 0x7ae   :  { %v7038_v57 = vmul.f32 %v7003_v44, %v23736_v41  ;;  %v7040_v28 = vmul.f32 %v7003_v44, %v23740_v24  ;;  %23741 = vst [vmem:[#allocation8_spill] sm:$0xff] %v20503_v15  ;;  %v7133_v43 = vand.u32 4294901760, %v7030_v20  ;;  %14809 = vmatprep.subr.bf16.mxu1 %v20503_v15  ;;  %v23744_v56 = vmax.f32 %v23743_v4, 0.0  ;;  %v23745_v24 = vld [vmem:[#allocation30_spill] sm:$0xff] }
 0x7af   :  { %v8122_v62 = vand.u32 4294901760, %v7031_v58  ;;  %23742 = vst [vmem:[#allocation130_spill] sm:$0xff] %v20506_v48  ;;  %v20508_v41 = vsub.f32 %v7029_v39, %v7135_v1  ;;  %v7145_v19 = vand.u32 4294901760, %v7039_v23  ;;  %14811 = vmatpush1.bf16.msra.mxu1 %v20506_v48  ;;  %v23746_v52 = vmax.f32 %v23745_v24, 0.0 }
 0x7b0   :  { %v7147_v18 = vand.u32 4294901760, %v7038_v57  ;;  %v8131_v45 = vand.u32 4294901760, %v7040_v28  ;;  %v7035_v51 = vmul.f32 %v6998_v61, %v23744_v56  ;;  %v20513_v6 = vsub.f32 %v7030_v20, %v7133_v43  ;;  %v23747_v56 = vld [vmem:[#allocation129_spill] sm:$0xff] }
 0x7b1   :  { %v20515_v35 = vpack.c.bf16 %v8125_v2, %v8122_v62  ;;  %v20517_v0 = vsub.f32 %v7031_v58, %v8122_v62  ;;  %v20523_v27 = vsub.f32 %v7039_v23, %v7145_v19  ;;  %v7036_v4 = vmul.f32 %v6998_v61, %v23746_v52 }
 0x7b2   :  { %v20519_v44 = vsub.f32 %v7038_v57, %v7147_v18  ;;  %v20525_v39 = vsub.f32 %v7040_v28, %v8131_v45  ;;  %v23748_v2 = vmax.f32 %v23747_v56, 0.0  ;;  %v7143_v58 = vand.u32 4294901760, %v7035_v51 }
 0x7b3   :  { %v20532_v62 = vpack.c.bf16 %v7137_v12, %v7133_v43  ;;  %14957 = vmatprep.subr.bf16.mxu0 %v20515_v35  ;;  %v7141_v57 = vand.u32 4294901760, %v7036_v4  ;;  %v20535_v48 = vpack.c.bf16 %v7139_v63, %v7135_v1  ;;  %v22932_v28 = vand.u32 4294901760, %v20343_v40 }
 0x7b4   :  { %v7037_v15 = vmul.f32 %v6998_v61, %v23748_v2  ;;  %14959 = vmatpush3.bf16.msra.mxu0 %v20515_v35  ;;  %v22933_v23 = vand.u32 4294901760, %v20333_v10  ;;  %v20540_v52 = vsub.f32 %v7035_v51, %v7143_v58  ;;  %v20543_v61 = vpack.c.bf16 %v7147_v18, %v7143_v58 }
 0x7b5   :  { %23749 = vst [vmem:[#allocation27_spill] sm:$0xff] %v20535_v48  ;;  %14813 = vmatprep.subr.bf16.mxu1 %v20532_v62  ;;  %v22934_v12 = vand.u32 4294901760, %v20349_v26  ;;  %v20546_v43 = vsub.f32 %v7036_v4, %v7141_v57  ;;  %v20549_v63 = vpack.c.bf16 %v7145_v19, %v7141_v57  ;;  %v7259_v1 = vsub.f32 %v20343_v40, %v22932_v28 }
 0x7b6   :  { %v8128_v24 = vand.u32 4294901760, %v7037_v15  ;;  %23750 = vst [vmem:[#allocation15_spill] sm:$0xff] %v20543_v61  ;;  %14815 = vmatpush1.bf16.msra.mxu1 %v20535_v48  ;;  %v7271_v51 = vsub.f32 %v20333_v10, %v22933_v23  ;;  %v22937_v57 = vand.u32 4294901760, %v20337_v30  ;;  %v23753_v28 = vand.u32 4294901760, %v20345_v31 }
 0x7b7   :  { %23751 = vst [vmem:[#allocation64_spill] sm:$0xff] %v20549_v63  ;;  %v8238_v4 = vsub.f32 %v20349_v26, %v22934_v12  ;;  %14817 = vmatprep.subr.bf16.mxu1 %v20549_v63  ;;  %v7260_v19 = vand.u32 4294901760, %v7259_v1  ;;  %v22938_v20 = vand.u32 4294901760, %v20384_v47  ;;  %v22941_v12 = vand.u32 4294901760, %v20377_v29 }
 0x7b8   :  { %v20558_v18 = vpack.c.bf16 %v8131_v45, %v8128_v24  ;;  %v20560_v2 = vsub.f32 %v7037_v15, %v8128_v24  ;;  %v7272_v58 = vand.u32 4294901760, %v7271_v51  ;;  %v7265_v23 = vsub.f32 %v20345_v31, %v23753_v28 }
 0x7b9   :  { %v8239_v45 = vand.u32 4294901760, %v8238_v4  ;;  %v23754_v15 = vand.u32 4294901760, %v20335_v33  ;;  %v8245_v28 = vsub.f32 %v20337_v30, %v22937_v57  ;;  %v22942_v4 = vand.u32 4294901760, %v20390_v46 }
 0x7ba   :  { %23752 = vst [vmem:[#allocation20_spill] sm:$0xff] %v20558_v18  ;;  %14961 = vmatprep.subr.bf16.mxu0 %v20558_v18  ;;  %14819 = vmatpush1.bf16.msra.mxu1 %v20543_v61  ;;  %v14820_v1 = vpack.c.bf16 %v7272_v58, %v7260_v19  ;;  %v7266_v51 = vand.u32 4294901760, %v7265_v23  ;;  %v7295_v54 = vsub.f32 %v20377_v29, %v22941_v12  ;;  %v8258_v61 = vand.u32 4294901760, %v20380_v11 }
 0x7bb   :  { %v7277_v24 = vsub.f32 %v20335_v33, %v23754_v15  ;;  %14963 = vmatpush3.bf16.msra.mxu0 %v20558_v18  ;;  %v7283_v15 = vsub.f32 %v20384_v47, %v22938_v20  ;;  %v8246_v19 = vand.u32 4294901760, %v8245_v28  ;;  %v8252_v58 = vsub.f32 %v20390_v46, %v22942_v4 }
 0x7bc   :  { %14821 = vmatprep.subr.bf16.mxu1 %v14820_v1  ;;  %v23755_v23 = vand.u32 4294901760, %v20386_v38  ;;  %v23756_v57 = vand.u32 4294901760, %v20366_v25  ;;  %v7296_v1 = vand.u32 4294901760, %v7295_v54  ;;  %v8259_v28 = vsub.f32 %v20380_v11, %v8258_v61 }
 0x7bd   :  { %v7278_v56 = vand.u32 4294901760, %v7277_v24  ;;  %7195 = vmatmul.mubr.f32.vlgmr.msra.gmra.mrb[38].mxu1 %v20147_v3  ;;  %v7284_v12 = vand.u32 4294901760, %v7283_v15  ;;  %v14964_v4 = vpack.c.bf16 %v8246_v19, %v8239_v45  ;;  %v8253_v63 = vand.u32 4294901760, %v8252_v58 }
 0x7be   :  { %v7289_v24 = vsub.f32 %v20386_v38, %v23755_v23  ;;  %v7301_v20 = vsub.f32 %v20366_v25, %v23756_v57  ;;  %13603 = vmatmul.mubr.f32.vlgmr.msra.gmra.mrb[48].mxu0 %v20309_v8  ;;  %7200 = vmatprep.mubr.f32.mxu1 %v23218_v32  ;;  %v8260_v3 = vand.u32 4294901760, %v8259_v28  ;;  %v22947_v15 = vand.u32 4294901760, %v20435_v36 }
 0x7bf   :  { %v14822_v18 = vpack.c.bf16 %v7278_v56, %v7266_v51  ;;  %13605 = vmatprep.mubr.f32.mxu0 %v20319_v53  ;;  %v14824_v57 = vpack.c.bf16 %v7296_v1, %v7284_v12  ;;  %v7306_v56 = vand.u32 4294901760, %v20428_v21  ;;  %v7318_v51 = vand.u32 4294901760, %v20405_v13  ;;  %14965 = vmatprep.subr.bf16.mxu0 %v14964_v4 }
 0x7c0   :  { %v7290_v23 = vand.u32 4294901760, %v7289_v24  ;;  %v7302_v48 = vand.u32 4294901760, %v7301_v20  ;;  %v22948_v45 = vand.u32 4294901760, %v20410_v49  ;;  %v23757_v19 = vand.u32 4294901760, %v20430_v59  ;;  %14967 = vmatpush3.bf16.msra.mxu0 %v14964_v4 }
 0x7c1   :  { %14823 = vmatpush1.bf16.msra.mxu1 %v14822_v18  ;;  %v14968_v20 = vpack.c.bf16 %v8260_v3, %v8253_v63  ;;  %v7307_v12 = vsub.f32 %v20428_v21, %v7306_v56  ;;  %v7319_v18 = vsub.f32 %v20405_v13, %v7318_v51  ;;  %v8266_v24 = vsub.f32 %v20435_v36, %v22947_v15 }
 0x7c2   :  { %v14826_v54 = vpack.c.bf16 %v7302_v48, %v7290_v23  ;;  %v7313_v58 = vsub.f32 %v20430_v59, %v23757_v19  ;;  %14825 = vmatprep.subr.bf16.mxu1 %v14824_v57  ;;  %v22949_v48 = vand.u32 4294901760, %v20473_v60  ;;  %7206 = vmatmul.mubr.f32.gmra.mrb[40].mxu1 %v20309_v8  ;;  %v8273_v63 = vsub.f32 %v20410_v49, %v22948_v45 }
 0x7c3   :  { %v23758_v1 = vand.u32 4294901760, %v20408_v16  ;;  %13606 = vmatmul.mubr.f32.gmra.mrb[50].mxu0 %v20327_v7  ;;  %14969 = vmatprep.subr.bf16.mxu0 %v14968_v20  ;;  %v7308_v23 = vand.u32 4294901760, %v7307_v12  ;;  %v7320_v57 = vand.u32 4294901760, %v7319_v18  ;;  %v22955_v3 = vand.u32 4294901760, %v20441_v5 }
 0x7c4   :  { %v7314_v4 = vand.u32 4294901760, %v7313_v58  ;;  %v7331_v8 = vsub.f32 %v20473_v60, %v22949_v48  ;;  %v8267_v19 = vand.u32 4294901760, %v8266_v24  ;;  %v8274_v15 = vand.u32 4294901760, %v8273_v63  ;;  %7211 = vmatprep.mubr.f32.mxu1 %v23218_v32  ;;  %13608 = vmatprep.mubr.f32.mxu0 %v20329_v17 }
 0x7c5   :  { %v7325_v28 = vsub.f32 %v20408_v16, %v23758_v1  ;;  %14827 = vmatpush1.bf16.msra.mxu1 %v14826_v54  ;;  %v22951_v45 = vand.u32 4294901760, %v20477_v9  ;;  %14971 = vmatpush3.bf16.msra.mxu0 %v14968_v20  ;;  %v14828_v1 = vpack.c.bf16 %v7320_v57, %v7308_v23  ;;  %v7343_v12 = vsub.f32 %v20441_v5, %v22955_v3 }
 0x7c6   :  { %v7332_v54 = vand.u32 4294901760, %v7331_v8  ;;  %v22950_v18 = vand.u32 4294901760, %v20448_v42  ;;  %v14972_v48 = vpack.c.bf16 %v8274_v15, %v8267_v19  ;;  %7217 = vmatmul.mubr.f32.gmra.mrb[42].mxu1 %v20319_v53  ;;  %v23760_v15 = vand.u32 4294901760, %v20444_v37 }
 0x7c7   :  { %v7326_v58 = vand.u32 4294901760, %v7325_v28  ;;  %v8280_v63 = vsub.f32 %v20477_v9, %v22951_v45  ;;  %v23759_v28 = vand.u32 4294901760, %v20469_v22  ;;  %14829 = vmatprep.subr.bf16.mxu1 %v14828_v1  ;;  %v7344_v23 = vand.u32 4294901760, %v7343_v12  ;;  %7222 = vmatprep.mubr.f32.mxu1 %v23218_v32 }
 0x7c8   :  { %v8287_v57 = vsub.f32 %v20448_v42, %v22950_v18  ;;  %v7349_v53 = vsub.f32 %v20444_v37, %v23760_v15  ;;  %14973 = vmatprep.subr.bf16.mxu0 %v14972_v48  ;;  %v22953_v1 = vand.u32 4294901760, %v20517_v0  ;;  %13609 = vmatmul.mubr.f32.gmra.mrb[52].mxu0 %v20331_v55  ;;  %v23762_v15 = vand.u32 4294901760, %v20480_v14 }
 0x7c9   :  { %v14830_v24 = vpack.c.bf16 %v7326_v58, %v7314_v4  ;;  %v7337_v20 = vsub.f32 %v20469_v22, %v23759_v28  ;;  %v22954_v4 = vand.u32 4294901760, %v20513_v6  ;;  %v8281_v8 = vand.u32 4294901760, %v8280_v63  ;;  %14975 = vmatpush3.bf16.msra.mxu0 %v14972_v48 }
 0x7ca   :  { %v22952_v58 = vand.u32 4294901760, %v20484_v34  ;;  %v14832_v12 = vpack.c.bf16 %v7344_v23, %v7332_v54  ;;  %v8288_v28 = vand.u32 4294901760, %v8287_v57  ;;  %v7350_v18 = vand.u32 4294901760, %v7349_v53  ;;  %7228 = vmatmul.mubr.f32.gmra.mrb[44].mxu1 %v20327_v7 }
 0x7cb   :  { %14831 = vmatpush1.bf16.msra.mxu1 %v14830_v24  ;;  %v7338_v19 = vand.u32 4294901760, %v7337_v20  ;;  %v7355_v45 = vsub.f32 %v20513_v6, %v22954_v4  ;;  %v8294_v63 = vsub.f32 %v20517_v0, %v22953_v1  ;;  %v8300_v20 = vand.u32 4294901760, %v20486_v50  ;;  %7233 = vmatprep.mubr.f32.mxu1 %v23218_v32 }
 0x7cc   :  { %v7367_v24 = vsub.f32 %v20484_v34, %v22952_v58  ;;  %v23761_v48 = vand.u32 4294901760, %v20508_v41  ;;  %14833 = vmatprep.subr.bf16.mxu1 %v14832_v12  ;;  %v14976_v23 = vpack.c.bf16 %v8288_v28, %v8281_v8  ;;  %v7373_v53 = vsub.f32 %v20480_v14, %v23762_v15 }
 0x7cd   :  { %v14834_v57 = vpack.c.bf16 %v7350_v18, %v7338_v19  ;;  %v7356_v7 = vand.u32 4294901760, %v7355_v45  ;;  %v8295_v1 = vand.u32 4294901760, %v8294_v63  ;;  %v8301_v4 = vsub.f32 %v20486_v50, %v8300_v20 }
 0x7ce   :  { %v7361_v54 = vsub.f32 %v20508_v41, %v23761_v48  ;;  %v7368_v58 = vand.u32 4294901760, %v7367_v24  ;;  %v23763_v48 = vld [vmem:[#allocation98_spill] sm:$0xff]  ;;  %14977 = vmatprep.subr.bf16.mxu0 %v14976_v23  ;;  %v7374_v8 = vand.u32 4294901760, %v7373_v53  ;;  %v22957_v45 = vand.u32 4294901760, %v20546_v43  ;;  %7239 = vmatmul.mubr.f32.gmra.mrb[46].mxu1 %v20329_v17 }
 0x7cf   :  { %13635 = vmatprep.mubr.f32.mxu0 %v23763_v48  ;;  %14835 = vmatpush1.bf16.msra.mxu1 %v14834_v57  ;;  %v22956_v18 = vand.u32 4294901760, %v20523_v27  ;;  %v22958_v19 = vand.u32 4294901760, %v20560_v2  ;;  %v8302_v28 = vand.u32 4294901760, %v8301_v4  ;;  %v8314_v24 = vand.u32 4294901760, %v20525_v39 }
 0x7d0   :  { %v7362_v3 = vand.u32 4294901760, %v7361_v54  ;;  %14979 = vmatpush3.bf16.msra.mxu0 %v14976_v23  ;;  %v14836_v12 = vpack.c.bf16 %v7368_v58, %v7356_v7  ;;  %v23764_v63 = vand.u32 4294901760, %v20540_v52  ;;  %v7379_v57 = vsub.f32 %v20546_v43, %v22957_v45  ;;  %7244 = vmatprep.mubr.f32.mxu1 %v23218_v32 }
 0x7d1   :  { %v7391_v53 = vsub.f32 %v20523_v27, %v22956_v18  ;;  %v8308_v4 = vsub.f32 %v20560_v2, %v22958_v19  ;;  %v14980_v17 = vpack.c.bf16 %v8302_v28, %v8295_v1  ;;  %v23765_v23 = vand.u32 4294901760, %v20519_v44 }
 0x7d2   :  { %v7385_v54 = vsub.f32 %v20540_v52, %v23764_v63  ;;  %v14838_v15 = vpack.c.bf16 %v7374_v8, %v7362_v3  ;;  %14837 = vmatprep.subr.bf16.mxu1 %v14836_v12  ;;  %v8315_v3 = vsub.f32 %v20525_v39, %v8314_v24  ;;  %v7380_v8 = vand.u32 4294901760, %v7379_v57  ;;  %7250 = vmatmul.mubr.f32.gmra.mrb[48].mxu1 %v20331_v55  ;;  %v20707_v12 = vpop.xlane.xlu0 %8961 }
 0x7d3   :  { %v7397_v7 = vsub.f32 %v20519_v44, %v23765_v23  ;;  %v7392_v63 = vand.u32 4294901760, %v7391_v53  ;;  %v8309_v18 = vand.u32 4294901760, %v8308_v4  ;;  %14981 = vmatprep.subr.bf16.mxu0 %v14980_v17  ;;  %7440 = vmatprep.mubr.f32.mxu1 %v23218_v32  ;;  %v14988_v57 = vpack.c.bf16 %v20337_v30, %v20349_v26 }
 0x7d4   :  { %v7386_v58 = vand.u32 4294901760, %v7385_v54  ;;  %14839 = vmatpush1.bf16.msra.mxu1 %v14838_v15  ;;  %v8316_v45 = vand.u32 4294901760, %v8315_v3  ;;  %14983 = vmatpush3.bf16.msra.mxu0 %v14980_v17  ;;  %v14844_v15 = vpack.c.bf16 %v20333_v10, %v20343_v40  ;;  %v14846_v53 = vpack.c.bf16 %v20335_v33, %v20345_v31 }
 0x7d5   :  { %v7398_v19 = vand.u32 4294901760, %v7397_v7  ;;  %v14840_v1 = vpack.c.bf16 %v7392_v63, %v7380_v8  ;;  %v23768_v17 = vand.u32 4294901760, %v20349_v26  ;;  %v23769_v3 = vand.u32 4294901760, %v20337_v30  ;;  %v23772_v63 = vld [vmem:[#allocation100_spill] sm:$0xff] }
 0x7d6   :  { %v14984_v28 = vpack.c.bf16 %v8316_v45, %v8309_v18  ;;  %v20713_v55 = vpop.xlane.xlu0 %8965  ;;  %v14848_v45 = vpack.c.bf16 %v20377_v29, %v20384_v47  ;;  %v23766_v18 = vand.u32 4294901760, %v20343_v40  ;;  %v23770_v23 = vand.u32 4294901760, %v20345_v31 }
 0x7d7   :  { %v14842_v54 = vpack.c.bf16 %v7398_v19, %v7386_v58  ;;  %14841 = vmatprep.subr.bf16.mxu1 %v14840_v1  ;;  %v23767_v19 = vand.u32 4294901760, %v20333_v10  ;;  %v20730_v58 = vpack.c.bf16 %v23769_v3, %v23768_v17  ;;  %v23771_v7 = vand.u32 4294901760, %v20335_v33  ;;  %v20753_v33 = vpop.xlane.xlu1 %8957 }
 0x7d8   :  { %14985 = vmatprep.subr.bf16.mxu0 %v14984_v28  ;;  %v14992_v10 = vpack.c.bf16 %v20380_v11, %v20390_v46  ;;  %v23773_v40 = vand.u32 4294901760, %v20384_v47  ;;  %v23774_v26 = vand.u32 4294901760, %v20377_v29  ;;  %v23775_v30 = vand.u32 4294901760, %v20390_v46 }
 0x7d9   :  { %14843 = vmatpush1.bf16.msra.mxu1 %v14842_v54  ;;  %14987 = vmatpush3.bf16.msra.mxu0 %v14984_v28  ;;  %v20724_v4 = vpack.c.bf16 %v23767_v19, %v23766_v18  ;;  %v20736_v8 = vpack.c.bf16 %v23771_v7, %v23770_v23  ;;  %v23776_v54 = vand.u32 4294901760, %v20386_v38  ;;  %v23777_v47 = vand.u32 4294901760, %v20366_v25 }
 0x7da   :  { %14845 = vmatprep.subr.bf16.mxu1 %v14844_v15  ;;  %14989 = vmatprep.subr.bf16.mxu0 %v14988_v57  ;;  %v20745_v1 = vpack.c.bf16 %v23774_v26, %v23773_v40  ;;  %v20751_v31 = vpack.c.bf16 %v8258_v61, %v23775_v30  ;;  %v20755_v28 = vpop.xlane.xlu0 %8973  ;;  %v20767_v46 = vpack.c.bf16 %v7318_v51, %v7306_v56  ;;  %v23778_v61 = vand.u32 4294901760, %v20435_v36 }
 0x7db   :  { %v20761_v15 = vpack.c.bf16 %v23777_v47, %v23776_v54  ;;  %v14850_v29 = vpack.c.bf16 %v20366_v25, %v20386_v38  ;;  %v14852_v11 = vpack.c.bf16 %v20405_v13, %v20428_v21  ;;  %v23781_v56 = vand.u32 4294901760, %v20430_v59  ;;  %v20803_v23 = vpop.xlane.xlu1 %8969 }
 0x7dc   :  { %7442 = vmatmul.mubr.f32.vlgmr.msra.gmra.mrb[38].mxu1 %v23763_v48  ;;  %13636 = vmatmul.mubr.f32.vlgmr.msra.gmra.mrb[48].mxu0 %v23772_v63  ;;  %v23782_v51 = vand.u32 4294901760, %v20408_v16  ;;  %v23783_v38 = vand.u32 4294901760, %v20473_v60  ;;  %v23784_v21 = vand.u32 4294901760, %v20441_v5  ;;  %v23785_v13 = vand.u32 4294901760, %v20477_v9 }
 0x7dd   :  { %14847 = vmatpush1.bf16.msra.mxu1 %v14846_v53  ;;  %14991 = vmatpush3.bf16.msra.mxu0 %v14988_v57  ;;  %v23779_v57 = vand.u32 4294901760, %v20410_v49  ;;  %v23786_v19 = vand.u32 4294901760, %v20448_v42  ;;  %v14996_v3 = vpack.c.bf16 %v20410_v49, %v20435_v36  ;;  %v23787_v40 = vand.u32 4294901760, %v20469_v22 }
 0x7de   :  { %14849 = vmatprep.subr.bf16.mxu1 %v14848_v45  ;;  %14993 = vmatprep.subr.bf16.mxu0 %v14992_v10  ;;  %v23780_v45 = vld [vmem:[#allocation9_spill] sm:$0xff]  ;;  %v20786_v18 = vpack.c.bf16 %v23782_v51, %v23781_v56  ;;  %v20792_v25 = vpack.c.bf16 %v23784_v21, %v23783_v38  ;;  %v20805_v7 = vpop.xlane.xlu0 %8981  ;;  %v23788_v26 = vand.u32 4294901760, %v20444_v37  ;;  %v23789_v54 = vand.u32 4294901760, %v20513_v6 }
 0x7df   :  { %7447 = vmatprep.mubr.f32.mxu1 %v23218_v32  ;;  %v20778_v53 = vpack.c.bf16 %v23779_v57, %v23778_v61  ;;  %13638 = vmatprep.mubr.f32.mxu0 %v23780_v45  ;;  %v20798_v17 = vpack.c.bf16 %v23786_v19, %v23785_v13  ;;  %v23790_v47 = vand.u32 4294901760, %v20484_v34  ;;  %v14854_v49 = vpack.c.bf16 %v20408_v16, %v20430_v59  ;;  %v23793_v57 = vld [vmem:[#allocation105_spill] sm:$0xff]  ;;  %v20853_v13 = vpop.xlane.xlu1 %8977 }
 0x7e0   :  { %7449 = vmatmul.mubr.f32.gmra.mrb[40].mxu1 %v23772_v63  ;;  %v20811_v30 = vpack.c.bf16 %v23788_v26, %v23787_v40  ;;  %v14856_v36 = vpack.c.bf16 %v20441_v5, %v20473_v60  ;;  %v23794_v56 = vand.u32 4294901760, %v20508_v41  ;;  %v23795_v51 = vand.u32 4294901760, %v20480_v14 }
 0x7e1   :  { %14851 = vmatpush1.bf16.msra.mxu1 %v14850_v29  ;;  %7454 = vmatprep.mubr.f32.mxu1 %v23218_v32  ;;  %v20817_v29 = vpack.c.bf16 %v23790_v47, %v23789_v54  ;;  %v23796_v16 = vand.u32 4294901760, %v20546_v43  ;;  %v23797_v5 = vand.u32 4294901760, %v20523_v27  ;;  %v23798_v38 = vand.u32 4294901760, %v20560_v2  ;;  %v23801_v47 = vld [vmem:[#allocation109_spill] sm:$0xff] }
 0x7e2   :  { %14995 = vmatpush3.bf16.msra.mxu0 %v14992_v10  ;;  %14853 = vmatprep.subr.bf16.mxu1 %v14852_v11  ;;  %v23791_v10 = vld [vmem:[#allocation13_spill] sm:$0xff]  ;;  %v23792_v11 = vand.u32 4294901760, %v20517_v0  ;;  %v20836_v59 = vpack.c.bf16 %v23795_v51, %v23794_v56  ;;  %v15000_v21 = vpack.c.bf16 %v20448_v42, %v20477_v9  ;;  %v20855_v19 = vpop.xlane.xlu0 %8989  ;;  %v23799_v40 = vand.u32 4294901760, %v20540_v52 }
 0x7e3   :  { %14997 = vmatprep.subr.bf16.mxu0 %v14996_v3  ;;  %13639 = vmatmul.mubr.f32.gmra.mrb[50].mxu0 %v23791_v10  ;;  %v20842_v60 = vpack.c.bf16 %v23797_v5, %v23796_v16  ;;  %v23800_v26 = vand.u32 4294901760, %v20519_v44  ;;  %v14860_v42 = vpack.c.bf16 %v20484_v34, %v20513_v6  ;;  %v22968_v9 = vand.u32 4294901760, %v20753_v33 }
 0x7e4   :  { %v20828_v61 = vpack.c.bf16 %v8300_v20, %v23792_v11  ;;  %7456 = vmatmul.mubr.f32.gmra.mrb[42].mxu1 %v23780_v45  ;;  %13641 = vmatprep.mubr.f32.mxu0 %v23793_v57  ;;  %v20848_v20 = vpack.c.bf16 %v8314_v24, %v23798_v38  ;;  %v14858_v24 = vpack.c.bf16 %v20444_v37, %v20469_v22  ;;  %v22964_v37 = vand.u32 4294901760, %v20803_v23  ;;  %v20877_v11 = vpop.xlane.xlu1 %8985 }
 0x7e5   :  { %14855 = vmatpush1.bf16.msra.mxu1 %v14854_v49  ;;  %7461 = vmatprep.mubr.f32.mxu1 %v23218_v32  ;;  %v20861_v54 = vpack.c.bf16 %v23800_v26, %v23799_v40  ;;  %v15004_v49 = vpack.c.bf16 %v20486_v50, %v20517_v0  ;;  %v22960_v22 = vand.u32 4294901760, %v20853_v13  ;;  %v14862_v34 = vpack.c.bf16 %v20480_v14, %v20508_v41 }
 0x7e6   :  { %14999 = vmatpush3.bf16.msra.mxu0 %v14996_v3  ;;  %14857 = vmatprep.subr.bf16.mxu1 %v14856_v36  ;;  %v23802_v3 = vld [vmem:[#allocation132_spill] sm:$0xff]  ;;  %v22966_v36 = vand.u32 4294901760, %v20707_v12  ;;  %v22959_v6 = vand.u32 4294901760, %v20877_v11  ;;  %v22965_v50 = vand.u32 4294901760, %v20713_v55  ;;  %v20886_v0 = vsub.f32 %v20753_v33, %v22968_v9  ;;  %v20892_v16 = vpop.xlane.xlu0 %8997 }
 0x7e7   :  { %15001 = vmatprep.subr.bf16.mxu0 %v15000_v21  ;;  %13642 = vmatmul.mubr.f32.gmra.mrb[52].mxu0 %v23801_v47  ;;  %v22962_v56 = vand.u32 4294901760, %v20755_v28  ;;  %v14864_v51 = vpack.c.bf16 %v20523_v27, %v20546_v43  ;;  %23803 = vst [vmem:[#allocation14_spill] sm:$0xff] %v20892_v16  ;;  %v15008_v14 = vpack.c.bf16 %v20525_v39, %v20560_v2  ;;  %v22961_v41 = vand.u32 4294901760, %v20805_v7 }
 0x7e8   :  { %7463 = vmatmul.mubr.f32.gmra.mrb[44].mxu1 %v23791_v10  ;;  %13668 = vmatprep.mubr.f32.mxu0 %v23802_v3  ;;  %v20901_v5 = vsub.f32 %v20707_v12, %v22966_v36  ;;  %v20906_v27 = vsub.f32 %v20803_v23, %v22964_v37  ;;  %v20911_v39 = vsub.f32 %v20853_v13, %v22960_v22  ;;  %v22967_v43 = vand.u32 4294901760, %v20855_v19  ;;  %v20914_v2 = vpop.xlane.xlu1 %8993  ;;  %v23812_v22 = vld [vmem:[#allocation16_spill] sm:$0xff] }
 0x7e9   :  { %14859 = vmatpush1.bf16.msra.mxu1 %v14858_v24  ;;  %7468 = vmatprep.mubr.f32.mxu1 %v23218_v32  ;;  %v14866_v38 = vpack.c.bf16 %v20519_v44, %v20540_v52  ;;  %v22969_v40 = vand.u32 4294901760, %v20892_v16  ;;  %v22963_v26 = vand.u32 4294901760, %v20914_v2  ;;  %v20928_v24 = vsub.f32 %v20713_v55, %v22965_v50 }
 0x7ea   :  { %15003 = vmatpush3.bf16.msra.mxu0 %v15000_v21  ;;  %14861 = vmatprep.subr.bf16.mxu1 %v14860_v42  ;;  %v20921_v21 = vsub.f32 %v20877_v11, %v22959_v6  ;;  %v22971_v42 = vand.u32 4294901760, %v20886_v0  ;;  %v20934_v44 = vsub.f32 %v20755_v28, %v22962_v56  ;;  %v20940_v52 = vsub.f32 %v20805_v7, %v22961_v41  ;;  %v23805_v6 = vld [vmem:[#allocation22_spill] sm:$0xff]  ;;  %v23808_v56 = vld [vmem:[#allocation21_spill] sm:$0xff] }
 0x7eb   :  { %15005 = vmatprep.subr.bf16.mxu0 %v15004_v49  ;;  %23804 = vst [vmem:[#allocation41_spill] sm:$0xff] %v20928_v24  ;;  %v20964_v37 = vsub.f32 %v20892_v16, %v22969_v40  ;;  %v22978_v50 = vand.u32 4294901760, %v20928_v24  ;;  %v23811_v40 = vld [vmem:[#allocation107_spill] sm:$0xff] }
 0x7ec   :  { %7470 = vmatmul.mubr.f32.gmra.mrb[46].mxu1 %v23793_v57  ;;  %v20957_v41 = vpop.xlane.xlu1 %9001  ;;  %v23820_v24 = vand.u32 4294901760, %v20940_v52  ;;  %v23821_v16 = vand.u32 4294901760, %v20921_v21 }
 0x7ed   :  { %14863 = vmatpush1.bf16.msra.mxu1 %v14862_v34  ;;  %7475 = vmatprep.mubr.f32.mxu1 %v23218_v32  ;;  %v22970_v34 = vand.u32 4294901760, %v20901_v5  ;;  %23807 = vst [vmem:[#allocation61_spill] sm:$0xff] %v20957_v41  ;;  %23809 = vst [vmem:[#allocation96_spill] sm:$0xff] %v20964_v37 }
 0x7ee   :  { %15007 = vmatpush3.bf16.msra.mxu0 %v15004_v49  ;;  %14865 = vmatprep.subr.bf16.mxu1 %v14864_v51  ;;  %v20946_v49 = vsub.f32 %v20914_v2, %v22963_v26  ;;  %v22979_v51 = vand.u32 4294901760, %v20906_v27  ;;  %v23817_v26 = vand.u32 4294901760, %v20911_v39 }
 0x7ef   :  { %15009 = vmatprep.subr.bf16.mxu0 %v15008_v14  ;;  %v20975_v9 = vpack.c.bf16 %v22970_v34, %v22971_v42  ;;  %v23816_v42 = vand.u32 4294901760, %v20934_v44 }
 0x7f0   :  { %7477 = vmatmul.mubr.f32.gmra.mrb[48].mxu1 %v23801_v47  ;;  %v20992_v34 = vpack.c.bf16 %v22979_v51, %v22978_v50  ;;  %v21008_v50 = vpack.c.bf16 %v23821_v16, %v23820_v24  ;;  %v23823_v51 = vld [vmem:[#allocation114_spill] sm:$0xff]  ;;  %v23830_v24 = vld [vmem:[#allocation111_spill] sm:$0xff] }
 0x7f1   :  { %14867 = vmatpush1.bf16.msra.mxu1 %v14866_v38  ;;  %7595 = vmatprep.mubr.f32.mxu1 %v23218_v32  ;;  %v20955_v38 = vsub.f32 %v20855_v19, %v22967_v43  ;;  %23810 = vst [vmem:[#allocation77_spill] sm:$0xff] %v20975_v9  ;;  %v23814_v43 = vld [vmem:[#allocation11_spill] sm:$0xff]  ;;  %v20998_v9 = vpack.c.bf16 %v23817_v26, %v23816_v42  ;;  %v23825_v42 = vand.u32 4294901760, %v20946_v49 }
 0x7f2   :  { %15011 = vmatpush3.bf16.msra.mxu0 %v15008_v14  ;;  %14869 = vmatprep.subr.bf16.mxu1 %v23805_v6  ;;  %v22973_v14 = vand.u32 4294901760, %v20957_v41  ;;  %23815 = vst [vmem:[#allocation37_spill] sm:$0xff] %v20992_v34  ;;  %23822 = vst [vmem:[#allocation66_spill] sm:$0xff] %v21008_v50  ;;  %v23827_v34 = vld [vmem:[#allocation113_spill] sm:$0xff] }
 0x7f3   :  { %23806 = vst [vmem:[#allocation54_spill] sm:$0xff] %v20955_v38  ;;  %15013 = vmatprep.subr.bf16.mxu0 %v23808_v56  ;;  %23818 = vst [vmem:[#allocation119_spill] sm:$0xff] %v20998_v9  ;;  %v23824_v26 = vand.u32 4294901760, %v20955_v38  ;;  %v23831_v50 = vld [vmem:[#allocation117_spill] sm:$0xff]  ;;  %v23842_v38 = vld [vmem:[#allocation15_spill] sm:$0xff] }
 0x7f4   :  { %7598 = vmatmul.mubr.f32.vlgmr.msra.gmra.mrb[38].mxu1 %v23802_v3  ;;  %v20983_v36 = vsub.f32 %v20957_v41, %v22973_v14  ;;  %v23819_v14 = vld [vmem:[#allocation99_spill] sm:$0xff]  ;;  %v22983_v3 = vand.u32 4294901760, %v20964_v37  ;;  %v23838_v37 = vld [vmem:[#allocation130_spill] sm:$0xff] }
 0x7f5   :  { %14871 = vmatpush1.bf16.msra.mxu1 %v23811_v40  ;;  %13669 = vmatmul.mubr.f32.vlgmr.msra.gmra.mrb[48].mxu0 %v23812_v22  ;;  %v21016_v9 = vpack.c.bf16 %v23825_v42, %v23824_v26  ;;  %v23832_v26 = vld [vmem:[#allocation121_spill] sm:$0xff]  ;;  %v23833_v42 = vld [vmem:[#allocation120_spill] sm:$0xff] }
 0x7f6   :  { %23813 = vst [vmem:[#allocation42_spill] sm:$0xff] %v20983_v36  ;;  %15015 = vmatpush3.bf16.msra.mxu0 %v23808_v56  ;;  %14873 = vmatprep.subr.bf16.mxu1 %v23814_v43  ;;  %v22984_v41 = vand.u32 4294901760, %v20983_v36  ;;  %v23841_v36 = vld [vmem:[#allocation20_spill] sm:$0xff] }
 0x7f7   :  { %15017 = vmatprep.subr.bf16.mxu0 %v23819_v14  ;;  %7603 = vmatprep.mubr.f32.mxu1 %v23218_v32  ;;  %23826 = vst [vmem:[#allocation39_spill] sm:$0xff] %v21016_v9  ;;  %v23837_v9 = vld [vmem:[#allocation97_spill] sm:$0xff] }
 0x7f8   :  { %7606 = vmatmul.mubr.f32.gmra.mrb[40].mxu1 %v23812_v22  ;;  %13671 = vmatprep.mubr.f32.mxu0 %v23823_v51  ;;  %v21024_v16 = vpack.c.bf16 %v22984_v41, %v22983_v3  ;;  %v23829_v22 = vld [vmem:[#allocation116_spill] sm:$0xff] }
 0x7f9   :  { %14875 = vmatpush1.bf16.msra.mxu1 %v23827_v34  ;;  %7611 = vmatprep.mubr.f32.mxu1 %v23218_v32  ;;  %v23834_v3 = vld [vmem:[#allocation8_spill] sm:$0xff] }
 0x7fa   :  { %23828 = vst [vmem:[#allocation7_spill] sm:$0xff] %v21024_v16  ;;  %15019 = vmatpush3.bf16.msra.mxu0 %v23819_v14  ;;  %14877 = vmatprep.subr.bf16.mxu1 %v23829_v22  ;;  %v23835_v41 = vld [vmem:[#allocation124_spill] sm:$0xff]  ;;  %v23836_v16 = vld [vmem:[#allocation6_spill] sm:$0xff] }
 0x7fb   :  { %15021 = vmatprep.subr.bf16.mxu0 %v23830_v24  ;;  %13672 = vmatmul.mubr.f32.gmra.mrb[50].mxu0 %v23831_v50 }
 0x7fc   :  { %7614 = vmatmul.mubr.f32.gmra.mrb[42].mxu1 %v23823_v51  ;;  %13674 = vmatprep.mubr.f32.mxu0 %v23832_v26  ;;  %v23839_v51 = vld [vmem:[#allocation27_spill] sm:$0xff] }
 0x7fd   :  { %14879 = vmatpush1.bf16.msra.mxu1 %v23833_v42  ;;  %7619 = vmatprep.mubr.f32.mxu1 %v23218_v32 }
 0x7fe   :  { %15023 = vmatpush3.bf16.msra.mxu0 %v23830_v24  ;;  %14881 = vmatprep.subr.bf16.mxu1 %v23834_v3 }
 0x7ff   :  { %15025 = vmatprep.subr.bf16.mxu0 %v23835_v41  ;;  %13675 = vmatmul.mubr.f32.gmra.mrb[52].mxu0 %v23836_v16 }
 0x800   :  { %7622 = vmatmul.mubr.f32.gmra.mrb[44].mxu1 %v23831_v50  ;;  %13701 = vmatprep.mubr.f32.mxu0 %v23837_v9  ;;  %v23840_v50 = vld [vmem:[#allocation64_spill] sm:$0xff] }
 0x801   :  { %14883 = vmatpush1.bf16.msra.mxu1 %v23838_v37  ;;  %7627 = vmatprep.mubr.f32.mxu1 %v23218_v32 }
 0x802   :  { %15027 = vmatpush3.bf16.msra.mxu0 %v23835_v41  ;;  %14885 = vmatprep.subr.bf16.mxu1 %v20532_v62 }
 0x803   :  { %15029 = vmatprep.subr.bf16.mxu0 %v20515_v35 }
 0x804   :  { %7630 = vmatmul.mubr.f32.gmra.mrb[46].mxu1 %v23832_v26  ;;  %v23843_v26 = vld [vmem:[#allocation125_spill] sm:$0xff] }
 0x805   :  { %14887 = vmatpush1.bf16.msra.mxu1 %v23839_v51  ;;  %7635 = vmatprep.mubr.f32.mxu1 %v23218_v32 }
 0x806   :  { %15031 = vmatpush3.bf16.msra.mxu0 %v20515_v35  ;;  %14889 = vmatprep.subr.bf16.mxu1 %v23840_v50 }
 0x807   :  { %15033 = vmatprep.subr.bf16.mxu0 %v23841_v36 }
 0x808   :  { %7638 = vmatmul.mubr.f32.gmra.mrb[48].mxu1 %v23836_v16  ;;  %v23844_v16 = vld [vmem:[#allocation131_spill] sm:$0xff] }
 0x809   :  { %14891 = vmatpush1.bf16.msra.mxu1 %v23842_v38  ;;  %7732 = vmatprep.mubr.f32.mxu1 %v23218_v32 }
 0x80a   :  { %15035 = vmatpush3.bf16.msra.mxu0 %v23841_v36  ;;  %14893 = vmatprep.subr.bf16.mxu1 %v20724_v4  ;;  %v23845_v4 = vld [vmem:[#allocation87_spill] sm:$0xff] }
 0x80b   :  { %15037 = vmatprep.subr.bf16.mxu0 %v20730_v58 }
 0x80c   :  { %7736 = vmatmul.mubr.f32.vlgmr.msra.gmra.mrb[38].mxu1 %v23837_v9 }
 0x80d   :  { %14895 = vmatpush1.bf16.msra.mxu1 %v20736_v8  ;;  %13702 = vmatmul.mubr.f32.vlgmr.msra.gmra.mrb[48].mxu0 %v23843_v26  ;;  %v23847_v8 = vld [vmem:[#allocation91_spill] sm:$0xff] }
 0x80e   :  { %15039 = vmatpush3.bf16.msra.mxu0 %v20730_v58  ;;  %14897 = vmatprep.subr.bf16.mxu1 %v20745_v1  ;;  %v23846_v58 = vld [vmem:[#allocation35_spill] sm:$0xff]  ;;  %v9003_v1 = vld [vmem:[%s22469_s4] sm:$0xff] }
 0x80f   :  { %15041 = vmatprep.subr.bf16.mxu0 %v20751_v31  ;;  %7741 = vmatprep.mubr.f32.mxu1 %v23218_v32 }
 0x810   :  { %7745 = vmatmul.mubr.f32.gmra.mrb[40].mxu1 %v23843_v26  ;;  %13704 = vmatprep.mubr.f32.mxu0 %v23844_v16  ;;  %v23868_v26 = vand.u32 4294901760, %v20934_v44 }
 0x811   :  { %14899 = vmatpush1.bf16.msra.mxu1 %v20761_v15  ;;  %7750 = vmatprep.mubr.f32.mxu1 %v23218_v32 }
 0x812   :  { %15043 = vmatpush3.bf16.msra.mxu0 %v20751_v31  ;;  %14901 = vmatprep.subr.bf16.mxu1 %v20767_v46  ;;  %v23849_v31 = vand.u32 4294901760, %v20707_v12  ;;  %v23850_v12 = vand.u32 4294901760, %v20713_v55  ;;  %v23851_v46 = vand.u32 4294901760, %v20803_v23  ;;  %v23852_v55 = vand.u32 4294901760, %v20755_v28 }
 0x813   :  { %15045 = vmatprep.subr.bf16.mxu0 %v20778_v53  ;;  %13705 = vmatmul.mubr.f32.gmra.mrb[50].mxu0 %v23845_v4  ;;  %v23854_v28 = vand.u32 4294901760, %v20805_v7  ;;  %v23856_v7 = vand.u32 4294901760, %v20886_v0 }
 0x814   :  { %7754 = vmatmul.mubr.f32.gmra.mrb[42].mxu1 %v23844_v16  ;;  %13707 = vmatprep.mubr.f32.mxu0 %v23846_v58  ;;  %v9142_v16 = vsub.f32 %v20934_v44, %v23868_v26 }
 0x815   :  { %14903 = vmatpush1.bf16.msra.mxu1 %v20786_v18  ;;  %7759 = vmatprep.mubr.f32.mxu1 %v23218_v32 }
 0x816   :  { %15047 = vmatpush3.bf16.msra.mxu0 %v20778_v53  ;;  %14905 = vmatprep.subr.bf16.mxu1 %v20792_v25  ;;  %v21157_v53 = vpack.c.bf16 %v23851_v46, %v23850_v12 }
 0x817   :  { %15049 = vmatprep.subr.bf16.mxu0 %v20798_v17  ;;  %13708 = vmatmul.mubr.f32.gmra.mrb[52].mxu0 %v23847_v8 }
 0x818   :  { %7763 = vmatmul.mubr.f32.gmra.mrb[44].mxu1 %v23845_v4  ;;  %13734 = vmatprep.mubr.f32.mxu0 %v23763_v48 }
 0x819   :  { %14907 = vmatpush1.bf16.msra.mxu1 %v20811_v30  ;;  %7768 = vmatprep.mubr.f32.mxu1 %v23218_v32 }
 0x81a   :  { %15051 = vmatpush3.bf16.msra.mxu0 %v20798_v17  ;;  %14909 = vmatprep.subr.bf16.mxu1 %v20817_v29  ;;  %v23853_v17 = vand.u32 4294901760, %v20853_v13  ;;  %v23855_v29 = vand.u32 4294901760, %v20877_v11  ;;  %v23861_v11 = vld [vmem:[#allocation14_spill] sm:$0xff] }
 0x81b   :  { %15053 = vmatprep.subr.bf16.mxu0 %v20828_v61 }
 0x81c   :  { %7772 = vmatmul.mubr.f32.gmra.mrb[46].mxu1 %v23846_v58  ;;  %v21172_v23 = vpack.c.bf16 %v23853_v17, %v23852_v55  ;;  %v23869_v58 = vand.u32 4294901760, %v20921_v21  ;;  %v23872_v55 = vld [vmem:[#allocation54_spill] sm:$0xff] }
 0x81d   :  { %14911 = vmatpush1.bf16.msra.mxu1 %v20836_v59  ;;  %7777 = vmatprep.mubr.f32.mxu1 %v23218_v32  ;;  %v23873_v17 = vand.u32 4294901760, %v23872_v55 }
 0x81e   :  { %15055 = vmatpush3.bf16.msra.mxu0 %v20828_v61  ;;  %14913 = vmatprep.subr.bf16.mxu1 %v20842_v60  ;;  %v9114_v60 = vsub.f32 %v20886_v0, %v23856_v7  ;;  %v23874_v7 = vld [vmem:[#allocation42_spill] sm:$0xff] }
 0x81f   :  { %15057 = vmatprep.subr.bf16.mxu0 %v20848_v20 }
 0x820   :  { %7781 = vmatmul.mubr.f32.gmra.mrb[48].mxu1 %v23847_v8  ;;  %v9163_v8 = vsub.f32 %v20921_v21, %v23869_v58 }
 0x821   :  { %14915 = vmatpush1.bf16.msra.mxu1 %v20861_v54  ;;  %7923 = vmatprep.mubr.f32.mxu1 %v23218_v32 }
 0x822   :  { %15059 = vmatpush3.bf16.msra.mxu0 %v20848_v20  ;;  %14917 = vmatprep.subr.bf16.mxu1 %v23805_v6  ;;  %v23857_v20 = vand.u32 4294901760, %v20855_v19  ;;  %v23862_v6 = vand.u32 4294901760, %v23861_v11 }
 0x823   :  { %15061 = vmatprep.subr.bf16.mxu0 %v23808_v56 }
 0x824   :  { %7925 = vmatmul.mubr.f32.vlgmr.msra.gmra.mrb[38].mxu1 %v23763_v48 }
 0x825   :  { %14919 = vmatpush1.bf16.msra.mxu1 %v23811_v40  ;;  %13735 = vmatmul.mubr.f32.vlgmr.msra.gmra.mrb[48].mxu0 %v23772_v63 }
 0x826   :  { %15063 = vmatpush3.bf16.msra.mxu0 %v23808_v56  ;;  %14921 = vmatprep.subr.bf16.mxu1 %v23814_v43  ;;  %v23863_v56 = vld [vmem:[#allocation61_spill] sm:$0xff] }
 0x827   :  { %15065 = vmatprep.subr.bf16.mxu0 %v23819_v14  ;;  %7930 = vmatprep.mubr.f32.mxu1 %v23218_v32 }
 0x828   :  { %7932 = vmatmul.mubr.f32.gmra.mrb[40].mxu1 %v23772_v63  ;;  %13737 = vmatprep.mubr.f32.mxu0 %v23780_v45 }
 0x829   :  { %14923 = vmatpush1.bf16.msra.mxu1 %v23827_v34  ;;  %7937 = vmatprep.mubr.f32.mxu1 %v23218_v32 }
 0x82a   :  { %15067 = vmatpush3.bf16.msra.mxu0 %v23819_v14  ;;  %14925 = vmatprep.subr.bf16.mxu1 %v23829_v22 }
 0x82b   :  { %15069 = vmatprep.subr.bf16.mxu0 %v23830_v24  ;;  %13738 = vmatmul.mubr.f32.gmra.mrb[50].mxu0 %v23791_v10 }
 0x82c   :  { %7939 = vmatmul.mubr.f32.gmra.mrb[42].mxu1 %v23780_v45  ;;  %13740 = vmatprep.mubr.f32.mxu0 %v23793_v57 }
 0x82d   :  { %14927 = vmatpush1.bf16.msra.mxu1 %v23833_v42  ;;  %7944 = vmatprep.mubr.f32.mxu1 %v23218_v32 }
 0x82e   :  { %15071 = vmatpush3.bf16.msra.mxu0 %v23830_v24  ;;  %14929 = vmatprep.subr.bf16.mxu1 %v23834_v3  ;;  %v23867_v24 = vand.u32 4294901760, %v20911_v39 }
 0x82f   :  { %15073 = vmatprep.subr.bf16.mxu0 %v23835_v41  ;;  %13741 = vmatmul.mubr.f32.gmra.mrb[52].mxu0 %v23801_v47 }
 0x830   :  { %7946 = vmatmul.mubr.f32.gmra.mrb[44].mxu1 %v23791_v10  ;;  %13767 = vmatprep.mubr.f32.mxu0 %v23763_v48 }
 0x831   :  { %14931 = vmatpush1.bf16.msra.mxu1 %v23838_v37  ;;  %7951 = vmatprep.mubr.f32.mxu1 %v23218_v32  ;;  %v23860_v37 = vand.u32 4294901760, %v20906_v27 }
 0x832   :  { %15075 = vmatpush3.bf16.msra.mxu0 %v23835_v41  ;;  %14933 = vmatprep.subr.bf16.mxu1 %v20532_v62  ;;  %v23848_v62 = vand.u32 4294901760, %v20753_v33  ;;  %v9004_v33 = vld [vmem:[%s22469_s4 + $0x8] sm:$0xf]  ;;  %v23864_v41 = vand.u32 4294901760, %v23863_v56 }
 0x833   :  { %15077 = vmatprep.subr.bf16.mxu0 %v20515_v35  ;;  %v9011_v25 = vsel %vm5235_vm15, %v9004_v33, 0  ;;  %v23871_v33 = vand.u32 4294901760, %v20946_v49 }
 0x834   :  { %7953 = vmatmul.mubr.f32.gmra.mrb[46].mxu1 %v23793_v57  ;;  %v21142_v15 = vpack.c.bf16 %v23849_v31, %v23848_v62  ;;  %v21227_v43 = vpack.c.bf16 %v23864_v41, %v23862_v6 }
 0x835   :  { %14935 = vmatpush1.bf16.msra.mxu1 %v23839_v51  ;;  %7958 = vmatprep.mubr.f32.mxu1 %v23218_v32  ;;  %v9177_v12 = vsub.f32 %v20946_v49, %v23871_v33  ;;  %v9651_v33 = vld [vmem:[%s22471_s6 + $0x20] sm:$0xff] }
 0x836   :  { %15079 = vmatpush3.bf16.msra.mxu0 %v20515_v35  ;;  %14937 = vmatprep.subr.bf16.mxu1 %v23840_v50  ;;  %v9008_v35 = vsel %vm5235_vm15, %v9003_v1, 0 }
 0x837   :  { %15081 = vmatprep.subr.bf16.mxu0 %v23841_v36  ;;  %v21162_v18 = vand.u32 4294901760, %v9008_v35 }
 0x838   :  { %7960 = vmatmul.mubr.f32.gmra.mrb[48].mxu1 %v23801_v47 }
 0x839   :  { %14939 = vmatpush1.bf16.msra.mxu1 %v23842_v38  ;;  %8054 = vmatprep.mubr.f32.mxu1 %v23218_v32  ;;  %v21180_v30 = vsub.f32 %v9008_v35, %v21162_v18  ;;  %v23865_v38 = vld [vmem:[#allocation41_spill] sm:$0xff]  ;;  %v9143_v35 = vand.u32 4294901760, %v9142_v16 }
 0x83a   :  { %15083 = vmatpush3.bf16.msra.mxu0 %v23841_v36  ;;  %15085 = vmatprep.subr.bf16.mxu1 %v21142_v15  ;;  %v23859_v36 = vand.u32 4294901760, %v20901_v5  ;;  %v23866_v14 = vand.u32 4294901760, %v23865_v38  ;;  %v9648_v16 = vld [vmem:[%s22471_s6 + $0x8] sm:$0xff] }
 0x83b   :  { %v9092_v59 = vand.u32 4294901760, %v21180_v30 }
 0x83c   :  { %8056 = vmatmul.mubr.f32.vlgmr.msra.gmra.mrb[38].mxu1 %v23763_v48  ;;  %v21175_v48 = vand.u32 4294901760, %v9011_v25  ;;  %v9121_v19 = vsub.f32 %v20901_v5, %v23859_v36  ;;  %v9128_v3 = vsub.f32 %v23865_v38, %v23866_v14  ;;  %v23876_v36 = vld [vmem:[#allocation96_spill] sm:$0xff]  ;;  %v15144_v14 = vpack.c.bf16 %v20921_v21, %v20940_v52  ;;  %v23880_v21 = vld [vmem:[#allocation119_spill] sm:$0xff] }
 0x83d   :  { %15087 = vmatpush3.bf16.msra.mxu1 %v21142_v15  ;;  %8061 = vmatprep.mubr.f32.mxu1 %v23218_v32  ;;  %v9093_v9 = vsub.f32 %v21180_v30, %v9092_v59 }
 0x83e   :  { %15089 = vmatprep.subr.bf16.mxu1 %v21157_v53  ;;  %13768 = vmatmul.mubr.f32.vlgmr.msra.gmra.mrb[48].mxu0 %v23772_v63  ;;  %v21193_v61 = vsub.f32 %v9011_v25, %v21175_v48  ;;  %v9122_v22 = vand.u32 4294901760, %v9121_v19  ;;  %v9129_v4 = vand.u32 4294901760, %v9128_v3  ;;  %v9164_v25 = vand.u32 4294901760, %v9163_v8 }
 0x83f   :  { %13770 = vmatprep.mubr.f32.mxu0 %v23780_v45  ;;  %v9094_v34 = vand.u32 4294901760, %v9093_v9  ;;  %v9178_v9 = vand.u32 4294901760, %v9177_v12  ;;  %v23877_v19 = vand.u32 4294901760, %v23876_v36  ;;  %v9675_v8 = vsel %vm5900_vm4, %v9648_v16, 0 }
 0x840   :  { %8063 = vmatmul.mubr.f32.gmra.mrb[40].mxu1 %v23772_v63  ;;  %v21189_v63 = vpack.c.bf16 %v23855_v29, %v23854_v28  ;;  %v9102_v54 = vand.u32 4294901760, %v21193_v61  ;;  %v9170_v28 = vsub.f32 %v23872_v55, %v23873_v17  ;;  %v9684_v17 = vsel %vm5900_vm4, %v9651_v33, 0 }
 0x841   :  { %15091 = vmatpush3.bf16.msra.mxu1 %v21157_v53  ;;  %8068 = vmatprep.mubr.f32.mxu1 %v23218_v32 }
 0x842   :  { %15093 = vmatprep.subr.bf16.mxu1 %v21172_v23  ;;  %13771 = vmatmul.mubr.f32.gmra.mrb[50].mxu0 %v23791_v10  ;;  %v9103_v40 = vsub.f32 %v21193_v61, %v9102_v54 }
 0x843   :  { %13773 = vmatprep.mubr.f32.mxu0 %v23793_v57 }
 0x844   :  { %8070 = vmatmul.mubr.f32.gmra.mrb[42].mxu1 %v23780_v45  ;;  %v23858_v45 = vand.u32 4294901760, %v20914_v2  ;;  %v9115_v2 = vand.u32 4294901760, %v9114_v60  ;;  %v9104_v51 = vand.u32 4294901760, %v9103_v40  ;;  %v23875_v60 = vand.u32 4294901760, %v23874_v7 }
 0x845   :  { %15095 = vmatpush3.bf16.msra.mxu1 %v21172_v23  ;;  %8075 = vmatprep.mubr.f32.mxu1 %v23218_v32  ;;  %v15136_v40 = vpack.c.bf16 %v20906_v27, %v23865_v38  ;;  %v9647_v38 = vld [vmem:[%s22471_s6] sm:$0xff] }
 0x846   :  { %15097 = vmatprep.subr.bf16.mxu1 %v21189_v63  ;;  %13774 = vmatmul.mubr.f32.gmra.mrb[52].mxu0 %v23801_v47  ;;  %v21207_v13 = vpack.c.bf16 %v23858_v45, %v23857_v20  ;;  %v15108_v42 = vpack.c.bf16 %v9122_v22, %v9115_v2  ;;  %v9191_v20 = vsub.f32 %v23874_v7, %v23875_v60  ;;  %v9672_v3 = vsel %vm5900_vm4, %v9647_v38, 0 }
 0x847   :  { %v15132_v2 = vpack.c.bf16 %v20901_v5, %v20886_v0  ;;  %v15148_v0 = vpack.c.bf16 %v20946_v49, %v23872_v55  ;;  %v15152_v5 = vpack.c.bf16 %v23874_v7, %v23876_v36  ;;  %v23883_v49 = vld [vmem:[#allocation7_spill] sm:$0xff]  ;;  %v21354_v22 = vand.u32 4294901760, %v9672_v3 }
 0x848   :  { %8077 = vmatmul.mubr.f32.gmra.mrb[44].mxu1 %v23791_v10  ;;  %v9135_v10 = vsub.f32 %v20906_v27, %v23860_v37  ;;  %v9184_v37 = vsub.f32 %v23876_v36, %v23877_v19  ;;  %v9192_v6 = vand.u32 4294901760, %v9191_v20  ;;  %v23878_v27 = vld [vmem:[#allocation77_spill] sm:$0xff]  ;;  %v21406_v60 = vand.u32 4294901760, %v9684_v17  ;;  %v9653_v20 = vld [vmem:[%s22471_s6 + $0x30] sm:$0xff]  ;;  %v9005_v19 = vld [vmem:[%s22470_s5] sm:$0xff] }
 0x849   :  { %15099 = vmatpush3.bf16.msra.mxu1 %v21189_v63  ;;  %8082 = vmatprep.mubr.f32.mxu1 %v23218_v32 }
 0x84a   :  { %15101 = vmatprep.subr.bf16.mxu1 %v21207_v13  ;;  %v9136_v50 = vand.u32 4294901760, %v9135_v10  ;;  %v9171_v10 = vand.u32 4294901760, %v9170_v28  ;;  %v9185_v56 = vand.u32 4294901760, %v9184_v37 }
 0x84c   :  { %8084 = vmatmul.mubr.f32.gmra.mrb[46].mxu1 %v23793_v57  ;;  %v9149_v57 = vsub.f32 %v20911_v39, %v23867_v24  ;;  %v15112_v1 = vpack.c.bf16 %v9136_v50, %v9129_v4  ;;  %v15124_v11 = vpack.c.bf16 %v9178_v9, %v9171_v10  ;;  %v15128_v41 = vpack.c.bf16 %v9192_v6, %v9185_v56  ;;  %v9649_v4 = vld [vmem:[%s22471_s6 + $0x10] sm:$0xff]  ;;  %v9654_v10 = vld [vmem:[%s22471_s6 + $0x38] sm:$0xff] }
 0x84d   :  { %15103 = vmatpush3.bf16.msra.mxu1 %v21207_v13  ;;  %8089 = vmatprep.mubr.f32.mxu1 %v23218_v32  ;;  %v21357_v24 = vsub.f32 %v9672_v3, %v21354_v22  ;;  %v9690_v56 = vsel %vm5900_vm4, %v9653_v20, 0  ;;  %v9656_v3 = vld [vmem:[%s22471_s6 + $0x48] sm:$0xff] }
 0x84e   :  { %15105 = vmatprep.subr.bf16.mxu1 %v21227_v43  ;;  %v9150_v62 = vand.u32 4294901760, %v9149_v57  ;;  %v9699_v20 = vsel %vm5900_vm4, %v9656_v3, 0 }
 0x84f   :  { %v22997_v57 = vand.u32 4294901760, %v21357_v24 }
 0x850   :  { %8091 = vmatmul.mubr.f32.gmra.mrb[48].mxu1 %v23801_v47  ;;  %v23870_v47 = vand.u32 4294901760, %v20940_v52  ;;  %v15116_v46 = vpack.c.bf16 %v9150_v62, %v9143_v35  ;;  %v9678_v62 = vsel %vm5900_vm4, %v9649_v4, 0 }
 0x851   :  { %15107 = vmatpush3.bf16.msra.mxu1 %v21227_v43  ;;  %13800 = vmatprep.mubr.f32.mxu1 %v9094_v34  ;;  %v15140_v34 = vpack.c.bf16 %v20911_v39, %v20934_v44  ;;  %v23879_v39 = vld [vmem:[#allocation37_spill] sm:$0xff]  ;;  %v23881_v44 = vld [vmem:[#allocation66_spill] sm:$0xff] }
 0x852   :  { %15109 = vmatprep.subr.bf16.mxu1 %v15108_v42  ;;  %v9156_v31 = vsub.f32 %v20940_v52, %v23870_v47  ;;  %v23882_v52 = vld [vmem:[#allocation39_spill] sm:$0xff] }
 0x853   :  { %v9650_v47 = vld [vmem:[%s22471_s6 + $0x18] sm:$0xff] }
 0x854   :  { %13801 = vmatmul.mubr.f32.vlgmr.msra.gmra.mrb[50].mxu1 %v9104_v51  ;;  %v9157_v29 = vand.u32 4294901760, %v9156_v31  ;;  %v21382_v31 = vand.u32 4294901760, %v9675_v8 }
 0x855   :  { %15111 = vmatpush3.bf16.msra.mxu1 %v15108_v42  ;;  %13827 = vmatprep.mubr.f32.mxu1 %v21162_v18  ;;  %v9780_v42 = vsub.f32 %v21357_v24, %v22997_v57 }
 0x856   :  { %15113 = vmatprep.subr.bf16.mxu1 %v15112_v1  ;;  %v15120_v45 = vpack.c.bf16 %v9164_v25, %v9157_v29  ;;  %v9681_v25 = vsel %vm5900_vm4, %v9650_v47, 0  ;;  %v21395_v55 = vsub.f32 %v9675_v8, %v21382_v31  ;;  %v9652_v29 = vld [vmem:[%s22471_s6 + $0x28] sm:$0xff]  ;;  %v9657_v8 = vld [vmem:[%s22471_s6 + $0x50] sm:$0xff] }
 0x857   :  { %v9781_v51 = vand.u32 4294901760, %v9780_v42  ;;  %v21398_v28 = vand.u32 4294901760, %v9681_v25  ;;  %v9687_v36 = vsel %vm5900_vm4, %v9652_v29, 0 }
 0x858   :  { %v22996_v9 = vand.u32 4294901760, %v21395_v55 }
 0x859   :  { %15115 = vmatpush3.bf16.msra.mxu1 %v15112_v1  ;;  %13942 = vmatprep.mubr.f32.mxu0 %v9781_v51  ;;  %v21420_v37 = vsub.f32 %v9681_v25, %v21398_v28 }
 0x85a   :  { %15117 = vmatprep.subr.bf16.mxu1 %v15116_v46 }
 0x85d   :  { %15119 = vmatpush3.bf16.msra.mxu1 %v15116_v46  ;;  %v21391_v46 = vand.u32 4294901760, %v9678_v62 }
 0x85e   :  { %15121 = vmatprep.subr.bf16.mxu1 %v15120_v45 }
 0x85f   :  { %v21404_v7 = vsub.f32 %v9678_v62, %v21391_v46 }
 0x861   :  { %15123 = vmatpush3.bf16.msra.mxu1 %v15120_v45  ;;  %v9006_v45 = vld [vmem:[%s22470_s5 + $0x8] sm:$0xf]  ;;  %v22995_v6 = vand.u32 4294901760, %v21404_v7 }
 0x862   :  { %15125 = vmatprep.subr.bf16.mxu1 %v15124_v11 }
 0x865   :  { %15127 = vmatpush3.bf16.msra.mxu1 %v15124_v11 }
 0x866   :  { %15129 = vmatprep.subr.bf16.mxu1 %v15128_v41 }
 0x869   :  { %15131 = vmatpush3.bf16.msra.mxu1 %v15128_v41 }
 0x86a   :  { %15133 = vmatprep.subr.bf16.mxu1 %v15132_v2 }
 0x86c   :  { %13828 = vmatmul.mubr.f32.vlgmr.msra.gmra.mrb[50].mxu1 %v21175_v48 }
 0x86d   :  { %15135 = vmatpush3.bf16.msra.mxu1 %v15132_v2  ;;  %13854 = vmatprep.mubr.f32.mxu1 %v21180_v30 }
 0x86e   :  { %15137 = vmatprep.subr.bf16.mxu1 %v15136_v40 }
 0x871   :  { %15139 = vmatpush3.bf16.msra.mxu1 %v15136_v40  ;;  %v21428_v40 = vsub.f32 %v9684_v17, %v21406_v60 }
 0x872   :  { %15141 = vmatprep.subr.bf16.mxu1 %v15140_v34 }
 0x873   :  { %v22993_v51 = vand.u32 4294901760, %v21428_v40 }
 0x875   :  { %15143 = vmatpush3.bf16.msra.mxu1 %v15140_v34  ;;  %v21430_v34 = vand.u32 4294901760, %v9687_v36 }
 0x876   :  { %15145 = vmatprep.subr.bf16.mxu1 %v15144_v14 }
 0x877   :  { %v21452_v16 = vsub.f32 %v9687_v36, %v21430_v34 }
 0x879   :  { %15147 = vmatpush3.bf16.msra.mxu1 %v15144_v14  ;;  %v9655_v14 = vld [vmem:[%s22471_s6 + $0x40] sm:$0xff] }
 0x87a   :  { %15149 = vmatprep.subr.bf16.mxu1 %v15148_v0  ;;  %v9696_v38 = vsel %vm5900_vm4, %v9655_v14, 0 }
 0x87b   :  { %v21465_v29 = vand.u32 4294901760, %v9696_v38 }
 0x87d   :  { %15151 = vmatpush3.bf16.msra.mxu1 %v15148_v0  ;;  %v21487_v3 = vsub.f32 %v9696_v38, %v21465_v29 }
 0x87e   :  { %15153 = vmatprep.subr.bf16.mxu1 %v15152_v5 }
 0x881   :  { %15155 = vmatpush3.bf16.msra.mxu1 %v15152_v5  ;;  %v9790_v5 = vsub.f32 %v21395_v55, %v22996_v9 }
 0x882   :  { %15157 = vmatprep.subr.bf16.mxu1 %v21142_v15 }
 0x883   :  { %v9791_v33 = vand.u32 4294901760, %v9790_v5 }
 0x884   :  { %13855 = vmatmul.mubr.f32.vlgmr.msra.gmra.mrb[50].mxu1 %v21193_v61 }
 0x885   :  { %15159 = vmatpush3.bf16.msra.mxu1 %v21142_v15  ;;  %13881 = vmatprep.mubr.f32.mxu1 %v9092_v59 }
 0x886   :  { %15161 = vmatprep.subr.bf16.mxu1 %v21157_v53 }
 0x889   :  { %15163 = vmatpush3.bf16.msra.mxu1 %v21157_v53 }
 0x88a   :  { %15165 = vmatprep.subr.bf16.mxu1 %v21172_v23 }
 0x88d   :  { %15167 = vmatpush3.bf16.msra.mxu1 %v21172_v23 }
 0x88e   :  { %15169 = vmatprep.subr.bf16.mxu1 %v21189_v63 }
 0x891   :  { %15171 = vmatpush3.bf16.msra.mxu1 %v21189_v63 }
 0x892   :  { %15173 = vmatprep.subr.bf16.mxu1 %v21207_v13 }
 0x895   :  { %15175 = vmatpush3.bf16.msra.mxu1 %v21207_v13 }
 0x896   :  { %15177 = vmatprep.subr.bf16.mxu1 %v21227_v43 }
 0x899   :  { %15179 = vmatpush3.bf16.msra.mxu1 %v21227_v43 }
 0x89a   :  { %15181 = vmatprep.subr.bf16.mxu1 %v23878_v27 }
 0x89c   :  { %13882 = vmatmul.mubr.f32.vlgmr.msra.gmra.mrb[50].mxu1 %v9102_v54 }
 0x89d   :  { %15183 = vmatpush3.bf16.msra.mxu1 %v23878_v27  ;;  %13908 = vmatprep.mubr.f32.mxu1 %v21162_v18  ;;  %v9693_v27 = vsel %vm5900_vm4, %v9654_v10, 0  ;;  %v9702_v10 = vsel %vm5900_vm4, %v9657_v8, 0 }
 0x89e   :  { %15185 = vmatprep.subr.bf16.mxu1 %v23879_v39  ;;  %v21454_v4 = vand.u32 4294901760, %v9693_v27 }
 0x8a0   :  { %v21479_v14 = vsub.f32 %v9693_v27, %v21454_v4 }
 0x8a1   :  { %15187 = vmatpush3.bf16.msra.mxu1 %v23879_v39 }
 0x8a2   :  { %15189 = vmatprep.subr.bf16.mxu1 %v23880_v21 }
 0x8a5   :  { %15191 = vmatpush3.bf16.msra.mxu1 %v23880_v21  ;;  %v22994_v21 = vand.u32 4294901760, %v21420_v37 }
 0x8a6   :  { %15193 = vmatprep.subr.bf16.mxu1 %v23881_v44 }
 0x8a7   :  { %v9810_v25 = vsub.f32 %v21420_v37, %v22994_v21 }
 0x8a9   :  { %15195 = vmatpush3.bf16.msra.mxu1 %v23881_v44  ;;  %v21440_v44 = vand.u32 4294901760, %v9690_v56 }
 0x8aa   :  { %15197 = vmatprep.subr.bf16.mxu1 %v23882_v52 }
 0x8ab   :  { %v21463_v17 = vsub.f32 %v9690_v56, %v21440_v44  ;;  %v9820_v56 = vsub.f32 %v21428_v40, %v22993_v51  ;;  %v9811_v51 = vand.u32 4294901760, %v9810_v25 }
 0x8ad   :  { %15199 = vmatpush3.bf16.msra.mxu1 %v23882_v52 }
 0x8ae   :  { %15201 = vmatprep.subr.bf16.mxu1 %v23883_v49 }
 0x8b1   :  { %15203 = vmatpush3.bf16.msra.mxu1 %v23883_v49  ;;  %v9800_v49 = vsub.f32 %v21404_v7, %v22995_v6  ;;  %v9849_v6 = vand.u32 4294901760, %v21479_v14 }
 0x8b2   :  { %15205 = vmatprep.subr.bf16.mxu1 %v21142_v15 }
 0x8b4   :  { %13909 = vmatmul.mubr.f32.vlgmr.msra.gmra.mrb[50].mxu1 %v21175_v48 }
 0x8b5   :  { %15207 = vmatpush3.bf16.msra.mxu1 %v21142_v15  ;;  %13935 = vmatprep.mubr.f32.mxu1 %v21162_v18 }
 0x8b6   :  { %15209 = vmatprep.subr.bf16.mxu1 %v21157_v53 }
 0x8b9   :  { %15211 = vmatpush3.bf16.msra.mxu1 %v21157_v53 }
 0x8ba   :  { %15213 = vmatprep.subr.bf16.mxu1 %v21172_v23 }
 0x8bd   :  { %15215 = vmatpush3.bf16.msra.mxu1 %v21172_v23 }
 0x8be   :  { %15217 = vmatprep.subr.bf16.mxu1 %v21189_v63 }
 0x8c1   :  { %15219 = vmatpush3.bf16.msra.mxu1 %v21189_v63 }
 0x8c2   :  { %15221 = vmatprep.subr.bf16.mxu1 %v21207_v13 }
 0x8c5   :  { %15223 = vmatpush3.bf16.msra.mxu1 %v21207_v13 }
 0x8c6   :  { %15225 = vmatprep.subr.bf16.mxu1 %v21227_v43 }
 0x8c9   :  { %15227 = vmatpush3.bf16.msra.mxu1 %v21227_v43 }
 0x8cc   :  { %13936 = vmatmul.mubr.f32.vlgmr.msra.gmra.mrb[50].mxu1 %v21175_v48 }
 0x8cd   :  { %10958 = vmatprep.mubr.f32.mxu1 %v23218_v32 }
 0x90f   :  { %v21326_v15 = vpop.f32.mrb[38].mxu1 }
 0x910   :  { %v21328_v53 = vpop.f32.mrb[39].mxu1 }
 0x911   :  { %v21363_v50 = vpop.f32.mrb[48].mxu0 }
 0x912   :  { %v21365_v26 = vpop.f32.mrb[49].mxu0 }
 0x913   :  { %v21330_v18 = vpop.f32.mrb[40].mxu1 }
 0x914   :  { %v21332_v23 = vpop.f32.mrb[41].mxu1 }
 0x915   :  { %v21373_v58 = vpop.f32.mrb[50].mxu0 }
 0x916   :  { %v21376_v1 = vpop.f32.mrb[51].mxu0 }
 0x917   :  { %v21334_v30 = vpop.f32.mrb[42].mxu1 }
 0x918   :  { %v21336_v63 = vpop.f32.mrb[43].mxu1 }
 0x919   :  { %v21384_v35 = vpop.f32.mrb[52].mxu0 }
 0x91a   :  { %v21389_v12 = vpop.f32.mrb[53].mxu0 }
 0x91b   :  { %v21338_v61 = vpop.f32.mrb[44].mxu1 }
 0x91c   :  { %v21340_v59 = vpop.f32.mrb[45].mxu1 }
 0x91f   :  { %v21342_v13 = vpop.f32.mrb[46].mxu1 }
 0x920   :  { %v21344_v48 = vpop.f32.mrb[47].mxu1 }
 0x923   :  { %v21346_v54 = vpop.f32.mrb[48].mxu1 }
 0x924   :  { %v21348_v43 = vpop.f32.mrb[49].mxu1 }
 0x99f   :  { %v13937_v11 = vpop.f32.mrb[50].mxu1 }
 0x9a0   :  { %v15644_v41 = vadd.f32 %v13937_v11, %v9006_v45  ;;  %v9635_v2 = vpop.f32.mrb[51].mxu1  ;;  %v9658_v11 = vld [vmem:[%s22471_s6 + $0x58] sm:$0xff] }
 0x9a1   :  { %v15645_v0 = vadd.f32 %v9635_v2, %v9005_v19  ;;  %v9829_v2 = vand.u32 4294901760, %v21452_v16  ;;  %v9705_v8 = vsel %vm5900_vm4, %v9658_v11, 0  ;;  %v9859_v11 = vand.u32 4294901760, %v21487_v3 }
 0x9a2   :  { %v9646_v39 = vmax.f32 %v15644_v41, 0.0  ;;  %v9801_v41 = vand.u32 4294901760, %v9800_v49  ;;  %v21501_v49 = vand.u32 4294901760, %v9705_v8 }
 0x9a3   :  { %v9645_v52 = vmax.f32 %v15645_v0, 0.0  ;;  %v9830_v21 = vsub.f32 %v21452_v16, %v9829_v2 }
 0x9a4   :  { %v9708_v42 = vsel %vm5937_vm11, %v9646_v39, 0 }
 0x9a5   :  { %v9714_v62 = vand.u32 4294901760, %v9708_v42  ;;  %v9711_v47 = vand.u32 4294901760, %v9645_v52 }
 0x9a7   :  { %v9906_v45 = vsub.f32 %v9708_v42, %v9714_v62  ;;  %v21468_v36 = vpack.c.bf16 %v9714_v62, %v9711_v47  ;;  %v9899_v19 = vsub.f32 %v9645_v52, %v9711_v47  ;;  %v21482_v52 = vand.u32 4294901760, %v9699_v20 }
 0x9a8   :  { %v21489_v42 = vand.u32 4294901760, %v9702_v10 }
 0x9a9   :  { %v9900_v0 = vand.u32 4294901760, %v9899_v19  ;;  %15229 = vmatprep.subr.bf16.mxu0 %v21468_v36  ;;  %v9907_v5 = vand.u32 4294901760, %v9906_v45  ;;  %v15236_v39 = vpack.c.bf16 %v9906_v45, %v9899_v19  ;;  %v21499_v38 = vsub.f32 %v9699_v20, %v21482_v52 }
 0x9aa   :  { %15231 = vmatpush3.bf16.msra.mxu0 %v21468_v36  ;;  %v9850_v20 = vsub.f32 %v21479_v14, %v9849_v6 }
 0x9ab   :  { %v9901_v27 = vsub.f32 %v9899_v19, %v9900_v0  ;;  %v9908_v62 = vsub.f32 %v9906_v45, %v9907_v5  ;;  %v21492_v47 = vpack.c.bf16 %v9907_v5, %v9900_v0  ;;  %v9821_v19 = vand.u32 4294901760, %v9820_v56 }
 0x9ac   :  { %v23884_v45 = vand.u32 4294901760, %v21463_v17  ;;  %v21508_v0 = vsub.f32 %v9702_v10, %v21489_v42  ;;  %v21515_v56 = vsub.f32 %v9705_v8, %v21501_v49  ;;  %v9860_v10 = vsub.f32 %v21487_v3, %v9859_v11 }
 0x9ad   :  { %13943 = vmatmul.mubr.f32.vlgmr.msra.gmra.mrb[54].mxu0 %v9791_v33  ;;  %v9902_v9 = vand.u32 4294901760, %v9901_v27  ;;  %v9909_v57 = vand.u32 4294901760, %v9908_v62  ;;  %v9831_v33 = vand.u32 4294901760, %v9830_v21 }
 0x9ae   :  { %13945 = vmatprep.mubr.f32.mxu0 %v9801_v41  ;;  %v9840_v25 = vsub.f32 %v21463_v17, %v23884_v45  ;;  %v9869_v41 = vand.u32 4294901760, %v21499_v38  ;;  %v9861_v62 = vand.u32 4294901760, %v9860_v10 }
 0x9af   :  { %v15232_v5 = vpack.c.bf16 %v9909_v57, %v9902_v9  ;;  %v9879_v57 = vand.u32 4294901760, %v21508_v0  ;;  %v9851_v9 = vand.u32 4294901760, %v9850_v20  ;;  %v23887_v20 = vand.u32 4294901760, %v21404_v7 }
 0x9b0   :  { %v9841_v27 = vand.u32 4294901760, %v9840_v25  ;;  %v9870_v21 = vsub.f32 %v21499_v38, %v9869_v41 }
 0x9b1   :  { %13946 = vmatmul.mubr.f32.gmra.mrb[56].mxu0 %v9811_v51  ;;  %15233 = vmatprep.subr.bf16.mxu0 %v15232_v5  ;;  %v9889_v51 = vand.u32 4294901760, %v21515_v56  ;;  %v9880_v8 = vsub.f32 %v21508_v0, %v9879_v57 }
 0x9b2   :  { %15235 = vmatpush3.bf16.msra.mxu0 %v15232_v5  ;;  %13948 = vmatprep.mubr.f32.mxu0 %v9821_v19  ;;  %v9871_v19 = vand.u32 4294901760, %v9870_v21 }
 0x9b3   :  { %15237 = vmatprep.subr.bf16.mxu0 %v15236_v39  ;;  %v9890_v45 = vsub.f32 %v21515_v56, %v9889_v51  ;;  %v9881_v25 = vand.u32 4294901760, %v9880_v8 }
 0x9b5   :  { %13949 = vmatmul.mubr.f32.gmra.mrb[58].mxu0 %v9831_v33  ;;  %v9891_v5 = vand.u32 4294901760, %v9890_v45  ;;  %v23886_v33 = vand.u32 4294901760, %v21395_v55 }
 0x9b6   :  { %13951 = vmatprep.mubr.f32.mxu0 %v9841_v27  ;;  %v23888_v27 = vand.u32 4294901760, %v21420_v37 }
 0x9b9   :  { %13952 = vmatmul.mubr.f32.gmra.mrb[60].mxu0 %v9851_v9  ;;  %v9668_v9 = vld [vmem:[%s22472_s7 + $0x48] sm:$0xff] }
 0x9ba   :  { %13954 = vmatprep.mubr.f32.mxu0 %v9861_v62  ;;  %v9667_v62 = vld [vmem:[%s22472_s7 + $0x40] sm:$0xff] }
 0x9bd   :  { %13955 = vmatmul.mubr.f32.gmra.mrb[62].mxu0 %v9871_v19 }
 0x9be   :  { %13957 = vmatprep.mubr.f32.mxu0 %v9881_v25 }
 0x9c1   :  { %13958 = vmatmul.mubr.f32.gmra.mrb[64].mxu0 %v9891_v5 }
 0x9c2   :  { %13964 = vmatprep.mubr.f32.mxu0 %v21354_v22 }
 0x9c5   :  { %13965 = vmatmul.mubr.f32.vlgmr.msra.gmra.mrb[54].mxu0 %v21382_v31 }
 0x9c6   :  { %15239 = vmatpush3.bf16.msra.mxu0 %v15236_v39  ;;  %13967 = vmatprep.mubr.f32.mxu0 %v21391_v46  ;;  %v23885_v39 = vand.u32 4294901760, %v21357_v24 }
 0x9c7   :  { %15241 = vmatprep.subr.bf16.mxu0 %v21468_v36 }
 0x9c9   :  { %13968 = vmatmul.mubr.f32.gmra.mrb[56].mxu0 %v21398_v28 }
 0x9ca   :  { %13970 = vmatprep.mubr.f32.mxu0 %v21406_v60 }
 0x9cd   :  { %13971 = vmatmul.mubr.f32.gmra.mrb[58].mxu0 %v21430_v34 }
 0x9ce   :  { %13973 = vmatprep.mubr.f32.mxu0 %v21440_v44 }
 0x9d1   :  { %13974 = vmatmul.mubr.f32.gmra.mrb[60].mxu0 %v21454_v4 }
 0x9d2   :  { %13976 = vmatprep.mubr.f32.mxu0 %v21465_v29 }
 0x9d5   :  { %13977 = vmatmul.mubr.f32.gmra.mrb[62].mxu0 %v21482_v52 }
 0x9d6   :  { %13979 = vmatprep.mubr.f32.mxu0 %v21489_v42 }
 0x9d9   :  { %13980 = vmatmul.mubr.f32.gmra.mrb[64].mxu0 %v21501_v49 }
 0x9da   :  { %13986 = vmatprep.mubr.f32.mxu0 %v21357_v24  ;;  %v23890_v24 = vand.u32 4294901760, %v21463_v17 }
 0x9dd   :  { %13987 = vmatmul.mubr.f32.vlgmr.msra.gmra.mrb[54].mxu0 %v21395_v55 }
 0x9de   :  { %15243 = vmatpush3.bf16.msra.mxu0 %v21468_v36  ;;  %13989 = vmatprep.mubr.f32.mxu0 %v21404_v7 }
 0x9df   :  { %15245 = vmatprep.subr.bf16.mxu0 %v21492_v47 }
 0x9e1   :  { %13990 = vmatmul.mubr.f32.gmra.mrb[56].mxu0 %v21420_v37 }
 0x9e2   :  { %13992 = vmatprep.mubr.f32.mxu0 %v21428_v40 }
 0x9e5   :  { %13993 = vmatmul.mubr.f32.gmra.mrb[58].mxu0 %v21452_v16 }
 0x9e6   :  { %13995 = vmatprep.mubr.f32.mxu0 %v21463_v17  ;;  %v9664_v17 = vld [vmem:[%s22472_s7 + $0x28] sm:$0xff] }
 0x9e9   :  { %13996 = vmatmul.mubr.f32.gmra.mrb[60].mxu0 %v21479_v14 }
 0x9ea   :  { %13998 = vmatprep.mubr.f32.mxu0 %v21487_v3 }
 0x9ed   :  { %13999 = vmatmul.mubr.f32.gmra.mrb[62].mxu0 %v21499_v38  ;;  %v23889_v38 = vand.u32 4294901760, %v21428_v40 }
 0x9ee   :  { %14001 = vmatprep.mubr.f32.mxu0 %v21508_v0 }
 0x9f1   :  { %14002 = vmatmul.mubr.f32.gmra.mrb[64].mxu0 %v21515_v56 }
 0x9f2   :  { %14008 = vmatprep.mubr.f32.mxu0 %v23885_v39 }
 0x9f5   :  { %14009 = vmatmul.mubr.f32.vlgmr.msra.gmra.mrb[54].mxu0 %v23886_v33 }
 0x9f6   :  { %15247 = vmatpush3.bf16.msra.mxu0 %v21492_v47  ;;  %14011 = vmatprep.mubr.f32.mxu0 %v23887_v20 }
 0x9f7   :  { %15249 = vmatprep.subr.bf16.mxu0 %v21468_v36 }
 0x9f9   :  { %14012 = vmatmul.mubr.f32.gmra.mrb[56].mxu0 %v23888_v27  ;;  %v9670_v27 = vld [vmem:[%s22472_s7 + $0x58] sm:$0xff] }
 0x9fa   :  { %14014 = vmatprep.mubr.f32.mxu0 %v23889_v38 }
 0x9fd   :  { %14015 = vmatmul.mubr.f32.gmra.mrb[58].mxu0 %v9829_v2 }
 0x9fe   :  { %14017 = vmatprep.mubr.f32.mxu0 %v23890_v24 }
 0xa01   :  { %14018 = vmatmul.mubr.f32.gmra.mrb[60].mxu0 %v9849_v6  ;;  %v9661_v6 = vld [vmem:[%s22472_s7 + $0x10] sm:$0xff] }
 0xa02   :  { %14020 = vmatprep.mubr.f32.mxu0 %v9859_v11  ;;  %v9665_v11 = vld [vmem:[%s22472_s7 + $0x30] sm:$0xff] }
 0xa05   :  { %14021 = vmatmul.mubr.f32.gmra.mrb[62].mxu0 %v9869_v41 }
 0xa06   :  { %14023 = vmatprep.mubr.f32.mxu0 %v9879_v57 }
 0xa09   :  { %14024 = vmatmul.mubr.f32.gmra.mrb[64].mxu0 %v9889_v51 }
 0xa0a   :  { %14030 = vmatprep.mubr.f32.mxu0 %v21354_v22 }
 0xa0d   :  { %14031 = vmatmul.mubr.f32.vlgmr.msra.gmra.mrb[54].mxu0 %v21382_v31 }
 0xa0e   :  { %15251 = vmatpush3.bf16.msra.mxu0 %v21468_v36  ;;  %14033 = vmatprep.mubr.f32.mxu0 %v21391_v46  ;;  %v9663_v36 = vld [vmem:[%s22472_s7 + $0x20] sm:$0xff] }
 0xa11   :  { %14034 = vmatmul.mubr.f32.gmra.mrb[56].mxu0 %v21398_v28 }
 0xa12   :  { %14036 = vmatprep.mubr.f32.mxu0 %v21406_v60 }
 0xa15   :  { %14037 = vmatmul.mubr.f32.gmra.mrb[58].mxu0 %v21430_v34 }
 0xa16   :  { %14039 = vmatprep.mubr.f32.mxu0 %v21440_v44 }
 0xa19   :  { %14040 = vmatmul.mubr.f32.gmra.mrb[60].mxu0 %v21454_v4 }
 0xa1a   :  { %14042 = vmatprep.mubr.f32.mxu0 %v21465_v29 }
 0xa1d   :  { %14043 = vmatmul.mubr.f32.gmra.mrb[62].mxu0 %v21482_v52 }
 0xa1e   :  { %14045 = vmatprep.mubr.f32.mxu0 %v21489_v42 }
 0xa21   :  { %14046 = vmatmul.mubr.f32.gmra.mrb[64].mxu0 %v21501_v49 }
 0xa22   :  { %14052 = vmatprep.mubr.f32.mxu0 %v21354_v22  ;;  %v9660_v22 = vld [vmem:[%s22472_s7 + $0x8] sm:$0xff] }
 0xa25   :  { %14053 = vmatmul.mubr.f32.vlgmr.msra.gmra.mrb[54].mxu0 %v21382_v31  ;;  %v9659_v31 = vld [vmem:[%s22472_s7] sm:$0xff] }
 0xa26   :  { %14055 = vmatprep.mubr.f32.mxu0 %v21391_v46 }
 0xa29   :  { %14056 = vmatmul.mubr.f32.gmra.mrb[56].mxu0 %v21398_v28 }
 0xa2a   :  { %14058 = vmatprep.mubr.f32.mxu0 %v21406_v60  ;;  %v9662_v60 = vld [vmem:[%s22472_s7 + $0x18] sm:$0xff] }
 0xa2d   :  { %14059 = vmatmul.mubr.f32.gmra.mrb[58].mxu0 %v21430_v34 }
 0xa2e   :  { %14061 = vmatprep.mubr.f32.mxu0 %v21440_v44 }
 0xa31   :  { %14062 = vmatmul.mubr.f32.gmra.mrb[60].mxu0 %v21454_v4 }
 0xa32   :  { %14064 = vmatprep.mubr.f32.mxu0 %v21465_v29 }
 0xa35   :  { %14065 = vmatmul.mubr.f32.gmra.mrb[62].mxu0 %v21482_v52 }
 0xa36   :  { %14067 = vmatprep.mubr.f32.mxu0 %v21489_v42  ;;  %v9666_v42 = vld [vmem:[%s22472_s7 + $0x38] sm:$0xff] }
 0xa39   :  { %14068 = vmatmul.mubr.f32.gmra.mrb[64].mxu0 %v21501_v49 }
 0xaf8   :  { %v14054_v46 = vpop.f32.mrb[54].mxu0 }
 0xaf9   :  { %v15646_v55 = vadd.f32 %v14054_v46, %v9660_v22  ;;  %v10572_v28 = vpop.f32.mrb[55].mxu0  ;;  %v9669_v22 = vld [vmem:[%s22472_s7 + $0x50] sm:$0xff] }
 0xafa   :  { %v15647_v7 = vadd.f32 %v10572_v28, %v9659_v31 }
 0xafb   :  { %v12721_v37 = vmul.f32 -1.442695, %v15646_v55 }
 0xafc   :  { %v12720_v40 = vmul.f32 -1.442695, %v15647_v7  ;;  %v14057_v34 = vpop.f32.mrb[56].mxu0 }
 0xafd   :  { %16442 = vpow2.f32 %v12721_v37  ;;  %v15648_v44 = vadd.f32 %v14057_v34, %v9662_v60  ;;  %v10584_v16 = vpop.f32.mrb[57].mxu0 }
 0xafe   :  { %16444 = vpow2.f32 %v12720_v40  ;;  %v15649_v4 = vadd.f32 %v10584_v16, %v9661_v6 }
 0xaff   :  { %v12723_v29 = vmul.f32 -1.442695, %v15648_v44 }
 0xb00   :  { %v12722_v2 = vmul.f32 -1.442695, %v15649_v4  ;;  %v14060_v14 = vpop.f32.mrb[58].mxu0 }
 0xb01   :  { %16446 = vpow2.f32 %v12723_v29  ;;  %v15650_v52 = vadd.f32 %v14060_v14, %v9664_v17  ;;  %v10596_v49 = vpop.f32.mrb[59].mxu0 }
 0xb02   :  { %16448 = vpow2.f32 %v12722_v2  ;;  %v15651_v3 = vadd.f32 %v10596_v49, %v9663_v36 }
 0xb03   :  { %v12725_v47 = vmul.f32 -1.442695, %v15650_v52 }
 0xb04   :  { %v12724_v0 = vmul.f32 -1.442695, %v15651_v3  ;;  %v14063_v41 = vpop.f32.mrb[60].mxu0 }
 0xb05   :  { %16450 = vpow2.f32 %v12725_v47  ;;  %v15652_v56 = vadd.f32 %v14063_v41, %v9666_v42  ;;  %v10608_v10 = vpop.f32.mrb[61].mxu0 }
 0xb06   :  { %16452 = vpow2.f32 %v12724_v0  ;;  %v15653_v57 = vadd.f32 %v10608_v10, %v9665_v11 }
 0xb07   :  { %v16443_v21 = vpop.eup %16442  ;;  %v12727_v51 = vmul.f32 -1.442695, %v15652_v56 }
 0xb08   :  { %v16445_v8 = vpop.eup %16444  ;;  %v10679_v19 = vadd.f32 1.0, %v16443_v21  ;;  %v12726_v45 = vmul.f32 -1.442695, %v15653_v57  ;;  %v14066_v25 = vpop.f32.mrb[62].mxu0 }
 0xb09   :  { %v10678_v5 = vadd.f32 1.0, %v16445_v8  ;;  %16454 = vpow2.f32 %v12727_v51  ;;  %v15654_v39 = vadd.f32 %v14066_v25, %v9668_v9  ;;  %v10620_v33 = vpop.f32.mrb[63].mxu0 }
 0xb0a   :  { %16456 = vrcp.f32 %v10679_v19  ;;  %v15655_v20 = vadd.f32 %v10620_v33, %v9667_v62  ;;  %v7047_v33 = vld [vmem:[%s22474_s9] sm:$0xff] }
 0xb0b   :  { %v16447_v38 = vpop.eup %16446  ;;  %16458 = vrcp.f32 %v10678_v5  ;;  %v12729_v24 = vmul.f32 -1.442695, %v15654_v39  ;;  %v7048_v39 = vld [vmem:[%s22474_s9 + $0x8] sm:$0xff] }
 0xb0c   :  { %v16449_v31 = vpop.eup %16448  ;;  %v10681_v46 = vadd.f32 1.0, %v16447_v38  ;;  %16460 = vpow2.f32 %v12726_v45  ;;  %v12728_v55 = vmul.f32 -1.442695, %v15655_v20  ;;  %v14069_v28 = vpop.f32.mrb[64].mxu0  ;;  %v7050_v20 = vld [vmem:[%s22474_s9 + $0x18] sm:$0xff]  ;;  %v7052_v38 = vld [vmem:[%s22474_s9 + $0x28] sm:$0xff] }
 0xb0d   :  { %v10680_v7 = vadd.f32 1.0, %v16449_v31  ;;  %16462 = vpow2.f32 %v12729_v24  ;;  %v15656_v60 = vadd.f32 %v14069_v28, %v9670_v27  ;;  %v10632_v37 = vpop.f32.mrb[65].mxu0  ;;  %v7049_v27 = vld [vmem:[%s22474_s9 + $0x10] sm:$0xff]  ;;  %v7051_v24 = vld [vmem:[%s22474_s9 + $0x20] sm:$0xff] }
 0xb0e   :  { %16464 = vrcp.f32 %v10681_v46  ;;  %v15657_v6 = vadd.f32 %v10632_v37, %v9669_v22  ;;  %v10810_v22 = vld [vmem:[%s22473_s8] sm:$0xff]  ;;  %v10811_v37 = vld [vmem:[%s22473_s8 + $0x8] sm:$0xff] }
 0xb0f   :  { %v16451_v40 = vpop.eup %16450  ;;  %16466 = vrcp.f32 %v10680_v7  ;;  %v12731_v34 = vmul.f32 -1.442695, %v15656_v60  ;;  %v10853_v31 = vsel %vm5235_vm15, %v10810_v22, 0 }
 0xb10   :  { %v16453_v44 = vpop.eup %16452  ;;  %v10683_v16 = vadd.f32 1.0, %v16451_v40  ;;  %16468 = vpow2.f32 %v12728_v55  ;;  %v12730_v4 = vmul.f32 -1.442695, %v15657_v6  ;;  %v21655_v46 = vand.u32 4294901760, %v10853_v31  ;;  %v10812_v6 = vld [vmem:[%s22473_s8 + $0x10] sm:$0xff] }
 0xb11   :  { %v10682_v17 = vadd.f32 1.0, %v16453_v44  ;;  %16470 = vpow2.f32 %v12731_v34  ;;  %v10856_v40 = vsel %vm5235_vm15, %v10811_v37, 0  ;;  %v10813_v34 = vld [vmem:[%s22473_s8 + $0x18] sm:$0xff]  ;;  %v10814_v44 = vld [vmem:[%s22473_s8 + $0x20] sm:$0xff] }
 0xb12   :  { %16472 = vrcp.f32 %v10683_v16  ;;  %23891 = vst [vmem:[#allocation46_spill] sm:$0xff] %v21655_v46  ;;  %v21658_v55 = vsub.f32 %v10853_v31, %v21655_v46  ;;  %v10859_v16 = vsel %vm5235_vm15, %v10812_v6, 0  ;;  %v23915_v6 = vld [vmem:[#allocation18_spill] sm:$0xff] }
 0xb13   :  { %v16455_v29 = vpop.eup %16454  ;;  %16474 = vrcp.f32 %v10682_v17  ;;  %v21685_v17 = vand.u32 4294901760, %v10856_v40 }
 0xb14   :  { %v16457_v36 = vpop.eup %16456  ;;  %v10685_v2 = vadd.f32 1.0, %v16455_v29  ;;  %16476 = vpow2.f32 %v12730_v4  ;;  %23892 = vst [vmem:[#allocation86_spill] sm:$0xff] %v21658_v55  ;;  %v21661_v28 = vand.u32 4294901760, %v21658_v55  ;;  %v10815_v4 = vld [vmem:[%s22473_s8 + $0x28] sm:$0xff]  ;;  %v10862_v29 = vsel %vm5235_vm15, %v10813_v34, 0  ;;  %s16542_s8 = smov [#allocation3]  }
 0xb15   :  { %v16459_v14 = vpop.eup %16458  ;;  %10721 = vperm.xlu1 %16385, %v16457_v36   ;;  %23894 = vst [vmem:[#allocation48_spill] sm:$0xff] %v21685_v17  ;;  %v10865_v36 = vsel %vm5235_vm15, %v10814_v44, 0  ;;  %v23917_v44 = vld [vmem:[#allocation55_spill] sm:$0xff]  ;;  %s12694_s26 = sshll.u32 %s16542_s8, 4  ;;  %s12695_s26 = int_to_ptr.vmem [resolvable:$true] %s12694_s26 }
 0xb16   :  { %v16461_v52 = vpop.eup %16460  ;;  %16478 = vrcp.f32 %v10685_v2  ;;  %10716 = vperm.xlu0 %16384, %v16459_v14   ;;  %23893 = vst [vmem:[#allocation59_spill] sm:$0xff] %v21661_v28  ;;  %v10962_v7 = vsub.f32 %v21658_v55, %v21661_v28  ;;  %v21689_v2 = vand.u32 4294901760, %v10859_v16  ;;  %v10868_v14 = vsel %vm5235_vm15, %v10815_v4, 0  ;;  %v23929_v28 = vld [vmem:[#allocation67_spill] sm:$0xff]  ;;  %s16492_s27 = scalar_lea.vmem %s12695_s26, 4608  ;;  %p16497_p1 = scmp.lt.s32.totalorder %s12695_s26, %s12695_s26 }
 0xb17   :  { %v16463_v49 = vpop.eup %16462  ;;  %v10684_v3 = vadd.f32 1.0, %v16461_v52  ;;  %v21692_v52 = vand.u32 4294901760, %v10862_v29  ;;  %p16493_p0 = scmp.ne.s32.totalorder %s12695_s26, %s16492_s27  ;;  %p16498_p2 = scmp.lt.s32.totalorder %s16492_s27, %s16492_s27 }
 0xb18   :  { %v16465_v42 = vpop.eup %16464  ;;  %v10687_v47 = vadd.f32 1.0, %v16463_v49  ;;  %v21665_v60 = vand.u32 4294901760, %v10962_v7  ;;  %23895 = vst [vmem:[#allocation29_spill] sm:$0xff] %v21689_v2  ;;  %v21695_v49 = vsub.f32 %v10856_v40, %v21685_v17  ;;  %v23916_v40 = vmax.f32 %v23915_v6, 0.0 }
 0xb19   :  { %v16467_v11 = vpop.eup %16466  ;;  %16480 = vrcp.f32 %v10684_v3  ;;  %23896 = vst [vmem:[#allocation68_spill] sm:$0xff] %v21692_v52  ;;  %v21697_v3 = vand.u32 4294901760, %v10865_v36  ;;  %p16499_p3 = por %p16498_p2, %p16497_p1 }
 0xb1a   :  { %v16469_v0 = vpop.eup %16468  ;;  %16482 = vrcp.f32 %v10687_v47  ;;  %10726 = vperm.xlu1 %16385, %v16467_v11   ;;  %10731 = vperm.xlu0 %16384, %v16465_v42   ;;  %23897 = vst [vmem:[#allocation133_spill] sm:$0xff] %v21695_v49  ;;  %v21699_v42 = vand.u32 4294901760, %v10868_v14  ;;  %v21702_v47 = vsub.f32 %v10859_v16, %v21689_v2  ;;  %v21705_v11 = vsub.f32 %v10862_v29, %v21692_v52  ;;  %v23919_v29 = vld [vmem:[#allocation70_spill] sm:$0xff] }
 0xb1b   :  { %v16471_v41 = vpop.eup %16470  ;;  %v10686_v56 = vadd.f32 1.0, %v16469_v0  ;;  %14094 = vmatprep.mubr.f32.mxu0 %v21665_v60  ;;  %23898 = vst [vmem:[#allocation58_spill] sm:$0xff] %v21697_v3  ;;  %v21708_v0 = vand.u32 4294901760, %v21695_v49  ;;  %v23918_v16 = vmax.f32 %v23917_v44, 0.0  ;;  %p16500_p4 = pnand %p16499_p3, %p16493_p0 }
 0xb1c   :  { %v16473_v10 = vpop.eup %16472  ;;  %v10689_v57 = vadd.f32 1.0, %v16471_v41  ;;  %23899 = vst [vmem:[#allocation33_spill] sm:$0xff] %v21699_v42  ;;  %23900 = vst [vmem:[#allocation123_spill] sm:$0xff] %v21702_v47  ;;  %v21711_v41 = vsub.f32 %v10865_v36, %v21697_v3  ;;  %v23920_v36 = vmax.f32 %v23919_v29, 0.0 }
 0xb1d   :  { %v16475_v9 = vpop.eup %16474  ;;  %16484 = vrcp.f32 %v10686_v56  ;;  %23901 = vst [vmem:[#allocation62_spill] sm:$0xff] %v21705_v11  ;;  %23902 = vst [vmem:[#allocation135_spill] sm:$0xff] %v21708_v0  ;;  %v21714_v56 = vsub.f32 %v10868_v14, %v21699_v42 }
 0xb1e   :  { %v16477_v21 = vpop.eup %16476  ;;  %16486 = vrcp.f32 %v10689_v57  ;;  %10736 = vperm.xlu1 %16385, %v16475_v9   ;;  %10741 = vperm.xlu0 %16384, %v16473_v10   ;;  %23903 = vst [vmem:[#allocation26_spill] sm:$0xff] %v21711_v41  ;;  %v21717_v10 = vand.u32 4294901760, %v21702_v47  ;;  %v21720_v57 = vand.u32 4294901760, %v21705_v11  ;;  %v10973_v9 = vsub.f32 %v21695_v49, %v21708_v0 }
 0xb1f   :  { %v10688_v51 = vadd.f32 1.0, %v16477_v21  ;;  %23904 = vst [vmem:[#allocation43_spill] sm:$0xff] %v21714_v56  ;;  %v21725_v21 = vand.u32 4294901760, %v21711_v41 }
 0xb20   :  { %v16479_v62 = vpop.eup %16478  ;;  %23905 = vst [vmem:[#allocation78_spill] sm:$0xff] %v21717_v10  ;;  %23906 = vst [vmem:[#allocation12_spill] sm:$0xff] %v21720_v57 }
 0xb21   :  { %16488 = vrcp.f32 %v10688_v51  ;;  %23907 = vst [vmem:[#allocation24_spill] sm:$0xff] %v21725_v21  ;;  %v21728_v51 = vand.u32 4294901760, %v21714_v56 }
 0xb22   :  { %10751 = vperm.xlu0 %16384, %v16479_v62   ;;  %v10984_v62 = vsub.f32 %v21702_v47, %v21717_v10  ;;  %v23935_v47 = vld [vmem:[#allocation101_spill] sm:$0xff] }
 0xb23   :  { %v16481_v8 = vpop.eup %16480  ;;  %23908 = vst [vmem:[#allocation60_spill] sm:$0xff] %v21728_v51  ;;  %v11017_v37 = vsub.f32 %v21714_v56, %v21728_v51 }
 0xb24   :  { %v16483_v19 = vpop.eup %16482  ;;  %10746 = vperm.xlu1 %16385, %v16481_v8   ;;  %v10995_v8 = vsub.f32 %v21705_v11, %v21720_v57  ;;  %v23933_v11 = vld [vmem:[#allocation74_spill] sm:$0xff] }
 0xb26   :  { %10761 = vperm.xlu0 %16384, %v16483_v19  }
 0xb27   :  { %v16485_v45 = vpop.eup %16484 }
 0xb28   :  { %v16487_v25 = vpop.eup %16486  ;;  %10756 = vperm.xlu1 %16385, %v16485_v45   ;;  %v21734_v45 = vand.u32 4294901760, %v10973_v9  ;;  %v21754_v9 = vand.u32 4294901760, %v10984_v62 }
 0xb2a   :  { %10771 = vperm.xlu0 %16384, %v16487_v25   ;;  %v11006_v25 = vsub.f32 %v21711_v41, %v21725_v21 }
 0xb2b   :  { %v16489_v5 = vpop.eup %16488 }
 0xb2c   :  { %10766 = vperm.xlu1 %16385, %v16489_v5   ;;  %v23909_v5 = vld [vmem:[#allocation19_spill] sm:$0xff]  ;;  %v21759_v51 = vand.u32 4294901760, %v11006_v25  ;;  %v23936_v25 = vmax.f32 %v23935_v47, 0.0 }
 0xb2e   :  { %7060 = vperm.xlu0 %16384, %v7048_v39   ;;  %23922 = vst [vmem:[#allocation81_spill] sm:$0xff] %v21759_v51 }
 0xb30   :  { %7055 = vperm.xlu1 %16385, %v7047_v33  }
 0xb32   :  { %7070 = vperm.xlu0 %16384, %v7050_v20  }
 0xb34   :  { %7065 = vperm.xlu1 %16385, %v7049_v27  }
 0xb36   :  { %7080 = vperm.xlu0 %16384, %v7052_v38  }
 0xb38   :  { %7075 = vperm.xlu1 %16385, %v7051_v24  }
 0xb3a   :  { %10829 = vperm.xlu0 %16384, %v7048_v39   ;;  %v23910_v39 = vmax.f32 %v23909_v5, 0.0 }
 0xb3c   :  { %10824 = vperm.xlu1 %16385, %v7047_v33  }
 0xb3e   :  { %10839 = vperm.xlu0 %16384, %v7050_v20   ;;  %v23911_v20 = vld [vmem:[#allocation36_spill] sm:$0xff] }
 0xb40   :  { %10834 = vperm.xlu1 %16385, %v7049_v27   ;;  %v23912_v27 = vmax.f32 %v23911_v20, 0.0 }
 0xb42   :  { %10849 = vperm.xlu0 %16384, %v7052_v38  }
 0xb44   :  { %10844 = vperm.xlu1 %16385, %v7051_v24   ;;  %v23913_v24 = vld [vmem:[#allocation53_spill] sm:$0xff] }
 0xb45   :  { %v23914_v22 = vmax.f32 %v23913_v24, 0.0 }
 0xb94   :  { %v10722_v19 = vpop.permute.xlu1 %10721 }
 0xb95   :  { %v21740_v33 = vmul.f32 %v10722_v19, %v23910_v39  ;;  %v10778_v38 = vmul.f32 %v10722_v19, %v23912_v27  ;;  %v10779_v31 = vmul.f32 %v10722_v19, %v23914_v22  ;;  %v10717_v7 = vpop.permute.xlu0 %10716  ;;  %v21757_v19 = vand.u32 4294901760, %v10995_v8 }
 0xb96   :  { %v10774_v34 = vmul.f32 %v10717_v7, %v23916_v40  ;;  %v10775_v4 = vmul.f32 %v10717_v7, %v23918_v16  ;;  %v10776_v14 = vmul.f32 %v10717_v7, %v23920_v36  ;;  %v21768_v16 = vand.u32 4294901760, %v11017_v37 }
 0xb97   :  { %v10874_v5 = vand.u32 4294901760, %v10778_v38  ;;  %v10876_v39 = vand.u32 4294901760, %v21740_v33  ;;  %v11870_v20 = vand.u32 4294901760, %v10779_v31  ;;  %23921 = vst [vmem:[#allocation75_spill] sm:$0xff] %v21757_v19  ;;  %v23930_v37 = vmax.f32 %v23929_v28, 0.0 }
 0xb98   :  { %v10870_v27 = vand.u32 4294901760, %v10775_v4  ;;  %v10872_v24 = vand.u32 4294901760, %v10774_v34  ;;  %v11867_v22 = vand.u32 4294901760, %v10776_v14  ;;  %23923 = vst [vmem:[#allocation95_spill] sm:$0xff] %v21768_v16 }
 0xb99   :  { %v21761_v6 = vsub.f32 %v10778_v38, %v10874_v5  ;;  %v21764_v40 = vsub.f32 %v21740_v33, %v10876_v39  ;;  %v21766_v44 = vsub.f32 %v10779_v31, %v11870_v20  ;;  %v10727_v62 = vpop.permute.xlu1 %10726  ;;  %v10732_v7 = vpop.permute.xlu0 %10731  ;;  %v23925_v38 = vld [vmem:[#allocation32_spill] sm:$0xff] }
 0xb9a   :  { %v21770_v29 = vsub.f32 %v10775_v4, %v10870_v27  ;;  %v21772_v8 = vsub.f32 %v10774_v34, %v10872_v24  ;;  %v21774_v36 = vpack.c.bf16 %v11870_v20, %v11867_v22  ;;  %v21776_v21 = vsub.f32 %v10776_v14, %v11867_v22  ;;  %v23927_v31 = vld [vmem:[#allocation52_spill] sm:$0xff]  ;;  %v23931_v34 = vld [vmem:[#allocation34_spill] sm:$0xff] }
 0xb9b   :  { %v23926_v57 = vmax.f32 %v23925_v38, 0.0  ;;  %v23928_v10 = vmax.f32 %v23927_v31, 0.0  ;;  %v10782_v56 = vmul.f32 %v10727_v62, %v23930_v37  ;;  %v23932_v41 = vmax.f32 %v23931_v34, 0.0 }
 0xb9c   :  { %23924 = vst [vmem:[#allocation47_spill] sm:$0xff] %v21774_v36  ;;  %v23934_v14 = vmax.f32 %v23933_v11, 0.0  ;;  %v10785_v49 = vmul.f32 %v10732_v7, %v23936_v25  ;;  %15397 = vmatprep.subr.bf16.mxu0 %v21774_v36  ;;  %v21796_v31 = vpack.c.bf16 %v10874_v5, %v10870_v27  ;;  %v23938_v11 = vld [vmem:[#allocation38_spill] sm:$0xff]  ;;  %v23941_v5 = vld [vmem:[#allocation72_spill] sm:$0xff] }
 0xb9d   :  { %v21781_v33 = vmul.f32 %v10727_v62, %v23926_v57  ;;  %v10781_v0 = vmul.f32 %v10727_v62, %v23928_v10  ;;  %v10783_v20 = vmul.f32 %v10732_v7, %v23932_v41  ;;  %v11873_v10 = vand.u32 4294901760, %v10782_v56  ;;  %v10737_v28 = vpop.permute.xlu1 %10736  ;;  %15399 = vmatpush3.bf16.msra.mxu0 %v21774_v36  ;;  %v10742_v62 = vpop.permute.xlu0 %10741 }
 0xb9e   :  { %v10784_v22 = vmul.f32 %v10732_v7, %v23934_v14  ;;  %23937 = vst [vmem:[#allocation44_spill] sm:$0xff] %v21796_v31  ;;  %v11876_v34 = vand.u32 4294901760, %v10785_v49  ;;  %v23939_v14 = vmax.f32 %v23938_v11, 0.0  ;;  %15253 = vmatprep.subr.bf16.mxu1 %v21796_v31  ;;  %v23942_v27 = vmax.f32 %v23941_v5, 0.0 }
 0xb9f   :  { %v10878_v57 = vand.u32 4294901760, %v10781_v0  ;;  %v10880_v38 = vand.u32 4294901760, %v21781_v33  ;;  %v10884_v41 = vand.u32 4294901760, %v10783_v20  ;;  %v21808_v25 = vsub.f32 %v10782_v56, %v11873_v10 }
 0xba0   :  { %v10882_v37 = vand.u32 4294901760, %v10784_v22  ;;  %v21801_v4 = vmul.f32 %v10737_v28, %v23939_v14  ;;  %v10787_v36 = vmul.f32 %v10737_v28, %v23942_v27  ;;  %v21817_v3 = vpack.c.bf16 %v11876_v34, %v11873_v10  ;;  %v23945_v14 = vld [vmem:[#allocation85_spill] sm:$0xff]  ;;  %v23950_v10 = vld [vmem:[#allocation108_spill] sm:$0xff] }
 0xba1   :  { %v21803_v47 = vsub.f32 %v10781_v0, %v10878_v57  ;;  %v21806_v7 = vsub.f32 %v21781_v33, %v10880_v38  ;;  %v21815_v42 = vsub.f32 %v10783_v20, %v10884_v41  ;;  %v21819_v11 = vsub.f32 %v10785_v49, %v11876_v34  ;;  %v10752_v31 = vpop.permute.xlu0 %10751 }
 0xba2   :  { %v21813_v55 = vsub.f32 %v10784_v22, %v10882_v37  ;;  %23944 = vst [vmem:[#allocation83_spill] sm:$0xff] %v21817_v3  ;;  %v23946_v33 = vmax.f32 %v23945_v14, 0.0  ;;  %v10886_v56 = vand.u32 4294901760, %v10787_v36  ;;  %v10888_v2 = vand.u32 4294901760, %v21801_v4  ;;  %v23948_v22 = vld [vmem:[#allocation40_spill] sm:$0xff]  ;;  %15401 = vmatprep.subr.bf16.mxu0 %v21817_v3 }
 0xba3   :  { %23940 = vst [vmem:[#allocation49_spill] sm:$0xff] %v21806_v7  ;;  %23943 = vst [vmem:[#allocation71_spill] sm:$0xff] %v21815_v42  ;;  %v21826_v27 = vpack.c.bf16 %v10876_v39, %v10872_v24  ;;  %v23949_v20 = vmax.f32 %v23948_v22, 0.0  ;;  %v23951_v46 = vmax.f32 %v23950_v10, 0.0  ;;  %v10747_v5 = vpop.permute.xlu1 %10746  ;;  %15403 = vmatpush3.bf16.msra.mxu0 %v21817_v3  ;;  %v21842_v22 = vpack.c.bf16 %v10882_v37, %v10878_v57  ;;  %v23964_v57 = vld [vmem:[#allocation112_spill] sm:$0xff] }
 0xba4   :  { %v10788_v52 = vmul.f32 %v10737_v28, %v23946_v33  ;;  %v21833_v34 = vsub.f32 %v10787_v36, %v10886_v56  ;;  %v21836_v28 = vsub.f32 %v21801_v4, %v10888_v2  ;;  %v23954_v33 = vld [vmem:[#allocation89_spill] sm:$0xff]  ;;  %v23965_v37 = vmax.f32 %v23964_v57, 0.0 }
 0xba5   :  { %23947 = vst [vmem:[#allocation80_spill] sm:$0xff] %v21826_v27  ;;  %v10789_v17 = vmul.f32 %v10742_v62, %v23949_v20  ;;  %v10790_v49 = vmul.f32 %v10742_v62, %v23951_v46  ;;  %v23955_v0 = vmax.f32 %v23954_v33, 0.0  ;;  %15255 = vmatpush1.bf16.msra.mxu1 %v21826_v27  ;;  %23956 = vst [vmem:[#allocation28_spill] sm:$0xff] %v21842_v22  ;;  %v23957_v46 = vld [vmem:[#allocation50_spill] sm:$0xff]  ;;  %v10762_v42 = vpop.permute.xlu0 %10761 }
 0xba6   :  { %23952 = vst [vmem:[#allocation31_spill] sm:$0xff] %v21833_v34  ;;  %23953 = vst [vmem:[#allocation23_spill] sm:$0xff] %v21836_v28  ;;  %v11879_v14 = vand.u32 4294901760, %v10788_v52  ;;  %v23958_v20 = vmax.f32 %v23957_v46, 0.0  ;;  %v23960_v33 = vld [vmem:[#allocation94_spill] sm:$0xff]  ;;  %15257 = vmatprep.subr.bf16.mxu1 %v21842_v22  ;;  %v10794_v46 = vmul.f32 %v10747_v5, %v23965_v37  ;;  %v21865_v28 = vpack.c.bf16 %v10884_v41, %v10880_v38  ;;  %v23970_v22 = vld [vmem:[#allocation57_spill] sm:$0xff] }
 0xba7   :  { %v10791_v16 = vmul.f32 %v10742_v62, %v23955_v0  ;;  %v10890_v39 = vand.u32 4294901760, %v10790_v49  ;;  %v10892_v24 = vand.u32 4294901760, %v10789_v17  ;;  %v23961_v62 = vmax.f32 %v23960_v33, 0.0  ;;  %v10757_v33 = vpop.permute.xlu1 %10756  ;;  %v23975_v37 = vld [vmem:[#allocation115_spill] sm:$0xff] }
 0xba8   :  { %v21846_v36 = vmul.f32 %v10747_v5, %v23958_v20  ;;  %v21849_v10 = vsub.f32 %v10788_v52, %v11879_v14  ;;  %23968 = vst [vmem:[#allocation25_spill] sm:$0xff] %v21865_v28  ;;  %v23976_v38 = vmax.f32 %v23975_v37, 0.0 }
 0xba9   :  { %v11882_v34 = vand.u32 4294901760, %v10791_v16  ;;  %v10793_v0 = vmul.f32 %v10747_v5, %v23961_v62  ;;  %v21853_v3 = vsub.f32 %v10790_v49, %v10890_v39  ;;  %v21855_v27 = vsub.f32 %v10789_v17, %v10892_v24  ;;  %15259 = vmatpush1.bf16.msra.mxu1 %v21865_v28  ;;  %v10772_v28 = vpop.permute.xlu0 %10771 }
 0xbaa   :  { %23959 = vst [vmem:[#allocation63_spill] sm:$0xff] %v21849_v10  ;;  %v10896_v20 = vand.u32 4294901760, %v21846_v36  ;;  %v11885_v62 = vand.u32 4294901760, %v10794_v46  ;;  %v23971_v10 = vmax.f32 %v23970_v22, 0.0  ;;  %v10797_v41 = vmul.f32 %v10752_v31, %v23976_v38  ;;  %v23979_v22 = vld [vmem:[#allocation69_spill] sm:$0xff] }
 0xbab   :  { %23962 = vst [vmem:[#allocation76_spill] sm:$0xff] %v21853_v3  ;;  %23963 = vst [vmem:[#allocation73_spill] sm:$0xff] %v21855_v27  ;;  %v21861_v51 = vpack.c.bf16 %v11882_v34, %v11879_v14  ;;  %v21863_v52 = vsub.f32 %v10791_v16, %v11882_v34  ;;  %v10894_v4 = vand.u32 4294901760, %v10793_v0  ;;  %v23973_v14 = vld [vmem:[#allocation93_spill] sm:$0xff] }
 0xbac   :  { %v21869_v17 = vsub.f32 %v21846_v36, %v10896_v20  ;;  %v10795_v57 = vmul.f32 %v10752_v31, %v23971_v10  ;;  %v23974_v16 = vmax.f32 %v23973_v14, 0.0  ;;  %v21883_v36 = vsub.f32 %v10794_v46, %v11885_v62  ;;  %v10767_v46 = vpop.permute.xlu1 %10766 }
 0xbad   :  { %23966 = vst [vmem:[#allocation102_spill] sm:$0xff] %v21861_v51  ;;  %23967 = vst [vmem:[#allocation10_spill] sm:$0xff] %v21863_v52  ;;  %v21873_v5 = vsub.f32 %v10793_v0, %v10894_v4  ;;  %v21880_v52 = vpack.c.bf16 %v10890_v39, %v10886_v56  ;;  %15405 = vmatprep.subr.bf16.mxu0 %v21861_v51  ;;  %v23980_v10 = vmax.f32 %v23979_v22, 0.0  ;;  %v11888_v14 = vand.u32 4294901760, %v10797_v41  ;;  %v23983_v39 = vld [vmem:[#allocation103_spill] sm:$0xff] }
 0xbae   :  { %23969 = vst [vmem:[#allocation51_spill] sm:$0xff] %v21869_v17  ;;  %v10796_v34 = vmul.f32 %v10752_v31, %v23974_v16  ;;  %23978 = vst [vmem:[#allocation127_spill] sm:$0xff] %v21883_v36  ;;  %v10900_v27 = vand.u32 4294901760, %v10795_v57  ;;  %v23981_v16 = vld [vmem:[#allocation106_spill] sm:$0xff]  ;;  %v23984_v37 = vmax.f32 %v23983_v39, 0.0  ;;  %15407 = vmatpush3.bf16.msra.mxu0 %v21861_v51 }
 0xbaf   :  { %23972 = vst [vmem:[#allocation56_spill] sm:$0xff] %v21873_v5  ;;  %23977 = vst [vmem:[#allocation82_spill] sm:$0xff] %v21880_v52  ;;  %v21888_v0 = vmul.f32 %v10757_v33, %v23980_v10  ;;  %15261 = vmatprep.subr.bf16.mxu1 %v21880_v52  ;;  %v23982_v31 = vmax.f32 %v23981_v16, 0.0  ;;  %v21899_v10 = vpack.c.bf16 %v10892_v24, %v10888_v2  ;;  %v23987_v17 = vld [vmem:[#allocation126_spill] sm:$0xff] }
 0xbb0   :  { %v10898_v5 = vand.u32 4294901760, %v10796_v34  ;;  %v10800_v38 = vmul.f32 %v10757_v33, %v23984_v37  ;;  %v21896_v49 = vsub.f32 %v10795_v57, %v10900_v27  ;;  %v23988_v36 = vmax.f32 %v23987_v17, 0.0  ;;  %v23993_v2 = vld [vmem:[#allocation118_spill] sm:$0xff] }
 0xbb1   :  { %v10799_v56 = vmul.f32 %v10757_v33, %v23982_v31  ;;  %v10904_v22 = vand.u32 4294901760, %v21888_v0  ;;  %23986 = vst [vmem:[#allocation45_spill] sm:$0xff] %v21899_v10  ;;  %v21905_v52 = vpack.c.bf16 %v11888_v14, %v11885_v62  ;;  %v21907_v16 = vsub.f32 %v10797_v41, %v11888_v14  ;;  %15263 = vmatpush1.bf16.msra.mxu1 %v21899_v10  ;;  %v7056_v14 = vpop.permute.xlu1 %7055  ;;  %v24000_v10 = vld [vmem:[#allocation90_spill] sm:$0xff] }
 0xbb2   :  { %23985 = vst [vmem:[#allocation17_spill] sm:$0xff] %v21896_v49  ;;  %v10801_v3 = vmul.f32 %v10762_v42, %v23988_v36  ;;  %v21903_v7 = vsub.f32 %v10796_v34, %v10898_v5  ;;  %v11891_v57 = vand.u32 4294901760, %v10800_v38  ;;  %v23994_v24 = vmax.f32 %v23993_v2, 0.0  ;;  %v23996_v34 = vld [vmem:[#allocation128_spill] sm:$0xff] }
 0xbb3   :  { %23990 = vst [vmem:[#allocation79_spill] sm:$0xff] %v21905_v52  ;;  %23991 = vst [vmem:[#allocation134_spill] sm:$0xff] %v21907_v16  ;;  %v10902_v31 = vand.u32 4294901760, %v10799_v56  ;;  %v21911_v39 = vsub.f32 %v21888_v0, %v10904_v22  ;;  %v23997_v36 = vmax.f32 %v23996_v34, 0.0  ;;  %v21920_v41 = vpack.c.bf16 %v10898_v5, %v10894_v4  ;;  %15409 = vmatprep.subr.bf16.mxu0 %v21905_v52  ;;  %v24003_v4 = vld [vmem:[#allocation110_spill] sm:$0xff] }
 0xbb4   :  { %23989 = vst [vmem:[#allocation65_spill] sm:$0xff] %v21903_v7  ;;  %v10802_v37 = vmul.f32 %v10762_v42, %v23994_v24  ;;  %v10908_v51 = vand.u32 4294901760, %v10801_v3  ;;  %v21924_v33 = vsub.f32 %v10800_v38, %v11891_v57  ;;  %v24001_v16 = vmax.f32 %v24000_v10, 0.0  ;;  %15411 = vmatpush3.bf16.msra.mxu0 %v21905_v52  ;;  %v24008_v10 = vld [vmem:[#allocation88_spill] sm:$0xff] }
 0xbb5   :  { %23992 = vst [vmem:[#allocation104_spill] sm:$0xff] %v21911_v39  ;;  %v21916_v17 = vsub.f32 %v10799_v56, %v10902_v31  ;;  %v10803_v62 = vmul.f32 %v10762_v42, %v23997_v36  ;;  %23998 = vst [vmem:[#allocation129_spill] sm:$0xff] %v21920_v41  ;;  %v7061_v56 = vpop.permute.xlu0 %7060  ;;  %15265 = vmatprep.subr.bf16.mxu1 %v21920_v41  ;;  %v24004_v5 = vmax.f32 %v24003_v4, 0.0  ;;  %v24005_v36 = vld [vmem:[#allocation122_spill] sm:$0xff]  ;;  %v7066_v4 = vpop.permute.xlu1 %7065 }
 0xbb6   :  { %23999 = vst [vmem:[#allocation98_spill] sm:$0xff] %v21924_v33  ;;  %v10906_v49 = vand.u32 4294901760, %v10802_v37  ;;  %v10804_v2 = vmul.f32 %v10767_v46, %v24001_v16  ;;  %v21929_v24 = vsub.f32 %v10801_v3, %v10908_v51  ;;  %v21938_v33 = vpack.c.bf16 %v10900_v27, %v10896_v20  ;;  %v24012_v20 = vld [vmem:[#allocation92_spill] sm:$0xff] }
 0xbb7   :  { %23995 = vst [vmem:[#allocation30_spill] sm:$0xff] %v21916_v17  ;;  %v11894_v42 = vand.u32 4294901760, %v10803_v62  ;;  %v10805_v34 = vmul.f32 %v10767_v46, %v24004_v5  ;;  %v24006_v17 = vmax.f32 %v24005_v36, 0.0  ;;  %v24009_v16 = vmax.f32 %v24008_v10, 0.0 }
 0xbb8   :  { %24002 = vst [vmem:[#allocation100_spill] sm:$0xff] %v21929_v24  ;;  %v21936_v38 = vsub.f32 %v10802_v37, %v10906_v49  ;;  %v10912_v39 = vand.u32 4294901760, %v10804_v2  ;;  %24007 = vst [vmem:[#allocation9_spill] sm:$0xff] %v21938_v33  ;;  %15267 = vmatpush1.bf16.msra.mxu1 %v21938_v33 }
 0xbb9   :  { %v10806_v0 = vmul.f32 %v10767_v46, %v24006_v17  ;;  %v10807_v52 = vmul.f32 %v10772_v28, %v24009_v16  ;;  %v21943_v7 = vpack.c.bf16 %v11894_v42, %v11891_v57  ;;  %v21945_v19 = vsub.f32 %v10803_v62, %v11894_v42  ;;  %v24010_v46 = vld [vmem:[#allocation84_spill] sm:$0xff] }
 0xbba   :  { %v10910_v41 = vand.u32 4294901760, %v10805_v34  ;;  %v21947_v5 = vsub.f32 %v10804_v2, %v10912_v39  ;;  %v24011_v37 = vmax.f32 %v24010_v46, 0.0  ;;  %v24013_v17 = vmax.f32 %v24012_v20, 0.0  ;;  %v7071_v46 = vpop.permute.xlu0 %7070 }
 0xbbb   :  { %v11897_v36 = vand.u32 4294901760, %v10806_v0  ;;  %v10916_v3 = vand.u32 4294901760, %v10807_v52  ;;  %v21956_v57 = vpack.c.bf16 %v10906_v49, %v10902_v31  ;;  %15413 = vmatprep.subr.bf16.mxu0 %v21943_v7  ;;  %v15626_v62 = vadd.f32 %v21326_v15, %v7056_v14 }
 0xbbc   :  { %v10808_v27 = vmul.f32 %v10772_v28, %v24011_v37  ;;  %v10809_v10 = vmul.f32 %v10772_v28, %v24013_v17  ;;  %v21954_v16 = vsub.f32 %v10805_v34, %v10910_v41  ;;  %15415 = vmatpush3.bf16.msra.mxu0 %v21943_v7  ;;  %v15627_v28 = vadd.f32 %v21328_v53, %v7056_v14 }
 0xbbd   :  { %v21961_v42 = vsub.f32 %v10806_v0, %v11897_v36  ;;  %v21964_v37 = vsub.f32 %v10807_v52, %v10916_v3  ;;  %15269 = vmatprep.subr.bf16.mxu1 %v21956_v57  ;;  %v15639_v49 = vadd.f32 %v21365_v26, %v7056_v14  ;;  %8901 = vst [vmem:[#allocation3] sm:$0xff] %v15626_v62 }
 0xbbe   :  { %v10914_v33 = vand.u32 4294901760, %v10808_v27  ;;  %v11900_v24 = vand.u32 4294901760, %v10809_v10  ;;  %v21969_v31 = vpack.c.bf16 %v10908_v51, %v10904_v22  ;;  %v15628_v20 = vadd.f32 %v21330_v18, %v7061_v56  ;;  %8902 = vst [vmem:[#allocation3 + $0x8] sm:$0xff] %v15627_v28  ;;  %v7076_v22 = vpop.permute.xlu1 %7075 }
 0xbbf   :  { %8903 = vst [vmem:[#allocation3 + $0x10] sm:$0xff] %v15639_v49  ;;  %v15629_v53 = vadd.f32 %v21332_v23, %v7061_v56  ;;  %v15638_v26 = vadd.f32 %v21363_v50, %v7061_v56  ;;  %v15630_v14 = vadd.f32 %v21334_v30, %v7066_v4  ;;  %v15631_v18 = vadd.f32 %v21336_v63, %v7066_v4  ;;  %v7081_v56 = vpop.permute.xlu0 %7080 }
 0xbc0   :  { %v21971_v15 = vsub.f32 %v10808_v27, %v10914_v33  ;;  %v21973_v0 = vpack.c.bf16 %v11900_v24, %v11897_v36  ;;  %v21975_v34 = vsub.f32 %v10809_v10, %v11900_v24  ;;  %15271 = vmatpush1.bf16.msra.mxu1 %v21969_v31  ;;  %v21982_v51 = vpack.c.bf16 %v10914_v33, %v10910_v41 }
 0xbc1   :  { %8904 = vst [vmem:[#allocation3 + $0x18] sm:$0xff] %v15628_v20  ;;  %v15641_v24 = vadd.f32 %v21376_v1, %v7066_v4  ;;  %v21988_v36 = vpack.c.bf16 %v10916_v3, %v10912_v39  ;;  %8905 = vst [vmem:[#allocation3 + $0x20] sm:$0xff] %v15629_v53  ;;  %v15632_v23 = vadd.f32 %v21338_v61, %v7071_v46  ;;  %v23100_v30 = vand.u32 4294901760, %v21770_v29 }
 0xbc2   :  { %15417 = vmatprep.subr.bf16.mxu0 %v21973_v0  ;;  %8906 = vst [vmem:[#allocation3 + $0x28] sm:$0xff] %v15638_v26  ;;  %15273 = vmatprep.subr.bf16.mxu1 %v21982_v51  ;;  %v15633_v50 = vadd.f32 %v21340_v59, %v7071_v46  ;;  %v15640_v33 = vadd.f32 %v21373_v58, %v7071_v46  ;;  %8907 = vst [vmem:[#allocation3 + $0x30] sm:$0xff] %v15630_v14  ;;  %v23099_v63 = vand.u32 4294901760, %v21761_v6 }
 0xbc3   :  { %24014 = vst [vmem:[#allocation13_spill] sm:$0xff] %v21988_v36  ;;  %15419 = vmatpush3.bf16.msra.mxu0 %v21973_v0  ;;  %8908 = vst [vmem:[#allocation3 + $0x38] sm:$0xff] %v15631_v18  ;;  %v23097_v1 = vand.u32 4294901760, %v21776_v21  ;;  %v23095_v39 = vand.u32 4294901760, %v21766_v44  ;;  %v15634_v41 = vadd.f32 %v21342_v13, %v7076_v22  ;;  %v11028_v61 = vsub.f32 %v21770_v29, %v23100_v30  ;;  %v24040_v30 = vld [vmem:[#allocation17_spill] sm:$0xff] }
 0xbc4   :  { %8909 = vst [vmem:[#allocation3 + $0x40] sm:$0xff] %v15641_v24  ;;  %15275 = vmatpush1.bf16.msra.mxu1 %v21988_v36  ;;  %8910 = vst [vmem:[#allocation3 + $0x48] sm:$0xff] %v15632_v23  ;;  %v15635_v59 = vadd.f32 %v21344_v48, %v7076_v22  ;;  %v15643_v58 = vadd.f32 %v21389_v12, %v7076_v22  ;;  %v24015_v3 = vand.u32 4294901760, %v21772_v8  ;;  %v24016_v48 = vand.u32 4294901760, %v21764_v40 }
 0xbc5   :  { %8911 = vst [vmem:[#allocation3 + $0x50] sm:$0xff] %v15633_v50  ;;  %8912 = vst [vmem:[#allocation3 + $0x58] sm:$0xff] %v15640_v33  ;;  %v11040_v13 = vsub.f32 %v21761_v6, %v23099_v63  ;;  %v12007_v27 = vsub.f32 %v21776_v21, %v23097_v1  ;;  %v12014_v17 = vsub.f32 %v21766_v44, %v23095_v39  ;;  %v11029_v10 = vand.u32 4294901760, %v11028_v61  ;;  %v24017_v33 = vld [vmem:[#allocation75_spill] sm:$0xff] }
 0xbc6   :  { %v11034_v4 = vsub.f32 %v21772_v8, %v24015_v3  ;;  %8913 = vst [vmem:[#allocation3 + $0x60] sm:$0xff] %v15634_v41  ;;  %v11046_v12 = vsub.f32 %v21764_v40, %v24016_v48  ;;  %14095 = vmatmul.mubr.f32.vlgmr.msra.gmra.mrb[66].mxu0 %v21734_v45  ;;  %8914 = vst [vmem:[#allocation3 + $0x68] sm:$0xff] %v15635_v59  ;;  %v15636_v46 = vadd.f32 %v21346_v54, %v7081_v56 }
 0xbc7   :  { %8915 = vst [vmem:[#allocation3 + $0x70] sm:$0xff] %v15643_v58  ;;  %v15637_v28 = vadd.f32 %v21348_v43, %v7081_v56  ;;  %14097 = vmatprep.mubr.f32.mxu0 %v21754_v9  ;;  %v11041_v49 = vand.u32 4294901760, %v11040_v13  ;;  %v12008_v20 = vand.u32 4294901760, %v12007_v27  ;;  %v12015_v53 = vand.u32 4294901760, %v12014_v17  ;;  %10964 = vmatmul.mubr.f32.vlgmr.msra.gmra.mrb[52].mxu1 %v21665_v60  ;;  %v24020_v58 = vld [vmem:[#allocation81_spill] sm:$0xff]  ;;  %v24023_v17 = vld [vmem:[#allocation31_spill] sm:$0xff] }
 0xbc8   :  { %v11035_v62 = vand.u32 4294901760, %v11034_v4  ;;  %v11047_v26 = vand.u32 4294901760, %v11046_v12  ;;  %v15642_v22 = vadd.f32 %v21384_v35, %v7081_v56  ;;  %8916 = vst [vmem:[#allocation3 + $0x78] sm:$0xff] %v15636_v46  ;;  %v23093_v14 = vand.u32 4294901760, %v21803_v47  ;;  %10969 = vmatprep.mubr.f32.mxu1 %v23218_v32  ;;  %v24018_v56 = vld [vmem:[#allocation49_spill] sm:$0xff]  ;;  %v24021_v4 = vld [vmem:[#allocation71_spill] sm:$0xff] }
 0xbc9   :  { %8917 = vst [vmem:[#allocation3 + $0x80] sm:$0xff] %v15637_v28  ;;  %v23091_v18 = vand.u32 4294901760, %v21813_v55  ;;  %v23090_v54 = vand.u32 4294901760, %v21808_v25  ;;  %v15276_v43 = vpack.c.bf16 %v11041_v49, %v11029_v10  ;;  %v15420_v24 = vpack.c.bf16 %v12015_v53, %v12008_v20  ;;  %v24024_v12 = vld [vmem:[#allocation76_spill] sm:$0xff] }
 0xbca   :  { %v15278_v23 = vpack.c.bf16 %v11047_v26, %v11035_v62  ;;  %v23088_v50 = vand.u32 4294901760, %v21819_v11  ;;  %14098 = vmatmul.mubr.f32.gmra.mrb[68].mxu0 %v24017_v33  ;;  %8918 = vst [vmem:[#allocation3 + $0x88] sm:$0xff] %v15642_v22  ;;  %v11052_v35 = vsub.f32 %v21803_v47, %v23093_v14  ;;  %v24019_v61 = vand.u32 4294901760, %v24018_v56 }
 0xbcb   :  { %v11064_v60 = vsub.f32 %v21813_v55, %v23091_v18  ;;  %v12021_v41 = vsub.f32 %v21808_v25, %v23090_v54  ;;  %14100 = vmatprep.mubr.f32.mxu0 %v24020_v58  ;;  %15277 = vmatprep.subr.bf16.mxu1 %v15276_v43  ;;  %v24022_v13 = vand.u32 4294901760, %v24021_v4  ;;  %v23087_v48 = vand.u32 4294901760, %v24023_v17  ;;  %v24025_v43 = vld [vmem:[#allocation95_spill] sm:$0xff]  ;;  %v24031_v54 = vld [vmem:[#allocation73_spill] sm:$0xff] }
 0xbcc   :  { %v11058_v59 = vsub.f32 %v24018_v56, %v24019_v61  ;;  %15421 = vmatprep.subr.bf16.mxu0 %v15420_v24  ;;  %v12028_v3 = vsub.f32 %v21819_v11, %v23088_v50  ;;  %v23089_v10 = vand.u32 4294901760, %v24024_v12  ;;  %15279 = vmatpush1.bf16.msra.mxu1 %v15278_v23  ;;  %v11053_v62 = vand.u32 4294901760, %v11052_v35  ;;  %v24028_v61 = vld [vmem:[#allocation23_spill] sm:$0xff] }
 0xbcd   :  { %v11070_v27 = vsub.f32 %v24021_v4, %v24022_v13  ;;  %15423 = vmatpush3.bf16.msra.mxu0 %v15420_v24  ;;  %v11065_v46 = vand.u32 4294901760, %v11064_v60  ;;  %v12022_v28 = vand.u32 4294901760, %v12021_v41  ;;  %10975 = vmatmul.mubr.f32.gmra.mrb[54].mxu1 %v21734_v45  ;;  %v11076_v26 = vsub.f32 %v24023_v17, %v23087_v48  ;;  %v24026_v24 = vld [vmem:[#allocation63_spill] sm:$0xff]  ;;  %v24027_v60 = vld [vmem:[#allocation10_spill] sm:$0xff] }
 0xbce   :  { %v11059_v49 = vand.u32 4294901760, %v11058_v59  ;;  %v12029_v20 = vand.u32 4294901760, %v12028_v3  ;;  %v11088_v22 = vsub.f32 %v24024_v12, %v23089_v10  ;;  %14101 = vmatmul.mubr.f32.gmra.mrb[70].mxu0 %v24025_v43  ;;  %v23092_v35 = vand.u32 4294901760, %v24026_v24  ;;  %10980 = vmatprep.mubr.f32.mxu1 %v23218_v32  ;;  %v24030_v3 = vld [vmem:[#allocation46_spill] sm:$0xff] }
 0xbcf   :  { %v11071_v53 = vand.u32 4294901760, %v11070_v27  ;;  %v15280_v23 = vpack.c.bf16 %v11065_v46, %v11053_v62  ;;  %v23094_v41 = vand.u32 4294901760, %v24027_v60  ;;  %v24029_v45 = vand.u32 4294901760, %v24028_v61  ;;  %14127 = vmatprep.mubr.f32.mxu0 %v24030_v3 }
 0xbd0   :  { %v15424_v13 = vpack.c.bf16 %v12029_v20, %v12022_v28  ;;  %v11077_v48 = vand.u32 4294901760, %v11076_v26  ;;  %v11089_v50 = vand.u32 4294901760, %v11088_v22  ;;  %v12035_v62 = vsub.f32 %v24026_v24, %v23092_v35  ;;  %v24035_v22 = vld [vmem:[#allocation127_spill] sm:$0xff] }
 0xbd1   :  { %v11082_v59 = vsub.f32 %v24028_v61, %v24029_v45  ;;  %v15282_v27 = vpack.c.bf16 %v11071_v53, %v11059_v49  ;;  %15281 = vmatprep.subr.bf16.mxu1 %v15280_v23  ;;  %v12042_v46 = vsub.f32 %v24027_v60, %v23094_v41  ;;  %v24032_v18 = vand.u32 4294901760, %v24031_v54  ;;  %v24033_v49 = vld [vmem:[#allocation56_spill] sm:$0xff]  ;;  %v24034_v53 = vld [vmem:[#allocation65_spill] sm:$0xff]  ;;  %10986 = vmatmul.mubr.f32.gmra.mrb[56].mxu1 %v21754_v9 }
 0xbd2   :  { %15425 = vmatprep.subr.bf16.mxu0 %v15424_v13  ;;  %v15284_v28 = vpack.c.bf16 %v11089_v50, %v11077_v48  ;;  %v23096_v20 = vand.u32 4294901760, %v24033_v49  ;;  %v23098_v26 = vand.u32 4294901760, %v24034_v53  ;;  %v23101_v23 = vand.u32 4294901760, %v24035_v22  ;;  %10991 = vmatprep.mubr.f32.mxu1 %v23218_v32 }
 0xbd3   :  { %v11083_v10 = vand.u32 4294901760, %v11082_v59  ;;  %v11094_v45 = vsub.f32 %v24031_v54, %v24032_v18  ;;  %15283 = vmatpush1.bf16.msra.mxu1 %v15282_v27  ;;  %15427 = vmatpush3.bf16.msra.mxu0 %v15424_v13  ;;  %v12036_v35 = vand.u32 4294901760, %v12035_v62  ;;  %v12043_v14 = vand.u32 4294901760, %v12042_v46  ;;  %v24036_v59 = vld [vmem:[#allocation134_spill] sm:$0xff] }
 0xbd4   :  { %v23102_v39 = vand.u32 4294901760, %v24036_v59  ;;  %15285 = vmatprep.subr.bf16.mxu1 %v15284_v28  ;;  %v11100_v18 = vsub.f32 %v24033_v49, %v23096_v20  ;;  %v11112_v50 = vsub.f32 %v24034_v53, %v23098_v26  ;;  %v12049_v48 = vsub.f32 %v24035_v22, %v23101_v23  ;;  %v24037_v13 = vld [vmem:[#allocation30_spill] sm:$0xff] }
 0xbd5   :  { %v11095_v41 = vand.u32 4294901760, %v11094_v45  ;;  %v23104_v9 = vand.u32 4294901760, %v24037_v13  ;;  %v15428_v27 = vpack.c.bf16 %v12043_v14, %v12036_v35  ;;  %v24038_v45 = vld [vmem:[#allocation51_spill] sm:$0xff]  ;;  %v24041_v52 = vand.u32 4294901760, %v24040_v30  ;;  %10997 = vmatmul.mubr.f32.gmra.mrb[58].mxu1 %v24017_v33 }
 0xbd6   :  { %v12056_v46 = vsub.f32 %v24036_v59, %v23102_v39  ;;  %v24039_v28 = vand.u32 4294901760, %v24038_v45  ;;  %v11101_v1 = vand.u32 4294901760, %v11100_v18  ;;  %v11113_v26 = vand.u32 4294901760, %v11112_v50  ;;  %v24042_v50 = vld [vmem:[#allocation98_spill] sm:$0xff]  ;;  %11002 = vmatprep.mubr.f32.mxu1 %v23218_v32 }
 0xbd7   :  { %v15286_v62 = vpack.c.bf16 %v11095_v41, %v11083_v10  ;;  %v12050_v63 = vand.u32 4294901760, %v12049_v48  ;;  %v11118_v23 = vsub.f32 %v24040_v30, %v24041_v52  ;;  %15429 = vmatprep.subr.bf16.mxu0 %v15428_v27  ;;  %v11124_v10 = vsub.f32 %v24037_v13, %v23104_v9 }
 0xbd8   :  { %v11106_v20 = vsub.f32 %v24038_v45, %v24039_v28  ;;  %v12057_v2 = vand.u32 4294901760, %v12056_v46  ;;  %v23103_v35 = vand.u32 4294901760, %v21936_v38  ;;  %15431 = vmatpush3.bf16.msra.mxu0 %v15428_v27  ;;  %v15288_v41 = vpack.c.bf16 %v11113_v26, %v11101_v1 }
 0xbd9   :  { %15287 = vmatpush1.bf16.msra.mxu1 %v15286_v62  ;;  %v11119_v18 = vand.u32 4294901760, %v11118_v23  ;;  %v23105_v48 = vand.u32 4294901760, %v24042_v50  ;;  %v12069_v28 = vand.u32 4294901760, %v21945_v19  ;;  %v11125_v39 = vand.u32 4294901760, %v11124_v10  ;;  %v24043_v62 = vld [vmem:[#allocation104_spill] sm:$0xff] }
 0xbda   :  { %v11107_v14 = vand.u32 4294901760, %v11106_v20  ;;  %v15432_v52 = vpack.c.bf16 %v12057_v2, %v12050_v63  ;;  %v11136_v20 = vsub.f32 %v21936_v38, %v23103_v35  ;;  %v24044_v46 = vand.u32 4294901760, %v24043_v62  ;;  %15289 = vmatprep.subr.bf16.mxu1 %v15288_v41  ;;  %v24045_v63 = vld [vmem:[#allocation100_spill] sm:$0xff]  ;;  %11008 = vmatmul.mubr.f32.gmra.mrb[60].mxu1 %v24020_v58 }
 0xbdb   :  { %v12063_v33 = vsub.f32 %v24042_v50, %v23105_v48  ;;  %v12070_v2 = vsub.f32 %v21945_v19, %v12069_v28  ;;  %v24046_v26 = vand.u32 4294901760, %v24045_v63  ;;  %v23110_v9 = vand.u32 4294901760, %v21954_v16  ;;  %11013 = vmatprep.mubr.f32.mxu1 %v23218_v32 }
 0xbdc   :  { %v11130_v27 = vsub.f32 %v24043_v62, %v24044_v46  ;;  %v15290_v1 = vpack.c.bf16 %v11119_v18, %v11107_v14  ;;  %15433 = vmatprep.subr.bf16.mxu0 %v15432_v52  ;;  %v11137_v10 = vand.u32 4294901760, %v11136_v20  ;;  %v23108_v41 = vand.u32 4294901760, %v21971_v15 }
 0xbdd   :  { %v11142_v23 = vsub.f32 %v24045_v63, %v24046_v26  ;;  %15435 = vmatpush3.bf16.msra.mxu0 %v15432_v52  ;;  %v12064_v14 = vand.u32 4294901760, %v12063_v33  ;;  %v12071_v18 = vand.u32 4294901760, %v12070_v2  ;;  %v23109_v48 = vand.u32 4294901760, %v21961_v42 }
 0xbde   :  { %v11131_v35 = vand.u32 4294901760, %v11130_v27  ;;  %15291 = vmatpush1.bf16.msra.mxu1 %v15290_v1  ;;  %v15292_v36 = vpack.c.bf16 %v11137_v10, %v11125_v39  ;;  %v11148_v26 = vsub.f32 %v21954_v16, %v23110_v9  ;;  %v11160_v20 = vsub.f32 %v21971_v15, %v23108_v41 }
 0xbdf   :  { %v11143_v46 = vand.u32 4294901760, %v11142_v23  ;;  %v12083_v27 = vand.u32 4294901760, %v21975_v34  ;;  %v15436_v1 = vpack.c.bf16 %v12071_v18, %v12064_v14  ;;  %v12077_v33 = vsub.f32 %v21961_v42, %v23109_v48  ;;  %11019 = vmatmul.mubr.f32.gmra.mrb[62].mxu1 %v24025_v43 }
 0xbe0   :  { %v24047_v39 = vand.u32 4294901760, %v21947_v5  ;;  %15293 = vmatprep.subr.bf16.mxu1 %v15292_v36  ;;  %v11149_v2 = vand.u32 4294901760, %v11148_v26  ;;  %v11161_v23 = vand.u32 4294901760, %v11160_v20  ;;  %v24048_v41 = vand.u32 4294901760, %v21964_v37  ;;  %11209 = vmatprep.mubr.f32.mxu1 %v23218_v32 }
 0xbe1   :  { %v15294_v52 = vpack.c.bf16 %v11143_v46, %v11131_v35  ;;  %v12084_v10 = vsub.f32 %v21975_v34, %v12083_v27  ;;  %15437 = vmatprep.subr.bf16.mxu0 %v15436_v1  ;;  %v12078_v35 = vand.u32 4294901760, %v12077_v33  ;;  %v15300_v20 = vpack.c.bf16 %v21761_v6, %v21770_v29 }
 0xbe2   :  { %v11154_v58 = vsub.f32 %v21947_v5, %v24047_v39  ;;  %v11166_v14 = vsub.f32 %v21964_v37, %v24048_v41  ;;  %15439 = vmatpush3.bf16.msra.mxu0 %v15436_v1  ;;  %v15296_v46 = vpack.c.bf16 %v11161_v23, %v11149_v2  ;;  %v15444_v41 = vpack.c.bf16 %v21766_v44, %v21776_v21 }
 0xbe3   :  { %15295 = vmatpush1.bf16.msra.mxu1 %v15294_v52  ;;  %v12085_v48 = vand.u32 4294901760, %v12084_v10  ;;  %v15302_v1 = vpack.c.bf16 %v21764_v40, %v21772_v8  ;;  %v15304_v43 = vpack.c.bf16 %v21813_v55, %v21803_v47  ;;  %v24049_v52 = vand.u32 4294901760, %v21770_v29 }
 0xbe4   :  { %v11155_v18 = vand.u32 4294901760, %v11154_v58  ;;  %v11167_v9 = vand.u32 4294901760, %v11166_v14  ;;  %15297 = vmatprep.subr.bf16.mxu1 %v15296_v46  ;;  %v24050_v33 = vand.u32 4294901760, %v21761_v6  ;;  %v24051_v58 = vand.u32 4294901760, %v21776_v21 }
 0xbe5   :  { %v15440_v36 = vpack.c.bf16 %v12085_v48, %v12078_v35  ;;  %v15448_v48 = vpack.c.bf16 %v21819_v11, %v21808_v25  ;;  %v24052_v2 = vand.u32 4294901760, %v21766_v44  ;;  %v24053_v10 = vand.u32 4294901760, %v21772_v8 }
 0xbe6   :  { %v15298_v26 = vpack.c.bf16 %v11167_v9, %v11155_v18  ;;  %v15306_v9 = vpack.c.bf16 %v24021_v4, %v24018_v56  ;;  %v22166_v39 = vpack.c.bf16 %v24050_v33, %v24049_v52  ;;  %v24054_v14 = vand.u32 4294901760, %v21764_v40 }
 0xbe7   :  { %15441 = vmatprep.subr.bf16.mxu0 %v15440_v36  ;;  %v22172_v23 = vpack.c.bf16 %v24052_v2, %v24051_v58  ;;  %v24055_v18 = vand.u32 4294901760, %v21803_v47  ;;  %v24056_v29 = vand.u32 4294901760, %v21813_v55  ;;  %v24057_v46 = vand.u32 4294901760, %v21808_v25 }
 0xbe8   :  { %15299 = vmatpush1.bf16.msra.mxu1 %v15298_v26  ;;  %15443 = vmatpush3.bf16.msra.mxu0 %v15440_v36  ;;  %v22178_v35 = vpack.c.bf16 %v24054_v14, %v24053_v10  ;;  %v24058_v21 = vand.u32 4294901760, %v21819_v11  ;;  %v24059_v44 = vand.u32 4294901760, %v24018_v56  ;;  %v24060_v40 = vand.u32 4294901760, %v24021_v4  ;;  %v24067_v4 = vld [vmem:[#allocation48_spill] sm:$0xff] }
 0xbe9   :  { %15301 = vmatprep.subr.bf16.mxu1 %v15300_v20  ;;  %15445 = vmatprep.subr.bf16.mxu0 %v15444_v41  ;;  %v22184_v6 = vpack.c.bf16 %v24056_v29, %v24055_v18  ;;  %v24061_v47 = vand.u32 4294901760, %v24023_v17  ;;  %v24062_v55 = vand.u32 4294901760, %v24024_v12  ;;  %v24063_v25 = vand.u32 4294901760, %v24026_v24 }
 0xbea   :  { %v22190_v36 = vpack.c.bf16 %v24058_v21, %v24057_v46  ;;  %v22197_v8 = vpack.c.bf16 %v24060_v40, %v24059_v44  ;;  %v24064_v11 = vand.u32 4294901760, %v24027_v60  ;;  %v24065_v52 = vand.u32 4294901760, %v24028_v61 }
 0xbeb   :  { %11211 = vmatmul.mubr.f32.vlgmr.msra.gmra.mrb[52].mxu1 %v24030_v3  ;;  %v22203_v26 = vpack.c.bf16 %v24062_v55, %v24061_v47  ;;  %v24066_v56 = vand.u32 4294901760, %v24031_v54  ;;  %14128 = vmatmul.mubr.f32.vlgmr.msra.gmra.mrb[66].mxu0 %v24067_v4  ;;  %v24068_v58 = vand.u32 4294901760, %v24033_v49  ;;  %v24069_v2 = vand.u32 4294901760, %v24034_v53 }
 0xbec   :  { %v22209_v20 = vpack.c.bf16 %v24064_v11, %v24063_v25  ;;  %15303 = vmatpush1.bf16.msra.mxu1 %v15302_v1  ;;  %v24070_v14 = vand.u32 4294901760, %v24035_v22  ;;  %v24071_v18 = vand.u32 4294901760, %v24036_v59  ;;  %v24072_v46 = vand.u32 4294901760, %v24038_v45  ;;  %15447 = vmatpush3.bf16.msra.mxu0 %v15444_v41 }
 0xbed   :  { %v22215_v33 = vpack.c.bf16 %v24066_v56, %v24065_v52  ;;  %v22222_v10 = vpack.c.bf16 %v24069_v2, %v24068_v58  ;;  %v24073_v21 = vand.u32 4294901760, %v24040_v30  ;;  %15305 = vmatprep.subr.bf16.mxu1 %v15304_v43  ;;  %v24074_v1 = vand.u32 4294901760, %v24037_v13  ;;  %15449 = vmatprep.subr.bf16.mxu0 %v15448_v48 }
 0xbee   :  { %v22228_v29 = vpack.c.bf16 %v24071_v18, %v24070_v14  ;;  %v24075_v40 = vand.u32 4294901760, %v21936_v38  ;;  %v24076_v55 = vand.u32 4294901760, %v24042_v50  ;;  %v24077_v11 = vand.u32 4294901760, %v24043_v62  ;;  %11216 = vmatprep.mubr.f32.mxu1 %v23218_v32 }
 0xbef   :  { %v22234_v44 = vpack.c.bf16 %v24073_v21, %v24072_v46  ;;  %v24078_v52 = vand.u32 4294901760, %v24045_v63  ;;  %v24079_v41 = vand.u32 4294901760, %v21954_v16  ;;  %v24080_v43 = vand.u32 4294901760, %v21971_v15  ;;  %11218 = vmatmul.mubr.f32.gmra.mrb[54].mxu1 %v24067_v4 }
 0xbf0   :  { %v22240_v47 = vpack.c.bf16 %v24075_v40, %v24074_v1  ;;  %v22246_v25 = vpack.c.bf16 %v12069_v28, %v24076_v55  ;;  %v24081_v2 = vand.u32 4294901760, %v21961_v42  ;;  %v24082_v28 = vand.u32 4294901760, %v21947_v5  ;;  %v24084_v1 = vld [vmem:[#allocation29_spill] sm:$0xff]  ;;  %15307 = vmatpush1.bf16.msra.mxu1 %v15306_v9  ;;  %11223 = vmatprep.mubr.f32.mxu1 %v23218_v32  ;;  %v24085_v55 = vld [vmem:[#allocation68_spill] sm:$0xff] }
 0xbf1   :  { %v22252_v56 = vpack.c.bf16 %v24078_v52, %v24077_v11  ;;  %v22259_v58 = vpack.c.bf16 %v24080_v43, %v24079_v41  ;;  %v24083_v18 = vand.u32 4294901760, %v21964_v37  ;;  %v15308_v21 = vpack.c.bf16 %v24024_v12, %v24023_v17  ;;  %14130 = vmatprep.mubr.f32.mxu0 %v24084_v1  ;;  %15451 = vmatpush3.bf16.msra.mxu0 %v15448_v48  ;;  %v24086_v12 = vld [vmem:[#allocation58_spill] sm:$0xff]  ;;  %v24101_v48 = vld [vmem:[#allocation45_spill] sm:$0xff]  ;;  %v24103_v11 = vld [vmem:[#allocation79_spill] sm:$0xff] }
 0xbf2   :  { %v22263_v14 = vpack.c.bf16 %v12083_v27, %v24081_v2  ;;  %v15452_v40 = vpack.c.bf16 %v24027_v60, %v24026_v24  ;;  %v15310_v27 = vpack.c.bf16 %v24031_v54, %v24028_v61  ;;  %14131 = vmatmul.mubr.f32.gmra.mrb[68].mxu0 %v24085_v55  ;;  %v15312_v17 = vpack.c.bf16 %v24034_v53, %v24033_v49  ;;  %v24087_v60 = vld [vmem:[#allocation33_spill] sm:$0xff]  ;;  %v24088_v49 = vld [vmem:[#allocation86_spill] sm:$0xff]  ;;  %v24104_v52 = vld [vmem:[#allocation43_spill] sm:$0xff] }
 0xbf3   :  { %v22269_v46 = vpack.c.bf16 %v24083_v18, %v24082_v28  ;;  %15309 = vmatprep.subr.bf16.mxu1 %v15308_v21  ;;  %11225 = vmatmul.mubr.f32.gmra.mrb[56].mxu1 %v24084_v1  ;;  %v15456_v24 = vpack.c.bf16 %v24036_v59, %v24035_v22  ;;  %v15314_v54 = vpack.c.bf16 %v24040_v30, %v24038_v45  ;;  %v24089_v59 = vld [vmem:[#allocation44_spill] sm:$0xff]  ;;  %v24097_v45 = vld [vmem:[#allocation82_spill] sm:$0xff]  ;;  %v24102_v9 = vld [vmem:[#allocation129_spill] sm:$0xff] }
 0xbf4   :  { %15453 = vmatprep.subr.bf16.mxu0 %v15452_v40  ;;  %14133 = vmatprep.mubr.f32.mxu0 %v24086_v12  ;;  %v15316_v61 = vpack.c.bf16 %v21936_v38, %v24037_v13  ;;  %v15460_v53 = vpack.c.bf16 %v21945_v19, %v24042_v50  ;;  %v15318_v30 = vpack.c.bf16 %v24045_v63, %v24043_v62  ;;  %v24096_v13 = vld [vmem:[#allocation25_spill] sm:$0xff]  ;;  %v24098_v50 = vld [vmem:[#allocation102_spill] sm:$0xff]  ;;  %v24105_v41 = vld [vmem:[#allocation59_spill] sm:$0xff] }
 0xbf5   :  { %15311 = vmatpush1.bf16.msra.mxu1 %v15310_v27  ;;  %11230 = vmatprep.mubr.f32.mxu1 %v23218_v32  ;;  %v15320_v22 = vpack.c.bf16 %v21971_v15, %v21954_v16  ;;  %v15464_v38 = vpack.c.bf16 %v21975_v34, %v21961_v42  ;;  %v15322_v19 = vpack.c.bf16 %v21964_v37, %v21947_v5  ;;  %v24090_v16 = vld [vmem:[#allocation47_spill] sm:$0xff]  ;;  %v24091_v42 = vld [vmem:[#allocation80_spill] sm:$0xff]  ;;  %v24092_v15 = vld [vmem:[#allocation133_spill] sm:$0xff] }
 0xbf6   :  { %15455 = vmatpush3.bf16.msra.mxu0 %v15452_v40  ;;  %15313 = vmatprep.subr.bf16.mxu1 %v15312_v17  ;;  %v24093_v34 = vld [vmem:[#allocation28_spill] sm:$0xff]  ;;  %v24094_v5 = vld [vmem:[#allocation83_spill] sm:$0xff]  ;;  %v24099_v62 = vld [vmem:[#allocation62_spill] sm:$0xff] }
 0xbf7   :  { %15457 = vmatprep.subr.bf16.mxu0 %v15456_v24  ;;  %14134 = vmatmul.mubr.f32.gmra.mrb[70].mxu0 %v24087_v60  ;;  %v24095_v37 = vld [vmem:[#allocation123_spill] sm:$0xff]  ;;  %v24100_v63 = vld [vmem:[#allocation26_spill] sm:$0xff]  ;;  %v24106_v43 = vld [vmem:[#allocation9_spill] sm:$0xff] }
 0xbf8   :  { %11232 = vmatmul.mubr.f32.gmra.mrb[58].mxu1 %v24085_v55  ;;  %14160 = vmatprep.mubr.f32.mxu0 %v24088_v49  ;;  %v24107_v2 = vld [vmem:[#allocation13_spill] sm:$0xff]  ;;  %v24108_v28 = vld [vmem:[#allocation135_spill] sm:$0xff]  ;;  %v24109_v18 = vld [vmem:[#allocation78_spill] sm:$0xff] }
 0xbf9   :  { %15315 = vmatpush1.bf16.msra.mxu1 %v15314_v54  ;;  %11237 = vmatprep.mubr.f32.mxu1 %v23218_v32 }
 0xbfa   :  { %15459 = vmatpush3.bf16.msra.mxu0 %v15456_v24  ;;  %15317 = vmatprep.subr.bf16.mxu1 %v15316_v61 }
 0xbfb   :  { %15461 = vmatprep.subr.bf16.mxu0 %v15460_v53 }
 0xbfc   :  { %11239 = vmatmul.mubr.f32.gmra.mrb[60].mxu1 %v24086_v12 }
 0xbfd   :  { %15319 = vmatpush1.bf16.msra.mxu1 %v15318_v30  ;;  %11244 = vmatprep.mubr.f32.mxu1 %v23218_v32 }
 0xbfe   :  { %15463 = vmatpush3.bf16.msra.mxu0 %v15460_v53  ;;  %15321 = vmatprep.subr.bf16.mxu1 %v15320_v22 }
 0xbff   :  { %15465 = vmatprep.subr.bf16.mxu0 %v15464_v38 }
 0xc00   :  { %11246 = vmatmul.mubr.f32.gmra.mrb[62].mxu1 %v24087_v60 }
 0xc01   :  { %15323 = vmatpush1.bf16.msra.mxu1 %v15322_v19  ;;  %11364 = vmatprep.mubr.f32.mxu1 %v23218_v32 }
 0xc02   :  { %15467 = vmatpush3.bf16.msra.mxu0 %v15464_v38  ;;  %15325 = vmatprep.subr.bf16.mxu1 %v24089_v59 }
 0xc03   :  { %15469 = vmatprep.subr.bf16.mxu0 %v24090_v16 }
 0xc04   :  { %11367 = vmatmul.mubr.f32.vlgmr.msra.gmra.mrb[52].mxu1 %v24088_v49 }
 0xc05   :  { %15327 = vmatpush1.bf16.msra.mxu1 %v24091_v42  ;;  %14161 = vmatmul.mubr.f32.vlgmr.msra.gmra.mrb[66].mxu0 %v24092_v15 }
 0xc06   :  { %15471 = vmatpush3.bf16.msra.mxu0 %v24090_v16  ;;  %15329 = vmatprep.subr.bf16.mxu1 %v24093_v34 }
 0xc07   :  { %15473 = vmatprep.subr.bf16.mxu0 %v24094_v5  ;;  %11372 = vmatprep.mubr.f32.mxu1 %v23218_v32 }
 0xc08   :  { %11375 = vmatmul.mubr.f32.gmra.mrb[54].mxu1 %v24092_v15  ;;  %14163 = vmatprep.mubr.f32.mxu0 %v24095_v37 }
 0xc09   :  { %15331 = vmatpush1.bf16.msra.mxu1 %v24096_v13  ;;  %11380 = vmatprep.mubr.f32.mxu1 %v23218_v32 }
 0xc0a   :  { %15475 = vmatpush3.bf16.msra.mxu0 %v24094_v5  ;;  %15333 = vmatprep.subr.bf16.mxu1 %v24097_v45 }
 0xc0b   :  { %15477 = vmatprep.subr.bf16.mxu0 %v24098_v50  ;;  %14164 = vmatmul.mubr.f32.gmra.mrb[68].mxu0 %v24099_v62 }
 0xc0c   :  { %11383 = vmatmul.mubr.f32.gmra.mrb[56].mxu1 %v24095_v37  ;;  %14166 = vmatprep.mubr.f32.mxu0 %v24100_v63 }
 0xc0d   :  { %15335 = vmatpush1.bf16.msra.mxu1 %v24101_v48  ;;  %11388 = vmatprep.mubr.f32.mxu1 %v23218_v32 }
 0xc0e   :  { %15479 = vmatpush3.bf16.msra.mxu0 %v24098_v50  ;;  %15337 = vmatprep.subr.bf16.mxu1 %v24102_v9 }
 0xc0f   :  { %15481 = vmatprep.subr.bf16.mxu0 %v24103_v11  ;;  %14167 = vmatmul.mubr.f32.gmra.mrb[70].mxu0 %v24104_v52 }
 0xc10   :  { %11391 = vmatmul.mubr.f32.gmra.mrb[58].mxu1 %v24099_v62  ;;  %14193 = vmatprep.mubr.f32.mxu0 %v24105_v41 }
 0xc11   :  { %15339 = vmatpush1.bf16.msra.mxu1 %v24106_v43  ;;  %11396 = vmatprep.mubr.f32.mxu1 %v23218_v32 }
 0xc12   :  { %15483 = vmatpush3.bf16.msra.mxu0 %v24103_v11  ;;  %15341 = vmatprep.subr.bf16.mxu1 %v21956_v57 }
 0xc13   :  { %15485 = vmatprep.subr.bf16.mxu0 %v21943_v7 }
 0xc14   :  { %11399 = vmatmul.mubr.f32.gmra.mrb[60].mxu1 %v24100_v63 }
 0xc15   :  { %15343 = vmatpush1.bf16.msra.mxu1 %v21969_v31  ;;  %11404 = vmatprep.mubr.f32.mxu1 %v23218_v32 }
 0xc16   :  { %15487 = vmatpush3.bf16.msra.mxu0 %v21943_v7  ;;  %15345 = vmatprep.subr.bf16.mxu1 %v21982_v51 }
 0xc17   :  { %15489 = vmatprep.subr.bf16.mxu0 %v21973_v0 }
 0xc18   :  { %11407 = vmatmul.mubr.f32.gmra.mrb[62].mxu1 %v24104_v52 }
 0xc19   :  { %15347 = vmatpush1.bf16.msra.mxu1 %v24107_v2  ;;  %11501 = vmatprep.mubr.f32.mxu1 %v23218_v32 }
 0xc1a   :  { %15491 = vmatpush3.bf16.msra.mxu0 %v21973_v0  ;;  %15349 = vmatprep.subr.bf16.mxu1 %v22166_v39  ;;  %v24110_v39 = vld [vmem:[#allocation12_spill] sm:$0xff] }
 0xc1b   :  { %15493 = vmatprep.subr.bf16.mxu0 %v22172_v23 }
 0xc1c   :  { %11505 = vmatmul.mubr.f32.vlgmr.msra.gmra.mrb[52].mxu1 %v24105_v41 }
 0xc1d   :  { %15351 = vmatpush1.bf16.msra.mxu1 %v22178_v35  ;;  %14194 = vmatmul.mubr.f32.vlgmr.msra.gmra.mrb[66].mxu0 %v24108_v28  ;;  %v24112_v35 = vld [vmem:[#allocation60_spill] sm:$0xff] }
 0xc1e   :  { %15495 = vmatpush3.bf16.msra.mxu0 %v22172_v23  ;;  %15353 = vmatprep.subr.bf16.mxu1 %v22184_v6  ;;  %v24111_v23 = vld [vmem:[#allocation24_spill] sm:$0xff] }
 0xc1f   :  { %15497 = vmatprep.subr.bf16.mxu0 %v22190_v36  ;;  %11510 = vmatprep.mubr.f32.mxu1 %v23218_v32 }
 0xc20   :  { %11514 = vmatmul.mubr.f32.gmra.mrb[54].mxu1 %v24108_v28  ;;  %14196 = vmatprep.mubr.f32.mxu0 %v24109_v18 }
 0xc21   :  { %15355 = vmatpush1.bf16.msra.mxu1 %v22197_v8  ;;  %11519 = vmatprep.mubr.f32.mxu1 %v23218_v32 }
 0xc22   :  { %15499 = vmatpush3.bf16.msra.mxu0 %v22190_v36  ;;  %15357 = vmatprep.subr.bf16.mxu1 %v22203_v26 }
 0xc23   :  { %15501 = vmatprep.subr.bf16.mxu0 %v22209_v20  ;;  %14197 = vmatmul.mubr.f32.gmra.mrb[68].mxu0 %v24110_v39 }
 0xc24   :  { %11523 = vmatmul.mubr.f32.gmra.mrb[56].mxu1 %v24109_v18  ;;  %14199 = vmatprep.mubr.f32.mxu0 %v24111_v23 }
 0xc25   :  { %15359 = vmatpush1.bf16.msra.mxu1 %v22215_v33  ;;  %11528 = vmatprep.mubr.f32.mxu1 %v23218_v32 }
 0xc26   :  { %15503 = vmatpush3.bf16.msra.mxu0 %v22209_v20  ;;  %15361 = vmatprep.subr.bf16.mxu1 %v22222_v10 }
 0xc27   :  { %15505 = vmatprep.subr.bf16.mxu0 %v22228_v29  ;;  %14200 = vmatmul.mubr.f32.gmra.mrb[70].mxu0 %v24112_v35 }
 0xc28   :  { %11532 = vmatmul.mubr.f32.gmra.mrb[58].mxu1 %v24110_v39  ;;  %14226 = vmatprep.mubr.f32.mxu0 %v24030_v3 }
 0xc29   :  { %15363 = vmatpush1.bf16.msra.mxu1 %v22234_v44  ;;  %11537 = vmatprep.mubr.f32.mxu1 %v23218_v32 }
 0xc2a   :  { %15507 = vmatpush3.bf16.msra.mxu0 %v22228_v29  ;;  %15365 = vmatprep.subr.bf16.mxu1 %v22240_v47 }
 0xc2b   :  { %15509 = vmatprep.subr.bf16.mxu0 %v22246_v25 }
 0xc2c   :  { %11541 = vmatmul.mubr.f32.gmra.mrb[60].mxu1 %v24111_v23 }
 0xc2d   :  { %15367 = vmatpush1.bf16.msra.mxu1 %v22252_v56  ;;  %11546 = vmatprep.mubr.f32.mxu1 %v23218_v32 }
 0xc2e   :  { %15511 = vmatpush3.bf16.msra.mxu0 %v22246_v25  ;;  %15369 = vmatprep.subr.bf16.mxu1 %v22259_v58 }
 0xc2f   :  { %15513 = vmatprep.subr.bf16.mxu0 %v22263_v14 }
 0xc30   :  { %11550 = vmatmul.mubr.f32.gmra.mrb[62].mxu1 %v24112_v35 }
 0xc31   :  { %15371 = vmatpush1.bf16.msra.mxu1 %v22269_v46  ;;  %11692 = vmatprep.mubr.f32.mxu1 %v23218_v32 }
 0xc32   :  { %15515 = vmatpush3.bf16.msra.mxu0 %v22263_v14  ;;  %15373 = vmatprep.subr.bf16.mxu1 %v24089_v59 }
 0xc33   :  { %15517 = vmatprep.subr.bf16.mxu0 %v24090_v16 }
 0xc34   :  { %11694 = vmatmul.mubr.f32.vlgmr.msra.gmra.mrb[52].mxu1 %v24030_v3 }
 0xc35   :  { %15375 = vmatpush1.bf16.msra.mxu1 %v24091_v42  ;;  %14227 = vmatmul.mubr.f32.vlgmr.msra.gmra.mrb[66].mxu0 %v24067_v4 }
 0xc36   :  { %15519 = vmatpush3.bf16.msra.mxu0 %v24090_v16  ;;  %15377 = vmatprep.subr.bf16.mxu1 %v24093_v34 }
 0xc37   :  { %15521 = vmatprep.subr.bf16.mxu0 %v24094_v5  ;;  %11699 = vmatprep.mubr.f32.mxu1 %v23218_v32 }
 0xc38   :  { %11701 = vmatmul.mubr.f32.gmra.mrb[54].mxu1 %v24067_v4  ;;  %14229 = vmatprep.mubr.f32.mxu0 %v24084_v1 }
 0xc39   :  { %15379 = vmatpush1.bf16.msra.mxu1 %v24096_v13  ;;  %11706 = vmatprep.mubr.f32.mxu1 %v23218_v32 }
 0xc3a   :  { %15523 = vmatpush3.bf16.msra.mxu0 %v24094_v5  ;;  %15381 = vmatprep.subr.bf16.mxu1 %v24097_v45 }
 0xc3b   :  { %15525 = vmatprep.subr.bf16.mxu0 %v24098_v50  ;;  %14230 = vmatmul.mubr.f32.gmra.mrb[68].mxu0 %v24085_v55 }
 0xc3c   :  { %11708 = vmatmul.mubr.f32.gmra.mrb[56].mxu1 %v24084_v1  ;;  %14232 = vmatprep.mubr.f32.mxu0 %v24086_v12 }
 0xc3d   :  { %15383 = vmatpush1.bf16.msra.mxu1 %v24101_v48  ;;  %11713 = vmatprep.mubr.f32.mxu1 %v23218_v32 }
 0xc3e   :  { %15527 = vmatpush3.bf16.msra.mxu0 %v24098_v50  ;;  %15385 = vmatprep.subr.bf16.mxu1 %v24102_v9 }
 0xc3f   :  { %15529 = vmatprep.subr.bf16.mxu0 %v24103_v11  ;;  %14233 = vmatmul.mubr.f32.gmra.mrb[70].mxu0 %v24087_v60 }
 0xc40   :  { %11715 = vmatmul.mubr.f32.gmra.mrb[58].mxu1 %v24085_v55  ;;  %14259 = vmatprep.mubr.f32.mxu0 %v24030_v3 }
 0xc41   :  { %15387 = vmatpush1.bf16.msra.mxu1 %v24106_v43  ;;  %11720 = vmatprep.mubr.f32.mxu1 %v23218_v32 }
 0xc42   :  { %15531 = vmatpush3.bf16.msra.mxu0 %v24103_v11  ;;  %15389 = vmatprep.subr.bf16.mxu1 %v21956_v57  ;;  %v10825_v57 = vpop.permute.xlu1 %10824 }
 0xc43   :  { %15533 = vmatprep.subr.bf16.mxu0 %v21943_v7 }
 0xc44   :  { %11722 = vmatmul.mubr.f32.gmra.mrb[60].mxu1 %v24086_v12 }
 0xc45   :  { %15391 = vmatpush1.bf16.msra.mxu1 %v21969_v31  ;;  %11727 = vmatprep.mubr.f32.mxu1 %v23218_v32 }
 0xc46   :  { %15535 = vmatpush3.bf16.msra.mxu0 %v21943_v7  ;;  %15393 = vmatprep.subr.bf16.mxu1 %v21982_v51  ;;  %v10830_v7 = vpop.permute.xlu0 %10829  ;;  %v10835_v33 = vpop.permute.xlu1 %10834 }
 0xc47   :  { %15537 = vmatprep.subr.bf16.mxu0 %v21973_v0 }
 0xc48   :  { %11729 = vmatmul.mubr.f32.gmra.mrb[62].mxu1 %v24087_v60 }
 0xc49   :  { %15395 = vmatpush1.bf16.msra.mxu1 %v24107_v2  ;;  %11823 = vmatprep.mubr.f32.mxu1 %v23218_v32 }
 0xc4a   :  { %15539 = vmatpush3.bf16.msra.mxu0 %v21973_v0  ;;  %v10840_v6 = vpop.permute.xlu0 %10839  ;;  %v10845_v40 = vpop.permute.xlu1 %10844 }
 0xc4c   :  { %11825 = vmatmul.mubr.f32.vlgmr.msra.gmra.mrb[52].mxu1 %v24030_v3 }
 0xc4d   :  { %14260 = vmatmul.mubr.f32.vlgmr.msra.gmra.mrb[66].mxu0 %v24067_v4  ;;  %11830 = vmatprep.mubr.f32.mxu1 %v23218_v32 }
 0xc4e   :  { %14262 = vmatprep.mubr.f32.mxu0 %v24084_v1  ;;  %v10850_v58 = vpop.permute.xlu0 %10849 }
 0xc50   :  { %11832 = vmatmul.mubr.f32.gmra.mrb[54].mxu1 %v24067_v4 }
 0xc51   :  { %14263 = vmatmul.mubr.f32.gmra.mrb[68].mxu0 %v24085_v55  ;;  %11837 = vmatprep.mubr.f32.mxu1 %v23218_v32 }
 0xc52   :  { %14265 = vmatprep.mubr.f32.mxu0 %v24086_v12 }
 0xc54   :  { %11839 = vmatmul.mubr.f32.gmra.mrb[56].mxu1 %v24084_v1 }
 0xc55   :  { %14266 = vmatmul.mubr.f32.gmra.mrb[70].mxu0 %v24087_v60  ;;  %11844 = vmatprep.mubr.f32.mxu1 %v23218_v32 }
 0xc58   :  { %11846 = vmatmul.mubr.f32.gmra.mrb[58].mxu1 %v24085_v55 }
 0xc59   :  { %11851 = vmatprep.mubr.f32.mxu1 %v23218_v32 }
 0xc5c   :  { %11853 = vmatmul.mubr.f32.gmra.mrb[60].mxu1 %v24086_v12 }
 0xc5d   :  { %11858 = vmatprep.mubr.f32.mxu1 %v23218_v32 }
 0xc60   :  { %11860 = vmatmul.mubr.f32.gmra.mrb[62].mxu1 %v24087_v60 }
 0xd1f   :  { %v11826_v31 = vpop.f32.mrb[52].mxu1 }
 0xd20   :  { %v15658_v0 = vadd.f32 %v11826_v31, %v10825_v57  ;;  %v14261_v51 = vpop.f32.mrb[66].mxu0  ;;  %v11828_v3 = vpop.f32.mrb[53].mxu1 }
 0xd21   :  { %v15670_v36 = vadd.f32 %v14261_v51, %v10830_v7  ;;  %v15659_v8 = vadd.f32 %v11828_v3, %v10825_v57  ;;  %v12636_v26 = vpop.f32.mrb[67].mxu0 }
 0xd22   :  { %12671 = vst [vmem:[#allocation3 + $0x90] sm:$0xff] %v15658_v0  ;;  %v15671_v20 = vadd.f32 %v12636_v26, %v10825_v57 }
 0xd23   :  { %12676 = vst [vmem:[#allocation3 + $0xb8] sm:$0xff] %v15670_v36  ;;  %12672 = vst [vmem:[#allocation3 + $0x98] sm:$0xff] %v15659_v8  ;;  %v11833_v4 = vpop.f32.mrb[54].mxu1 }
 0xd24   :  { %12673 = vst [vmem:[#allocation3 + $0xa0] sm:$0xff] %v15671_v20  ;;  %v15660_v32 = vadd.f32 %v11833_v4, %v10830_v7  ;;  %v14264_v10 = vpop.f32.mrb[68].mxu0  ;;  %v11835_v29 = vpop.f32.mrb[55].mxu1 }
 0xd25   :  { %v15672_v44 = vadd.f32 %v14264_v10, %v10840_v6  ;;  %v15661_v47 = vadd.f32 %v11835_v29, %v10830_v7  ;;  %v12648_v25 = vpop.f32.mrb[69].mxu0 }
 0xd26   :  { %12674 = vst [vmem:[#allocation3 + $0xa8] sm:$0xff] %v15660_v32  ;;  %v15673_v56 = vadd.f32 %v12648_v25, %v10835_v33 }
 0xd27   :  { %12682 = vst [vmem:[#allocation3 + $0xe8] sm:$0xff] %v15672_v44  ;;  %12675 = vst [vmem:[#allocation3 + $0xb0] sm:$0xff] %v15661_v47  ;;  %v11840_v14 = vpop.f32.mrb[56].mxu1 }
 0xd28   :  { %12679 = vst [vmem:[#allocation3 + $0xd0] sm:$0xff] %v15673_v56  ;;  %v15662_v46 = vadd.f32 %v11840_v14, %v10835_v33  ;;  %v14267_v21 = vpop.f32.mrb[70].mxu0  ;;  %v11842_v1 = vpop.f32.mrb[57].mxu1 }
 0xd29   :  { %v15674_v27 = vadd.f32 %v14267_v21, %v10850_v58  ;;  %v15663_v55 = vadd.f32 %v11842_v1, %v10835_v33  ;;  %v12660_v17 = vpop.f32.mrb[71].mxu0 }
 0xd2a   :  { %12677 = vst [vmem:[#allocation3 + $0xc0] sm:$0xff] %v15662_v46  ;;  %v15675_v12 = vadd.f32 %v12660_v17, %v10845_v40 }
 0xd2b   :  { %12688 = vst [vmem:[#allocation3 + $0x118] sm:$0xff] %v15674_v27  ;;  %12678 = vst [vmem:[#allocation3 + $0xc8] sm:$0xff] %v15663_v55  ;;  %v11847_v24 = vpop.f32.mrb[58].mxu1 }
 0xd2c   :  { %12685 = vst [vmem:[#allocation3 + $0x100] sm:$0xff] %v15675_v12  ;;  %v15664_v54 = vadd.f32 %v11847_v24, %v10840_v6  ;;  %v11849_v60 = vpop.f32.mrb[59].mxu1 }
 0xd2d   :  { %v15665_v61 = vadd.f32 %v11849_v60, %v10840_v6 }
 0xd2e   :  { %12680 = vst [vmem:[#allocation3 + $0xd8] sm:$0xff] %v15664_v54 }
 0xd2f   :  { %12681 = vst [vmem:[#allocation3 + $0xe0] sm:$0xff] %v15665_v61  ;;  %v11854_v49 = vpop.f32.mrb[60].mxu1 }
 0xd30   :  { %v15666_v53 = vadd.f32 %v11854_v49, %v10845_v40  ;;  %v11856_v30 = vpop.f32.mrb[61].mxu1 }
 0xd31   :  { %v15667_v22 = vadd.f32 %v11856_v30, %v10845_v40 }
 0xd32   :  { %12683 = vst [vmem:[#allocation3 + $0xf0] sm:$0xff] %v15666_v53 }
 0xd33   :  { %12684 = vst [vmem:[#allocation3 + $0xf8] sm:$0xff] %v15667_v22  ;;  %v11861_v38 = vpop.f32.mrb[62].mxu1 }
 0xd34   :  { %v15668_v19 = vadd.f32 %v11861_v38, %v10850_v58  ;;  %v11863_v59 = vpop.f32.mrb[63].mxu1 }
 0xd35   :  { %v15669_v16 = vadd.f32 %v11863_v59, %v10850_v58 }
 0xd36   :  { %12686 = vst [vmem:[#allocation3 + $0x108] sm:$0xff] %v15668_v19 }
 0xd37   :  { %12687 = vst [vmem:[#allocation3 + $0x110] sm:$0xff] %v15669_v16 }
 0xd38   :  { %16503 = shalt.err (!%p16500_p4)
}
 0xd39   :  { %s16504_s7 = scalar_lea.hbm %s22475_s10, 4608 }
 0xd3a   :  { %p16505_p5 = scmp.ne.s32.totalorder %s22475_s10, %s16504_s7  ;;  %p16508_p6 = scmp.lt.u32.totalorder %s16504_s7, %s22475_s10 }
 0xd3c   :  { %p16510_p7 = pnand %p16508_p6, %p16505_p5 }
 0xd3e   :  { %16513 = shalt.err (!%p16510_p7)
}
 0xd3f   :  { %s16543_s12 = smov 384  }
 0xd40   :  { %12700 = dma.vmem_to_hbm [thread:$0]  %s12695_s26, 4608, %s22475_s10, [#allocation4], %s16543_s12, %s16543_s12, %s23447_s25  }
 0xd41   :  { %16514 = dma.done.wait [#allocation4], 4608  }
 0xd42   :  { %16515 = vsyncadd [#allocation4], 4294962688 }
 0xd43   :  { %12704 = vsyncpa [#allocation4], 1 }

</bundles_post_ra>
